<compile_context>
chip_gen: v6e
topology: v6e:2x2x1
jax: 0.10.0
libtpu: 0.0.40
codegen_flags: <defaults>
</compile_context>

<pallas_src>
import functools

import jax
import jax.numpy as jnp
from jax.experimental import pallas as pl
from jax.experimental.pallas import tpu as pltpu

LANES = 128          # K (kw*Cin) and Cout are zero-padded to a full lane width.
_ACC_CHUNK = 256     # accumulator rows produced per dot (keeps values small)
_BN_EPS = 1e-5


def _round_up(x, m):
    return (x + m - 1) // m * m


# ------------------------------ geometry -------------------------------------

def _conv_geom(H, W, kh, kw, stride, pad):
    OH = (H + 2 * pad - kh) // stride + 1
    OW = (W + 2 * pad - kw) // stride + 1
    OHh, OWh = OH // 2, OW // 2                # pooled output (floor mode)
    OWhp = _round_up(max(OWh, 1), 8)           # even/odd column group, 8-aligned
    OW_cov = 2 * OWhp                          # columns stored per conv row
    Hh = OH + (kh - 1) // 2                    # rows per height-phase plane
    return dict(OH=OH, OW=OW, OHh=OHh, OWh=OWh, OWhp=OWhp, OW_cov=OW_cov,
                Hh=Hh, L_rows=Hh * OW_cov, L_cov=OH * OW_cov)


# --------------------------- wrapper-side prep --------------------------------

def _build_patches(x_nhwc, kh, kw, stride, pad, g):
    """Width-direction im2col + height phase split + even/odd column grouping.

    Result: (N, 2*L_rows, 128) bf16 where row  p*L_rows + y2*OW_cov + j  holds
    the kw*Cin patch for padded input row (2*y2 + p) and output column
      2*j            if j <  OWhp   ("even" group)
      2*(j-OWhp)+1   if j >= OWhp   ("odd"  group)
    so each conv tap ki is the contiguous window starting at
      (ki%2)*L_rows + (ki//2)*OW_cov.
    """
    assert stride == 2
    N, H, W, C = x_nhwc.shape
    assert kw * C <= LANES
    OWh, OWhp, OW_cov, Hh = g["OWh"], g["OWhp"], g["OW_cov"], g["Hh"]
    Hp = 2 * Hh
    Wp = max(W + 2 * pad, 4 * OWh + kw - 2)
    xp = jnp.pad(x_nhwc,
                 ((0, 0), (pad, Hp - H - pad), (pad, Wp - W - pad), (0, 0)))

    def grab(col0):
        # [n, y, j, kj, c] = xp[n, y, col0 + 4*j + kj, c],  j in [0, OWh)
        slabs = [xp[:, :, col0 + kj: col0 + kj + 4 * (OWh - 1) + 1: 4, :]
                 for kj in range(kw)]
        s = jnp.stack(slabs, axis=3)                        # (N, Hp, OWh, kw, C)
        return jnp.pad(s, ((0, 0), (0, 0), (0, OWhp - OWh), (0, 0), (0, 0)))

    cols = jnp.concatenate([grab(0), grab(2)], axis=2)      # (N, Hp, OW_cov, kw, C)
    cols = cols.reshape(N, Hp, OW_cov, kw * C)
    cols = jnp.pad(cols, ((0, 0), (0, 0), (0, 0), (0, LANES - kw * C)))
    cols = cols.reshape(N, Hh, 2, OW_cov, LANES).transpose(0, 2, 1, 3, 4)
    return cols.reshape(N, 2 * g["L_rows"], LANES).astype(jnp.bfloat16)


def _prep_conv_w(w_hwio):
    kh, kw, cin, cout = w_hwio.shape
    assert kw * cin <= LANES and cout <= LANES
    w2 = w_hwio.reshape(kh, kw * cin, cout)                 # kj-major, c-minor
    w2 = jnp.pad(w2, ((0, 0), (0, LANES - kw * cin), (0, LANES - cout)))
    return w2.astype(jnp.bfloat16)


def _prep_affine(bias, bn):
    gamma, beta, mean, var = bn
    scale = gamma / jnp.sqrt(var + _BN_EPS)
    shift = beta - mean * scale
    p = jnp.stack([bias, scale, shift], axis=0).astype(jnp.float32)  # (3, Cout)
    return jnp.pad(p, ((0, 0), (0, LANES - p.shape[1])))


# ------------------------------ Pallas kernels --------------------------------

def _accumulate_conv(a_ref, w_ref, acc_ref, *, kh, L_rows, OW_cov, L_cov):
    """acc[r,:] (f32) = sum_ki A[(ki%2)*L_rows + (ki//2)*OW_cov + r, :] @ W[ki]."""
    for c0 in range(0, L_cov, _ACC_CHUNK):
        sz = min(_ACC_CHUNK, L_cov - c0)
        acc = None
        for ki in range(kh):
            off = (ki % 2) * L_rows + (ki // 2) * OW_cov + c0
            d = jnp.dot(a_ref[pl.ds(off, sz), :], w_ref[ki],
                        preferred_element_type=jnp.float32)
            acc = d if acc is None else acc + d
        acc_ref[pl.ds(c0, sz), :] = acc


def _pooled_row(acc_ref, epi, b, OWhp, OW_cov):
    # Epilogue must run per element *before* the max (BN scale may be negative),
    # so apply it to each of the four 2x2 window slices (all contiguous/aligned).
    r0 = jnp.maximum(epi(acc_ref[pl.ds(b, OWhp), :]),
                     epi(acc_ref[pl.ds(b + OWhp, OWhp), :]))
    r1 = jnp.maximum(epi(acc_ref[pl.ds(b + OW_cov, OWhp), :]),
                     epi(acc_ref[pl.ds(b + OW_cov + OWhp, OWhp), :]))
    return jnp.maximum(r0, r1)


def _conv_pool_kernel(a_ref, w_ref, p_ref, o_ref, acc_ref, *,
                      kh, OW_cov, OWhp, OHh, L_rows, L_cov):
    _accumulate_conv(a_ref, w_ref, acc_ref, kh=kh, L_rows=L_rows,
                     OW_cov=OW_cov, L_cov=L_cov)
    bias, scale, shift = p_ref[0:1, :], p_ref[1:2, :], p_ref[2:3, :]
    epi = lambda v: jnp.maximum(v + bias, 0.0) * scale + shift
    for py in range(OHh):                                   # fused 2x2/2 max-pool
        v = _pooled_row(acc_ref, epi, 2 * py * OW_cov, OWhp, OW_cov)
        o_ref[pl.ds(py * OWhp, OWhp), :] = v


def _conv_pool_fc_kernel(a_ref, w_ref, p_ref, w1_ref, w2_ref, fb_ref,
                         o_ref, acc_ref, *, kh, OW_cov, OWhp, L_rows, L_cov):
    _accumulate_conv(a_ref, w_ref, acc_ref, kh=kh, L_rows=L_rows,
                     OW_cov=OW_cov, L_cov=L_cov)
    bias, scale, shift = p_ref[0:1, :], p_ref[1:2, :], p_ref[2:3, :]
    epi = lambda v: jnp.maximum(v + bias, 0.0) * scale + shift
    v = _pooled_row(acc_ref, epi, 0, OWhp, OW_cov)          # pooled spatial = 1x1
    feat = v[0:1, :].astype(jnp.bfloat16)                   # == nn.Flatten()
    h = jnp.dot(feat, w1_ref[...], preferred_element_type=jnp.float32)
    h = jnp.maximum(h + fb_ref[0:1, :], 0.0).astype(jnp.bfloat16)   # fc1 + ReLU
    # drop2 (p=0.5): identity in eval mode.
    y = jnp.dot(h, w2_ref[...], preferred_element_type=jnp.float32)
    o_ref[...] = y + fb_ref[1:2, :]                         # fc2 logits


# ------------------------------ layer wrappers --------------------------------

def _conv_pool_call(x_nhwc, w_hwio, bias, bn, *, stride=2, pad=1):
    N, H, W, _ = x_nhwc.shape
    kh, kw, _, cout = w_hwio.shape
    g = _conv_geom(H, W, kh, kw, stride, pad)
    a = _build_patches(x_nhwc, kh, kw, stride, pad, g)
    wk = _prep_conv_w(w_hwio)
    pk = _prep_affine(bias, bn)

    rows_in = 2 * g["L_rows"]
    rows_out = g["OHh"] * g["OWhp"]
    kernel = functools.partial(
        _conv_pool_kernel, kh=kh, OW_cov=g["OW_cov"], OWhp=g["OWhp"],
        OHh=g["OHh"], L_rows=g["L_rows"], L_cov=g["L_cov"])
    out = pl.pallas_call(
        kernel,
        out_shape=jax.ShapeDtypeStruct((N, rows_out, LANES), jnp.float32),
        grid_spec=pltpu.PrefetchScalarGridSpec(
            num_scalar_prefetch=0,
            grid=(N,),
            in_specs=[
                pl.BlockSpec((None, rows_in, LANES), lambda n: (n, 0, 0)),
                pl.BlockSpec((kh, LANES, LANES), lambda n: (0, 0, 0)),
                pl.BlockSpec((3, LANES), lambda n: (0, 0)),
            ],
            out_specs=pl.BlockSpec((None, rows_out, LANES), lambda n: (n, 0, 0)),
            scratch_shapes=[pltpu.VMEM((g["L_cov"], LANES), jnp.float32)],
        ),
        compiler_params=pltpu.CompilerParams(dimension_semantics=("parallel",)),
    )(a, wk, pk)
    # NHWC view for the next layer's patch builder (tiny reshape/slice).
    return out.reshape(N, g["OHh"], g["OWhp"], LANES)[:, :, :g["OWh"], :cout]


def _conv_pool_fc_call(x_nhwc, w_hwio, bias, bn, fc1_w, fc1_b, fc2_w, fc2_b,
                       *, stride=2, pad=1):
    N, H, W, _ = x_nhwc.shape
    kh, kw, _, cout = w_hwio.shape
    g = _conv_geom(H, W, kh, kw, stride, pad)
    assert g["OHh"] == 1 and g["OWh"] == 1, "final stage must pool to 1x1"
    assert cout == fc1_w.shape[0]
    d_in, d_hid = fc1_w.shape
    nc = fc2_w.shape[1]
    assert max(d_in, d_hid, nc) <= LANES

    a = _build_patches(x_nhwc, kh, kw, stride, pad, g)
    wk = _prep_conv_w(w_hwio)
    pk = _prep_affine(bias, bn)
    w1p = jnp.pad(fc1_w, ((0, LANES - d_in), (0, LANES - d_hid))).astype(jnp.bfloat16)
    w2p = jnp.pad(fc2_w, ((0, LANES - d_hid), (0, LANES - nc))).astype(jnp.bfloat16)
    fbp = jnp.stack([jnp.pad(fc1_b, (0, LANES - d_hid)),
                     jnp.pad(fc2_b, (0, LANES - nc))], axis=0).astype(jnp.float32)

    rows_in = 2 * g["L_rows"]
    kernel = functools.partial(
        _conv_pool_fc_kernel, kh=kh, OW_cov=g["OW_cov"], OWhp=g["OWhp"],
        L_rows=g["L_rows"], L_cov=g["L_cov"])
    out = pl.pallas_call(
        kernel,
        out_shape=jax.ShapeDtypeStruct((N, 1, LANES), jnp.float32),
        grid_spec=pltpu.PrefetchScalarGridSpec(
            num_scalar_prefetch=0,
            grid=(N,),
            in_specs=[
                pl.BlockSpec((None, rows_in, LANES), lambda n: (n, 0, 0)),
                pl.BlockSpec((kh, LANES, LANES), lambda n: (0, 0, 0)),
                pl.BlockSpec((3, LANES), lambda n: (0, 0)),
                pl.BlockSpec((LANES, LANES), lambda n: (0, 0)),
                pl.BlockSpec((LANES, LANES), lambda n: (0, 0)),
                pl.BlockSpec((2, LANES), lambda n: (0, 0)),
            ],
            out_specs=pl.BlockSpec((None, 1, LANES), lambda n: (n, 0, 0)),
            scratch_shapes=[pltpu.VMEM((g["L_cov"], LANES), jnp.float32)],
        ),
        compiler_params=pltpu.CompilerParams(dimension_semantics=("parallel",)),
    )(a, wk, pk, w1p, w2p, fbp)
    return out.reshape(N, LANES)[:, :nc]


# ---------------------------------- model -------------------------------------

def init_params(key, input_ch, num_classes):
    ks = jax.random.split(key, 12)

    def w(k, shape, s=0.05):
        return s * jax.random.normal(k, shape, jnp.float32)

    def bn(k, c):
        k1, k2, k3, k4 = jax.random.split(k, 4)
        gamma = 1.0 + 0.1 * jax.random.normal(k1, (c,), jnp.float32)
        beta = 0.1 * jax.random.normal(k2, (c,), jnp.float32)
        mean = 0.1 * jax.random.normal(k3, (c,), jnp.float32)
        var = jnp.abs(jax.random.normal(k4, (c,), jnp.float32)) + 0.5
        return (gamma, beta, mean, var)

    return {
        "conv1_w": w(ks[0], (7, 7, input_ch, 16)), "conv1_b": w(ks[1], (16,)),
        "conv2_w": w(ks[2], (5, 5, 16, 32)),       "conv2_b": w(ks[3], (32,)),
        "conv3_w": w(ks[4], (3, 3, 32, 64)),       "conv3_b": w(ks[5], (64,)),
        "bn1": bn(ks[6], 16), "bn2": bn(ks[7], 32), "bn3": bn(ks[8], 64),
        "fc1_w": w(ks[9], (64, 64)),  "fc1_b": w(ks[10], (64,)),
        "fc2_w": w(ks[11], (64, num_classes)),
        "fc2_b": jnp.zeros((num_classes,), jnp.float32),
    }


def cnn_forward(params, x_nchw):
    # layout: accept PyTorch NCHW, run all kernels in NHWC / patch-matrix form.
    x = jnp.transpose(x_nchw, (0, 2, 3, 1)).astype(jnp.float32)
    x = _conv_pool_call(x, params["conv1_w"], params["conv1_b"], params["bn1"])
    # drop1 (p=0.2): identity in eval mode.
    x = _conv_pool_call(x, params["conv2_w"], params["conv2_b"], params["bn2"])
    # drop1 (p=0.2): identity in eval mode.
    logits = _conv_pool_fc_call(
        x, params["conv3_w"], params["conv3_b"], params["bn3"],
        params["fc1_w"], params["fc1_b"], params["fc2_w"], params["fc2_b"])
    return logits


if __name__ == "__main__":
    key = jax.random.PRNGKey(0)
    kx, kp = jax.random.split(key)
    input_ch, num_classes = 3, 10
    # 64x64 input is the size for which the flatten width equals fc1's 64 inputs
    # (spatial is 1x1 after the three conv+pool stages), matching the module.
    x = jax.random.normal(kx, (2, input_ch, 64, 64), jnp.float32)
    params = init_params(kp, input_ch, num_classes)

    out = jax.jit(cnn_forward)(params, x)
    jax.block_until_ready(out)
    assert out.shape == (2, num_classes), out.shape
    print("KERNEL_OK")
</pallas_src>

<mosaic_0001>
module attributes {stable_mosaic.version = 11 : i64} {
  func.func @_conv_pool_kernel(%arg0: i32, %arg1: memref<1x2112x128xbf16, #tpu.memory_space<vmem>>, %arg2: memref<7x128x128xbf16, #tpu.memory_space<vmem>>, %arg3: memref<3x128xf32, #tpu.memory_space<vmem>>, %arg4: memref<1x240x128xf32, #tpu.memory_space<vmem>>, %arg5: memref<960x128xf32, #tpu.memory_space<vmem>>) attributes {dimension_semantics = [#tpu.dimension_semantics<parallel>], iteration_bounds = array<i64: 2>, scalar_prefetch = 0 : i64, scratch_operands = 1 : i64, tpu.core_type = #tpu.core_type<tc>, window_params = [{transform_indices = @transform_0, window_bounds = array<i64: 1, 2112, 128>}, {pipeline_mode = #tpu.pipeline_mode<synchronous>, transform_indices = @transform_1, window_bounds = array<i64: 7, 128, 128>}, {pipeline_mode = #tpu.pipeline_mode<synchronous>, transform_indices = @transform_2, window_bounds = array<i64: 3, 128>}, {transform_indices = @transform_3, window_bounds = array<i64: 1, 240, 128>}]} {
    %c0 = arith.constant 0 : index
    %c0_0 = arith.constant 0 : index
    %c0_1 = arith.constant 0 : index
    %0 = vector.load %arg1[%c0, %c0_0, %c0_1] : memref<1x2112x128xbf16, #tpu.memory_space<vmem>>, vector<1x256x128xbf16>
    %1 = vector.shape_cast %0 : vector<1x256x128xbf16> to vector<256x128xbf16>
    %c0_2 = arith.constant 0 : index
    %c0_3 = arith.constant 0 : index
    %c0_4 = arith.constant 0 : index
    %2 = vector.load %arg2[%c0_2, %c0_3, %c0_4] : memref<7x128x128xbf16, #tpu.memory_space<vmem>>, vector<1x128x128xbf16>
    %3 = vector.shape_cast %2 : vector<1x128x128xbf16> to vector<128x128xbf16>
    %cst = arith.constant dense<0.000000e+00> : vector<256x128xf32>
    %4 = tpu.matmul %1, %3, %cst {dimension_numbers = #tpu.dot_dimension_numbers<[1], [0], [0], [1], [0, 0, 1, 1], [], []>} : vector<256x128xbf16>, vector<128x128xbf16>, vector<256x128xf32> -> vector<256x128xf32>
    %c0_5 = arith.constant 0 : index
    %c1056 = arith.constant 1056 : index
    %c0_6 = arith.constant 0 : index
    %5 = vector.load %arg1[%c0_5, %c1056, %c0_6] : memref<1x2112x128xbf16, #tpu.memory_space<vmem>>, vector<1x256x128xbf16>
    %6 = vector.shape_cast %5 : vector<1x256x128xbf16> to vector<256x128xbf16>
    %c1 = arith.constant 1 : index
    %c0_7 = arith.constant 0 : index
    %c0_8 = arith.constant 0 : index
    %7 = vector.load %arg2[%c1, %c0_7, %c0_8] : memref<7x128x128xbf16, #tpu.memory_space<vmem>>, vector<1x128x128xbf16>
    %8 = vector.shape_cast %7 : vector<1x128x128xbf16> to vector<128x128xbf16>
    %cst_9 = arith.constant dense<0.000000e+00> : vector<256x128xf32>
    %9 = tpu.matmul %6, %8, %cst_9 {dimension_numbers = #tpu.dot_dimension_numbers<[1], [0], [0], [1], [0, 0, 1, 1], [], []>} : vector<256x128xbf16>, vector<128x128xbf16>, vector<256x128xf32> -> vector<256x128xf32>
    %10 = arith.addf %4, %9 : vector<256x128xf32>
    %c0_10 = arith.constant 0 : index
    %c32 = arith.constant 32 : index
    %c0_11 = arith.constant 0 : index
    %11 = vector.load %arg1[%c0_10, %c32, %c0_11] : memref<1x2112x128xbf16, #tpu.memory_space<vmem>>, vector<1x256x128xbf16>
    %12 = vector.shape_cast %11 : vector<1x256x128xbf16> to vector<256x128xbf16>
    %c2 = arith.constant 2 : index
    %c0_12 = arith.constant 0 : index
    %c0_13 = arith.constant 0 : index
    %13 = vector.load %arg2[%c2, %c0_12, %c0_13] : memref<7x128x128xbf16, #tpu.memory_space<vmem>>, vector<1x128x128xbf16>
    %14 = vector.shape_cast %13 : vector<1x128x128xbf16> to vector<128x128xbf16>
    %cst_14 = arith.constant dense<0.000000e+00> : vector<256x128xf32>
    %15 = tpu.matmul %12, %14, %cst_14 {dimension_numbers = #tpu.dot_dimension_numbers<[1], [0], [0], [1], [0, 0, 1, 1], [], []>} : vector<256x128xbf16>, vector<128x128xbf16>, vector<256x128xf32> -> vector<256x128xf32>
    %16 = arith.addf %10, %15 : vector<256x128xf32>
    %c0_15 = arith.constant 0 : index
    %c1088 = arith.constant 1088 : index
    %c0_16 = arith.constant 0 : index
    %17 = vector.load %arg1[%c0_15, %c1088, %c0_16] : memref<1x2112x128xbf16, #tpu.memory_space<vmem>>, vector<1x256x128xbf16>
    %18 = vector.shape_cast %17 : vector<1x256x128xbf16> to vector<256x128xbf16>
    %c3 = arith.constant 3 : index
    %c0_17 = arith.constant 0 : index
    %c0_18 = arith.constant 0 : index
    %19 = vector.load %arg2[%c3, %c0_17, %c0_18] : memref<7x128x128xbf16, #tpu.memory_space<vmem>>, vector<1x128x128xbf16>
    %20 = vector.shape_cast %19 : vector<1x128x128xbf16> to vector<128x128xbf16>
    %cst_19 = arith.constant dense<0.000000e+00> : vector<256x128xf32>
    %21 = tpu.matmul %18, %20, %cst_19 {dimension_numbers = #tpu.dot_dimension_numbers<[1], [0], [0], [1], [0, 0, 1, 1], [], []>} : vector<256x128xbf16>, vector<128x128xbf16>, vector<256x128xf32> -> vector<256x128xf32>
    %22 = arith.addf %16, %21 : vector<256x128xf32>
    %c0_20 = arith.constant 0 : index
    %c64 = arith.constant 64 : index
    %c0_21 = arith.constant 0 : index
    %23 = vector.load %arg1[%c0_20, %c64, %c0_21] : memref<1x2112x128xbf16, #tpu.memory_space<vmem>>, vector<1x256x128xbf16>
    %24 = vector.shape_cast %23 : vector<1x256x128xbf16> to vector<256x128xbf16>
    %c4 = arith.constant 4 : index
    %c0_22 = arith.constant 0 : index
    %c0_23 = arith.constant 0 : index
    %25 = vector.load %arg2[%c4, %c0_22, %c0_23] : memref<7x128x128xbf16, #tpu.memory_space<vmem>>, vector<1x128x128xbf16>
    %26 = vector.shape_cast %25 : vector<1x128x128xbf16> to vector<128x128xbf16>
    %cst_24 = arith.constant dense<0.000000e+00> : vector<256x128xf32>
    %27 = tpu.matmul %24, %26, %cst_24 {dimension_numbers = #tpu.dot_dimension_numbers<[1], [0], [0], [1], [0, 0, 1, 1], [], []>} : vector<256x128xbf16>, vector<128x128xbf16>, vector<256x128xf32> -> vector<256x128xf32>
    %28 = arith.addf %22, %27 : vector<256x128xf32>
    %c0_25 = arith.constant 0 : index
    %c1120 = arith.constant 1120 : index
    %c0_26 = arith.constant 0 : index
    %29 = vector.load %arg1[%c0_25, %c1120, %c0_26] : memref<1x2112x128xbf16, #tpu.memory_space<vmem>>, vector<1x256x128xbf16>
    %30 = vector.shape_cast %29 : vector<1x256x128xbf16> to vector<256x128xbf16>
    %c5 = arith.constant 5 : index
    %c0_27 = arith.constant 0 : index
    %c0_28 = arith.constant 0 : index
    %31 = vector.load %arg2[%c5, %c0_27, %c0_28] : memref<7x128x128xbf16, #tpu.memory_space<vmem>>, vector<1x128x128xbf16>
    %32 = vector.shape_cast %31 : vector<1x128x128xbf16> to vector<128x128xbf16>
    %cst_29 = arith.constant dense<0.000000e+00> : vector<256x128xf32>
    %33 = tpu.matmul %30, %32, %cst_29 {dimension_numbers = #tpu.dot_dimension_numbers<[1], [0], [0], [1], [0, 0, 1, 1], [], []>} : vector<256x128xbf16>, vector<128x128xbf16>, vector<256x128xf32> -> vector<256x128xf32>
    %34 = arith.addf %28, %33 : vector<256x128xf32>
    %c0_30 = arith.constant 0 : index
    %c96 = arith.constant 96 : index
    %c0_31 = arith.constant 0 : index
    %35 = vector.load %arg1[%c0_30, %c96, %c0_31] : memref<1x2112x128xbf16, #tpu.memory_space<vmem>>, vector<1x256x128xbf16>
    %36 = vector.shape_cast %35 : vector<1x256x128xbf16> to vector<256x128xbf16>
    %c6 = arith.constant 6 : index
    %c0_32 = arith.constant 0 : index
    %c0_33 = arith.constant 0 : index
    %37 = vector.load %arg2[%c6, %c0_32, %c0_33] : memref<7x128x128xbf16, #tpu.memory_space<vmem>>, vector<1x128x128xbf16>
    %38 = vector.shape_cast %37 : vector<1x128x128xbf16> to vector<128x128xbf16>
    %cst_34 = arith.constant dense<0.000000e+00> : vector<256x128xf32>
    %39 = tpu.matmul %36, %38, %cst_34 {dimension_numbers = #tpu.dot_dimension_numbers<[1], [0], [0], [1], [0, 0, 1, 1], [], []>} : vector<256x128xbf16>, vector<128x128xbf16>, vector<256x128xf32> -> vector<256x128xf32>
    %40 = arith.addf %34, %39 : vector<256x128xf32>
    %c0_35 = arith.constant 0 : index
    %c0_36 = arith.constant 0 : index
    %41 = vector.load %arg5[%c0_35, %c0_36] : memref<960x128xf32, #tpu.memory_space<vmem>>, vector<256x128xf32>
    tpu.vector_store %arg5[%c0_35, %c0_36], %40 {strides = array<i32>} : memref<960x128xf32, #tpu.memory_space<vmem>>, vector<256x128xf32>,
    %c0_37 = arith.constant 0 : index
    %c256 = arith.constant 256 : index
    %c0_38 = arith.constant 0 : index
    %42 = vector.load %arg1[%c0_37, %c256, %c0_38] : memref<1x2112x128xbf16, #tpu.memory_space<vmem>>, vector<1x256x128xbf16>
    %43 = vector.shape_cast %42 : vector<1x256x128xbf16> to vector<256x128xbf16>
    %c0_39 = arith.constant 0 : index
    %c0_40 = arith.constant 0 : index
    %c0_41 = arith.constant 0 : index
    %44 = vector.load %arg2[%c0_39, %c0_40, %c0_41] : memref<7x128x128xbf16, #tpu.memory_space<vmem>>, vector<1x128x128xbf16>
    %45 = vector.shape_cast %44 : vector<1x128x128xbf16> to vector<128x128xbf16>
    %cst_42 = arith.constant dense<0.000000e+00> : vector<256x128xf32>
    %46 = tpu.matmul %43, %45, %cst_42 {dimension_numbers = #tpu.dot_dimension_numbers<[1], [0], [0], [1], [0, 0, 1, 1], [], []>} : vector<256x128xbf16>, vector<128x128xbf16>, vector<256x128xf32> -> vector<256x128xf32>
    %c0_43 = arith.constant 0 : index
    %c1312 = arith.constant 1312 : index
    %c0_44 = arith.constant 0 : index
    %47 = vector.load %arg1[%c0_43, %c1312, %c0_44] : memref<1x2112x128xbf16, #tpu.memory_space<vmem>>, vector<1x256x128xbf16>
    %48 = vector.shape_cast %47 : vector<1x256x128xbf16> to vector<256x128xbf16>
    %c1_45 = arith.constant 1 : index
    %c0_46 = arith.constant 0 : index
    %c0_47 = arith.constant 0 : index
    %49 = vector.load %arg2[%c1_45, %c0_46, %c0_47] : memref<7x128x128xbf16, #tpu.memory_space<vmem>>, vector<1x128x128xbf16>
    %50 = vector.shape_cast %49 : vector<1x128x128xbf16> to vector<128x128xbf16>
    %cst_48 = arith.constant dense<0.000000e+00> : vector<256x128xf32>
    %51 = tpu.matmul %48, %50, %cst_48 {dimension_numbers = #tpu.dot_dimension_numbers<[1], [0], [0], [1], [0, 0, 1, 1], [], []>} : vector<256x128xbf16>, vector<128x128xbf16>, vector<256x128xf32> -> vector<256x128xf32>
    %52 = arith.addf %46, %51 : vector<256x128xf32>
    %c0_49 = arith.constant 0 : index
    %c288 = arith.constant 288 : index
    %c0_50 = arith.constant 0 : index
    %53 = vector.load %arg1[%c0_49, %c288, %c0_50] : memref<1x2112x128xbf16, #tpu.memory_space<vmem>>, vector<1x256x128xbf16>
    %54 = vector.shape_cast %53 : vector<1x256x128xbf16> to vector<256x128xbf16>
    %c2_51 = arith.constant 2 : index
    %c0_52 = arith.constant 0 : index
    %c0_53 = arith.constant 0 : index
    %55 = vector.load %arg2[%c2_51, %c0_52, %c0_53] : memref<7x128x128xbf16, #tpu.memory_space<vmem>>, vector<1x128x128xbf16>
    %56 = vector.shape_cast %55 : vector<1x128x128xbf16> to vector<128x128xbf16>
    %cst_54 = arith.constant dense<0.000000e+00> : vector<256x128xf32>
    %57 = tpu.matmul %54, %56, %cst_54 {dimension_numbers = #tpu.dot_dimension_numbers<[1], [0], [0], [1], [0, 0, 1, 1], [], []>} : vector<256x128xbf16>, vector<128x128xbf16>, vector<256x128xf32> -> vector<256x128xf32>
    %58 = arith.addf %52, %57 : vector<256x128xf32>
    %c0_55 = arith.constant 0 : index
    %c1344 = arith.constant 1344 : index
    %c0_56 = arith.constant 0 : index
    %59 = vector.load %arg1[%c0_55, %c1344, %c0_56] : memref<1x2112x128xbf16, #tpu.memory_space<vmem>>, vector<1x256x128xbf16>
    %60 = vector.shape_cast %59 : vector<1x256x128xbf16> to vector<256x128xbf16>
    %c3_57 = arith.constant 3 : index
    %c0_58 = arith.constant 0 : index
    %c0_59 = arith.constant 0 : index
    %61 = vector.load %arg2[%c3_57, %c0_58, %c0_59] : memref<7x128x128xbf16, #tpu.memory_space<vmem>>, vector<1x128x128xbf16>
    %62 = vector.shape_cast %61 : vector<1x128x128xbf16> to vector<128x128xbf16>
    %cst_60 = arith.constant dense<0.000000e+00> : vector<256x128xf32>
    %63 = tpu.matmul %60, %62, %cst_60 {dimension_numbers = #tpu.dot_dimension_numbers<[1], [0], [0], [1], [0, 0, 1, 1], [], []>} : vector<256x128xbf16>, vector<128x128xbf16>, vector<256x128xf32> -> vector<256x128xf32>
    %64 = arith.addf %58, %63 : vector<256x128xf32>
    %c0_61 = arith.constant 0 : index
    %c320 = arith.constant 320 : index
    %c0_62 = arith.constant 0 : index
    %65 = vector.load %arg1[%c0_61, %c320, %c0_62] : memref<1x2112x128xbf16, #tpu.memory_space<vmem>>, vector<1x256x128xbf16>
    %66 = vector.shape_cast %65 : vector<1x256x128xbf16> to vector<256x128xbf16>
    %c4_63 = arith.constant 4 : index
    %c0_64 = arith.constant 0 : index
    %c0_65 = arith.constant 0 : index
    %67 = vector.load %arg2[%c4_63, %c0_64, %c0_65] : memref<7x128x128xbf16, #tpu.memory_space<vmem>>, vector<1x128x128xbf16>
    %68 = vector.shape_cast %67 : vector<1x128x128xbf16> to vector<128x128xbf16>
    %cst_66 = arith.constant dense<0.000000e+00> : vector<256x128xf32>
    %69 = tpu.matmul %66, %68, %cst_66 {dimension_numbers = #tpu.dot_dimension_numbers<[1], [0], [0], [1], [0, 0, 1, 1], [], []>} : vector<256x128xbf16>, vector<128x128xbf16>, vector<256x128xf32> -> vector<256x128xf32>
    %70 = arith.addf %64, %69 : vector<256x128xf32>
    %c0_67 = arith.constant 0 : index
    %c1376 = arith.constant 1376 : index
    %c0_68 = arith.constant 0 : index
    %71 = vector.load %arg1[%c0_67, %c1376, %c0_68] : memref<1x2112x128xbf16, #tpu.memory_space<vmem>>, vector<1x256x128xbf16>
    %72 = vector.shape_cast %71 : vector<1x256x128xbf16> to vector<256x128xbf16>
    %c5_69 = arith.constant 5 : index
    %c0_70 = arith.constant 0 : index
    %c0_71 = arith.constant 0 : index
    %73 = vector.load %arg2[%c5_69, %c0_70, %c0_71] : memref<7x128x128xbf16, #tpu.memory_space<vmem>>, vector<1x128x128xbf16>
    %74 = vector.shape_cast %73 : vector<1x128x128xbf16> to vector<128x128xbf16>
    %cst_72 = arith.constant dense<0.000000e+00> : vector<256x128xf32>
    %75 = tpu.matmul %72, %74, %cst_72 {dimension_numbers = #tpu.dot_dimension_numbers<[1], [0], [0], [1], [0, 0, 1, 1], [], []>} : vector<256x128xbf16>, vector<128x128xbf16>, vector<256x128xf32> -> vector<256x128xf32>
    %76 = arith.addf %70, %75 : vector<256x128xf32>
    %c0_73 = arith.constant 0 : index
    %c352 = arith.constant 352 : index
    %c0_74 = arith.constant 0 : index
    %77 = vector.load %arg1[%c0_73, %c352, %c0_74] : memref<1x2112x128xbf16, #tpu.memory_space<vmem>>, vector<1x256x128xbf16>
    %78 = vector.shape_cast %77 : vector<1x256x128xbf16> to vector<256x128xbf16>
    %c6_75 = arith.constant 6 : index
    %c0_76 = arith.constant 0 : index
    %c0_77 = arith.constant 0 : index
    %79 = vector.load %arg2[%c6_75, %c0_76, %c0_77] : memref<7x128x128xbf16, #tpu.memory_space<vmem>>, vector<1x128x128xbf16>
    %80 = vector.shape_cast %79 : vector<1x128x128xbf16> to vector<128x128xbf16>
    %cst_78 = arith.constant dense<0.000000e+00> : vector<256x128xf32>
    %81 = tpu.matmul %78, %80, %cst_78 {dimension_numbers = #tpu.dot_dimension_numbers<[1], [0], [0], [1], [0, 0, 1, 1], [], []>} : vector<256x128xbf16>, vector<128x128xbf16>, vector<256x128xf32> -> vector<256x128xf32>
    %82 = arith.addf %76, %81 : vector<256x128xf32>
    %c256_79 = arith.constant 256 : index
    %c0_80 = arith.constant 0 : index
    %83 = vector.load %arg5[%c256_79, %c0_80] : memref<960x128xf32, #tpu.memory_space<vmem>>, vector<256x128xf32>
    tpu.vector_store %arg5[%c256_79, %c0_80], %82 {strides = array<i32>} : memref<960x128xf32, #tpu.memory_space<vmem>>, vector<256x128xf32>,
    %c0_81 = arith.constant 0 : index
    %c512 = arith.constant 512 : index
    %c0_82 = arith.constant 0 : index
    %84 = vector.load %arg1[%c0_81, %c512, %c0_82] : memref<1x2112x128xbf16, #tpu.memory_space<vmem>>, vector<1x256x128xbf16>
    %85 = vector.shape_cast %84 : vector<1x256x128xbf16> to vector<256x128xbf16>
    %c0_83 = arith.constant 0 : index
    %c0_84 = arith.constant 0 : index
    %c0_85 = arith.constant 0 : index
    %86 = vector.load %arg2[%c0_83, %c0_84, %c0_85] : memref<7x128x128xbf16, #tpu.memory_space<vmem>>, vector<1x128x128xbf16>
    %87 = vector.shape_cast %86 : vector<1x128x128xbf16> to vector<128x128xbf16>
    %cst_86 = arith.constant dense<0.000000e+00> : vector<256x128xf32>
    %88 = tpu.matmul %85, %87, %cst_86 {dimension_numbers = #tpu.dot_dimension_numbers<[1], [0], [0], [1], [0, 0, 1, 1], [], []>} : vector<256x128xbf16>, vector<128x128xbf16>, vector<256x128xf32> -> vector<256x128xf32>
    %c0_87 = arith.constant 0 : index
    %c1568 = arith.constant 1568 : index
    %c0_88 = arith.constant 0 : index
    %89 = vector.load %arg1[%c0_87, %c1568, %c0_88] : memref<1x2112x128xbf16, #tpu.memory_space<vmem>>, vector<1x256x128xbf16>
    %90 = vector.shape_cast %89 : vector<1x256x128xbf16> to vector<256x128xbf16>
    %c1_89 = arith.constant 1 : index
    %c0_90 = arith.constant 0 : index
    %c0_91 = arith.constant 0 : index
    %91 = vector.load %arg2[%c1_89, %c0_90, %c0_91] : memref<7x128x128xbf16, #tpu.memory_space<vmem>>, vector<1x128x128xbf16>
    %92 = vector.shape_cast %91 : vector<1x128x128xbf16> to vector<128x128xbf16>
    %cst_92 = arith.constant dense<0.000000e+00> : vector<256x128xf32>
    %93 = tpu.matmul %90, %92, %cst_92 {dimension_numbers = #tpu.dot_dimension_numbers<[1], [0], [0], [1], [0, 0, 1, 1], [], []>} : vector<256x128xbf16>, vector<128x128xbf16>, vector<256x128xf32> -> vector<256x128xf32>
    %94 = arith.addf %88, %93 : vector<256x128xf32>
    %c0_93 = arith.constant 0 : index
    %c544 = arith.constant 544 : index
    %c0_94 = arith.constant 0 : index
    %95 = vector.load %arg1[%c0_93, %c544, %c0_94] : memref<1x2112x128xbf16, #tpu.memory_space<vmem>>, vector<1x256x128xbf16>
    %96 = vector.shape_cast %95 : vector<1x256x128xbf16> to vector<256x128xbf16>
    %c2_95 = arith.constant 2 : index
    %c0_96 = arith.constant 0 : index
    %c0_97 = arith.constant 0 : index
    %97 = vector.load %arg2[%c2_95, %c0_96, %c0_97] : memref<7x128x128xbf16, #tpu.memory_space<vmem>>, vector<1x128x128xbf16>
    %98 = vector.shape_cast %97 : vector<1x128x128xbf16> to vector<128x128xbf16>
    %cst_98 = arith.constant dense<0.000000e+00> : vector<256x128xf32>
    %99 = tpu.matmul %96, %98, %cst_98 {dimension_numbers = #tpu.dot_dimension_numbers<[1], [0], [0], [1], [0, 0, 1, 1], [], []>} : vector<256x128xbf16>, vector<128x128xbf16>, vector<256x128xf32> -> vector<256x128xf32>
    %100 = arith.addf %94, %99 : vector<256x128xf32>
    %c0_99 = arith.constant 0 : index
    %c1600 = arith.constant 1600 : index
    %c0_100 = arith.constant 0 : index
    %101 = vector.load %arg1[%c0_99, %c1600, %c0_100] : memref<1x2112x128xbf16, #tpu.memory_space<vmem>>, vector<1x256x128xbf16>
    %102 = vector.shape_cast %101 : vector<1x256x128xbf16> to vector<256x128xbf16>
    %c3_101 = arith.constant 3 : index
    %c0_102 = arith.constant 0 : index
    %c0_103 = arith.constant 0 : index
    %103 = vector.load %arg2[%c3_101, %c0_102, %c0_103] : memref<7x128x128xbf16, #tpu.memory_space<vmem>>, vector<1x128x128xbf16>
    %104 = vector.shape_cast %103 : vector<1x128x128xbf16> to vector<128x128xbf16>
    %cst_104 = arith.constant dense<0.000000e+00> : vector<256x128xf32>
    %105 = tpu.matmul %102, %104, %cst_104 {dimension_numbers = #tpu.dot_dimension_numbers<[1], [0], [0], [1], [0, 0, 1, 1], [], []>} : vector<256x128xbf16>, vector<128x128xbf16>, vector<256x128xf32> -> vector<256x128xf32>
    %106 = arith.addf %100, %105 : vector<256x128xf32>
    %c0_105 = arith.constant 0 : index
    %c576 = arith.constant 576 : index
    %c0_106 = arith.constant 0 : index
    %107 = vector.load %arg1[%c0_105, %c576, %c0_106] : memref<1x2112x128xbf16, #tpu.memory_space<vmem>>, vector<1x256x128xbf16>
    %108 = vector.shape_cast %107 : vector<1x256x128xbf16> to vector<256x128xbf16>
    %c4_107 = arith.constant 4 : index
    %c0_108 = arith.constant 0 : index
    %c0_109 = arith.constant 0 : index
    %109 = vector.load %arg2[%c4_107, %c0_108, %c0_109] : memref<7x128x128xbf16, #tpu.memory_space<vmem>>, vector<1x128x128xbf16>
    %110 = vector.shape_cast %109 : vector<1x128x128xbf16> to vector<128x128xbf16>
    %cst_110 = arith.constant dense<0.000000e+00> : vector<256x128xf32>
    %111 = tpu.matmul %108, %110, %cst_110 {dimension_numbers = #tpu.dot_dimension_numbers<[1], [0], [0], [1], [0, 0, 1, 1], [], []>} : vector<256x128xbf16>, vector<128x128xbf16>, vector<256x128xf32> -> vector<256x128xf32>
    %112 = arith.addf %106, %111 : vector<256x128xf32>
    %c0_111 = arith.constant 0 : index
    %c1632 = arith.constant 1632 : index
    %c0_112 = arith.constant 0 : index
    %113 = vector.load %arg1[%c0_111, %c1632, %c0_112] : memref<1x2112x128xbf16, #tpu.memory_space<vmem>>, vector<1x256x128xbf16>
    %114 = vector.shape_cast %113 : vector<1x256x128xbf16> to vector<256x128xbf16>
    %c5_113 = arith.constant 5 : index
    %c0_114 = arith.constant 0 : index
    %c0_115 = arith.constant 0 : index
    %115 = vector.load %arg2[%c5_113, %c0_114, %c0_115] : memref<7x128x128xbf16, #tpu.memory_space<vmem>>, vector<1x128x128xbf16>
    %116 = vector.shape_cast %115 : vector<1x128x128xbf16> to vector<128x128xbf16>
    %cst_116 = arith.constant dense<0.000000e+00> : vector<256x128xf32>
    %117 = tpu.matmul %114, %116, %cst_116 {dimension_numbers = #tpu.dot_dimension_numbers<[1], [0], [0], [1], [0, 0, 1, 1], [], []>} : vector<256x128xbf16>, vector<128x128xbf16>, vector<256x128xf32> -> vector<256x128xf32>
    %118 = arith.addf %112, %117 : vector<256x128xf32>
    %c0_117 = arith.constant 0 : index
    %c608 = arith.constant 608 : index
    %c0_118 = arith.constant 0 : index
    %119 = vector.load %arg1[%c0_117, %c608, %c0_118] : memref<1x2112x128xbf16, #tpu.memory_space<vmem>>, vector<1x256x128xbf16>
    %120 = vector.shape_cast %119 : vector<1x256x128xbf16> to vector<256x128xbf16>
    %c6_119 = arith.constant 6 : index
    %c0_120 = arith.constant 0 : index
    %c0_121 = arith.constant 0 : index
    %121 = vector.load %arg2[%c6_119, %c0_120, %c0_121] : memref<7x128x128xbf16, #tpu.memory_space<vmem>>, vector<1x128x128xbf16>
    %122 = vector.shape_cast %121 : vector<1x128x128xbf16> to vector<128x128xbf16>
    %cst_122 = arith.constant dense<0.000000e+00> : vector<256x128xf32>
    %123 = tpu.matmul %120, %122, %cst_122 {dimension_numbers = #tpu.dot_dimension_numbers<[1], [0], [0], [1], [0, 0, 1, 1], [], []>} : vector<256x128xbf16>, vector<128x128xbf16>, vector<256x128xf32> -> vector<256x128xf32>
    %124 = arith.addf %118, %123 : vector<256x128xf32>
    %c512_123 = arith.constant 512 : index
    %c0_124 = arith.constant 0 : index
    %125 = vector.load %arg5[%c512_123, %c0_124] : memref<960x128xf32, #tpu.memory_space<vmem>>, vector<256x128xf32>
    tpu.vector_store %arg5[%c512_123, %c0_124], %124 {strides = array<i32>} : memref<960x128xf32, #tpu.memory_space<vmem>>, vector<256x128xf32>,
    %c0_125 = arith.constant 0 : index
    %c768 = arith.constant 768 : index
    %c0_126 = arith.constant 0 : index
    %126 = vector.load %arg1[%c0_125, %c768, %c0_126] : memref<1x2112x128xbf16, #tpu.memory_space<vmem>>, vector<1x192x128xbf16>
    %127 = vector.shape_cast %126 : vector<1x192x128xbf16> to vector<192x128xbf16>
    %c0_127 = arith.constant 0 : index
    %c0_128 = arith.constant 0 : index
    %c0_129 = arith.constant 0 : index
    %128 = vector.load %arg2[%c0_127, %c0_128, %c0_129] : memref<7x128x128xbf16, #tpu.memory_space<vmem>>, vector<1x128x128xbf16>
    %129 = vector.shape_cast %128 : vector<1x128x128xbf16> to vector<128x128xbf16>
    %cst_130 = arith.constant dense<0.000000e+00> : vector<192x128xf32>
    %130 = tpu.matmul %127, %129, %cst_130 {dimension_numbers = #tpu.dot_dimension_numbers<[1], [0], [0], [1], [0, 0, 1, 1], [], []>} : vector<192x128xbf16>, vector<128x128xbf16>, vector<192x128xf32> -> vector<192x128xf32>
    %c0_131 = arith.constant 0 : index
    %c1824 = arith.constant 1824 : index
    %c0_132 = arith.constant 0 : index
    %131 = vector.load %arg1[%c0_131, %c1824, %c0_132] : memref<1x2112x128xbf16, #tpu.memory_space<vmem>>, vector<1x192x128xbf16>
    %132 = vector.shape_cast %131 : vector<1x192x128xbf16> to vector<192x128xbf16>
    %c1_133 = arith.constant 1 : index
    %c0_134 = arith.constant 0 : index
    %c0_135 = arith.constant 0 : index
    %133 = vector.load %arg2[%c1_133, %c0_134, %c0_135] : memref<7x128x128xbf16, #tpu.memory_space<vmem>>, vector<1x128x128xbf16>
    %134 = vector.shape_cast %133 : vector<1x128x128xbf16> to vector<128x128xbf16>
    %cst_136 = arith.constant dense<0.000000e+00> : vector<192x128xf32>
    %135 = tpu.matmul %132, %134, %cst_136 {dimension_numbers = #tpu.dot_dimension_numbers<[1], [0], [0], [1], [0, 0, 1, 1], [], []>} : vector<192x128xbf16>, vector<128x128xbf16>, vector<192x128xf32> -> vector<192x128xf32>
    %136 = arith.addf %130, %135 : vector<192x128xf32>
    %c0_137 = arith.constant 0 : index
    %c800 = arith.constant 800 : index
    %c0_138 = arith.constant 0 : index
    %137 = vector.load %arg1[%c0_137, %c800, %c0_138] : memref<1x2112x128xbf16, #tpu.memory_space<vmem>>, vector<1x192x128xbf16>
    %138 = vector.shape_cast %137 : vector<1x192x128xbf16> to vector<192x128xbf16>
    %c2_139 = arith.constant 2 : index
    %c0_140 = arith.constant 0 : index
    %c0_141 = arith.constant 0 : index
    %139 = vector.load %arg2[%c2_139, %c0_140, %c0_141] : memref<7x128x128xbf16, #tpu.memory_space<vmem>>, vector<1x128x128xbf16>
    %140 = vector.shape_cast %139 : vector<1x128x128xbf16> to vector<128x128xbf16>
    %cst_142 = arith.constant dense<0.000000e+00> : vector<192x128xf32>
    %141 = tpu.matmul %138, %140, %cst_142 {dimension_numbers = #tpu.dot_dimension_numbers<[1], [0], [0], [1], [0, 0, 1, 1], [], []>} : vector<192x128xbf16>, vector<128x128xbf16>, vector<192x128xf32> -> vector<192x128xf32>
    %142 = arith.addf %136, %141 : vector<192x128xf32>
    %c0_143 = arith.constant 0 : index
    %c1856 = arith.constant 1856 : index
    %c0_144 = arith.constant 0 : index
    %143 = vector.load %arg1[%c0_143, %c1856, %c0_144] : memref<1x2112x128xbf16, #tpu.memory_space<vmem>>, vector<1x192x128xbf16>
    %144 = vector.shape_cast %143 : vector<1x192x128xbf16> to vector<192x128xbf16>
    %c3_145 = arith.constant 3 : index
    %c0_146 = arith.constant 0 : index
    %c0_147 = arith.constant 0 : index
    %145 = vector.load %arg2[%c3_145, %c0_146, %c0_147] : memref<7x128x128xbf16, #tpu.memory_space<vmem>>, vector<1x128x128xbf16>
    %146 = vector.shape_cast %145 : vector<1x128x128xbf16> to vector<128x128xbf16>
    %cst_148 = arith.constant dense<0.000000e+00> : vector<192x128xf32>
    %147 = tpu.matmul %144, %146, %cst_148 {dimension_numbers = #tpu.dot_dimension_numbers<[1], [0], [0], [1], [0, 0, 1, 1], [], []>} : vector<192x128xbf16>, vector<128x128xbf16>, vector<192x128xf32> -> vector<192x128xf32>
    %148 = arith.addf %142, %147 : vector<192x128xf32>
    %c0_149 = arith.constant 0 : index
    %c832 = arith.constant 832 : index
    %c0_150 = arith.constant 0 : index
    %149 = vector.load %arg1[%c0_149, %c832, %c0_150] : memref<1x2112x128xbf16, #tpu.memory_space<vmem>>, vector<1x192x128xbf16>
    %150 = vector.shape_cast %149 : vector<1x192x128xbf16> to vector<192x128xbf16>
    %c4_151 = arith.constant 4 : index
    %c0_152 = arith.constant 0 : index
    %c0_153 = arith.constant 0 : index
    %151 = vector.load %arg2[%c4_151, %c0_152, %c0_153] : memref<7x128x128xbf16, #tpu.memory_space<vmem>>, vector<1x128x128xbf16>
    %152 = vector.shape_cast %151 : vector<1x128x128xbf16> to vector<128x128xbf16>
    %cst_154 = arith.constant dense<0.000000e+00> : vector<192x128xf32>
    %153 = tpu.matmul %150, %152, %cst_154 {dimension_numbers = #tpu.dot_dimension_numbers<[1], [0], [0], [1], [0, 0, 1, 1], [], []>} : vector<192x128xbf16>, vector<128x128xbf16>, vector<192x128xf32> -> vector<192x128xf32>
    %154 = arith.addf %148, %153 : vector<192x128xf32>
    %c0_155 = arith.constant 0 : index
    %c1888 = arith.constant 1888 : index
    %c0_156 = arith.constant 0 : index
    %155 = vector.load %arg1[%c0_155, %c1888, %c0_156] : memref<1x2112x128xbf16, #tpu.memory_space<vmem>>, vector<1x192x128xbf16>
    %156 = vector.shape_cast %155 : vector<1x192x128xbf16> to vector<192x128xbf16>
    %c5_157 = arith.constant 5 : index
    %c0_158 = arith.constant 0 : index
    %c0_159 = arith.constant 0 : index
    %157 = vector.load %arg2[%c5_157, %c0_158, %c0_159] : memref<7x128x128xbf16, #tpu.memory_space<vmem>>, vector<1x128x128xbf16>
    %158 = vector.shape_cast %157 : vector<1x128x128xbf16> to vector<128x128xbf16>
    %cst_160 = arith.constant dense<0.000000e+00> : vector<192x128xf32>
    %159 = tpu.matmul %156, %158, %cst_160 {dimension_numbers = #tpu.dot_dimension_numbers<[1], [0], [0], [1], [0, 0, 1, 1], [], []>} : vector<192x128xbf16>, vector<128x128xbf16>, vector<192x128xf32> -> vector<192x128xf32>
    %160 = arith.addf %154, %159 : vector<192x128xf32>
    %c0_161 = arith.constant 0 : index
    %c864 = arith.constant 864 : index
    %c0_162 = arith.constant 0 : index
    %161 = vector.load %arg1[%c0_161, %c864, %c0_162] : memref<1x2112x128xbf16, #tpu.memory_space<vmem>>, vector<1x192x128xbf16>
    %162 = vector.shape_cast %161 : vector<1x192x128xbf16> to vector<192x128xbf16>
    %c6_163 = arith.constant 6 : index
    %c0_164 = arith.constant 0 : index
    %c0_165 = arith.constant 0 : index
    %163 = vector.load %arg2[%c6_163, %c0_164, %c0_165] : memref<7x128x128xbf16, #tpu.memory_space<vmem>>, vector<1x128x128xbf16>
    %164 = vector.shape_cast %163 : vector<1x128x128xbf16> to vector<128x128xbf16>
    %cst_166 = arith.constant dense<0.000000e+00> : vector<192x128xf32>
    %165 = tpu.matmul %162, %164, %cst_166 {dimension_numbers = #tpu.dot_dimension_numbers<[1], [0], [0], [1], [0, 0, 1, 1], [], []>} : vector<192x128xbf16>, vector<128x128xbf16>, vector<192x128xf32> -> vector<192x128xf32>
    %166 = arith.addf %160, %165 : vector<192x128xf32>
    %c768_167 = arith.constant 768 : index
    %c0_168 = arith.constant 0 : index
    %167 = vector.load %arg5[%c768_167, %c0_168] : memref<960x128xf32, #tpu.memory_space<vmem>>, vector<192x128xf32>
    tpu.vector_store %arg5[%c768_167, %c0_168], %166 {strides = array<i32>} : memref<960x128xf32, #tpu.memory_space<vmem>>, vector<192x128xf32>,
    %c0_169 = arith.constant 0 : index
    %c0_170 = arith.constant 0 : index
    %168 = vector.load %arg3[%c0_169, %c0_170] : memref<3x128xf32, #tpu.memory_space<vmem>>, vector<1x128xf32>
    %c1_171 = arith.constant 1 : index
    %c0_172 = arith.constant 0 : index
    %169 = vector.load %arg3[%c1_171, %c0_172] : memref<3x128xf32, #tpu.memory_space<vmem>>, vector<1x128xf32>
    %c2_173 = arith.constant 2 : index
    %c0_174 = arith.constant 0 : index
    %170 = vector.load %arg3[%c2_173, %c0_174] : memref<3x128xf32, #tpu.memory_space<vmem>>, vector<1x128xf32>
    %c0_175 = arith.constant 0 : index
    %c0_176 = arith.constant 0 : index
    %171 = vector.load %arg5[%c0_175, %c0_176] : memref<960x128xf32, #tpu.memory_space<vmem>>, vector<16x128xf32>
    %172 = vector.broadcast %168 : vector<1x128xf32> to vector<16x128xf32>
    %173 = arith.addf %171, %172 : vector<16x128xf32>
    %cst_177 = arith.constant 0.000000e+00 : f32
    %174 = vector.broadcast %cst_177 : f32 to vector<16x128xf32>
    %175 = arith.maximumf %173, %174 : vector<16x128xf32>
    %176 = vector.broadcast %169 : vector<1x128xf32> to vector<16x128xf32>
    %177 = arith.mulf %175, %176 : vector<16x128xf32>
    %178 = vector.broadcast %170 : vector<1x128xf32> to vector<16x128xf32>
    %179 = arith.addf %177, %178 : vector<16x128xf32>
    %c16 = arith.constant 16 : index
    %c0_178 = arith.constant 0 : index
    %180 = vector.load %arg5[%c16, %c0_178] : memref<960x128xf32, #tpu.memory_space<vmem>>, vector<16x128xf32>
    %181 = vector.broadcast %168 : vector<1x128xf32> to vector<16x128xf32>
    %182 = arith.addf %180, %181 : vector<16x128xf32>
    %cst_179 = arith.constant 0.000000e+00 : f32
    %183 = vector.broadcast %cst_179 : f32 to vector<16x128xf32>
    %184 = arith.maximumf %182, %183 : vector<16x128xf32>
    %185 = vector.broadcast %169 : vector<1x128xf32> to vector<16x128xf32>
    %186 = arith.mulf %184, %185 : vector<16x128xf32>
    %187 = vector.broadcast %170 : vector<1x128xf32> to vector<16x128xf32>
    %188 = arith.addf %186, %187 : vector<16x128xf32>
    %189 = arith.maximumf %179, %188 : vector<16x128xf32>
    %c32_180 = arith.constant 32 : index
    %c0_181 = arith.constant 0 : index
    %190 = vector.load %arg5[%c32_180, %c0_181] : memref<960x128xf32, #tpu.memory_space<vmem>>, vector<16x128xf32>
    %191 = vector.broadcast %168 : vector<1x128xf32> to vector<16x128xf32>
    %192 = arith.addf %190, %191 : vector<16x128xf32>
    %cst_182 = arith.constant 0.000000e+00 : f32
    %193 = vector.broadcast %cst_182 : f32 to vector<16x128xf32>
    %194 = arith.maximumf %192, %193 : vector<16x128xf32>
    %195 = vector.broadcast %169 : vector<1x128xf32> to vector<16x128xf32>
    %196 = arith.mulf %194, %195 : vector<16x128xf32>
    %197 = vector.broadcast %170 : vector<1x128xf32> to vector<16x128xf32>
    %198 = arith.addf %196, %197 : vector<16x128xf32>
    %c48 = arith.constant 48 : index
    %c0_183 = arith.constant 0 : index
    %199 = vector.load %arg5[%c48, %c0_183] : memref<960x128xf32, #tpu.memory_space<vmem>>, vector<16x128xf32>
    %200 = vector.broadcast %168 : vector<1x128xf32> to vector<16x128xf32>
    %201 = arith.addf %199, %200 : vector<16x128xf32>
    %cst_184 = arith.constant 0.000000e+00 : f32
    %202 = vector.broadcast %cst_184 : f32 to vector<16x128xf32>
    %203 = arith.maximumf %201, %202 : vector<16x128xf32>
    %204 = vector.broadcast %169 : vector<1x128xf32> to vector<16x128xf32>
    %205 = arith.mulf %203, %204 : vector<16x128xf32>
    %206 = vector.broadcast %170 : vector<1x128xf32> to vector<16x128xf32>
    %207 = arith.addf %205, %206 : vector<16x128xf32>
    %208 = arith.maximumf %198, %207 : vector<16x128xf32>
    %209 = arith.maximumf %189, %208 : vector<16x128xf32>
    %c0_185 = arith.constant 0 : index
    %c0_186 = arith.constant 0 : index
    %c0_187 = arith.constant 0 : index
    %210 = vector.load %arg4[%c0_185, %c0_186, %c0_187] : memref<1x240x128xf32, #tpu.memory_space<vmem>>, vector<1x16x128xf32>
    %211 = vector.shape_cast %210 : vector<1x16x128xf32> to vector<16x128xf32>
    %212 = vector.shape_cast %209 : vector<16x128xf32> to vector<1x16x128xf32>
    tpu.vector_store %arg4[%c0_185, %c0_186, %c0_187], %212 {strides = array<i32>} : memref<1x240x128xf32, #tpu.memory_space<vmem>>, vector<1x16x128xf32>,
    %c64_188 = arith.constant 64 : index
    %c0_189 = arith.constant 0 : index
    %213 = vector.load %arg5[%c64_188, %c0_189] : memref<960x128xf32, #tpu.memory_space<vmem>>, vector<16x128xf32>
    %214 = vector.broadcast %168 : vector<1x128xf32> to vector<16x128xf32>
    %215 = arith.addf %213, %214 : vector<16x128xf32>
    %cst_190 = arith.constant 0.000000e+00 : f32
    %216 = vector.broadcast %cst_190 : f32 to vector<16x128xf32>
    %217 = arith.maximumf %215, %216 : vector<16x128xf32>
    %218 = vector.broadcast %169 : vector<1x128xf32> to vector<16x128xf32>
    %219 = arith.mulf %217, %218 : vector<16x128xf32>
    %220 = vector.broadcast %170 : vector<1x128xf32> to vector<16x128xf32>
    %221 = arith.addf %219, %220 : vector<16x128xf32>
    %c80 = arith.constant 80 : index
    %c0_191 = arith.constant 0 : index
    %222 = vector.load %arg5[%c80, %c0_191] : memref<960x128xf32, #tpu.memory_space<vmem>>, vector<16x128xf32>
    %223 = vector.broadcast %168 : vector<1x128xf32> to vector<16x128xf32>
    %224 = arith.addf %222, %223 : vector<16x128xf32>
    %cst_192 = arith.constant 0.000000e+00 : f32
    %225 = vector.broadcast %cst_192 : f32 to vector<16x128xf32>
    %226 = arith.maximumf %224, %225 : vector<16x128xf32>
    %227 = vector.broadcast %169 : vector<1x128xf32> to vector<16x128xf32>
    %228 = arith.mulf %226, %227 : vector<16x128xf32>
    %229 = vector.broadcast %170 : vector<1x128xf32> to vector<16x128xf32>
    %230 = arith.addf %228, %229 : vector<16x128xf32>
    %231 = arith.maximumf %221, %230 : vector<16x128xf32>
    %c96_193 = arith.constant 96 : index
    %c0_194 = arith.constant 0 : index
    %232 = vector.load %arg5[%c96_193, %c0_194] : memref<960x128xf32, #tpu.memory_space<vmem>>, vector<16x128xf32>
    %233 = vector.broadcast %168 : vector<1x128xf32> to vector<16x128xf32>
    %234 = arith.addf %232, %233 : vector<16x128xf32>
    %cst_195 = arith.constant 0.000000e+00 : f32
    %235 = vector.broadcast %cst_195 : f32 to vector<16x128xf32>
    %236 = arith.maximumf %234, %235 : vector<16x128xf32>
    %237 = vector.broadcast %169 : vector<1x128xf32> to vector<16x128xf32>
    %238 = arith.mulf %236, %237 : vector<16x128xf32>
    %239 = vector.broadcast %170 : vector<1x128xf32> to vector<16x128xf32>
    %240 = arith.addf %238, %239 : vector<16x128xf32>
    %c112 = arith.constant 112 : index
    %c0_196 = arith.constant 0 : index
    %241 = vector.load %arg5[%c112, %c0_196] : memref<960x128xf32, #tpu.memory_space<vmem>>, vector<16x128xf32>
    %242 = vector.broadcast %168 : vector<1x128xf32> to vector<16x128xf32>
    %243 = arith.addf %241, %242 : vector<16x128xf32>
    %cst_197 = arith.constant 0.000000e+00 : f32
    %244 = vector.broadcast %cst_197 : f32 to vector<16x128xf32>
    %245 = arith.maximumf %243, %244 : vector<16x128xf32>
    %246 = vector.broadcast %169 : vector<1x128xf32> to vector<16x128xf32>
    %247 = arith.mulf %245, %246 : vector<16x128xf32>
    %248 = vector.broadcast %170 : vector<1x128xf32> to vector<16x128xf32>
    %249 = arith.addf %247, %248 : vector<16x128xf32>
    %250 = arith.maximumf %240, %249 : vector<16x128xf32>
    %251 = arith.maximumf %231, %250 : vector<16x128xf32>
    %c0_198 = arith.constant 0 : index
    %c16_199 = arith.constant 16 : index
    %c0_200 = arith.constant 0 : index
    %252 = vector.load %arg4[%c0_198, %c16_199, %c0_200] : memref<1x240x128xf32, #tpu.memory_space<vmem>>, vector<1x16x128xf32>
    %253 = vector.shape_cast %252 : vector<1x16x128xf32> to vector<16x128xf32>
    %254 = vector.shape_cast %251 : vector<16x128xf32> to vector<1x16x128xf32>
    tpu.vector_store %arg4[%c0_198, %c16_199, %c0_200], %254 {strides = array<i32>} : memref<1x240x128xf32, #tpu.memory_space<vmem>>, vector<1x16x128xf32>,
    %c128 = arith.constant 128 : index
    %c0_201 = arith.constant 0 : index
    %255 = vector.load %arg5[%c128, %c0_201] : memref<960x128xf32, #tpu.memory_space<vmem>>, vector<16x128xf32>
    %256 = vector.broadcast %168 : vector<1x128xf32> to vector<16x128xf32>
    %257 = arith.addf %255, %256 : vector<16x128xf32>
    %cst_202 = arith.constant 0.000000e+00 : f32
    %258 = vector.broadcast %cst_202 : f32 to vector<16x128xf32>
    %259 = arith.maximumf %257, %258 : vector<16x128xf32>
    %260 = vector.broadcast %169 : vector<1x128xf32> to vector<16x128xf32>
    %261 = arith.mulf %259, %260 : vector<16x128xf32>
    %262 = vector.broadcast %170 : vector<1x128xf32> to vector<16x128xf32>
    %263 = arith.addf %261, %262 : vector<16x128xf32>
    %c144 = arith.constant 144 : index
    %c0_203 = arith.constant 0 : index
    %264 = vector.load %arg5[%c144, %c0_203] : memref<960x128xf32, #tpu.memory_space<vmem>>, vector<16x128xf32>
    %265 = vector.broadcast %168 : vector<1x128xf32> to vector<16x128xf32>
    %266 = arith.addf %264, %265 : vector<16x128xf32>
    %cst_204 = arith.constant 0.000000e+00 : f32
    %267 = vector.broadcast %cst_204 : f32 to vector<16x128xf32>
    %268 = arith.maximumf %266, %267 : vector<16x128xf32>
    %269 = vector.broadcast %169 : vector<1x128xf32> to vector<16x128xf32>
    %270 = arith.mulf %268, %269 : vector<16x128xf32>
    %271 = vector.broadcast %170 : vector<1x128xf32> to vector<16x128xf32>
    %272 = arith.addf %270, %271 : vector<16x128xf32>
    %273 = arith.maximumf %263, %272 : vector<16x128xf32>
    %c160 = arith.constant 160 : index
    %c0_205 = arith.constant 0 : index
    %274 = vector.load %arg5[%c160, %c0_205] : memref<960x128xf32, #tpu.memory_space<vmem>>, vector<16x128xf32>
    %275 = vector.broadcast %168 : vector<1x128xf32> to vector<16x128xf32>
    %276 = arith.addf %274, %275 : vector<16x128xf32>
    %cst_206 = arith.constant 0.000000e+00 : f32
    %277 = vector.broadcast %cst_206 : f32 to vector<16x128xf32>
    %278 = arith.maximumf %276, %277 : vector<16x128xf32>
    %279 = vector.broadcast %169 : vector<1x128xf32> to vector<16x128xf32>
    %280 = arith.mulf %278, %279 : vector<16x128xf32>
    %281 = vector.broadcast %170 : vector<1x128xf32> to vector<16x128xf32>
    %282 = arith.addf %280, %281 : vector<16x128xf32>
    %c176 = arith.constant 176 : index
    %c0_207 = arith.constant 0 : index
    %283 = vector.load %arg5[%c176, %c0_207] : memref<960x128xf32, #tpu.memory_space<vmem>>, vector<16x128xf32>
    %284 = vector.broadcast %168 : vector<1x128xf32> to vector<16x128xf32>
    %285 = arith.addf %283, %284 : vector<16x128xf32>
    %cst_208 = arith.constant 0.000000e+00 : f32
    %286 = vector.broadcast %cst_208 : f32 to vector<16x128xf32>
    %287 = arith.maximumf %285, %286 : vector<16x128xf32>
    %288 = vector.broadcast %169 : vector<1x128xf32> to vector<16x128xf32>
    %289 = arith.mulf %287, %288 : vector<16x128xf32>
    %290 = vector.broadcast %170 : vector<1x128xf32> to vector<16x128xf32>
    %291 = arith.addf %289, %290 : vector<16x128xf32>
    %292 = arith.maximumf %282, %291 : vector<16x128xf32>
    %293 = arith.maximumf %273, %292 : vector<16x128xf32>
    %c0_209 = arith.constant 0 : index
    %c32_210 = arith.constant 32 : index
    %c0_211 = arith.constant 0 : index
    %294 = vector.load %arg4[%c0_209, %c32_210, %c0_211] : memref<1x240x128xf32, #tpu.memory_space<vmem>>, vector<1x16x128xf32>
    %295 = vector.shape_cast %294 : vector<1x16x128xf32> to vector<16x128xf32>
    %296 = vector.shape_cast %293 : vector<16x128xf32> to vector<1x16x128xf32>
    tpu.vector_store %arg4[%c0_209, %c32_210, %c0_211], %296 {strides = array<i32>} : memref<1x240x128xf32, #tpu.memory_space<vmem>>, vector<1x16x128xf32>,
    %c192 = arith.constant 192 : index
    %c0_212 = arith.constant 0 : index
    %297 = vector.load %arg5[%c192, %c0_212] : memref<960x128xf32, #tpu.memory_space<vmem>>, vector<16x128xf32>
    %298 = vector.broadcast %168 : vector<1x128xf32> to vector<16x128xf32>
    %299 = arith.addf %297, %298 : vector<16x128xf32>
    %cst_213 = arith.constant 0.000000e+00 : f32
    %300 = vector.broadcast %cst_213 : f32 to vector<16x128xf32>
    %301 = arith.maximumf %299, %300 : vector<16x128xf32>
    %302 = vector.broadcast %169 : vector<1x128xf32> to vector<16x128xf32>
    %303 = arith.mulf %301, %302 : vector<16x128xf32>
    %304 = vector.broadcast %170 : vector<1x128xf32> to vector<16x128xf32>
    %305 = arith.addf %303, %304 : vector<16x128xf32>
    %c208 = arith.constant 208 : index
    %c0_214 = arith.constant 0 : index
    %306 = vector.load %arg5[%c208, %c0_214] : memref<960x128xf32, #tpu.memory_space<vmem>>, vector<16x128xf32>
    %307 = vector.broadcast %168 : vector<1x128xf32> to vector<16x128xf32>
    %308 = arith.addf %306, %307 : vector<16x128xf32>
    %cst_215 = arith.constant 0.000000e+00 : f32
    %309 = vector.broadcast %cst_215 : f32 to vector<16x128xf32>
    %310 = arith.maximumf %308, %309 : vector<16x128xf32>
    %311 = vector.broadcast %169 : vector<1x128xf32> to vector<16x128xf32>
    %312 = arith.mulf %310, %311 : vector<16x128xf32>
    %313 = vector.broadcast %170 : vector<1x128xf32> to vector<16x128xf32>
    %314 = arith.addf %312, %313 : vector<16x128xf32>
    %315 = arith.maximumf %305, %314 : vector<16x128xf32>
    %c224 = arith.constant 224 : index
    %c0_216 = arith.constant 0 : index
    %316 = vector.load %arg5[%c224, %c0_216] : memref<960x128xf32, #tpu.memory_space<vmem>>, vector<16x128xf32>
    %317 = vector.broadcast %168 : vector<1x128xf32> to vector<16x128xf32>
    %318 = arith.addf %316, %317 : vector<16x128xf32>
    %cst_217 = arith.constant 0.000000e+00 : f32
    %319 = vector.broadcast %cst_217 : f32 to vector<16x128xf32>
    %320 = arith.maximumf %318, %319 : vector<16x128xf32>
    %321 = vector.broadcast %169 : vector<1x128xf32> to vector<16x128xf32>
    %322 = arith.mulf %320, %321 : vector<16x128xf32>
    %323 = vector.broadcast %170 : vector<1x128xf32> to vector<16x128xf32>
    %324 = arith.addf %322, %323 : vector<16x128xf32>
    %c240 = arith.constant 240 : index
    %c0_218 = arith.constant 0 : index
    %325 = vector.load %arg5[%c240, %c0_218] : memref<960x128xf32, #tpu.memory_space<vmem>>, vector<16x128xf32>
    %326 = vector.broadcast %168 : vector<1x128xf32> to vector<16x128xf32>
    %327 = arith.addf %325, %326 : vector<16x128xf32>
    %cst_219 = arith.constant 0.000000e+00 : f32
    %328 = vector.broadcast %cst_219 : f32 to vector<16x128xf32>
    %329 = arith.maximumf %327, %328 : vector<16x128xf32>
    %330 = vector.broadcast %169 : vector<1x128xf32> to vector<16x128xf32>
    %331 = arith.mulf %329, %330 : vector<16x128xf32>
    %332 = vector.broadcast %170 : vector<1x128xf32> to vector<16x128xf32>
    %333 = arith.addf %331, %332 : vector<16x128xf32>
    %334 = arith.maximumf %324, %333 : vector<16x128xf32>
    %335 = arith.maximumf %315, %334 : vector<16x128xf32>
    %c0_220 = arith.constant 0 : index
    %c48_221 = arith.constant 48 : index
    %c0_222 = arith.constant 0 : index
    %336 = vector.load %arg4[%c0_220, %c48_221, %c0_222] : memref<1x240x128xf32, #tpu.memory_space<vmem>>, vector<1x16x128xf32>
    %337 = vector.shape_cast %336 : vector<1x16x128xf32> to vector<16x128xf32>
    %338 = vector.shape_cast %335 : vector<16x128xf32> to vector<1x16x128xf32>
    tpu.vector_store %arg4[%c0_220, %c48_221, %c0_222], %338 {strides = array<i32>} : memref<1x240x128xf32, #tpu.memory_space<vmem>>, vector<1x16x128xf32>,
    %c256_223 = arith.constant 256 : index
    %c0_224 = arith.constant 0 : index
    %339 = vector.load %arg5[%c256_223, %c0_224] : memref<960x128xf32, #tpu.memory_space<vmem>>, vector<16x128xf32>
    %340 = vector.broadcast %168 : vector<1x128xf32> to vector<16x128xf32>
    %341 = arith.addf %339, %340 : vector<16x128xf32>
    %cst_225 = arith.constant 0.000000e+00 : f32
    %342 = vector.broadcast %cst_225 : f32 to vector<16x128xf32>
    %343 = arith.maximumf %341, %342 : vector<16x128xf32>
    %344 = vector.broadcast %169 : vector<1x128xf32> to vector<16x128xf32>
    %345 = arith.mulf %343, %344 : vector<16x128xf32>
    %346 = vector.broadcast %170 : vector<1x128xf32> to vector<16x128xf32>
    %347 = arith.addf %345, %346 : vector<16x128xf32>
    %c272 = arith.constant 272 : index
    %c0_226 = arith.constant 0 : index
    %348 = vector.load %arg5[%c272, %c0_226] : memref<960x128xf32, #tpu.memory_space<vmem>>, vector<16x128xf32>
    %349 = vector.broadcast %168 : vector<1x128xf32> to vector<16x128xf32>
    %350 = arith.addf %348, %349 : vector<16x128xf32>
    %cst_227 = arith.constant 0.000000e+00 : f32
    %351 = vector.broadcast %cst_227 : f32 to vector<16x128xf32>
    %352 = arith.maximumf %350, %351 : vector<16x128xf32>
    %353 = vector.broadcast %169 : vector<1x128xf32> to vector<16x128xf32>
    %354 = arith.mulf %352, %353 : vector<16x128xf32>
    %355 = vector.broadcast %170 : vector<1x128xf32> to vector<16x128xf32>
    %356 = arith.addf %354, %355 : vector<16x128xf32>
    %357 = arith.maximumf %347, %356 : vector<16x128xf32>
    %c288_228 = arith.constant 288 : index
    %c0_229 = arith.constant 0 : index
    %358 = vector.load %arg5[%c288_228, %c0_229] : memref<960x128xf32, #tpu.memory_space<vmem>>, vector<16x128xf32>
    %359 = vector.broadcast %168 : vector<1x128xf32> to vector<16x128xf32>
    %360 = arith.addf %358, %359 : vector<16x128xf32>
    %cst_230 = arith.constant 0.000000e+00 : f32
    %361 = vector.broadcast %cst_230 : f32 to vector<16x128xf32>
    %362 = arith.maximumf %360, %361 : vector<16x128xf32>
    %363 = vector.broadcast %169 : vector<1x128xf32> to vector<16x128xf32>
    %364 = arith.mulf %362, %363 : vector<16x128xf32>
    %365 = vector.broadcast %170 : vector<1x128xf32> to vector<16x128xf32>
    %366 = arith.addf %364, %365 : vector<16x128xf32>
    %c304 = arith.constant 304 : index
    %c0_231 = arith.constant 0 : index
    %367 = vector.load %arg5[%c304, %c0_231] : memref<960x128xf32, #tpu.memory_space<vmem>>, vector<16x128xf32>
    %368 = vector.broadcast %168 : vector<1x128xf32> to vector<16x128xf32>
    %369 = arith.addf %367, %368 : vector<16x128xf32>
    %cst_232 = arith.constant 0.000000e+00 : f32
    %370 = vector.broadcast %cst_232 : f32 to vector<16x128xf32>
    %371 = arith.maximumf %369, %370 : vector<16x128xf32>
    %372 = vector.broadcast %169 : vector<1x128xf32> to vector<16x128xf32>
    %373 = arith.mulf %371, %372 : vector<16x128xf32>
    %374 = vector.broadcast %170 : vector<1x128xf32> to vector<16x128xf32>
    %375 = arith.addf %373, %374 : vector<16x128xf32>
    %376 = arith.maximumf %366, %375 : vector<16x128xf32>
    %377 = arith.maximumf %357, %376 : vector<16x128xf32>
    %c0_233 = arith.constant 0 : index
    %c64_234 = arith.constant 64 : index
    %c0_235 = arith.constant 0 : index
    %378 = vector.load %arg4[%c0_233, %c64_234, %c0_235] : memref<1x240x128xf32, #tpu.memory_space<vmem>>, vector<1x16x128xf32>
    %379 = vector.shape_cast %378 : vector<1x16x128xf32> to vector<16x128xf32>
    %380 = vector.shape_cast %377 : vector<16x128xf32> to vector<1x16x128xf32>
    tpu.vector_store %arg4[%c0_233, %c64_234, %c0_235], %380 {strides = array<i32>} : memref<1x240x128xf32, #tpu.memory_space<vmem>>, vector<1x16x128xf32>,
    %c320_236 = arith.constant 320 : index
    %c0_237 = arith.constant 0 : index
    %381 = vector.load %arg5[%c320_236, %c0_237] : memref<960x128xf32, #tpu.memory_space<vmem>>, vector<16x128xf32>
    %382 = vector.broadcast %168 : vector<1x128xf32> to vector<16x128xf32>
    %383 = arith.addf %381, %382 : vector<16x128xf32>
    %cst_238 = arith.constant 0.000000e+00 : f32
    %384 = vector.broadcast %cst_238 : f32 to vector<16x128xf32>
    %385 = arith.maximumf %383, %384 : vector<16x128xf32>
    %386 = vector.broadcast %169 : vector<1x128xf32> to vector<16x128xf32>
    %387 = arith.mulf %385, %386 : vector<16x128xf32>
    %388 = vector.broadcast %170 : vector<1x128xf32> to vector<16x128xf32>
    %389 = arith.addf %387, %388 : vector<16x128xf32>
    %c336 = arith.constant 336 : index
    %c0_239 = arith.constant 0 : index
    %390 = vector.load %arg5[%c336, %c0_239] : memref<960x128xf32, #tpu.memory_space<vmem>>, vector<16x128xf32>
    %391 = vector.broadcast %168 : vector<1x128xf32> to vector<16x128xf32>
    %392 = arith.addf %390, %391 : vector<16x128xf32>
    %cst_240 = arith.constant 0.000000e+00 : f32
    %393 = vector.broadcast %cst_240 : f32 to vector<16x128xf32>
    %394 = arith.maximumf %392, %393 : vector<16x128xf32>
    %395 = vector.broadcast %169 : vector<1x128xf32> to vector<16x128xf32>
    %396 = arith.mulf %394, %395 : vector<16x128xf32>
    %397 = vector.broadcast %170 : vector<1x128xf32> to vector<16x128xf32>
    %398 = arith.addf %396, %397 : vector<16x128xf32>
    %399 = arith.maximumf %389, %398 : vector<16x128xf32>
    %c352_241 = arith.constant 352 : index
    %c0_242 = arith.constant 0 : index
    %400 = vector.load %arg5[%c352_241, %c0_242] : memref<960x128xf32, #tpu.memory_space<vmem>>, vector<16x128xf32>
    %401 = vector.broadcast %168 : vector<1x128xf32> to vector<16x128xf32>
    %402 = arith.addf %400, %401 : vector<16x128xf32>
    %cst_243 = arith.constant 0.000000e+00 : f32
    %403 = vector.broadcast %cst_243 : f32 to vector<16x128xf32>
    %404 = arith.maximumf %402, %403 : vector<16x128xf32>
    %405 = vector.broadcast %169 : vector<1x128xf32> to vector<16x128xf32>
    %406 = arith.mulf %404, %405 : vector<16x128xf32>
    %407 = vector.broadcast %170 : vector<1x128xf32> to vector<16x128xf32>
    %408 = arith.addf %406, %407 : vector<16x128xf32>
    %c368 = arith.constant 368 : index
    %c0_244 = arith.constant 0 : index
    %409 = vector.load %arg5[%c368, %c0_244] : memref<960x128xf32, #tpu.memory_space<vmem>>, vector<16x128xf32>
    %410 = vector.broadcast %168 : vector<1x128xf32> to vector<16x128xf32>
    %411 = arith.addf %409, %410 : vector<16x128xf32>
    %cst_245 = arith.constant 0.000000e+00 : f32
    %412 = vector.broadcast %cst_245 : f32 to vector<16x128xf32>
    %413 = arith.maximumf %411, %412 : vector<16x128xf32>
    %414 = vector.broadcast %169 : vector<1x128xf32> to vector<16x128xf32>
    %415 = arith.mulf %413, %414 : vector<16x128xf32>
    %416 = vector.broadcast %170 : vector<1x128xf32> to vector<16x128xf32>
    %417 = arith.addf %415, %416 : vector<16x128xf32>
    %418 = arith.maximumf %408, %417 : vector<16x128xf32>
    %419 = arith.maximumf %399, %418 : vector<16x128xf32>
    %c0_246 = arith.constant 0 : index
    %c80_247 = arith.constant 80 : index
    %c0_248 = arith.constant 0 : index
    %420 = vector.load %arg4[%c0_246, %c80_247, %c0_248] : memref<1x240x128xf32, #tpu.memory_space<vmem>>, vector<1x16x128xf32>
    %421 = vector.shape_cast %420 : vector<1x16x128xf32> to vector<16x128xf32>
    %422 = vector.shape_cast %419 : vector<16x128xf32> to vector<1x16x128xf32>
    tpu.vector_store %arg4[%c0_246, %c80_247, %c0_248], %422 {strides = array<i32>} : memref<1x240x128xf32, #tpu.memory_space<vmem>>, vector<1x16x128xf32>,
    %c384 = arith.constant 384 : index
    %c0_249 = arith.constant 0 : index
    %423 = vector.load %arg5[%c384, %c0_249] : memref<960x128xf32, #tpu.memory_space<vmem>>, vector<16x128xf32>
    %424 = vector.broadcast %168 : vector<1x128xf32> to vector<16x128xf32>
    %425 = arith.addf %423, %424 : vector<16x128xf32>
    %cst_250 = arith.constant 0.000000e+00 : f32
    %426 = vector.broadcast %cst_250 : f32 to vector<16x128xf32>
    %427 = arith.maximumf %425, %426 : vector<16x128xf32>
    %428 = vector.broadcast %169 : vector<1x128xf32> to vector<16x128xf32>
    %429 = arith.mulf %427, %428 : vector<16x128xf32>
    %430 = vector.broadcast %170 : vector<1x128xf32> to vector<16x128xf32>
    %431 = arith.addf %429, %430 : vector<16x128xf32>
    %c400 = arith.constant 400 : index
    %c0_251 = arith.constant 0 : index
    %432 = vector.load %arg5[%c400, %c0_251] : memref<960x128xf32, #tpu.memory_space<vmem>>, vector<16x128xf32>
    %433 = vector.broadcast %168 : vector<1x128xf32> to vector<16x128xf32>
    %434 = arith.addf %432, %433 : vector<16x128xf32>
    %cst_252 = arith.constant 0.000000e+00 : f32
    %435 = vector.broadcast %cst_252 : f32 to vector<16x128xf32>
    %436 = arith.maximumf %434, %435 : vector<16x128xf32>
    %437 = vector.broadcast %169 : vector<1x128xf32> to vector<16x128xf32>
    %438 = arith.mulf %436, %437 : vector<16x128xf32>
    %439 = vector.broadcast %170 : vector<1x128xf32> to vector<16x128xf32>
    %440 = arith.addf %438, %439 : vector<16x128xf32>
    %441 = arith.maximumf %431, %440 : vector<16x128xf32>
    %c416 = arith.constant 416 : index
    %c0_253 = arith.constant 0 : index
    %442 = vector.load %arg5[%c416, %c0_253] : memref<960x128xf32, #tpu.memory_space<vmem>>, vector<16x128xf32>
    %443 = vector.broadcast %168 : vector<1x128xf32> to vector<16x128xf32>
    %444 = arith.addf %442, %443 : vector<16x128xf32>
    %cst_254 = arith.constant 0.000000e+00 : f32
    %445 = vector.broadcast %cst_254 : f32 to vector<16x128xf32>
    %446 = arith.maximumf %444, %445 : vector<16x128xf32>
    %447 = vector.broadcast %169 : vector<1x128xf32> to vector<16x128xf32>
    %448 = arith.mulf %446, %447 : vector<16x128xf32>
    %449 = vector.broadcast %170 : vector<1x128xf32> to vector<16x128xf32>
    %450 = arith.addf %448, %449 : vector<16x128xf32>
    %c432 = arith.constant 432 : index
    %c0_255 = arith.constant 0 : index
    %451 = vector.load %arg5[%c432, %c0_255] : memref<960x128xf32, #tpu.memory_space<vmem>>, vector<16x128xf32>
    %452 = vector.broadcast %168 : vector<1x128xf32> to vector<16x128xf32>
    %453 = arith.addf %451, %452 : vector<16x128xf32>
    %cst_256 = arith.constant 0.000000e+00 : f32
    %454 = vector.broadcast %cst_256 : f32 to vector<16x128xf32>
    %455 = arith.maximumf %453, %454 : vector<16x128xf32>
    %456 = vector.broadcast %169 : vector<1x128xf32> to vector<16x128xf32>
    %457 = arith.mulf %455, %456 : vector<16x128xf32>
    %458 = vector.broadcast %170 : vector<1x128xf32> to vector<16x128xf32>
    %459 = arith.addf %457, %458 : vector<16x128xf32>
    %460 = arith.maximumf %450, %459 : vector<16x128xf32>
    %461 = arith.maximumf %441, %460 : vector<16x128xf32>
    %c0_257 = arith.constant 0 : index
    %c96_258 = arith.constant 96 : index
    %c0_259 = arith.constant 0 : index
    %462 = vector.load %arg4[%c0_257, %c96_258, %c0_259] : memref<1x240x128xf32, #tpu.memory_space<vmem>>, vector<1x16x128xf32>
    %463 = vector.shape_cast %462 : vector<1x16x128xf32> to vector<16x128xf32>
    %464 = vector.shape_cast %461 : vector<16x128xf32> to vector<1x16x128xf32>
    tpu.vector_store %arg4[%c0_257, %c96_258, %c0_259], %464 {strides = array<i32>} : memref<1x240x128xf32, #tpu.memory_space<vmem>>, vector<1x16x128xf32>,
    %c448 = arith.constant 448 : index
    %c0_260 = arith.constant 0 : index
    %465 = vector.load %arg5[%c448, %c0_260] : memref<960x128xf32, #tpu.memory_space<vmem>>, vector<16x128xf32>
    %466 = vector.broadcast %168 : vector<1x128xf32> to vector<16x128xf32>
    %467 = arith.addf %465, %466 : vector<16x128xf32>
    %cst_261 = arith.constant 0.000000e+00 : f32
    %468 = vector.broadcast %cst_261 : f32 to vector<16x128xf32>
    %469 = arith.maximumf %467, %468 : vector<16x128xf32>
    %470 = vector.broadcast %169 : vector<1x128xf32> to vector<16x128xf32>
    %471 = arith.mulf %469, %470 : vector<16x128xf32>
    %472 = vector.broadcast %170 : vector<1x128xf32> to vector<16x128xf32>
    %473 = arith.addf %471, %472 : vector<16x128xf32>
    %c464 = arith.constant 464 : index
    %c0_262 = arith.constant 0 : index
    %474 = vector.load %arg5[%c464, %c0_262] : memref<960x128xf32, #tpu.memory_space<vmem>>, vector<16x128xf32>
    %475 = vector.broadcast %168 : vector<1x128xf32> to vector<16x128xf32>
    %476 = arith.addf %474, %475 : vector<16x128xf32>
    %cst_263 = arith.constant 0.000000e+00 : f32
    %477 = vector.broadcast %cst_263 : f32 to vector<16x128xf32>
    %478 = arith.maximumf %476, %477 : vector<16x128xf32>
    %479 = vector.broadcast %169 : vector<1x128xf32> to vector<16x128xf32>
    %480 = arith.mulf %478, %479 : vector<16x128xf32>
    %481 = vector.broadcast %170 : vector<1x128xf32> to vector<16x128xf32>
    %482 = arith.addf %480, %481 : vector<16x128xf32>
    %483 = arith.maximumf %473, %482 : vector<16x128xf32>
    %c480 = arith.constant 480 : index
    %c0_264 = arith.constant 0 : index
    %484 = vector.load %arg5[%c480, %c0_264] : memref<960x128xf32, #tpu.memory_space<vmem>>, vector<16x128xf32>
    %485 = vector.broadcast %168 : vector<1x128xf32> to vector<16x128xf32>
    %486 = arith.addf %484, %485 : vector<16x128xf32>
    %cst_265 = arith.constant 0.000000e+00 : f32
    %487 = vector.broadcast %cst_265 : f32 to vector<16x128xf32>
    %488 = arith.maximumf %486, %487 : vector<16x128xf32>
    %489 = vector.broadcast %169 : vector<1x128xf32> to vector<16x128xf32>
    %490 = arith.mulf %488, %489 : vector<16x128xf32>
    %491 = vector.broadcast %170 : vector<1x128xf32> to vector<16x128xf32>
    %492 = arith.addf %490, %491 : vector<16x128xf32>
    %c496 = arith.constant 496 : index
    %c0_266 = arith.constant 0 : index
    %493 = vector.load %arg5[%c496, %c0_266] : memref<960x128xf32, #tpu.memory_space<vmem>>, vector<16x128xf32>
    %494 = vector.broadcast %168 : vector<1x128xf32> to vector<16x128xf32>
    %495 = arith.addf %493, %494 : vector<16x128xf32>
    %cst_267 = arith.constant 0.000000e+00 : f32
    %496 = vector.broadcast %cst_267 : f32 to vector<16x128xf32>
    %497 = arith.maximumf %495, %496 : vector<16x128xf32>
    %498 = vector.broadcast %169 : vector<1x128xf32> to vector<16x128xf32>
    %499 = arith.mulf %497, %498 : vector<16x128xf32>
    %500 = vector.broadcast %170 : vector<1x128xf32> to vector<16x128xf32>
    %501 = arith.addf %499, %500 : vector<16x128xf32>
    %502 = arith.maximumf %492, %501 : vector<16x128xf32>
    %503 = arith.maximumf %483, %502 : vector<16x128xf32>
    %c0_268 = arith.constant 0 : index
    %c112_269 = arith.constant 112 : index
    %c0_270 = arith.constant 0 : index
    %504 = vector.load %arg4[%c0_268, %c112_269, %c0_270] : memref<1x240x128xf32, #tpu.memory_space<vmem>>, vector<1x16x128xf32>
    %505 = vector.shape_cast %504 : vector<1x16x128xf32> to vector<16x128xf32>
    %506 = vector.shape_cast %503 : vector<16x128xf32> to vector<1x16x128xf32>
    tpu.vector_store %arg4[%c0_268, %c112_269, %c0_270], %506 {strides = array<i32>} : memref<1x240x128xf32, #tpu.memory_space<vmem>>, vector<1x16x128xf32>,
    %c512_271 = arith.constant 512 : index
    %c0_272 = arith.constant 0 : index
    %507 = vector.load %arg5[%c512_271, %c0_272] : memref<960x128xf32, #tpu.memory_space<vmem>>, vector<16x128xf32>
    %508 = vector.broadcast %168 : vector<1x128xf32> to vector<16x128xf32>
    %509 = arith.addf %507, %508 : vector<16x128xf32>
    %cst_273 = arith.constant 0.000000e+00 : f32
    %510 = vector.broadcast %cst_273 : f32 to vector<16x128xf32>
    %511 = arith.maximumf %509, %510 : vector<16x128xf32>
    %512 = vector.broadcast %169 : vector<1x128xf32> to vector<16x128xf32>
    %513 = arith.mulf %511, %512 : vector<16x128xf32>
    %514 = vector.broadcast %170 : vector<1x128xf32> to vector<16x128xf32>
    %515 = arith.addf %513, %514 : vector<16x128xf32>
    %c528 = arith.constant 528 : index
    %c0_274 = arith.constant 0 : index
    %516 = vector.load %arg5[%c528, %c0_274] : memref<960x128xf32, #tpu.memory_space<vmem>>, vector<16x128xf32>
    %517 = vector.broadcast %168 : vector<1x128xf32> to vector<16x128xf32>
    %518 = arith.addf %516, %517 : vector<16x128xf32>
    %cst_275 = arith.constant 0.000000e+00 : f32
    %519 = vector.broadcast %cst_275 : f32 to vector<16x128xf32>
    %520 = arith.maximumf %518, %519 : vector<16x128xf32>
    %521 = vector.broadcast %169 : vector<1x128xf32> to vector<16x128xf32>
    %522 = arith.mulf %520, %521 : vector<16x128xf32>
    %523 = vector.broadcast %170 : vector<1x128xf32> to vector<16x128xf32>
    %524 = arith.addf %522, %523 : vector<16x128xf32>
    %525 = arith.maximumf %515, %524 : vector<16x128xf32>
    %c544_276 = arith.constant 544 : index
    %c0_277 = arith.constant 0 : index
    %526 = vector.load %arg5[%c544_276, %c0_277] : memref<960x128xf32, #tpu.memory_space<vmem>>, vector<16x128xf32>
    %527 = vector.broadcast %168 : vector<1x128xf32> to vector<16x128xf32>
    %528 = arith.addf %526, %527 : vector<16x128xf32>
    %cst_278 = arith.constant 0.000000e+00 : f32
    %529 = vector.broadcast %cst_278 : f32 to vector<16x128xf32>
    %530 = arith.maximumf %528, %529 : vector<16x128xf32>
    %531 = vector.broadcast %169 : vector<1x128xf32> to vector<16x128xf32>
    %532 = arith.mulf %530, %531 : vector<16x128xf32>
    %533 = vector.broadcast %170 : vector<1x128xf32> to vector<16x128xf32>
    %534 = arith.addf %532, %533 : vector<16x128xf32>
    %c560 = arith.constant 560 : index
    %c0_279 = arith.constant 0 : index
    %535 = vector.load %arg5[%c560, %c0_279] : memref<960x128xf32, #tpu.memory_space<vmem>>, vector<16x128xf32>
    %536 = vector.broadcast %168 : vector<1x128xf32> to vector<16x128xf32>
    %537 = arith.addf %535, %536 : vector<16x128xf32>
    %cst_280 = arith.constant 0.000000e+00 : f32
    %538 = vector.broadcast %cst_280 : f32 to vector<16x128xf32>
    %539 = arith.maximumf %537, %538 : vector<16x128xf32>
    %540 = vector.broadcast %169 : vector<1x128xf32> to vector<16x128xf32>
    %541 = arith.mulf %539, %540 : vector<16x128xf32>
    %542 = vector.broadcast %170 : vector<1x128xf32> to vector<16x128xf32>
    %543 = arith.addf %541, %542 : vector<16x128xf32>
    %544 = arith.maximumf %534, %543 : vector<16x128xf32>
    %545 = arith.maximumf %525, %544 : vector<16x128xf32>
    %c0_281 = arith.constant 0 : index
    %c128_282 = arith.constant 128 : index
    %c0_283 = arith.constant 0 : index
    %546 = vector.load %arg4[%c0_281, %c128_282, %c0_283] : memref<1x240x128xf32, #tpu.memory_space<vmem>>, vector<1x16x128xf32>
    %547 = vector.shape_cast %546 : vector<1x16x128xf32> to vector<16x128xf32>
    %548 = vector.shape_cast %545 : vector<16x128xf32> to vector<1x16x128xf32>
    tpu.vector_store %arg4[%c0_281, %c128_282, %c0_283], %548 {strides = array<i32>} : memref<1x240x128xf32, #tpu.memory_space<vmem>>, vector<1x16x128xf32>,
    %c576_284 = arith.constant 576 : index
    %c0_285 = arith.constant 0 : index
    %549 = vector.load %arg5[%c576_284, %c0_285] : memref<960x128xf32, #tpu.memory_space<vmem>>, vector<16x128xf32>
    %550 = vector.broadcast %168 : vector<1x128xf32> to vector<16x128xf32>
    %551 = arith.addf %549, %550 : vector<16x128xf32>
    %cst_286 = arith.constant 0.000000e+00 : f32
    %552 = vector.broadcast %cst_286 : f32 to vector<16x128xf32>
    %553 = arith.maximumf %551, %552 : vector<16x128xf32>
    %554 = vector.broadcast %169 : vector<1x128xf32> to vector<16x128xf32>
    %555 = arith.mulf %553, %554 : vector<16x128xf32>
    %556 = vector.broadcast %170 : vector<1x128xf32> to vector<16x128xf32>
    %557 = arith.addf %555, %556 : vector<16x128xf32>
    %c592 = arith.constant 592 : index
    %c0_287 = arith.constant 0 : index
    %558 = vector.load %arg5[%c592, %c0_287] : memref<960x128xf32, #tpu.memory_space<vmem>>, vector<16x128xf32>
    %559 = vector.broadcast %168 : vector<1x128xf32> to vector<16x128xf32>
    %560 = arith.addf %558, %559 : vector<16x128xf32>
    %cst_288 = arith.constant 0.000000e+00 : f32
    %561 = vector.broadcast %cst_288 : f32 to vector<16x128xf32>
    %562 = arith.maximumf %560, %561 : vector<16x128xf32>
    %563 = vector.broadcast %169 : vector<1x128xf32> to vector<16x128xf32>
    %564 = arith.mulf %562, %563 : vector<16x128xf32>
    %565 = vector.broadcast %170 : vector<1x128xf32> to vector<16x128xf32>
    %566 = arith.addf %564, %565 : vector<16x128xf32>
    %567 = arith.maximumf %557, %566 : vector<16x128xf32>
    %c608_289 = arith.constant 608 : index
    %c0_290 = arith.constant 0 : index
    %568 = vector.load %arg5[%c608_289, %c0_290] : memref<960x128xf32, #tpu.memory_space<vmem>>, vector<16x128xf32>
    %569 = vector.broadcast %168 : vector<1x128xf32> to vector<16x128xf32>
    %570 = arith.addf %568, %569 : vector<16x128xf32>
    %cst_291 = arith.constant 0.000000e+00 : f32
    %571 = vector.broadcast %cst_291 : f32 to vector<16x128xf32>
    %572 = arith.maximumf %570, %571 : vector<16x128xf32>
    %573 = vector.broadcast %169 : vector<1x128xf32> to vector<16x128xf32>
    %574 = arith.mulf %572, %573 : vector<16x128xf32>
    %575 = vector.broadcast %170 : vector<1x128xf32> to vector<16x128xf32>
    %576 = arith.addf %574, %575 : vector<16x128xf32>
    %c624 = arith.constant 624 : index
    %c0_292 = arith.constant 0 : index
    %577 = vector.load %arg5[%c624, %c0_292] : memref<960x128xf32, #tpu.memory_space<vmem>>, vector<16x128xf32>
    %578 = vector.broadcast %168 : vector<1x128xf32> to vector<16x128xf32>
    %579 = arith.addf %577, %578 : vector<16x128xf32>
    %cst_293 = arith.constant 0.000000e+00 : f32
    %580 = vector.broadcast %cst_293 : f32 to vector<16x128xf32>
    %581 = arith.maximumf %579, %580 : vector<16x128xf32>
    %582 = vector.broadcast %169 : vector<1x128xf32> to vector<16x128xf32>
    %583 = arith.mulf %581, %582 : vector<16x128xf32>
    %584 = vector.broadcast %170 : vector<1x128xf32> to vector<16x128xf32>
    %585 = arith.addf %583, %584 : vector<16x128xf32>
    %586 = arith.maximumf %576, %585 : vector<16x128xf32>
    %587 = arith.maximumf %567, %586 : vector<16x128xf32>
    %c0_294 = arith.constant 0 : index
    %c144_295 = arith.constant 144 : index
    %c0_296 = arith.constant 0 : index
    %588 = vector.load %arg4[%c0_294, %c144_295, %c0_296] : memref<1x240x128xf32, #tpu.memory_space<vmem>>, vector<1x16x128xf32>
    %589 = vector.shape_cast %588 : vector<1x16x128xf32> to vector<16x128xf32>
    %590 = vector.shape_cast %587 : vector<16x128xf32> to vector<1x16x128xf32>
    tpu.vector_store %arg4[%c0_294, %c144_295, %c0_296], %590 {strides = array<i32>} : memref<1x240x128xf32, #tpu.memory_space<vmem>>, vector<1x16x128xf32>,
    %c640 = arith.constant 640 : index
    %c0_297 = arith.constant 0 : index
    %591 = vector.load %arg5[%c640, %c0_297] : memref<960x128xf32, #tpu.memory_space<vmem>>, vector<16x128xf32>
    %592 = vector.broadcast %168 : vector<1x128xf32> to vector<16x128xf32>
    %593 = arith.addf %591, %592 : vector<16x128xf32>
    %cst_298 = arith.constant 0.000000e+00 : f32
    %594 = vector.broadcast %cst_298 : f32 to vector<16x128xf32>
    %595 = arith.maximumf %593, %594 : vector<16x128xf32>
    %596 = vector.broadcast %169 : vector<1x128xf32> to vector<16x128xf32>
    %597 = arith.mulf %595, %596 : vector<16x128xf32>
    %598 = vector.broadcast %170 : vector<1x128xf32> to vector<16x128xf32>
    %599 = arith.addf %597, %598 : vector<16x128xf32>
    %c656 = arith.constant 656 : index
    %c0_299 = arith.constant 0 : index
    %600 = vector.load %arg5[%c656, %c0_299] : memref<960x128xf32, #tpu.memory_space<vmem>>, vector<16x128xf32>
    %601 = vector.broadcast %168 : vector<1x128xf32> to vector<16x128xf32>
    %602 = arith.addf %600, %601 : vector<16x128xf32>
    %cst_300 = arith.constant 0.000000e+00 : f32
    %603 = vector.broadcast %cst_300 : f32 to vector<16x128xf32>
    %604 = arith.maximumf %602, %603 : vector<16x128xf32>
    %605 = vector.broadcast %169 : vector<1x128xf32> to vector<16x128xf32>
    %606 = arith.mulf %604, %605 : vector<16x128xf32>
    %607 = vector.broadcast %170 : vector<1x128xf32> to vector<16x128xf32>
    %608 = arith.addf %606, %607 : vector<16x128xf32>
    %609 = arith.maximumf %599, %608 : vector<16x128xf32>
    %c672 = arith.constant 672 : index
    %c0_301 = arith.constant 0 : index
    %610 = vector.load %arg5[%c672, %c0_301] : memref<960x128xf32, #tpu.memory_space<vmem>>, vector<16x128xf32>
    %611 = vector.broadcast %168 : vector<1x128xf32> to vector<16x128xf32>
    %612 = arith.addf %610, %611 : vector<16x128xf32>
    %cst_302 = arith.constant 0.000000e+00 : f32
    %613 = vector.broadcast %cst_302 : f32 to vector<16x128xf32>
    %614 = arith.maximumf %612, %613 : vector<16x128xf32>
    %615 = vector.broadcast %169 : vector<1x128xf32> to vector<16x128xf32>
    %616 = arith.mulf %614, %615 : vector<16x128xf32>
    %617 = vector.broadcast %170 : vector<1x128xf32> to vector<16x128xf32>
    %618 = arith.addf %616, %617 : vector<16x128xf32>
    %c688 = arith.constant 688 : index
    %c0_303 = arith.constant 0 : index
    %619 = vector.load %arg5[%c688, %c0_303] : memref<960x128xf32, #tpu.memory_space<vmem>>, vector<16x128xf32>
    %620 = vector.broadcast %168 : vector<1x128xf32> to vector<16x128xf32>
    %621 = arith.addf %619, %620 : vector<16x128xf32>
    %cst_304 = arith.constant 0.000000e+00 : f32
    %622 = vector.broadcast %cst_304 : f32 to vector<16x128xf32>
    %623 = arith.maximumf %621, %622 : vector<16x128xf32>
    %624 = vector.broadcast %169 : vector<1x128xf32> to vector<16x128xf32>
    %625 = arith.mulf %623, %624 : vector<16x128xf32>
    %626 = vector.broadcast %170 : vector<1x128xf32> to vector<16x128xf32>
    %627 = arith.addf %625, %626 : vector<16x128xf32>
    %628 = arith.maximumf %618, %627 : vector<16x128xf32>
    %629 = arith.maximumf %609, %628 : vector<16x128xf32>
    %c0_305 = arith.constant 0 : index
    %c160_306 = arith.constant 160 : index
    %c0_307 = arith.constant 0 : index
    %630 = vector.load %arg4[%c0_305, %c160_306, %c0_307] : memref<1x240x128xf32, #tpu.memory_space<vmem>>, vector<1x16x128xf32>
    %631 = vector.shape_cast %630 : vector<1x16x128xf32> to vector<16x128xf32>
    %632 = vector.shape_cast %629 : vector<16x128xf32> to vector<1x16x128xf32>
    tpu.vector_store %arg4[%c0_305, %c160_306, %c0_307], %632 {strides = array<i32>} : memref<1x240x128xf32, #tpu.memory_space<vmem>>, vector<1x16x128xf32>,
    %c704 = arith.constant 704 : index
    %c0_308 = arith.constant 0 : index
    %633 = vector.load %arg5[%c704, %c0_308] : memref<960x128xf32, #tpu.memory_space<vmem>>, vector<16x128xf32>
    %634 = vector.broadcast %168 : vector<1x128xf32> to vector<16x128xf32>
    %635 = arith.addf %633, %634 : vector<16x128xf32>
    %cst_309 = arith.constant 0.000000e+00 : f32
    %636 = vector.broadcast %cst_309 : f32 to vector<16x128xf32>
    %637 = arith.maximumf %635, %636 : vector<16x128xf32>
    %638 = vector.broadcast %169 : vector<1x128xf32> to vector<16x128xf32>
    %639 = arith.mulf %637, %638 : vector<16x128xf32>
    %640 = vector.broadcast %170 : vector<1x128xf32> to vector<16x128xf32>
    %641 = arith.addf %639, %640 : vector<16x128xf32>
    %c720 = arith.constant 720 : index
    %c0_310 = arith.constant 0 : index
    %642 = vector.load %arg5[%c720, %c0_310] : memref<960x128xf32, #tpu.memory_space<vmem>>, vector<16x128xf32>
    %643 = vector.broadcast %168 : vector<1x128xf32> to vector<16x128xf32>
    %644 = arith.addf %642, %643 : vector<16x128xf32>
    %cst_311 = arith.constant 0.000000e+00 : f32
    %645 = vector.broadcast %cst_311 : f32 to vector<16x128xf32>
    %646 = arith.maximumf %644, %645 : vector<16x128xf32>
    %647 = vector.broadcast %169 : vector<1x128xf32> to vector<16x128xf32>
    %648 = arith.mulf %646, %647 : vector<16x128xf32>
    %649 = vector.broadcast %170 : vector<1x128xf32> to vector<16x128xf32>
    %650 = arith.addf %648, %649 : vector<16x128xf32>
    %651 = arith.maximumf %641, %650 : vector<16x128xf32>
    %c736 = arith.constant 736 : index
    %c0_312 = arith.constant 0 : index
    %652 = vector.load %arg5[%c736, %c0_312] : memref<960x128xf32, #tpu.memory_space<vmem>>, vector<16x128xf32>
    %653 = vector.broadcast %168 : vector<1x128xf32> to vector<16x128xf32>
    %654 = arith.addf %652, %653 : vector<16x128xf32>
    %cst_313 = arith.constant 0.000000e+00 : f32
    %655 = vector.broadcast %cst_313 : f32 to vector<16x128xf32>
    %656 = arith.maximumf %654, %655 : vector<16x128xf32>
    %657 = vector.broadcast %169 : vector<1x128xf32> to vector<16x128xf32>
    %658 = arith.mulf %656, %657 : vector<16x128xf32>
    %659 = vector.broadcast %170 : vector<1x128xf32> to vector<16x128xf32>
    %660 = arith.addf %658, %659 : vector<16x128xf32>
    %c752 = arith.constant 752 : index
    %c0_314 = arith.constant 0 : index
    %661 = vector.load %arg5[%c752, %c0_314] : memref<960x128xf32, #tpu.memory_space<vmem>>, vector<16x128xf32>
    %662 = vector.broadcast %168 : vector<1x128xf32> to vector<16x128xf32>
    %663 = arith.addf %661, %662 : vector<16x128xf32>
    %cst_315 = arith.constant 0.000000e+00 : f32
    %664 = vector.broadcast %cst_315 : f32 to vector<16x128xf32>
    %665 = arith.maximumf %663, %664 : vector<16x128xf32>
    %666 = vector.broadcast %169 : vector<1x128xf32> to vector<16x128xf32>
    %667 = arith.mulf %665, %666 : vector<16x128xf32>
    %668 = vector.broadcast %170 : vector<1x128xf32> to vector<16x128xf32>
    %669 = arith.addf %667, %668 : vector<16x128xf32>
    %670 = arith.maximumf %660, %669 : vector<16x128xf32>
    %671 = arith.maximumf %651, %670 : vector<16x128xf32>
    %c0_316 = arith.constant 0 : index
    %c176_317 = arith.constant 176 : index
    %c0_318 = arith.constant 0 : index
    %672 = vector.load %arg4[%c0_316, %c176_317, %c0_318] : memref<1x240x128xf32, #tpu.memory_space<vmem>>, vector<1x16x128xf32>
    %673 = vector.shape_cast %672 : vector<1x16x128xf32> to vector<16x128xf32>
    %674 = vector.shape_cast %671 : vector<16x128xf32> to vector<1x16x128xf32>
    tpu.vector_store %arg4[%c0_316, %c176_317, %c0_318], %674 {strides = array<i32>} : memref<1x240x128xf32, #tpu.memory_space<vmem>>, vector<1x16x128xf32>,
    %c768_319 = arith.constant 768 : index
    %c0_320 = arith.constant 0 : index
    %675 = vector.load %arg5[%c768_319, %c0_320] : memref<960x128xf32, #tpu.memory_space<vmem>>, vector<16x128xf32>
    %676 = vector.broadcast %168 : vector<1x128xf32> to vector<16x128xf32>
    %677 = arith.addf %675, %676 : vector<16x128xf32>
    %cst_321 = arith.constant 0.000000e+00 : f32
    %678 = vector.broadcast %cst_321 : f32 to vector<16x128xf32>
    %679 = arith.maximumf %677, %678 : vector<16x128xf32>
    %680 = vector.broadcast %169 : vector<1x128xf32> to vector<16x128xf32>
    %681 = arith.mulf %679, %680 : vector<16x128xf32>
    %682 = vector.broadcast %170 : vector<1x128xf32> to vector<16x128xf32>
    %683 = arith.addf %681, %682 : vector<16x128xf32>
    %c784 = arith.constant 784 : index
    %c0_322 = arith.constant 0 : index
    %684 = vector.load %arg5[%c784, %c0_322] : memref<960x128xf32, #tpu.memory_space<vmem>>, vector<16x128xf32>
    %685 = vector.broadcast %168 : vector<1x128xf32> to vector<16x128xf32>
    %686 = arith.addf %684, %685 : vector<16x128xf32>
    %cst_323 = arith.constant 0.000000e+00 : f32
    %687 = vector.broadcast %cst_323 : f32 to vector<16x128xf32>
    %688 = arith.maximumf %686, %687 : vector<16x128xf32>
    %689 = vector.broadcast %169 : vector<1x128xf32> to vector<16x128xf32>
    %690 = arith.mulf %688, %689 : vector<16x128xf32>
    %691 = vector.broadcast %170 : vector<1x128xf32> to vector<16x128xf32>
    %692 = arith.addf %690, %691 : vector<16x128xf32>
    %693 = arith.maximumf %683, %692 : vector<16x128xf32>
    %c800_324 = arith.constant 800 : index
    %c0_325 = arith.constant 0 : index
    %694 = vector.load %arg5[%c800_324, %c0_325] : memref<960x128xf32, #tpu.memory_space<vmem>>, vector<16x128xf32>
    %695 = vector.broadcast %168 : vector<1x128xf32> to vector<16x128xf32>
    %696 = arith.addf %694, %695 : vector<16x128xf32>
    %cst_326 = arith.constant 0.000000e+00 : f32
    %697 = vector.broadcast %cst_326 : f32 to vector<16x128xf32>
    %698 = arith.maximumf %696, %697 : vector<16x128xf32>
    %699 = vector.broadcast %169 : vector<1x128xf32> to vector<16x128xf32>
    %700 = arith.mulf %698, %699 : vector<16x128xf32>
    %701 = vector.broadcast %170 : vector<1x128xf32> to vector<16x128xf32>
    %702 = arith.addf %700, %701 : vector<16x128xf32>
    %c816 = arith.constant 816 : index
    %c0_327 = arith.constant 0 : index
    %703 = vector.load %arg5[%c816, %c0_327] : memref<960x128xf32, #tpu.memory_space<vmem>>, vector<16x128xf32>
    %704 = vector.broadcast %168 : vector<1x128xf32> to vector<16x128xf32>
    %705 = arith.addf %703, %704 : vector<16x128xf32>
    %cst_328 = arith.constant 0.000000e+00 : f32
    %706 = vector.broadcast %cst_328 : f32 to vector<16x128xf32>
    %707 = arith.maximumf %705, %706 : vector<16x128xf32>
    %708 = vector.broadcast %169 : vector<1x128xf32> to vector<16x128xf32>
    %709 = arith.mulf %707, %708 : vector<16x128xf32>
    %710 = vector.broadcast %170 : vector<1x128xf32> to vector<16x128xf32>
    %711 = arith.addf %709, %710 : vector<16x128xf32>
    %712 = arith.maximumf %702, %711 : vector<16x128xf32>
    %713 = arith.maximumf %693, %712 : vector<16x128xf32>
    %c0_329 = arith.constant 0 : index
    %c192_330 = arith.constant 192 : index
    %c0_331 = arith.constant 0 : index
    %714 = vector.load %arg4[%c0_329, %c192_330, %c0_331] : memref<1x240x128xf32, #tpu.memory_space<vmem>>, vector<1x16x128xf32>
    %715 = vector.shape_cast %714 : vector<1x16x128xf32> to vector<16x128xf32>
    %716 = vector.shape_cast %713 : vector<16x128xf32> to vector<1x16x128xf32>
    tpu.vector_store %arg4[%c0_329, %c192_330, %c0_331], %716 {strides = array<i32>} : memref<1x240x128xf32, #tpu.memory_space<vmem>>, vector<1x16x128xf32>,
    %c832_332 = arith.constant 832 : index
    %c0_333 = arith.constant 0 : index
    %717 = vector.load %arg5[%c832_332, %c0_333] : memref<960x128xf32, #tpu.memory_space<vmem>>, vector<16x128xf32>
    %718 = vector.broadcast %168 : vector<1x128xf32> to vector<16x128xf32>
    %719 = arith.addf %717, %718 : vector<16x128xf32>
    %cst_334 = arith.constant 0.000000e+00 : f32
    %720 = vector.broadcast %cst_334 : f32 to vector<16x128xf32>
    %721 = arith.maximumf %719, %720 : vector<16x128xf32>
    %722 = vector.broadcast %169 : vector<1x128xf32> to vector<16x128xf32>
    %723 = arith.mulf %721, %722 : vector<16x128xf32>
    %724 = vector.broadcast %170 : vector<1x128xf32> to vector<16x128xf32>
    %725 = arith.addf %723, %724 : vector<16x128xf32>
    %c848 = arith.constant 848 : index
    %c0_335 = arith.constant 0 : index
    %726 = vector.load %arg5[%c848, %c0_335] : memref<960x128xf32, #tpu.memory_space<vmem>>, vector<16x128xf32>
    %727 = vector.broadcast %168 : vector<1x128xf32> to vector<16x128xf32>
    %728 = arith.addf %726, %727 : vector<16x128xf32>
    %cst_336 = arith.constant 0.000000e+00 : f32
    %729 = vector.broadcast %cst_336 : f32 to vector<16x128xf32>
    %730 = arith.maximumf %728, %729 : vector<16x128xf32>
    %731 = vector.broadcast %169 : vector<1x128xf32> to vector<16x128xf32>
    %732 = arith.mulf %730, %731 : vector<16x128xf32>
    %733 = vector.broadcast %170 : vector<1x128xf32> to vector<16x128xf32>
    %734 = arith.addf %732, %733 : vector<16x128xf32>
    %735 = arith.maximumf %725, %734 : vector<16x128xf32>
    %c864_337 = arith.constant 864 : index
    %c0_338 = arith.constant 0 : index
    %736 = vector.load %arg5[%c864_337, %c0_338] : memref<960x128xf32, #tpu.memory_space<vmem>>, vector<16x128xf32>
    %737 = vector.broadcast %168 : vector<1x128xf32> to vector<16x128xf32>
    %738 = arith.addf %736, %737 : vector<16x128xf32>
    %cst_339 = arith.constant 0.000000e+00 : f32
    %739 = vector.broadcast %cst_339 : f32 to vector<16x128xf32>
    %740 = arith.maximumf %738, %739 : vector<16x128xf32>
    %741 = vector.broadcast %169 : vector<1x128xf32> to vector<16x128xf32>
    %742 = arith.mulf %740, %741 : vector<16x128xf32>
    %743 = vector.broadcast %170 : vector<1x128xf32> to vector<16x128xf32>
    %744 = arith.addf %742, %743 : vector<16x128xf32>
    %c880 = arith.constant 880 : index
    %c0_340 = arith.constant 0 : index
    %745 = vector.load %arg5[%c880, %c0_340] : memref<960x128xf32, #tpu.memory_space<vmem>>, vector<16x128xf32>
    %746 = vector.broadcast %168 : vector<1x128xf32> to vector<16x128xf32>
    %747 = arith.addf %745, %746 : vector<16x128xf32>
    %cst_341 = arith.constant 0.000000e+00 : f32
    %748 = vector.broadcast %cst_341 : f32 to vector<16x128xf32>
    %749 = arith.maximumf %747, %748 : vector<16x128xf32>
    %750 = vector.broadcast %169 : vector<1x128xf32> to vector<16x128xf32>
    %751 = arith.mulf %749, %750 : vector<16x128xf32>
    %752 = vector.broadcast %170 : vector<1x128xf32> to vector<16x128xf32>
    %753 = arith.addf %751, %752 : vector<16x128xf32>
    %754 = arith.maximumf %744, %753 : vector<16x128xf32>
    %755 = arith.maximumf %735, %754 : vector<16x128xf32>
    %c0_342 = arith.constant 0 : index
    %c208_343 = arith.constant 208 : index
    %c0_344 = arith.constant 0 : index
    %756 = vector.load %arg4[%c0_342, %c208_343, %c0_344] : memref<1x240x128xf32, #tpu.memory_space<vmem>>, vector<1x16x128xf32>
    %757 = vector.shape_cast %756 : vector<1x16x128xf32> to vector<16x128xf32>
    %758 = vector.shape_cast %755 : vector<16x128xf32> to vector<1x16x128xf32>
    tpu.vector_store %arg4[%c0_342, %c208_343, %c0_344], %758 {strides = array<i32>} : memref<1x240x128xf32, #tpu.memory_space<vmem>>, vector<1x16x128xf32>,
    %c896 = arith.constant 896 : index
    %c0_345 = arith.constant 0 : index
    %759 = vector.load %arg5[%c896, %c0_345] : memref<960x128xf32, #tpu.memory_space<vmem>>, vector<16x128xf32>
    %760 = vector.broadcast %168 : vector<1x128xf32> to vector<16x128xf32>
    %761 = arith.addf %759, %760 : vector<16x128xf32>
    %cst_346 = arith.constant 0.000000e+00 : f32
    %762 = vector.broadcast %cst_346 : f32 to vector<16x128xf32>
    %763 = arith.maximumf %761, %762 : vector<16x128xf32>
    %764 = vector.broadcast %169 : vector<1x128xf32> to vector<16x128xf32>
    %765 = arith.mulf %763, %764 : vector<16x128xf32>
    %766 = vector.broadcast %170 : vector<1x128xf32> to vector<16x128xf32>
    %767 = arith.addf %765, %766 : vector<16x128xf32>
    %c912 = arith.constant 912 : index
    %c0_347 = arith.constant 0 : index
    %768 = vector.load %arg5[%c912, %c0_347] : memref<960x128xf32, #tpu.memory_space<vmem>>, vector<16x128xf32>
    %769 = vector.broadcast %168 : vector<1x128xf32> to vector<16x128xf32>
    %770 = arith.addf %768, %769 : vector<16x128xf32>
    %cst_348 = arith.constant 0.000000e+00 : f32
    %771 = vector.broadcast %cst_348 : f32 to vector<16x128xf32>
    %772 = arith.maximumf %770, %771 : vector<16x128xf32>
    %773 = vector.broadcast %169 : vector<1x128xf32> to vector<16x128xf32>
    %774 = arith.mulf %772, %773 : vector<16x128xf32>
    %775 = vector.broadcast %170 : vector<1x128xf32> to vector<16x128xf32>
    %776 = arith.addf %774, %775 : vector<16x128xf32>
    %777 = arith.maximumf %767, %776 : vector<16x128xf32>
    %c928 = arith.constant 928 : index
    %c0_349 = arith.constant 0 : index
    %778 = vector.load %arg5[%c928, %c0_349] : memref<960x128xf32, #tpu.memory_space<vmem>>, vector<16x128xf32>
    %779 = vector.broadcast %168 : vector<1x128xf32> to vector<16x128xf32>
    %780 = arith.addf %778, %779 : vector<16x128xf32>
    %cst_350 = arith.constant 0.000000e+00 : f32
    %781 = vector.broadcast %cst_350 : f32 to vector<16x128xf32>
    %782 = arith.maximumf %780, %781 : vector<16x128xf32>
    %783 = vector.broadcast %169 : vector<1x128xf32> to vector<16x128xf32>
    %784 = arith.mulf %782, %783 : vector<16x128xf32>
    %785 = vector.broadcast %170 : vector<1x128xf32> to vector<16x128xf32>
    %786 = arith.addf %784, %785 : vector<16x128xf32>
    %c944 = arith.constant 944 : index
    %c0_351 = arith.constant 0 : index
    %787 = vector.load %arg5[%c944, %c0_351] : memref<960x128xf32, #tpu.memory_space<vmem>>, vector<16x128xf32>
    %788 = vector.broadcast %168 : vector<1x128xf32> to vector<16x128xf32>
    %789 = arith.addf %787, %788 : vector<16x128xf32>
    %cst_352 = arith.constant 0.000000e+00 : f32
    %790 = vector.broadcast %cst_352 : f32 to vector<16x128xf32>
    %791 = arith.maximumf %789, %790 : vector<16x128xf32>
    %792 = vector.broadcast %169 : vector<1x128xf32> to vector<16x128xf32>
    %793 = arith.mulf %791, %792 : vector<16x128xf32>
    %794 = vector.broadcast %170 : vector<1x128xf32> to vector<16x128xf32>
    %795 = arith.addf %793, %794 : vector<16x128xf32>
    %796 = arith.maximumf %786, %795 : vector<16x128xf32>
    %797 = arith.maximumf %777, %796 : vector<16x128xf32>
    %c0_353 = arith.constant 0 : index
    %c224_354 = arith.constant 224 : index
    %c0_355 = arith.constant 0 : index
    %798 = vector.load %arg4[%c0_353, %c224_354, %c0_355] : memref<1x240x128xf32, #tpu.memory_space<vmem>>, vector<1x16x128xf32>
    %799 = vector.shape_cast %798 : vector<1x16x128xf32> to vector<16x128xf32>
    %800 = vector.shape_cast %797 : vector<16x128xf32> to vector<1x16x128xf32>
    tpu.vector_store %arg4[%c0_353, %c224_354, %c0_355], %800 {strides = array<i32>} : memref<1x240x128xf32, #tpu.memory_space<vmem>>, vector<1x16x128xf32>,
    return
  }
  func.func @transform_0(%arg0: i32) -> (i32, i32, i32) {
    %c0_i32 = arith.constant 0 : i32
    %c0_i32_0 = arith.constant 0 : i32
    %c0_i32_1 = arith.constant 0 : i32
    return %arg0, %c0_i32, %c0_i32_0 : i32, i32, i32
  }
  func.func @transform_1(%arg0: i32) -> (i32, i32, i32) {
    %c0_i32 = arith.constant 0 : i32
    %c0_i32_0 = arith.constant 0 : i32
    %c0_i32_1 = arith.constant 0 : i32
    %c0_i32_2 = arith.constant 0 : i32
    return %c0_i32, %c0_i32_0, %c0_i32_1 : i32, i32, i32
  }
  func.func @transform_2(%arg0: i32) -> (i32, i32) {
    %c0_i32 = arith.constant 0 : i32
    %c0_i32_0 = arith.constant 0 : i32
    %c0_i32_1 = arith.constant 0 : i32
    return %c0_i32, %c0_i32_0 : i32, i32
  }
  func.func @transform_3(%arg0: i32) -> (i32, i32, i32) {
    %c0_i32 = arith.constant 0 : i32
    %c0_i32_0 = arith.constant 0 : i32
    %c0_i32_1 = arith.constant 0 : i32
    return %arg0, %c0_i32, %c0_i32_0 : i32, i32, i32
  }
}

module attributes {stable_mosaic.version = 11 : i64} {
  func.func @_conv_pool_kernel(%arg0: i32, %arg1: memref<1x288x128xbf16, #tpu.memory_space<vmem>>, %arg2: memref<5x128x128xbf16, #tpu.memory_space<vmem>>, %arg3: memref<3x128xf32, #tpu.memory_space<vmem>>, %arg4: memref<1x24x128xf32, #tpu.memory_space<vmem>>, %arg5: memref<112x128xf32, #tpu.memory_space<vmem>>) attributes {dimension_semantics = [#tpu.dimension_semantics<parallel>], iteration_bounds = array<i64: 2>, scalar_prefetch = 0 : i64, scratch_operands = 1 : i64, tpu.core_type = #tpu.core_type<tc>, window_params = [{transform_indices = @transform_0, window_bounds = array<i64: 1, 288, 128>}, {pipeline_mode = #tpu.pipeline_mode<synchronous>, transform_indices = @transform_1, window_bounds = array<i64: 5, 128, 128>}, {pipeline_mode = #tpu.pipeline_mode<synchronous>, transform_indices = @transform_2, window_bounds = array<i64: 3, 128>}, {transform_indices = @transform_3, window_bounds = array<i64: 1, 24, 128>}]} {
    %c0 = arith.constant 0 : index
    %c0_0 = arith.constant 0 : index
    %c0_1 = arith.constant 0 : index
    %0 = vector.load %arg1[%c0, %c0_0, %c0_1] : memref<1x288x128xbf16, #tpu.memory_space<vmem>>, vector<1x112x128xbf16>
    %1 = vector.shape_cast %0 : vector<1x112x128xbf16> to vector<112x128xbf16>
    %c0_2 = arith.constant 0 : index
    %c0_3 = arith.constant 0 : index
    %c0_4 = arith.constant 0 : index
    %2 = vector.load %arg2[%c0_2, %c0_3, %c0_4] : memref<5x128x128xbf16, #tpu.memory_space<vmem>>, vector<1x128x128xbf16>
    %3 = vector.shape_cast %2 : vector<1x128x128xbf16> to vector<128x128xbf16>
    %cst = arith.constant dense<0.000000e+00> : vector<112x128xf32>
    %4 = tpu.matmul %1, %3, %cst {dimension_numbers = #tpu.dot_dimension_numbers<[1], [0], [0], [1], [0, 0, 1, 1], [], []>} : vector<112x128xbf16>, vector<128x128xbf16>, vector<112x128xf32> -> vector<112x128xf32>
    %c0_5 = arith.constant 0 : index
    %c144 = arith.constant 144 : index
    %c0_6 = arith.constant 0 : index
    %5 = vector.load %arg1[%c0_5, %c144, %c0_6] : memref<1x288x128xbf16, #tpu.memory_space<vmem>>, vector<1x112x128xbf16>
    %6 = vector.shape_cast %5 : vector<1x112x128xbf16> to vector<112x128xbf16>
    %c1 = arith.constant 1 : index
    %c0_7 = arith.constant 0 : index
    %c0_8 = arith.constant 0 : index
    %7 = vector.load %arg2[%c1, %c0_7, %c0_8] : memref<5x128x128xbf16, #tpu.memory_space<vmem>>, vector<1x128x128xbf16>
    %8 = vector.shape_cast %7 : vector<1x128x128xbf16> to vector<128x128xbf16>
    %cst_9 = arith.constant dense<0.000000e+00> : vector<112x128xf32>
    %9 = tpu.matmul %6, %8, %cst_9 {dimension_numbers = #tpu.dot_dimension_numbers<[1], [0], [0], [1], [0, 0, 1, 1], [], []>} : vector<112x128xbf16>, vector<128x128xbf16>, vector<112x128xf32> -> vector<112x128xf32>
    %10 = arith.addf %4, %9 : vector<112x128xf32>
    %c0_10 = arith.constant 0 : index
    %c16 = arith.constant 16 : index
    %c0_11 = arith.constant 0 : index
    %11 = vector.load %arg1[%c0_10, %c16, %c0_11] : memref<1x288x128xbf16, #tpu.memory_space<vmem>>, vector<1x112x128xbf16>
    %12 = vector.shape_cast %11 : vector<1x112x128xbf16> to vector<112x128xbf16>
    %c2 = arith.constant 2 : index
    %c0_12 = arith.constant 0 : index
    %c0_13 = arith.constant 0 : index
    %13 = vector.load %arg2[%c2, %c0_12, %c0_13] : memref<5x128x128xbf16, #tpu.memory_space<vmem>>, vector<1x128x128xbf16>
    %14 = vector.shape_cast %13 : vector<1x128x128xbf16> to vector<128x128xbf16>
    %cst_14 = arith.constant dense<0.000000e+00> : vector<112x128xf32>
    %15 = tpu.matmul %12, %14, %cst_14 {dimension_numbers = #tpu.dot_dimension_numbers<[1], [0], [0], [1], [0, 0, 1, 1], [], []>} : vector<112x128xbf16>, vector<128x128xbf16>, vector<112x128xf32> -> vector<112x128xf32>
    %16 = arith.addf %10, %15 : vector<112x128xf32>
    %c0_15 = arith.constant 0 : index
    %c160 = arith.constant 160 : index
    %c0_16 = arith.constant 0 : index
    %17 = vector.load %arg1[%c0_15, %c160, %c0_16] : memref<1x288x128xbf16, #tpu.memory_space<vmem>>, vector<1x112x128xbf16>
    %18 = vector.shape_cast %17 : vector<1x112x128xbf16> to vector<112x128xbf16>
    %c3 = arith.constant 3 : index
    %c0_17 = arith.constant 0 : index
    %c0_18 = arith.constant 0 : index
    %19 = vector.load %arg2[%c3, %c0_17, %c0_18] : memref<5x128x128xbf16, #tpu.memory_space<vmem>>, vector<1x128x128xbf16>
    %20 = vector.shape_cast %19 : vector<1x128x128xbf16> to vector<128x128xbf16>
    %cst_19 = arith.constant dense<0.000000e+00> : vector<112x128xf32>
    %21 = tpu.matmul %18, %20, %cst_19 {dimension_numbers = #tpu.dot_dimension_numbers<[1], [0], [0], [1], [0, 0, 1, 1], [], []>} : vector<112x128xbf16>, vector<128x128xbf16>, vector<112x128xf32> -> vector<112x128xf32>
    %22 = arith.addf %16, %21 : vector<112x128xf32>
    %c0_20 = arith.constant 0 : index
    %c32 = arith.constant 32 : index
    %c0_21 = arith.constant 0 : index
    %23 = vector.load %arg1[%c0_20, %c32, %c0_21] : memref<1x288x128xbf16, #tpu.memory_space<vmem>>, vector<1x112x128xbf16>
    %24 = vector.shape_cast %23 : vector<1x112x128xbf16> to vector<112x128xbf16>
    %c4 = arith.constant 4 : index
    %c0_22 = arith.constant 0 : index
    %c0_23 = arith.constant 0 : index
    %25 = vector.load %arg2[%c4, %c0_22, %c0_23] : memref<5x128x128xbf16, #tpu.memory_space<vmem>>, vector<1x128x128xbf16>
    %26 = vector.shape_cast %25 : vector<1x128x128xbf16> to vector<128x128xbf16>
    %cst_24 = arith.constant dense<0.000000e+00> : vector<112x128xf32>
    %27 = tpu.matmul %24, %26, %cst_24 {dimension_numbers = #tpu.dot_dimension_numbers<[1], [0], [0], [1], [0, 0, 1, 1], [], []>} : vector<112x128xbf16>, vector<128x128xbf16>, vector<112x128xf32> -> vector<112x128xf32>
    %28 = arith.addf %22, %27 : vector<112x128xf32>
    %c0_25 = arith.constant 0 : index
    %c0_26 = arith.constant 0 : index
    %29 = vector.load %arg5[%c0_25, %c0_26] : memref<112x128xf32, #tpu.memory_space<vmem>>, vector<112x128xf32>
    tpu.vector_store %arg5[%c0_25, %c0_26], %28 {strides = array<i32>} : memref<112x128xf32, #tpu.memory_space<vmem>>, vector<112x128xf32>,
    %c0_27 = arith.constant 0 : index
    %c0_28 = arith.constant 0 : index
    %30 = vector.load %arg3[%c0_27, %c0_28] : memref<3x128xf32, #tpu.memory_space<vmem>>, vector<1x128xf32>
    %c1_29 = arith.constant 1 : index
    %c0_30 = arith.constant 0 : index
    %31 = vector.load %arg3[%c1_29, %c0_30] : memref<3x128xf32, #tpu.memory_space<vmem>>, vector<1x128xf32>
    %c2_31 = arith.constant 2 : index
    %c0_32 = arith.constant 0 : index
    %32 = vector.load %arg3[%c2_31, %c0_32] : memref<3x128xf32, #tpu.memory_space<vmem>>, vector<1x128xf32>
    %c0_33 = arith.constant 0 : index
    %c0_34 = arith.constant 0 : index
    %33 = vector.load %arg5[%c0_33, %c0_34] : memref<112x128xf32, #tpu.memory_space<vmem>>, vector<8x128xf32>
    %34 = vector.broadcast %30 : vector<1x128xf32> to vector<8x128xf32>
    %35 = arith.addf %33, %34 : vector<8x128xf32>
    %cst_35 = arith.constant 0.000000e+00 : f32
    %36 = vector.broadcast %cst_35 : f32 to vector<8x128xf32>
    %37 = arith.maximumf %35, %36 : vector<8x128xf32>
    %38 = vector.broadcast %31 : vector<1x128xf32> to vector<8x128xf32>
    %39 = arith.mulf %37, %38 : vector<8x128xf32>
    %40 = vector.broadcast %32 : vector<1x128xf32> to vector<8x128xf32>
    %41 = arith.addf %39, %40 : vector<8x128xf32>
    %c8 = arith.constant 8 : index
    %c0_36 = arith.constant 0 : index
    %42 = vector.load %arg5[%c8, %c0_36] : memref<112x128xf32, #tpu.memory_space<vmem>>, vector<8x128xf32>
    %43 = vector.broadcast %30 : vector<1x128xf32> to vector<8x128xf32>
    %44 = arith.addf %42, %43 : vector<8x128xf32>
    %cst_37 = arith.constant 0.000000e+00 : f32
    %45 = vector.broadcast %cst_37 : f32 to vector<8x128xf32>
    %46 = arith.maximumf %44, %45 : vector<8x128xf32>
    %47 = vector.broadcast %31 : vector<1x128xf32> to vector<8x128xf32>
    %48 = arith.mulf %46, %47 : vector<8x128xf32>
    %49 = vector.broadcast %32 : vector<1x128xf32> to vector<8x128xf32>
    %50 = arith.addf %48, %49 : vector<8x128xf32>
    %51 = arith.maximumf %41, %50 : vector<8x128xf32>
    %c16_38 = arith.constant 16 : index
    %c0_39 = arith.constant 0 : index
    %52 = vector.load %arg5[%c16_38, %c0_39] : memref<112x128xf32, #tpu.memory_space<vmem>>, vector<8x128xf32>
    %53 = vector.broadcast %30 : vector<1x128xf32> to vector<8x128xf32>
    %54 = arith.addf %52, %53 : vector<8x128xf32>
    %cst_40 = arith.constant 0.000000e+00 : f32
    %55 = vector.broadcast %cst_40 : f32 to vector<8x128xf32>
    %56 = arith.maximumf %54, %55 : vector<8x128xf32>
    %57 = vector.broadcast %31 : vector<1x128xf32> to vector<8x128xf32>
    %58 = arith.mulf %56, %57 : vector<8x128xf32>
    %59 = vector.broadcast %32 : vector<1x128xf32> to vector<8x128xf32>
    %60 = arith.addf %58, %59 : vector<8x128xf32>
    %c24 = arith.constant 24 : index
    %c0_41 = arith.constant 0 : index
    %61 = vector.load %arg5[%c24, %c0_41] : memref<112x128xf32, #tpu.memory_space<vmem>>, vector<8x128xf32>
    %62 = vector.broadcast %30 : vector<1x128xf32> to vector<8x128xf32>
    %63 = arith.addf %61, %62 : vector<8x128xf32>
    %cst_42 = arith.constant 0.000000e+00 : f32
    %64 = vector.broadcast %cst_42 : f32 to vector<8x128xf32>
    %65 = arith.maximumf %63, %64 : vector<8x128xf32>
    %66 = vector.broadcast %31 : vector<1x128xf32> to vector<8x128xf32>
    %67 = arith.mulf %65, %66 : vector<8x128xf32>
    %68 = vector.broadcast %32 : vector<1x128xf32> to vector<8x128xf32>
    %69 = arith.addf %67, %68 : vector<8x128xf32>
    %70 = arith.maximumf %60, %69 : vector<8x128xf32>
    %71 = arith.maximumf %51, %70 : vector<8x128xf32>
    %c0_43 = arith.constant 0 : index
    %c0_44 = arith.constant 0 : index
    %c0_45 = arith.constant 0 : index
    %72 = vector.load %arg4[%c0_43, %c0_44, %c0_45] : memref<1x24x128xf32, #tpu.memory_space<vmem>>, vector<1x8x128xf32>
    %73 = vector.shape_cast %72 : vector<1x8x128xf32> to vector<8x128xf32>
    %74 = vector.shape_cast %71 : vector<8x128xf32> to vector<1x8x128xf32>
    tpu.vector_store %arg4[%c0_43, %c0_44, %c0_45], %74 {strides = array<i32>} : memref<1x24x128xf32, #tpu.memory_space<vmem>>, vector<1x8x128xf32>,
    %c32_46 = arith.constant 32 : index
    %c0_47 = arith.constant 0 : index
    %75 = vector.load %arg5[%c32_46, %c0_47] : memref<112x128xf32, #tpu.memory_space<vmem>>, vector<8x128xf32>
    %76 = vector.broadcast %30 : vector<1x128xf32> to vector<8x128xf32>
    %77 = arith.addf %75, %76 : vector<8x128xf32>
    %cst_48 = arith.constant 0.000000e+00 : f32
    %78 = vector.broadcast %cst_48 : f32 to vector<8x128xf32>
    %79 = arith.maximumf %77, %78 : vector<8x128xf32>
    %80 = vector.broadcast %31 : vector<1x128xf32> to vector<8x128xf32>
    %81 = arith.mulf %79, %80 : vector<8x128xf32>
    %82 = vector.broadcast %32 : vector<1x128xf32> to vector<8x128xf32>
    %83 = arith.addf %81, %82 : vector<8x128xf32>
    %c40 = arith.constant 40 : index
    %c0_49 = arith.constant 0 : index
    %84 = vector.load %arg5[%c40, %c0_49] : memref<112x128xf32, #tpu.memory_space<vmem>>, vector<8x128xf32>
    %85 = vector.broadcast %30 : vector<1x128xf32> to vector<8x128xf32>
    %86 = arith.addf %84, %85 : vector<8x128xf32>
    %cst_50 = arith.constant 0.000000e+00 : f32
    %87 = vector.broadcast %cst_50 : f32 to vector<8x128xf32>
    %88 = arith.maximumf %86, %87 : vector<8x128xf32>
    %89 = vector.broadcast %31 : vector<1x128xf32> to vector<8x128xf32>
    %90 = arith.mulf %88, %89 : vector<8x128xf32>
    %91 = vector.broadcast %32 : vector<1x128xf32> to vector<8x128xf32>
    %92 = arith.addf %90, %91 : vector<8x128xf32>
    %93 = arith.maximumf %83, %92 : vector<8x128xf32>
    %c48 = arith.constant 48 : index
    %c0_51 = arith.constant 0 : index
    %94 = vector.load %arg5[%c48, %c0_51] : memref<112x128xf32, #tpu.memory_space<vmem>>, vector<8x128xf32>
    %95 = vector.broadcast %30 : vector<1x128xf32> to vector<8x128xf32>
    %96 = arith.addf %94, %95 : vector<8x128xf32>
    %cst_52 = arith.constant 0.000000e+00 : f32
    %97 = vector.broadcast %cst_52 : f32 to vector<8x128xf32>
    %98 = arith.maximumf %96, %97 : vector<8x128xf32>
    %99 = vector.broadcast %31 : vector<1x128xf32> to vector<8x128xf32>
    %100 = arith.mulf %98, %99 : vector<8x128xf32>
    %101 = vector.broadcast %32 : vector<1x128xf32> to vector<8x128xf32>
    %102 = arith.addf %100, %101 : vector<8x128xf32>
    %c56 = arith.constant 56 : index
    %c0_53 = arith.constant 0 : index
    %103 = vector.load %arg5[%c56, %c0_53] : memref<112x128xf32, #tpu.memory_space<vmem>>, vector<8x128xf32>
    %104 = vector.broadcast %30 : vector<1x128xf32> to vector<8x128xf32>
    %105 = arith.addf %103, %104 : vector<8x128xf32>
    %cst_54 = arith.constant 0.000000e+00 : f32
    %106 = vector.broadcast %cst_54 : f32 to vector<8x128xf32>
    %107 = arith.maximumf %105, %106 : vector<8x128xf32>
    %108 = vector.broadcast %31 : vector<1x128xf32> to vector<8x128xf32>
    %109 = arith.mulf %107, %108 : vector<8x128xf32>
    %110 = vector.broadcast %32 : vector<1x128xf32> to vector<8x128xf32>
    %111 = arith.addf %109, %110 : vector<8x128xf32>
    %112 = arith.maximumf %102, %111 : vector<8x128xf32>
    %113 = arith.maximumf %93, %112 : vector<8x128xf32>
    %c0_55 = arith.constant 0 : index
    %c8_56 = arith.constant 8 : index
    %c0_57 = arith.constant 0 : index
    %114 = vector.load %arg4[%c0_55, %c8_56, %c0_57] : memref<1x24x128xf32, #tpu.memory_space<vmem>>, vector<1x8x128xf32>
    %115 = vector.shape_cast %114 : vector<1x8x128xf32> to vector<8x128xf32>
    %116 = vector.shape_cast %113 : vector<8x128xf32> to vector<1x8x128xf32>
    tpu.vector_store %arg4[%c0_55, %c8_56, %c0_57], %116 {strides = array<i32>} : memref<1x24x128xf32, #tpu.memory_space<vmem>>, vector<1x8x128xf32>,
    %c64 = arith.constant 64 : index
    %c0_58 = arith.constant 0 : index
    %117 = vector.load %arg5[%c64, %c0_58] : memref<112x128xf32, #tpu.memory_space<vmem>>, vector<8x128xf32>
    %118 = vector.broadcast %30 : vector<1x128xf32> to vector<8x128xf32>
    %119 = arith.addf %117, %118 : vector<8x128xf32>
    %cst_59 = arith.constant 0.000000e+00 : f32
    %120 = vector.broadcast %cst_59 : f32 to vector<8x128xf32>
    %121 = arith.maximumf %119, %120 : vector<8x128xf32>
    %122 = vector.broadcast %31 : vector<1x128xf32> to vector<8x128xf32>
    %123 = arith.mulf %121, %122 : vector<8x128xf32>
    %124 = vector.broadcast %32 : vector<1x128xf32> to vector<8x128xf32>
    %125 = arith.addf %123, %124 : vector<8x128xf32>
    %c72 = arith.constant 72 : index
    %c0_60 = arith.constant 0 : index
    %126 = vector.load %arg5[%c72, %c0_60] : memref<112x128xf32, #tpu.memory_space<vmem>>, vector<8x128xf32>
    %127 = vector.broadcast %30 : vector<1x128xf32> to vector<8x128xf32>
    %128 = arith.addf %126, %127 : vector<8x128xf32>
    %cst_61 = arith.constant 0.000000e+00 : f32
    %129 = vector.broadcast %cst_61 : f32 to vector<8x128xf32>
    %130 = arith.maximumf %128, %129 : vector<8x128xf32>
    %131 = vector.broadcast %31 : vector<1x128xf32> to vector<8x128xf32>
    %132 = arith.mulf %130, %131 : vector<8x128xf32>
    %133 = vector.broadcast %32 : vector<1x128xf32> to vector<8x128xf32>
    %134 = arith.addf %132, %133 : vector<8x128xf32>
    %135 = arith.maximumf %125, %134 : vector<8x128xf32>
    %c80 = arith.constant 80 : index
    %c0_62 = arith.constant 0 : index
    %136 = vector.load %arg5[%c80, %c0_62] : memref<112x128xf32, #tpu.memory_space<vmem>>, vector<8x128xf32>
    %137 = vector.broadcast %30 : vector<1x128xf32> to vector<8x128xf32>
    %138 = arith.addf %136, %137 : vector<8x128xf32>
    %cst_63 = arith.constant 0.000000e+00 : f32
    %139 = vector.broadcast %cst_63 : f32 to vector<8x128xf32>
    %140 = arith.maximumf %138, %139 : vector<8x128xf32>
    %141 = vector.broadcast %31 : vector<1x128xf32> to vector<8x128xf32>
    %142 = arith.mulf %140, %141 : vector<8x128xf32>
    %143 = vector.broadcast %32 : vector<1x128xf32> to vector<8x128xf32>
    %144 = arith.addf %142, %143 : vector<8x128xf32>
    %c88 = arith.constant 88 : index
    %c0_64 = arith.constant 0 : index
    %145 = vector.load %arg5[%c88, %c0_64] : memref<112x128xf32, #tpu.memory_space<vmem>>, vector<8x128xf32>
    %146 = vector.broadcast %30 : vector<1x128xf32> to vector<8x128xf32>
    %147 = arith.addf %145, %146 : vector<8x128xf32>
    %cst_65 = arith.constant 0.000000e+00 : f32
    %148 = vector.broadcast %cst_65 : f32 to vector<8x128xf32>
    %149 = arith.maximumf %147, %148 : vector<8x128xf32>
    %150 = vector.broadcast %31 : vector<1x128xf32> to vector<8x128xf32>
    %151 = arith.mulf %149, %150 : vector<8x128xf32>
    %152 = vector.broadcast %32 : vector<1x128xf32> to vector<8x128xf32>
    %153 = arith.addf %151, %152 : vector<8x128xf32>
    %154 = arith.maximumf %144, %153 : vector<8x128xf32>
    %155 = arith.maximumf %135, %154 : vector<8x128xf32>
    %c0_66 = arith.constant 0 : index
    %c16_67 = arith.constant 16 : index
    %c0_68 = arith.constant 0 : index
    %156 = vector.load %arg4[%c0_66, %c16_67, %c0_68] : memref<1x24x128xf32, #tpu.memory_space<vmem>>, vector<1x8x128xf32>
    %157 = vector.shape_cast %156 : vector<1x8x128xf32> to vector<8x128xf32>
    %158 = vector.shape_cast %155 : vector<8x128xf32> to vector<1x8x128xf32>
    tpu.vector_store %arg4[%c0_66, %c16_67, %c0_68], %158 {strides = array<i32>} : memref<1x24x128xf32, #tpu.memory_space<vmem>>, vector<1x8x128xf32>,
    return
  }
  func.func @transform_0(%arg0: i32) -> (i32, i32, i32) {
    %c0_i32 = arith.constant 0 : i32
    %c0_i32_0 = arith.constant 0 : i32
    %c0_i32_1 = arith.constant 0 : i32
    return %arg0, %c0_i32, %c0_i32_0 : i32, i32, i32
  }
  func.func @transform_1(%arg0: i32) -> (i32, i32, i32) {
    %c0_i32 = arith.constant 0 : i32
    %c0_i32_0 = arith.constant 0 : i32
    %c0_i32_1 = arith.constant 0 : i32
    %c0_i32_2 = arith.constant 0 : i32
    return %c0_i32, %c0_i32_0, %c0_i32_1 : i32, i32, i32
  }
  func.func @transform_2(%arg0: i32) -> (i32, i32) {
    %c0_i32 = arith.constant 0 : i32
    %c0_i32_0 = arith.constant 0 : i32
    %c0_i32_1 = arith.constant 0 : i32
    return %c0_i32, %c0_i32_0 : i32, i32
  }
  func.func @transform_3(%arg0: i32) -> (i32, i32, i32) {
    %c0_i32 = arith.constant 0 : i32
    %c0_i32_0 = arith.constant 0 : i32
    %c0_i32_1 = arith.constant 0 : i32
    return %arg0, %c0_i32, %c0_i32_0 : i32, i32, i32
  }
}

module attributes {stable_mosaic.version = 11 : i64} {
  func.func @_conv_pool_fc_kernel(%arg0: i32, %arg1: memref<1x96x128xbf16, #tpu.memory_space<vmem>>, %arg2: memref<3x128x128xbf16, #tpu.memory_space<vmem>>, %arg3: memref<3x128xf32, #tpu.memory_space<vmem>>, %arg4: memref<128x128xbf16, #tpu.memory_space<vmem>>, %arg5: memref<128x128xbf16, #tpu.memory_space<vmem>>, %arg6: memref<2x128xf32, #tpu.memory_space<vmem>>, %arg7: memref<1x1x128xf32, #tpu.memory_space<vmem>>, %arg8: memref<32x128xf32, #tpu.memory_space<vmem>>) attributes {dimension_semantics = [#tpu.dimension_semantics<parallel>], iteration_bounds = array<i64: 2>, scalar_prefetch = 0 : i64, scratch_operands = 1 : i64, tpu.core_type = #tpu.core_type<tc>, window_params = [{transform_indices = @transform_0, window_bounds = array<i64: 1, 96, 128>}, {pipeline_mode = #tpu.pipeline_mode<synchronous>, transform_indices = @transform_1, window_bounds = array<i64: 3, 128, 128>}, {pipeline_mode = #tpu.pipeline_mode<synchronous>, transform_indices = @transform_2, window_bounds = array<i64: 3, 128>}, {pipeline_mode = #tpu.pipeline_mode<synchronous>, transform_indices = @transform_3, window_bounds = array<i64: 128, 128>}, {pipeline_mode = #tpu.pipeline_mode<synchronous>, transform_indices = @transform_4, window_bounds = array<i64: 128, 128>}, {pipeline_mode = #tpu.pipeline_mode<synchronous>, transform_indices = @transform_5, window_bounds = array<i64: 2, 128>}, {transform_indices = @transform_6, window_bounds = array<i64: 1, 1, 128>}]} {
    %c0 = arith.constant 0 : index
    %c0_0 = arith.constant 0 : index
    %c0_1 = arith.constant 0 : index
    %0 = vector.load %arg1[%c0, %c0_0, %c0_1] : memref<1x96x128xbf16, #tpu.memory_space<vmem>>, vector<1x32x128xbf16>
    %1 = vector.shape_cast %0 : vector<1x32x128xbf16> to vector<32x128xbf16>
    %c0_2 = arith.constant 0 : index
    %c0_3 = arith.constant 0 : index
    %c0_4 = arith.constant 0 : index
    %2 = vector.load %arg2[%c0_2, %c0_3, %c0_4] : memref<3x128x128xbf16, #tpu.memory_space<vmem>>, vector<1x128x128xbf16>
    %3 = vector.shape_cast %2 : vector<1x128x128xbf16> to vector<128x128xbf16>
    %cst = arith.constant dense<0.000000e+00> : vector<32x128xf32>
    %4 = tpu.matmul %1, %3, %cst {dimension_numbers = #tpu.dot_dimension_numbers<[1], [0], [0], [1], [0, 0, 1, 1], [], []>} : vector<32x128xbf16>, vector<128x128xbf16>, vector<32x128xf32> -> vector<32x128xf32>
    %c0_5 = arith.constant 0 : index
    %c48 = arith.constant 48 : index
    %c0_6 = arith.constant 0 : index
    %5 = vector.load %arg1[%c0_5, %c48, %c0_6] : memref<1x96x128xbf16, #tpu.memory_space<vmem>>, vector<1x32x128xbf16>
    %6 = vector.shape_cast %5 : vector<1x32x128xbf16> to vector<32x128xbf16>
    %c1 = arith.constant 1 : index
    %c0_7 = arith.constant 0 : index
    %c0_8 = arith.constant 0 : index
    %7 = vector.load %arg2[%c1, %c0_7, %c0_8] : memref<3x128x128xbf16, #tpu.memory_space<vmem>>, vector<1x128x128xbf16>
    %8 = vector.shape_cast %7 : vector<1x128x128xbf16> to vector<128x128xbf16>
    %cst_9 = arith.constant dense<0.000000e+00> : vector<32x128xf32>
    %9 = tpu.matmul %6, %8, %cst_9 {dimension_numbers = #tpu.dot_dimension_numbers<[1], [0], [0], [1], [0, 0, 1, 1], [], []>} : vector<32x128xbf16>, vector<128x128xbf16>, vector<32x128xf32> -> vector<32x128xf32>
    %10 = arith.addf %4, %9 : vector<32x128xf32>
    %c0_10 = arith.constant 0 : index
    %c16 = arith.constant 16 : index
    %c0_11 = arith.constant 0 : index
    %11 = vector.load %arg1[%c0_10, %c16, %c0_11] : memref<1x96x128xbf16, #tpu.memory_space<vmem>>, vector<1x32x128xbf16>
    %12 = vector.shape_cast %11 : vector<1x32x128xbf16> to vector<32x128xbf16>
    %c2 = arith.constant 2 : index
    %c0_12 = arith.constant 0 : index
    %c0_13 = arith.constant 0 : index
    %13 = vector.load %arg2[%c2, %c0_12, %c0_13] : memref<3x128x128xbf16, #tpu.memory_space<vmem>>, vector<1x128x128xbf16>
    %14 = vector.shape_cast %13 : vector<1x128x128xbf16> to vector<128x128xbf16>
    %cst_14 = arith.constant dense<0.000000e+00> : vector<32x128xf32>
    %15 = tpu.matmul %12, %14, %cst_14 {dimension_numbers = #tpu.dot_dimension_numbers<[1], [0], [0], [1], [0, 0, 1, 1], [], []>} : vector<32x128xbf16>, vector<128x128xbf16>, vector<32x128xf32> -> vector<32x128xf32>
    %16 = arith.addf %10, %15 : vector<32x128xf32>
    %c0_15 = arith.constant 0 : index
    %c0_16 = arith.constant 0 : index
    %17 = vector.load %arg8[%c0_15, %c0_16] : memref<32x128xf32, #tpu.memory_space<vmem>>, vector<32x128xf32>
    tpu.vector_store %arg8[%c0_15, %c0_16], %16 {strides = array<i32>} : memref<32x128xf32, #tpu.memory_space<vmem>>, vector<32x128xf32>,
    %c0_17 = arith.constant 0 : index
    %c0_18 = arith.constant 0 : index
    %18 = vector.load %arg3[%c0_17, %c0_18] : memref<3x128xf32, #tpu.memory_space<vmem>>, vector<1x128xf32>
    %c1_19 = arith.constant 1 : index
    %c0_20 = arith.constant 0 : index
    %19 = vector.load %arg3[%c1_19, %c0_20] : memref<3x128xf32, #tpu.memory_space<vmem>>, vector<1x128xf32>
    %c2_21 = arith.constant 2 : index
    %c0_22 = arith.constant 0 : index
    %20 = vector.load %arg3[%c2_21, %c0_22] : memref<3x128xf32, #tpu.memory_space<vmem>>, vector<1x128xf32>
    %c0_23 = arith.constant 0 : index
    %c0_24 = arith.constant 0 : index
    %21 = vector.load %arg8[%c0_23, %c0_24] : memref<32x128xf32, #tpu.memory_space<vmem>>, vector<8x128xf32>
    %22 = vector.broadcast %18 : vector<1x128xf32> to vector<8x128xf32>
    %23 = arith.addf %21, %22 : vector<8x128xf32>
    %cst_25 = arith.constant 0.000000e+00 : f32
    %24 = vector.broadcast %cst_25 : f32 to vector<8x128xf32>
    %25 = arith.maximumf %23, %24 : vector<8x128xf32>
    %26 = vector.broadcast %19 : vector<1x128xf32> to vector<8x128xf32>
    %27 = arith.mulf %25, %26 : vector<8x128xf32>
    %28 = vector.broadcast %20 : vector<1x128xf32> to vector<8x128xf32>
    %29 = arith.addf %27, %28 : vector<8x128xf32>
    %c8 = arith.constant 8 : index
    %c0_26 = arith.constant 0 : index
    %30 = vector.load %arg8[%c8, %c0_26] : memref<32x128xf32, #tpu.memory_space<vmem>>, vector<8x128xf32>
    %31 = vector.broadcast %18 : vector<1x128xf32> to vector<8x128xf32>
    %32 = arith.addf %30, %31 : vector<8x128xf32>
    %cst_27 = arith.constant 0.000000e+00 : f32
    %33 = vector.broadcast %cst_27 : f32 to vector<8x128xf32>
    %34 = arith.maximumf %32, %33 : vector<8x128xf32>
    %35 = vector.broadcast %19 : vector<1x128xf32> to vector<8x128xf32>
    %36 = arith.mulf %34, %35 : vector<8x128xf32>
    %37 = vector.broadcast %20 : vector<1x128xf32> to vector<8x128xf32>
    %38 = arith.addf %36, %37 : vector<8x128xf32>
    %39 = arith.maximumf %29, %38 : vector<8x128xf32>
    %c16_28 = arith.constant 16 : index
    %c0_29 = arith.constant 0 : index
    %40 = vector.load %arg8[%c16_28, %c0_29] : memref<32x128xf32, #tpu.memory_space<vmem>>, vector<8x128xf32>
    %41 = vector.broadcast %18 : vector<1x128xf32> to vector<8x128xf32>
    %42 = arith.addf %40, %41 : vector<8x128xf32>
    %cst_30 = arith.constant 0.000000e+00 : f32
    %43 = vector.broadcast %cst_30 : f32 to vector<8x128xf32>
    %44 = arith.maximumf %42, %43 : vector<8x128xf32>
    %45 = vector.broadcast %19 : vector<1x128xf32> to vector<8x128xf32>
    %46 = arith.mulf %44, %45 : vector<8x128xf32>
    %47 = vector.broadcast %20 : vector<1x128xf32> to vector<8x128xf32>
    %48 = arith.addf %46, %47 : vector<8x128xf32>
    %c24 = arith.constant 24 : index
    %c0_31 = arith.constant 0 : index
    %49 = vector.load %arg8[%c24, %c0_31] : memref<32x128xf32, #tpu.memory_space<vmem>>, vector<8x128xf32>
    %50 = vector.broadcast %18 : vector<1x128xf32> to vector<8x128xf32>
    %51 = arith.addf %49, %50 : vector<8x128xf32>
    %cst_32 = arith.constant 0.000000e+00 : f32
    %52 = vector.broadcast %cst_32 : f32 to vector<8x128xf32>
    %53 = arith.maximumf %51, %52 : vector<8x128xf32>
    %54 = vector.broadcast %19 : vector<1x128xf32> to vector<8x128xf32>
    %55 = arith.mulf %53, %54 : vector<8x128xf32>
    %56 = vector.broadcast %20 : vector<1x128xf32> to vector<8x128xf32>
    %57 = arith.addf %55, %56 : vector<8x128xf32>
    %58 = arith.maximumf %48, %57 : vector<8x128xf32>
    %59 = arith.maximumf %39, %58 : vector<8x128xf32>
    %60 = vector.extract_strided_slice %59 {offsets = [0, 0], sizes = [1, 128], strides = [1, 1]} : vector<8x128xf32> to vector<1x128xf32>
    %61 = arith.truncf %60 : vector<1x128xf32> to vector<1x128xbf16>
    %c0_33 = arith.constant 0 : index
    %c0_34 = arith.constant 0 : index
    %62 = vector.load %arg4[%c0_33, %c0_34] : memref<128x128xbf16, #tpu.memory_space<vmem>>, vector<128x128xbf16>
    %cst_35 = arith.constant dense<0.000000e+00> : vector<1x128xf32>
    %63 = tpu.matmul %61, %62, %cst_35 {dimension_numbers = #tpu.dot_dimension_numbers<[1], [0], [0], [1], [0, 0, 1, 1], [], []>} : vector<1x128xbf16>, vector<128x128xbf16>, vector<1x128xf32> -> vector<1x128xf32>
    %c0_36 = arith.constant 0 : index
    %c0_37 = arith.constant 0 : index
    %64 = vector.load %arg6[%c0_36, %c0_37] : memref<2x128xf32, #tpu.memory_space<vmem>>, vector<1x128xf32>
    %65 = arith.addf %63, %64 : vector<1x128xf32>
    %cst_38 = arith.constant 0.000000e+00 : f32
    %66 = vector.broadcast %cst_38 : f32 to vector<1x128xf32>
    %67 = arith.maximumf %65, %66 : vector<1x128xf32>
    %68 = arith.truncf %67 : vector<1x128xf32> to vector<1x128xbf16>
    %c0_39 = arith.constant 0 : index
    %c0_40 = arith.constant 0 : index
    %69 = vector.load %arg5[%c0_39, %c0_40] : memref<128x128xbf16, #tpu.memory_space<vmem>>, vector<128x128xbf16>
    %cst_41 = arith.constant dense<0.000000e+00> : vector<1x128xf32>
    %70 = tpu.matmul %68, %69, %cst_41 {dimension_numbers = #tpu.dot_dimension_numbers<[1], [0], [0], [1], [0, 0, 1, 1], [], []>} : vector<1x128xbf16>, vector<128x128xbf16>, vector<1x128xf32> -> vector<1x128xf32>
    %c1_42 = arith.constant 1 : index
    %c0_43 = arith.constant 0 : index
    %71 = vector.load %arg6[%c1_42, %c0_43] : memref<2x128xf32, #tpu.memory_space<vmem>>, vector<1x128xf32>
    %72 = arith.addf %70, %71 : vector<1x128xf32>
    %c0_44 = arith.constant 0 : index
    %c0_45 = arith.constant 0 : index
    %c0_46 = arith.constant 0 : index
    %73 = vector.load %arg7[%c0_44, %c0_45, %c0_46] : memref<1x1x128xf32, #tpu.memory_space<vmem>>, vector<1x1x128xf32>
    %74 = vector.shape_cast %73 : vector<1x1x128xf32> to vector<1x128xf32>
    %75 = vector.shape_cast %72 : vector<1x128xf32> to vector<1x1x128xf32>
    tpu.vector_store %arg7[%c0_44, %c0_45, %c0_46], %75 {strides = array<i32>} : memref<1x1x128xf32, #tpu.memory_space<vmem>>, vector<1x1x128xf32>,
    return
  }
  func.func @transform_0(%arg0: i32) -> (i32, i32, i32) {
    %c0_i32 = arith.constant 0 : i32
    %c0_i32_0 = arith.constant 0 : i32
    %c0_i32_1 = arith.constant 0 : i32
    return %arg0, %c0_i32, %c0_i32_0 : i32, i32, i32
  }
  func.func @transform_1(%arg0: i32) -> (i32, i32, i32) {
    %c0_i32 = arith.constant 0 : i32
    %c0_i32_0 = arith.constant 0 : i32
    %c0_i32_1 = arith.constant 0 : i32
    %c0_i32_2 = arith.constant 0 : i32
    return %c0_i32, %c0_i32_0, %c0_i32_1 : i32, i32, i32
  }
  func.func @transform_2(%arg0: i32) -> (i32, i32) {
    %c0_i32 = arith.constant 0 : i32
    %c0_i32_0 = arith.constant 0 : i32
    %c0_i32_1 = arith.constant 0 : i32
    return %c0_i32, %c0_i32_0 : i32, i32
  }
  func.func @transform_3(%arg0: i32) -> (i32, i32) {
    %c0_i32 = arith.constant 0 : i32
    %c0_i32_0 = arith.constant 0 : i32
    %c0_i32_1 = arith.constant 0 : i32
    return %c0_i32, %c0_i32_0 : i32, i32
  }
  func.func @transform_4(%arg0: i32) -> (i32, i32) {
    %c0_i32 = arith.constant 0 : i32
    %c0_i32_0 = arith.constant 0 : i32
    %c0_i32_1 = arith.constant 0 : i32
    return %c0_i32, %c0_i32_0 : i32, i32
  }
  func.func @transform_5(%arg0: i32) -> (i32, i32) {
    %c0_i32 = arith.constant 0 : i32
    %c0_i32_0 = arith.constant 0 : i32
    %c0_i32_1 = arith.constant 0 : i32
    return %c0_i32, %c0_i32_0 : i32, i32
  }
  func.func @transform_6(%arg0: i32) -> (i32, i32, i32) {
    %c0_i32 = arith.constant 0 : i32
    %c0_i32_0 = arith.constant 0 : i32
    %c0_i32_1 = arith.constant 0 : i32
    return %arg0, %c0_i32, %c0_i32_0 : i32, i32, i32
  }
}

</mosaic_0001>

<bundles_post_ra>
// kernel: cnn_forward.4
= control target key start
LH: loop header
LB: loop body
LE: loop exit
PB: predicated region body
PF: predicated region fallthrough
CT: control target
= control target key end

     0   :  { %s1998_s12 = smov 0   ;;  %s2431_s0 = inlined_call_operand.vmem [shape: bf16[2,288,128], index: 0, kind: input, shape index: {}]   ;;  %s2432_s1 = inlined_call_operand.vmem [shape: bf16[5,128,128], index: 1, kind: input, shape index: {}]   ;;  %s2433_s2 = inlined_call_operand.vmem [shape: f32[3,128], index: 2, kind: input, shape index: {}]   ;;  %s2434_s3 = inlined_call_operand.vmem [shape: f32[2,24,128], index: 3, kind: output, shape index: {}]  }
   0x1 LB: > { %s1419_s13 = sadd.s32 4294967295, %s1974_s12   ;;  %p1423_p0 = scmp.ge.s32.totalorder %s1974_s12, 1  ;;  %s1974_s12 = sphi %s1998_s12, %s13_s12  }
   0x2   : > { %p137_p1 = scmp.lt.s32.totalorder %s1974_s12, 3 }
   0x4   : > { %p138_p2 = pnand %p1423_p0, %p137_p1 }
   0x5   : > { %p161_p3 = scmp.lt.s32.totalorder (!%p138_p2), %s1419_s13, 1 }
   0x6   : > { %141 = sbr.rel (%p138_p2) target bundleno = 386 (0x182), region = 32 }
   0xb   : > { %v1893_v0 = vld [vmem:[%s2432_s1 + $0x78] sm:$0xff]   ;;  %v1976_v1 = vmov 0.0   ;;  %v1894_v2 = vld [vmem:[%s2432_s1 + $0x70] sm:$0xff]   ;;  %vm1977_vm0 = vmmov 0   ;;  %s2436_s13 = smov (!%p161_p3, %s1419_s13), 1  ;;  %v1895_v3 = vld [vmem:[%s2432_s1 + $0x68] sm:$0xff]  }
   0xc   : > { %1645 = vmatprep.subr.bf16.mxu0 %v1976_v1  ;;  %1865 = vmatprep.subr.bf16.mxu1 %v1976_v1  ;;  %s1881_s20 = smul.u32 144, %s2436_s13  ;;  %v1896_v4 = vld [vmem:[%s2432_s1 + $0x60] sm:$0xff]   ;;  %v1897_v5 = vld [vmem:[%s2432_s1 + $0x58] sm:$0xff]   ;;  %v1898_v6 = vld [vmem:[%s2432_s1 + $0x50] sm:$0xff]  }
   0xd   : > { %1646 = vmatpush3.bf16.msra.mxu0 %v1893_v0  ;;  %1873 = vmatpush3.bf16.msra.mxu1 %v1893_v0  ;;  %v1899_v7 = vld [vmem:[%s2432_s1 + $0x48] sm:$0xff]   ;;  %v1900_v8 = vld [vmem:[%s2432_s1 + $0x40] sm:$0xff]   ;;  %v1903_v10 = vld [vmem:[%s2432_s1 + $0x38] sm:$0xff]   ;;  %s1882_s4 = smul.u32 24, %s2436_s13 }
   0xe   : > { %1647 = vmatprep.subr.bf16.mxu0 %v1976_v1  ;;  %1866 = vmatprep.subr.bf16.mxu1 %v1976_v1  ;;  %s2031_s23 = scalar_lea.vmem %s2431_s0, %s1881_s20  ;;  %v1904_v12 = vld [vmem:[%s2432_s1 + $0xb8] sm:$0xff]   ;;  %v1905_v13 = vld [vmem:[%s2432_s1 + $0x30] sm:$0xff]   ;;  %v1908_v16 = vld [vmem:[%s2432_s1 + $0x28] sm:$0xff]  }
   0xf   : > { %1661 = vmatprep.mubr.msk.bf16.mxu0 %vm1977_vm0, %v1976_v1  ;;  %1677 = vmatprep.mubr.msk.bf16.mxu1 %vm1977_vm0, %v1976_v1  ;;  %v1901_v9 = vld [vmem:[%s2031_s23 + $0x48] sm:$0xff]   ;;  %v1906_v14 = vld [vmem:[%s2432_s1 + $0xb0] sm:$0xff]   ;;  %v1911_v19 = vld [vmem:[%s2432_s1 + $0x20] sm:$0xff]   ;;  %s2391_s13 = scalar_lea.vmem %s2434_s3, %s1882_s4 }
  0x10   : > { %v1902_v11 = vld [vmem:[%s2031_s23 + $0x68] sm:$0xff]   ;;  %v1907_v15 = vld [vmem:[%s2031_s23 + $0x50] sm:$0xff]   ;;  %v1912_v20 = vld [vmem:[%s2432_s1 + $0xa0] sm:$0xff]  }
  0x11   : > { %1648 = vmatpush3.bf16.msra.mxu0 %v1894_v2  ;;  %1874 = vmatpush3.bf16.msra.mxu1 %v1894_v2  ;;  %v1910_v17 = vld [vmem:[%s2031_s23 + $0x70] sm:$0xff]   ;;  %v1909_v18 = vld [vmem:[%s2432_s1 + $0xa8] sm:$0xff]   ;;  %v1913_v21 = vld [vmem:[%s2031_s23 + $0x58] sm:$0xff]  }
  0x12   : > { %1649 = vmatprep.subr.bf16.mxu0 %v1976_v1  ;;  %1867 = vmatprep.subr.bf16.mxu1 %v1976_v1  ;;  %v1914_v22 = vld [vmem:[%s2432_s1 + $0x18] sm:$0xff]   ;;  %v1917_v25 = vld [vmem:[%s2432_s1 + $0x10] sm:$0xff]   ;;  %v1919_v27 = vld [vmem:[%s2031_s23 + $0x60] sm:$0xff]  }
  0x13   : > { %v1916_v23 = vld [vmem:[%s2031_s23 + $0x78] sm:$0xff]   ;;  %v1918_v26 = vld [vmem:[%s2432_s1 + $0x90] sm:$0xff]   ;;  %v1920_v28 = vld [vmem:[%s2432_s1 + $0x8] sm:$0xff]  }
  0x14   : > { %v1915_v24 = vld [vmem:[%s2432_s1 + $0x98] sm:$0xff]   ;;  %v1921_v29 = vld [vmem:[%s2432_s1 + $0x88] sm:$0xff]   ;;  %v1922_v30 = vld [vmem:[%s2432_s1] sm:$0xff]  }
  0x15   : > { %1650 = vmatpush3.bf16.msra.mxu0 %v1895_v3  ;;  %1875 = vmatpush3.bf16.msra.mxu1 %v1895_v3  ;;  %v1923_v31 = vld [vmem:[%s2432_s1 + $0x80] sm:$0xff]   ;;  %v1925_v33 = vld [vmem:[%s2031_s23 + $0x8] sm:$0xff]   ;;  %v1926_v34 = vld [vmem:[%s2432_s1 + $0xf8] sm:$0xff]  }
  0x16   : > { %1651 = vmatprep.subr.bf16.mxu0 %v1976_v1  ;;  %1868 = vmatprep.subr.bf16.mxu1 %v1976_v1  ;;  %v1924_v32 = vld [vmem:[%s2031_s23] sm:$0xff]   ;;  %v1927_v35 = vld [vmem:[%s2432_s1 + $0x138] sm:$0xff]   ;;  %v1930_v36 = vld [vmem:[%s2432_s1 + $0xf0] sm:$0xff]  }
  0x17   : > { %v1931_v37 = vld [vmem:[%s2432_s1 + $0x130] sm:$0xff]   ;;  %v1928_v38 = vld [vmem:[%s2031_s23 + $0x8] sm:$0xff]   ;;  %v1936_v42 = vld [vmem:[%s2432_s1 + $0xe0] sm:$0xff]  }
  0x18   : > { %v1929_v39 = vld [vmem:[%s2031_s23 + $0x10] sm:$0xff]   ;;  %v1932_v40 = vld [vmem:[%s2432_s1 + $0xe8] sm:$0xff]   ;;  %v1939_v43 = vld [vmem:[%s2432_s1 + $0x120] sm:$0xff]  }
  0x19   : > { %1652 = vmatpush3.bf16.msra.mxu0 %v1896_v4  ;;  %1876 = vmatpush3.bf16.msra.mxu1 %v1896_v4  ;;  %v1935_v41 = vld [vmem:[%s2432_s1 + $0x128] sm:$0xff]   ;;  %v1933_v44 = vld [vmem:[%s2031_s23 + $0x10] sm:$0xff]   ;;  %v1934_v45 = vld [vmem:[%s2031_s23 + $0x18] sm:$0xff]  }
  0x1a   : > { %1653 = vmatprep.subr.bf16.mxu0 %v1976_v1  ;;  %1869 = vmatprep.subr.bf16.mxu1 %v1976_v1  ;;  %v1940_v46 = vld [vmem:[%s2432_s1 + $0xd8] sm:$0xff]   ;;  %v1944_v48 = vld [vmem:[%s2432_s1 + $0xd0] sm:$0xff]   ;;  %v1938_v51 = vld [vmem:[%s2031_s23 + $0x20] sm:$0xff]  }
  0x1b   : > { %v1941_v47 = vld [vmem:[%s2432_s1 + $0x118] sm:$0xff]   ;;  %v1945_v49 = vld [vmem:[%s2432_s1 + $0x110] sm:$0xff]   ;;  %v1948_v52 = vld [vmem:[%s2432_s1 + $0xc8] sm:$0xff]  }
  0x1c   : > { %v1937_v50 = vld [vmem:[%s2031_s23 + $0x18] sm:$0xff]   ;;  %v1949_v53 = vld [vmem:[%s2432_s1 + $0x108] sm:$0xff]   ;;  %v1952_v54 = vld [vmem:[%s2432_s1 + $0xc0] sm:$0xff]  }
  0x1d   : > { %1654 = vmatpush3.bf16.msra.mxu0 %v1897_v5  ;;  %1877 = vmatpush3.bf16.msra.mxu1 %v1897_v5  ;;  %v1953_v55 = vld [vmem:[%s2432_s1 + $0x100] sm:$0xff]   ;;  %v1943_v57 = vld [vmem:[%s2031_s23 + $0x28] sm:$0xff]   ;;  %v1947_v59 = vld [vmem:[%s2031_s23 + $0x30] sm:$0xff]  }
  0x1e   : > { %1655 = vmatprep.subr.bf16.mxu0 %v1976_v1  ;;  %1870 = vmatprep.subr.bf16.mxu1 %v1976_v1  ;;  %v1942_v56 = vld [vmem:[%s2031_s23 + $0x20] sm:$0xff]   ;;  %v1946_v58 = vld [vmem:[%s2031_s23 + $0x28] sm:$0xff]   ;;  %v1950_v60 = vld [vmem:[%s2031_s23 + $0x30] sm:$0xff]  }
  0x1f   : > { %v1951_v61 = vld [vmem:[%s2031_s23 + $0x38] sm:$0xff]   ;;  %v1954_v62 = vld [vmem:[%s2031_s23 + $0x50] sm:$0xff]   ;;  %v1958_v3 = vld [vmem:[%s2031_s23 + $0x60] sm:$0xff]  }
  0x20   : > { %v1955_v63 = vld [vmem:[%s2031_s23 + $0x10] sm:$0xff]   ;;  %v1956_v0 = vld [vmem:[%s2031_s23 + $0x58] sm:$0xff]   ;;  %v1959_v4 = vld [vmem:[%s2031_s23 + $0x20] sm:$0xff]  }
  0x21   : > { %1656 = vmatpush3.bf16.msra.mxu0 %v1898_v6  ;;  %1878 = vmatpush3.bf16.msra.mxu1 %v1898_v6  ;;  %v1957_v2 = vld [vmem:[%s2031_s23 + $0x18] sm:$0xff]   ;;  %v1960_v5 = vld [vmem:[%s2031_s23 + $0x68] sm:$0xff]  }
  0x22   : > { %1657 = vmatprep.subr.bf16.mxu0 %v1976_v1  ;;  %1871 = vmatprep.subr.bf16.mxu1 %v1976_v1  ;;  %v1961_v6 = vld [vmem:[%s2031_s23 + $0x28] sm:$0xff]  }
  0x25   : > { %1658 = vmatpush3.bf16.msra.mxu0 %v1899_v7  ;;  %1879 = vmatpush3.bf16.msra.mxu1 %v1899_v7  ;;  %v1962_v7 = vld [vmem:[%s2031_s23 + $0x70] sm:$0xff]  }
  0x26   : > { %1659 = vmatprep.subr.bf16.mxu0 %v1976_v1  ;;  %1872 = vmatprep.subr.bf16.mxu1 %v1976_v1 }
  0x29   : > { %1660 = vmatpush3.bf16.msra.mxu0 %v1900_v8  ;;  %1880 = vmatpush3.bf16.msra.mxu1 %v1900_v8  ;;  %v1963_v8 = vld [vmem:[%s2031_s23 + $0x30] sm:$0xff]  }
  0x2a   : > { %1689 = vmatprep.subr.bf16.mxu1 %v1976_v1  ;;  %1733 = vmatprep.subr.bf16.mxu0 %v1976_v1 }
  0x2c   : > { %1662 = vmatmul.mubr.bf16.vlgmr.msra.gmra.mxu0 %v1901_v9  ;;  %1678 = vmatmul.mubr.bf16.vlgmr.msra.gmra.mxu1 %v1902_v11  ;;  %v1964_v9 = vld [vmem:[%s2031_s23 + $0x78] sm:$0xff]   ;;  %v1966_v11 = vld [vmem:[%s2031_s23 + $0x80] sm:$0xff]  }
  0x2d   : > { %1690 = vmatpush3.bf16.msra.mxu1 %v1903_v10  ;;  %1734 = vmatpush3.bf16.msra.mxu0 %v1904_v12  ;;  %v1965_v10 = vld [vmem:[%s2031_s23 + $0x38] sm:$0xff]   ;;  %v1967_v12 = vld [vmem:[%s2031_s23 + $0x40] sm:$0xff]  }
  0x2e   : > { %1691 = vmatprep.subr.bf16.mxu1 %v1976_v1  ;;  %1735 = vmatprep.subr.bf16.mxu0 %v1976_v1 }
  0x2f   : > { %1665 = vmatprep.mubr.msk.bf16.mxu0 %vm1977_vm0, %v1976_v1  ;;  %1681 = vmatprep.mubr.msk.bf16.mxu1 %vm1977_vm0, %v1976_v1 }
  0x31   : > { %1692 = vmatpush3.bf16.msra.mxu1 %v1905_v13  ;;  %1736 = vmatpush3.bf16.msra.mxu0 %v1906_v14 }
  0x32   : > { %1693 = vmatprep.subr.bf16.mxu1 %v1976_v1  ;;  %1737 = vmatprep.subr.bf16.mxu0 %v1976_v1 }
  0x34   : > { %1666 = vmatmul.mubr.bf16.gmra.mxu0 %v1907_v15  ;;  %1682 = vmatmul.mubr.bf16.gmra.mxu1 %v1910_v17 }
  0x35   : > { %1694 = vmatpush3.bf16.msra.mxu1 %v1908_v16  ;;  %1738 = vmatpush3.bf16.msra.mxu0 %v1909_v18 }
  0x36   : > { %1695 = vmatprep.subr.bf16.mxu1 %v1976_v1  ;;  %1739 = vmatprep.subr.bf16.mxu0 %v1976_v1 }
  0x37   : > { %1669 = vmatprep.mubr.msk.bf16.mxu0 %vm1977_vm0, %v1976_v1  ;;  %1685 = vmatprep.mubr.msk.bf16.mxu1 %vm1977_vm0, %v1976_v1 }
  0x39   : > { %1696 = vmatpush3.bf16.msra.mxu1 %v1911_v19  ;;  %1740 = vmatpush3.bf16.msra.mxu0 %v1912_v20 }
  0x3a   : > { %1697 = vmatprep.subr.bf16.mxu1 %v1976_v1  ;;  %1741 = vmatprep.subr.bf16.mxu0 %v1976_v1 }
  0x3c   : > { %1670 = vmatmul.mubr.bf16.gmra.mxu0 %v1913_v21  ;;  %1686 = vmatmul.mubr.bf16.gmra.mxu1 %v1916_v23 }
  0x3d   : > { %1698 = vmatpush3.bf16.msra.mxu1 %v1914_v22  ;;  %1742 = vmatpush3.bf16.msra.mxu0 %v1915_v24 }
  0x3e   : > { %1699 = vmatprep.subr.bf16.mxu1 %v1976_v1  ;;  %1743 = vmatprep.subr.bf16.mxu0 %v1976_v1 }
  0x3f   : > { %1673 = vmatprep.mubr.msk.bf16.mxu0 %vm1977_vm0, %v1976_v1  ;;  %1705 = vmatprep.mubr.msk.bf16.mxu1 %vm1977_vm0, %v1976_v1 }
  0x41   : > { %1700 = vmatpush3.bf16.msra.mxu1 %v1917_v25  ;;  %1744 = vmatpush3.bf16.msra.mxu0 %v1918_v26 }
  0x42   : > { %1701 = vmatprep.subr.bf16.mxu1 %v1976_v1  ;;  %1745 = vmatprep.subr.bf16.mxu0 %v1976_v1 }
  0x44   : > { %1674 = vmatmul.mubr.bf16.gmra.mxu0 %v1919_v27 }
  0x45   : > { %1702 = vmatpush3.bf16.msra.mxu1 %v1920_v28  ;;  %1746 = vmatpush3.bf16.msra.mxu0 %v1921_v29 }
  0x46   : > { %1703 = vmatprep.subr.bf16.mxu1 %v1976_v1  ;;  %1747 = vmatprep.subr.bf16.mxu0 %v1976_v1 }
  0x47   : > { %1749 = vmatprep.mubr.msk.bf16.mxu0 %vm1977_vm0, %v1976_v1 }
  0x49   : > { %1704 = vmatpush3.bf16.msra.mxu1 %v1922_v30  ;;  %1748 = vmatpush3.bf16.msra.mxu0 %v1923_v31 }
  0x4a   : > { %1777 = vmatprep.subr.bf16.mxu1 %v1976_v1  ;;  %1821 = vmatprep.subr.bf16.mxu0 %v1976_v1 }
  0x4c   : > { %1706 = vmatmul.mubr.bf16.vlgmr.msra.gmra.mxu1 %v1924_v32  ;;  %1750 = vmatmul.mubr.bf16.vlgmr.msra.gmra.mxu0 %v1925_v33 }
  0x4d   : > { %1778 = vmatpush3.bf16.msra.mxu1 %v1926_v34  ;;  %1822 = vmatpush3.bf16.msra.mxu0 %v1927_v35 }
  0x4e   : > { %1709 = vmatprep.mubr.msk.bf16.mxu1 %vm1977_vm0, %v1976_v1  ;;  %1753 = vmatprep.mubr.msk.bf16.mxu0 %vm1977_vm0, %v1976_v1 }
  0x4f   : > { %1779 = vmatprep.subr.bf16.mxu1 %v1976_v1  ;;  %1823 = vmatprep.subr.bf16.mxu0 %v1976_v1 }
  0x51   : > { %1780 = vmatpush3.bf16.msra.mxu1 %v1930_v36  ;;  %1824 = vmatpush3.bf16.msra.mxu0 %v1931_v37 }
  0x52   : > { %1781 = vmatprep.subr.bf16.mxu1 %v1976_v1  ;;  %1825 = vmatprep.subr.bf16.mxu0 %v1976_v1 }
  0x54   : > { %1710 = vmatmul.mubr.bf16.gmra.mxu1 %v1928_v38  ;;  %1754 = vmatmul.mubr.bf16.gmra.mxu0 %v1929_v39 }
  0x55   : > { %1713 = vmatprep.mubr.msk.bf16.mxu1 %vm1977_vm0, %v1976_v1  ;;  %1757 = vmatprep.mubr.msk.bf16.mxu0 %vm1977_vm0, %v1976_v1 }
  0x56   : > { %1782 = vmatpush3.bf16.msra.mxu1 %v1932_v40  ;;  %1826 = vmatpush3.bf16.msra.mxu0 %v1935_v41 }
  0x57   : > { %1783 = vmatprep.subr.bf16.mxu1 %v1976_v1  ;;  %1827 = vmatprep.subr.bf16.mxu0 %v1976_v1 }
  0x5a   : > { %1784 = vmatpush3.bf16.msra.mxu1 %v1936_v42  ;;  %1828 = vmatpush3.bf16.msra.mxu0 %v1939_v43 }
  0x5b   : > { %1785 = vmatprep.subr.bf16.mxu1 %v1976_v1  ;;  %1829 = vmatprep.subr.bf16.mxu0 %v1976_v1 }
  0x5c   : > { %1714 = vmatmul.mubr.bf16.gmra.mxu1 %v1933_v44  ;;  %1758 = vmatmul.mubr.bf16.gmra.mxu0 %v1934_v45 }
  0x5d   : > { %1717 = vmatprep.mubr.msk.bf16.mxu1 %vm1977_vm0, %v1976_v1  ;;  %1761 = vmatprep.mubr.msk.bf16.mxu0 %vm1977_vm0, %v1976_v1 }
  0x5e   : > { %1786 = vmatpush3.bf16.msra.mxu1 %v1940_v46  ;;  %1830 = vmatpush3.bf16.msra.mxu0 %v1941_v47 }
  0x5f   : > { %1787 = vmatprep.subr.bf16.mxu1 %v1976_v1  ;;  %1831 = vmatprep.subr.bf16.mxu0 %v1976_v1 }
  0x62   : > { %1788 = vmatpush3.bf16.msra.mxu1 %v1944_v48  ;;  %1832 = vmatpush3.bf16.msra.mxu0 %v1945_v49 }
  0x63   : > { %1789 = vmatprep.subr.bf16.mxu1 %v1976_v1  ;;  %1833 = vmatprep.subr.bf16.mxu0 %v1976_v1 }
  0x64   : > { %1718 = vmatmul.mubr.bf16.gmra.mxu1 %v1937_v50  ;;  %1762 = vmatmul.mubr.bf16.gmra.mxu0 %v1938_v51 }
  0x65   : > { %1721 = vmatprep.mubr.msk.bf16.mxu1 %vm1977_vm0, %v1976_v1  ;;  %1765 = vmatprep.mubr.msk.bf16.mxu0 %vm1977_vm0, %v1976_v1 }
  0x66   : > { %1790 = vmatpush3.bf16.msra.mxu1 %v1948_v52  ;;  %1834 = vmatpush3.bf16.msra.mxu0 %v1949_v53 }
  0x67   : > { %1791 = vmatprep.subr.bf16.mxu1 %v1976_v1  ;;  %1835 = vmatprep.subr.bf16.mxu0 %v1976_v1 }
  0x6a   : > { %1792 = vmatpush3.bf16.msra.mxu1 %v1952_v54  ;;  %1836 = vmatpush3.bf16.msra.mxu0 %v1953_v55 }
  0x6c   : > { %1722 = vmatmul.mubr.bf16.gmra.mxu1 %v1942_v56  ;;  %1766 = vmatmul.mubr.bf16.gmra.mxu0 %v1943_v57 }
  0x6d   : > { %1725 = vmatprep.mubr.msk.bf16.mxu1 %vm1977_vm0, %v1976_v1  ;;  %1769 = vmatprep.mubr.msk.bf16.mxu0 %vm1977_vm0, %v1976_v1 }
  0x74   : > { %1726 = vmatmul.mubr.bf16.gmra.mxu1 %v1946_v58  ;;  %1770 = vmatmul.mubr.bf16.gmra.mxu0 %v1947_v59 }
  0x75   : > { %1729 = vmatprep.mubr.msk.bf16.mxu1 %vm1977_vm0, %v1976_v1  ;;  %1773 = vmatprep.mubr.msk.bf16.mxu0 %vm1977_vm0, %v1976_v1 }
  0x7c   : > { %1730 = vmatmul.mubr.bf16.gmra.mxu1 %v1950_v60  ;;  %1774 = vmatmul.mubr.bf16.gmra.mxu0 %v1951_v61 }
  0x7d   : > { %1793 = vmatprep.mubr.msk.bf16.mxu1 %vm1977_vm0, %v1976_v1  ;;  %1837 = vmatprep.mubr.msk.bf16.mxu0 %vm1977_vm0, %v1976_v1 }
  0x84   : > { %1794 = vmatmul.mubr.bf16.vlgmr.msra.gmra.mxu1 %v1954_v62  ;;  %1838 = vmatmul.mubr.bf16.vlgmr.msra.gmra.mxu0 %v1955_v63 }
  0x85   : > { %1797 = vmatprep.mubr.msk.bf16.mxu1 %vm1977_vm0, %v1976_v1  ;;  %1841 = vmatprep.mubr.msk.bf16.mxu0 %vm1977_vm0, %v1976_v1 }
  0x8c   : > { %1798 = vmatmul.mubr.bf16.gmra.mxu1 %v1956_v0  ;;  %1842 = vmatmul.mubr.bf16.gmra.mxu0 %v1957_v2 }
  0x8d   : > { %1801 = vmatprep.mubr.msk.bf16.mxu1 %vm1977_vm0, %v1976_v1  ;;  %1845 = vmatprep.mubr.msk.bf16.mxu0 %vm1977_vm0, %v1976_v1 }
  0x94   : > { %1802 = vmatmul.mubr.bf16.gmra.mxu1 %v1958_v3  ;;  %1846 = vmatmul.mubr.bf16.gmra.mxu0 %v1959_v4 }
  0x95   : > { %1805 = vmatprep.mubr.msk.bf16.mxu1 %vm1977_vm0, %v1976_v1  ;;  %1849 = vmatprep.mubr.msk.bf16.mxu0 %vm1977_vm0, %v1976_v1 }
  0x9c   : > { %1806 = vmatmul.mubr.bf16.gmra.mxu1 %v1960_v5  ;;  %1850 = vmatmul.mubr.bf16.gmra.mxu0 %v1961_v6 }
  0x9d   : > { %1809 = vmatprep.mubr.msk.bf16.mxu1 %vm1977_vm0, %v1976_v1  ;;  %1853 = vmatprep.mubr.msk.bf16.mxu0 %vm1977_vm0, %v1976_v1 }
  0xa4   : > { %1810 = vmatmul.mubr.bf16.gmra.mxu1 %v1962_v7  ;;  %1854 = vmatmul.mubr.bf16.gmra.mxu0 %v1963_v8 }
  0xa5   : > { %1813 = vmatprep.mubr.msk.bf16.mxu1 %vm1977_vm0, %v1976_v1  ;;  %1857 = vmatprep.mubr.msk.bf16.mxu0 %vm1977_vm0, %v1976_v1 }
  0xac   : > { %1814 = vmatmul.mubr.bf16.gmra.mxu1 %v1964_v9  ;;  %1858 = vmatmul.mubr.bf16.gmra.mxu0 %v1965_v10 }
  0xad   : > { %1817 = vmatprep.mubr.msk.bf16.mxu1 %vm1977_vm0, %v1976_v1  ;;  %1861 = vmatprep.mubr.msk.bf16.mxu0 %vm1977_vm0, %v1976_v1 }
  0xb4   : > { %1818 = vmatmul.mubr.bf16.gmra.mxu1 %v1966_v11  ;;  %1862 = vmatmul.mubr.bf16.gmra.mxu0 %v1967_v12 }
  0xec   : > { %v357_v13 = vpop.f32.mrf.mxu0  ;;  %v2287_v14 = vpop.f32.mrf.mxu1 }
  0xee   : > { %v1663_v15 = vpop.f32.mrf.mxu0  ;;  %v1679_v16 = vpop.f32.mrf.mxu1 }
  0xf0   : > { %v2289_v17 = vpop.f32.mrf.mxu0  ;;  %v2291_v18 = vpop.f32.mrf.mxu1 }
  0xf2   : > { %v1664_v19 = vpop.f32.mrf.mxu0  ;;  %v1680_v20 = vpop.f32.mrf.mxu1 }
  0xf4   : > { %v2293_v21 = vpop.f32.mrf.mxu0  ;;  %v2295_v22 = vpop.f32.mrf.mxu1 }
  0xf6   : > { %v1667_v1 = vpop.f32.mrf.mxu0  ;;  %v1683_v23 = vpop.f32.mrf.mxu1 }
  0xf8   : > { %v2297_v24 = vpop.f32.mrf.mxu0  ;;  %v2299_v25 = vpop.f32.mrf.mxu1 }
  0xfa   : > { %v1668_v26 = vpop.f32.mrf.mxu0  ;;  %v1684_v27 = vpop.f32.mrf.mxu1 }
  0xfc   : > { %v373_v28 = vpop.f32.mrf.mxu0  ;;  %v405_v29 = vpop.f32.mrf.mxu1 }
  0xfe   : > { %v1671_v30 = vpop.f32.mrf.mxu0  ;;  %v1687_v31 = vpop.f32.mrf.mxu1 }
 0x100   : > { %v2301_v32 = vpop.f32.mrf.mxu0  ;;  %v408_v33 = vpop.f32.mrf.mxu1 }
 0x102   : > { %v1672_v34 = vpop.f32.mrf.mxu0  ;;  %v1688_v35 = vpop.f32.mrf.mxu1 }
 0x104   : > { %v2303_v36 = vpop.f32.mrf.mxu0 }
 0x106   : > { %v1675_v37 = vpop.f32.mrf.mxu0 }
 0x108   : > { %v2305_v38 = vpop.f32.mrf.mxu0 }
 0x10a   : > { %v1676_v39 = vpop.f32.mrf.mxu0 }
 0x10c   : > { %v536_v40 = vpop.f32.mrf.mxu1  ;;  %v746_v41 = vpop.f32.mrf.mxu0 }
 0x10d   : > { %v537_v42 = vadd.f32 %v536_v40, %v357_v13 }
 0x10e   : > { %v1707_v43 = vpop.f32.mrf.mxu1  ;;  %v1751_v44 = vpop.f32.mrf.mxu0 }
 0x10f   : > { %v801_v45 = vadd.f32 %v746_v41, %v537_v42 }
 0x110   : > { %v539_v46 = vpop.f32.mrf.mxu1  ;;  %v749_v47 = vpop.f32.mrf.mxu0 }
 0x112   : > { %v1708_v48 = vpop.f32.mrf.mxu1  ;;  %v1752_v49 = vpop.f32.mrf.mxu0 }
 0x114   : > { %v544_v50 = vpop.f32.mrf.mxu1  ;;  %v2307_v51 = vpop.f32.mrf.mxu0 }
 0x116   : > { %v1711_v52 = vpop.f32.mrf.mxu1  ;;  %v1755_v53 = vpop.f32.mrf.mxu0 }
 0x117   : > { %v540_v52 = vadd.f32 %v539_v46, %v2289_v17 }
 0x118   : > { %v2309_v54 = vpop.f32.mrf.mxu1  ;;  %v2311_v55 = vpop.f32.mrf.mxu0 }
 0x11a   : > { %v1712_v56 = vpop.f32.mrf.mxu1  ;;  %v1756_v57 = vpop.f32.mrf.mxu0 }
 0x11c   : > { %v552_v58 = vpop.f32.mrf.mxu1  ;;  %v762_v59 = vpop.f32.mrf.mxu0 }
 0x11d   : > { %v553_v60 = vadd.f32 %v552_v58, %v373_v28  ;;  %v2346_v58 = vld [vmem:[%s2433_s2] ss:$0 sm:$0xff] }
 0x11e   : > { %v1715_v61 = vpop.f32.mrf.mxu1  ;;  %v1759_v62 = vpop.f32.mrf.mxu0 }
 0x11f   : > { %v2313_v63 = vadd.f32 %v762_v59, %v553_v60  ;;  %v802_v61 = vadd.f32 %v749_v47, %v540_v52  ;;  %v545_v62 = vadd.f32 %v544_v50, %v2293_v21  ;;  %v2356_v47 = vld [vmem:[%s2433_s2 + $0x1] ss:$0 sm:$0xff] }
 0x120   : > { %v2315_v0 = vpop.f32.mrf.mxu1  ;;  %v2317_v2 = vpop.f32.mrf.mxu0 }
 0x122   : > { %v1716_v3 = vpop.f32.mrf.mxu1  ;;  %v1760_v4 = vpop.f32.mrf.mxu0 }
 0x124   : > { %v2319_v5 = vpop.f32.mrf.mxu1  ;;  %v2321_v6 = vpop.f32.mrf.mxu0 }
 0x126   : > { %v1719_v7 = vpop.f32.mrf.mxu1  ;;  %v1763_v8 = vpop.f32.mrf.mxu0 }
 0x128   : > { %v2323_v9 = vpop.f32.mrf.mxu1  ;;  %v2325_v10 = vpop.f32.mrf.mxu0 }
 0x12a   : > { %v1720_v11 = vpop.f32.mrf.mxu1  ;;  %v1764_v12 = vpop.f32.mrf.mxu0 }
 0x12b   : > { %v548_v12 = vadd.f32 %v2309_v54, %v2297_v24  ;;  %v2364_v54 = vld [vmem:[%s2433_s2 + $0x2] ss:$0 sm:$0xff] }
 0x12c   : > { %v568_v13 = vpop.f32.mrf.mxu1  ;;  %v778_v15 = vpop.f32.mrf.mxu0 }
 0x12d   : > { %v569_v16 = vadd.f32 %v568_v13, %v2287_v14 }
 0x12e   : > { %v1723_v19 = vpop.f32.mrf.mxu1  ;;  %v1767_v20 = vpop.f32.mrf.mxu0 }
 0x12f   : > { %v2328_v1 = vadd.f32 %v778_v15, %v569_v16 }
 0x130   : > { %v2330_v23 = vpop.f32.mrf.mxu1  ;;  %v2332_v26 = vpop.f32.mrf.mxu0 }
 0x132   : > { %v1724_v27 = vpop.f32.mrf.mxu1  ;;  %v1768_v28 = vpop.f32.mrf.mxu0 }
 0x133   : > { %v804_v28 = vadd.f32 %v2311_v55, %v548_v12 }
 0x134   : > { %v2334_v29 = vpop.f32.mrf.mxu1  ;;  %v2336_v30 = vpop.f32.mrf.mxu0 }
 0x136   : > { %v1727_v31 = vpop.f32.mrf.mxu1  ;;  %v1771_v33 = vpop.f32.mrf.mxu0 }
 0x138   : > { %v2338_v34 = vpop.f32.mrf.mxu1  ;;  %v2340_v35 = vpop.f32.mrf.mxu0 }
 0x13a   : > { %v1728_v14 = vpop.f32.mrf.mxu1  ;;  %v1772_v37 = vpop.f32.mrf.mxu0 }
 0x13c   : > { %v584_v39 = vpop.f32.mrf.mxu1  ;;  %v794_v40 = vpop.f32.mrf.mxu0 }
 0x13e   : > { %v1731_v41 = vpop.f32.mrf.mxu1  ;;  %v1775_v42 = vpop.f32.mrf.mxu0 }
 0x13f   : > { %v556_v41 = vadd.f32 %v2315_v0, %v2301_v32 }
 0x140   : > { %v587_v43 = vpop.f32.mrf.mxu1  ;;  %v797_v44 = vpop.f32.mrf.mxu0 }
 0x142   : > { %v1732_v48 = vpop.f32.mrf.mxu1  ;;  %v1776_v49 = vpop.f32.mrf.mxu0 }
 0x144   : > { %v970_v53 = vpop.f32.mrf.mxu1  ;;  %v1194_v56 = vpop.f32.mrf.mxu0 }
 0x145   : > { %v1025_v57 = vadd.f32 %v970_v53, %v801_v45  ;;  %v803_v45 = vadd.f32 %v2307_v51, %v545_v62 }
 0x146   : > { %v1795_v59 = vpop.f32.mrf.mxu1  ;;  %v1839_v60 = vpop.f32.mrf.mxu0 }
 0x147   : > { %v1249_v3 = vadd.f32 %v1194_v56, %v1025_v57  ;;  %v561_v60 = vadd.f32 %v2319_v5, %v2303_v36  ;;  %v564_v36 = vadd.f32 %v2323_v9, %v2305_v38 }
 0x148   : > { %v973_v4 = vpop.f32.mrf.mxu1  ;;  %v1197_v7 = vpop.f32.mrf.mxu0 }
 0x149   : > { %v1285_v8 = vadd.f32 %v2346_v58, %v1249_v3  ;;  %v1026_v11 = vadd.f32 %v973_v4, %v802_v61  ;;  %v806_v61 = vadd.f32 %v2317_v2, %v556_v41 }
 0x14a   : > { %v1796_v17 = vpop.f32.mrf.mxu1  ;;  %v1840_v46 = vpop.f32.mrf.mxu0 }
 0x14b   : > { %v1286_v13 = vmax.f32 %v1285_v8, 0.0  ;;  %v1250_v15 = vadd.f32 %v1197_v7, %v1026_v11 }
 0x14c   : > { %v978_v21 = vpop.f32.mrf.mxu1  ;;  %v1202_v50 = vpop.f32.mrf.mxu0 }
 0x14d   : > { %v1298_v16 = vadd.f32 %v2346_v58, %v1250_v15  ;;  %v1027_v19 = vadd.f32 %v978_v21, %v803_v45  ;;  %v1291_v51 = vmul.f32 %v2356_v47, %v1286_v13 }
 0x14e   : > { %v1799_v20 = vpop.f32.mrf.mxu1  ;;  %v1843_v27 = vpop.f32.mrf.mxu0 }
 0x14f   : > { %v1299_v31 = vmax.f32 %v1298_v16, 0.0  ;;  %v1251_v24 = vadd.f32 %v1202_v50, %v1027_v19  ;;  %v1296_v43 = vadd.f32 %v2364_v54, %v1291_v51 }
 0x150   : > { %v981_v33 = vpop.f32.mrf.mxu1  ;;  %v1205_v14 = vpop.f32.mrf.mxu0 }
 0x151   : > { %v1300_v37 = vmul.f32 %v2356_v47, %v1299_v31  ;;  %v1304_v39 = vadd.f32 %v2346_v58, %v1251_v24  ;;  %v1028_v40 = vadd.f32 %v981_v33, %v804_v28 }
 0x152   : > { %v1800_v55 = vpop.f32.mrf.mxu1  ;;  %v1844_v42 = vpop.f32.mrf.mxu0 }
 0x153   : > { %v1301_v44 = vadd.f32 %v2364_v54, %v1300_v37  ;;  %v1305_v48 = vmax.f32 %v1304_v39, 0.0  ;;  %v1252_v49 = vadd.f32 %v1205_v14, %v1028_v40  ;;  %v572_v39 = vadd.f32 %v2330_v23, %v2291_v18 }
 0x154   : > { %v986_v52 = vpop.f32.mrf.mxu1  ;;  %v1210_v53 = vpop.f32.mrf.mxu0 }
 0x155   : > { %v1302_v56 = vmax.f32 %v1296_v43, %v1301_v44  ;;  %v1309_v57 = vadd.f32 %v2346_v58, %v1252_v49  ;;  %v1029_v59 = vadd.f32 %v986_v52, %v2313_v63  ;;  %v1306_v62 = vmul.f32 %v2356_v47, %v1305_v48 }
 0x156   : > { %v1803_v32 = vpop.f32.mrf.mxu1  ;;  %v1847_v0 = vpop.f32.mrf.mxu0  ;;  %v807_v63 = vadd.f32 %v2321_v6, %v561_v60  ;;  %v808_v6 = vadd.f32 %v2325_v10, %v564_v36  ;;  %v810_v23 = vadd.f32 %v2332_v26, %v572_v39 }
 0x157   : > { %v1310_v3 = vmax.f32 %v1309_v57, 0.0  ;;  %v1253_v4 = vadd.f32 %v1210_v53, %v1029_v59  ;;  %v1307_v2 = vadd.f32 %v2364_v54, %v1306_v62  ;;  %v577_v57 = vadd.f32 %v2334_v29, %v2295_v22 }
 0x158   : > { %v989_v7 = vpop.f32.mrf.mxu1  ;;  %v1213_v8 = vpop.f32.mrf.mxu0  ;;  %v580_v22 = vadd.f32 %v2338_v34, %v2299_v25 }
 0x159   : > { %v1311_v11 = vmul.f32 %v2356_v47, %v1310_v3  ;;  %v1317_v17 = vadd.f32 %v2346_v58, %v1253_v4  ;;  %v1030_v46 = vadd.f32 %v989_v7, %v806_v61 }
 0x15a   : > { %v1804_v5 = vpop.f32.mrf.mxu1  ;;  %v1848_v45 = vpop.f32.mrf.mxu0 }
 0x15b   : > { %v1312_v12 = vadd.f32 %v2364_v54, %v1311_v11  ;;  %v1318_v13 = vmax.f32 %v1317_v17, 0.0  ;;  %v1254_v15 = vadd.f32 %v1213_v8, %v1030_v46 }
 0x15c   : > { %v994_v21 = vpop.f32.mrf.mxu1  ;;  %v1218_v50 = vpop.f32.mrf.mxu0 }
 0x15d   : > { %v1313_v16 = vmax.f32 %v1307_v2, %v1312_v12  ;;  %v1322_v19 = vadd.f32 %v2346_v58, %v1254_v15  ;;  %v1031_v20 = vadd.f32 %v994_v21, %v807_v63  ;;  %v1319_v28 = vmul.f32 %v2356_v47, %v1318_v13 }
 0x15e   : > { %v1807_v38 = vpop.f32.mrf.mxu1  ;;  %v1851_v9 = vpop.f32.mrf.mxu0 }
 0x15f   : > { %v1314_v27 = vmax.f32 %v1302_v56, %v1313_v16  ;;  %v1323_v51 = vmax.f32 %v1322_v19, 0.0  ;;  %v1255_v31 = vadd.f32 %v1218_v50, %v1031_v20  ;;  %v1320_v55 = vadd.f32 %v2364_v54, %v1319_v28 }
 0x160   : > { %v997_v24 = vpop.f32.mrf.mxu1  ;;  %v1221_v33 = vpop.f32.mrf.mxu0 }
 0x161   : > { %1315 = vst [vmem:[%s2391_s13] sm:$0xff] %v1314_v27  ;;  %v1324_v14 = vmul.f32 %v2356_v47, %v1323_v51  ;;  %v1328_v10 = vadd.f32 %v2346_v58, %v1255_v31  ;;  %v1032_v37 = vadd.f32 %v997_v24, %v808_v6 }
 0x162   : > { %v1808_v40 = vpop.f32.mrf.mxu1  ;;  %v1852_v41 = vpop.f32.mrf.mxu0 }
 0x163   : > { %v1325_v42 = vadd.f32 %v2364_v54, %v1324_v14  ;;  %v1329_v43 = vmax.f32 %v1328_v10, 0.0  ;;  %v1256_v44 = vadd.f32 %v1221_v33, %v1032_v37 }
 0x164   : > { %v1002_v48 = vpop.f32.mrf.mxu1  ;;  %v1226_v49 = vpop.f32.mrf.mxu0 }
 0x165   : > { %v1326_v52 = vmax.f32 %v1320_v55, %v1325_v42  ;;  %v1333_v53 = vadd.f32 %v2346_v58, %v1256_v44  ;;  %v1033_v56 = vadd.f32 %v1002_v48, %v2328_v1  ;;  %v1330_v60 = vmul.f32 %v2356_v47, %v1329_v43 }
 0x166   : > { %v1811_v59 = vpop.f32.mrf.mxu1  ;;  %v1855_v18 = vpop.f32.mrf.mxu0  ;;  %v811_v1 = vadd.f32 %v2336_v30, %v577_v57  ;;  %v812_v30 = vadd.f32 %v2340_v35, %v580_v22 }
 0x167   : > { %v1334_v32 = vmax.f32 %v1333_v53, 0.0  ;;  %v1257_v0 = vadd.f32 %v1226_v49, %v1033_v56  ;;  %v1331_v26 = vadd.f32 %v2364_v54, %v1330_v60 }
 0x168   : > { %v1005_v61 = vpop.f32.mrf.mxu1  ;;  %v1229_v62 = vpop.f32.mrf.mxu0 }
 0x169   : > { %v1335_v3 = vmul.f32 %v2356_v47, %v1334_v32  ;;  %v1341_v4 = vadd.f32 %v2346_v58, %v1257_v0  ;;  %v1034_v7 = vadd.f32 %v1005_v61, %v810_v23 }
 0x16a   : > { %v1812_v29 = vpop.f32.mrf.mxu1  ;;  %v1856_v8 = vpop.f32.mrf.mxu0 }
 0x16b   : > { %v1336_v11 = vadd.f32 %v2364_v54, %v1335_v3  ;;  %v1342_v17 = vmax.f32 %v1341_v4, 0.0  ;;  %v1258_v46 = vadd.f32 %v1229_v62, %v1034_v7 }
 0x16c   : > { %v1010_v63 = vpop.f32.mrf.mxu1  ;;  %v1234_v36 = vpop.f32.mrf.mxu0 }
 0x16d   : > { %v1337_v5 = vmax.f32 %v1331_v26, %v1336_v11  ;;  %v1346_v45 = vadd.f32 %v2346_v58, %v1258_v46  ;;  %v1035_v2 = vadd.f32 %v1010_v63, %v811_v1  ;;  %v1343_v34 = vmul.f32 %v2356_v47, %v1342_v17 }
 0x16e   : > { %v1815_v12 = vpop.f32.mrf.mxu1  ;;  %v1859_v13 = vpop.f32.mrf.mxu0 }
 0x16f   : > { %v1338_v25 = vmax.f32 %v1326_v52, %v1337_v5  ;;  %v1347_v15 = vmax.f32 %v1346_v45, 0.0  ;;  %v1259_v21 = vadd.f32 %v1234_v36, %v1035_v2  ;;  %v1344_v27 = vadd.f32 %v2364_v54, %v1343_v34 }
 0x170   : > { %v1013_v50 = vpop.f32.mrf.mxu1  ;;  %v1237_v16 = vpop.f32.mrf.mxu0 }
 0x171   : > { %1339 = vst [vmem:[%s2391_s13 + $0x8] sm:$0xff] %v1338_v25  ;;  %v1348_v19 = vmul.f32 %v2356_v47, %v1347_v15  ;;  %v1352_v20 = vadd.f32 %v2346_v58, %v1259_v21  ;;  %v1036_v6 = vadd.f32 %v1013_v50, %v812_v30 }
 0x172   : > { %v1816_v38 = vpop.f32.mrf.mxu1  ;;  %v1860_v9 = vpop.f32.mrf.mxu0 }
 0x173   : > { %v1349_v35 = vadd.f32 %v2364_v54, %v1348_v19  ;;  %v1353_v28 = vmax.f32 %v1352_v20, 0.0  ;;  %v1260_v51 = vadd.f32 %v1237_v16, %v1036_v6 }
 0x174   : > { %v1018_v31 = vpop.f32.mrf.mxu1  ;;  %v1242_v24 = vpop.f32.mrf.mxu0 }
 0x175   : > { %v1350_v33 = vmax.f32 %v1344_v27, %v1349_v35  ;;  %v1357_v14 = vadd.f32 %v2346_v58, %v1260_v51  ;;  %v1354_v39 = vmul.f32 %v2356_v47, %v1353_v28 }
 0x176   : > { %v1819_v10 = vpop.f32.mrf.mxu1  ;;  %v1863_v37 = vpop.f32.mrf.mxu0 }
 0x177   : > { %v1358_v40 = vmax.f32 %v1357_v14, 0.0  ;;  %v1355_v48 = vadd.f32 %v2364_v54, %v1354_v39 }
 0x178   : > { %v1021_v41 = vpop.f32.mrf.mxu1  ;;  %v1245_v55 = vpop.f32.mrf.mxu0 }
 0x179   : > { %v1359_v42 = vmul.f32 %v2356_v47, %v1358_v40 }
 0x17a   : > { %v1820_v43 = vpop.f32.mrf.mxu1  ;;  %v1864_v44 = vpop.f32.mrf.mxu0 }
 0x17b   : > { %v1360_v49 = vadd.f32 %v2364_v54, %v1359_v42 }
 0x17d   : > { %v1361_v52 = vmax.f32 %v1355_v48, %v1360_v49 }
 0x17f   : > { %v1362_v53 = vmax.f32 %v1350_v33, %v1361_v52 }
 0x181   : > { %1363 = vst [vmem:[%s2391_s13 + $0x10] sm:$0xff] %v1362_v53 }
 0x182 PF: > { %s13_s12 = sadd.s32 1, %s1974_s12  }
 0x183   : > { %p10_p4 = scmp.ge.s32.totalorder %s13_s12, 4  }
 0x185   :  { %12 = sbr.rel (!%p10_p4) target bundleno = 1 (0x1), region = 66 }

// kernel: cnn_forward.5
= control target key start
LH: loop header
LB: loop body
LE: loop exit
PB: predicated region body
PF: predicated region fallthrough
CT: control target
= control target key end

     0   :  { %11 = vsyncpa [#allocation4], 0  ;;  %s1652_s0 = inlined_call_operand.vmem [shape: bf16[2,96,128], index: 0, kind: input, shape index: {}]   ;;  %s1653_s1 = inlined_call_operand.vmem [shape: bf16[3,128,128], index: 1, kind: input, shape index: {}]   ;;  %s1654_s2 = inlined_call_operand.vmem [shape: f32[3,128], index: 2, kind: input, shape index: {}]   ;;  %s1655_s3 = inlined_call_operand.vmem [shape: bf16[128,128], index: 3, kind: input, shape index: {}]   ;;  %s1656_s4 = inlined_call_operand.vmem [shape: bf16[128,128], index: 4, kind: input, shape index: {}]   ;;  %s1657_s5 = inlined_call_operand.vmem [shape: f32[2,128], index: 5, kind: input, shape index: {}]   ;;  %s1658_s6 = inlined_call_operand.hbm [shape: f32[2,1,128], index: 6, kind: output, shape index: {}]  }
   0x1   :  { %13 = vsyncpa [#allocation4 + $0x1], 0  ;;  %s1392_s21 = smov 0   ;;  %s1394_s22 = smov 0  }
   0x2   :  { %s1396_s23 = smov 0   ;;  %s1398_s24 = smov 0  }
   0x3 LB: > { %s1413_s25 = sadd.s32 4294967295, %s1352_s24   ;;  %s967_s26 = sadd.s32 4294967294, %s1352_s24   ;;  %s1352_s24 = sphi %s1398_s24, %s1664_s24   ;;  %s1348_s23 = sphi %s1396_s23, %s1663_s23   ;;  %s1344_s22 = sphi %s1394_s22, %s1662_s22   ;;  %s1340_s21 = sphi %s1392_s21, %s1661_s21  }
   0x4   : > { %s1417_s27 = sadd.s32 1, %s1352_s24   ;;  %s157_s28 = sadd.s32 1, %s1348_s23 }
   0x5   : > { %s154_s29 = ssub.s32 %s1352_s24, %s1417_s27  ;;  %p167_p0 = scmp.ne.s32.totalorder %s1348_s23, %s1344_s22 }
   0x6   : > { %p155_p1 = scmp.eq.s32.totalorder %s154_s29, 0  ;;  %p168_p2 = scmp.eq.s32.totalorder %s1413_s25, 1 }
   0x7   : > { %p173_p3 = scmp.ne.s32.totalorder %s1344_s22, %s1340_s21  ;;  %p174_p4 = scmp.eq.s32.totalorder %s967_s26, 1 }
   0x8   : > { %s1428_s30 = scalar_select %p155_p1, %s1348_s23, %s157_s28  }
   0x9   : > { %p1430_p5 = por %p168_p2, %p167_p0  ;;  %p1434_p6 = por %p174_p4, %p173_p3 }
   0xa   : > { %p970_p7 = scmp.ge.s32.totalorder %s1352_s24, 1  ;;  %p215_p8 = scmp.lt.s32.totalorder %s1352_s24, 3 }
   0xc   : > { %p216_p9 = pnand %p970_p7, %p215_p8 }
   0xd   : > { %p244_p10 = scmp.lt.s32.totalorder (!%p216_p9), %s1413_s25, 1  ;;  %s242_s13 = sand.u32 (!%p216_p9), 1, %s1344_s22  }
   0xe   : > { %219 = sbr.rel (%p216_p9) target bundleno = 707 (0x2c3), region = 44  ;;  %s1053_s16 = sshll.u32 (!%p216_p9), %s1413_s25, 4 }
   0xf   : > { %s243_s17 = scalar_lea.vmem (!%p216_p9), [#allocation3], %s242_s13  ;;  %s1611_s28 = scalar_lea.hbm (!%p216_p9), %s1658_s6, %s1053_s16 }
  0x10   : > { %s912_s19 = sshll.u32 (!%p216_p9), %s243_s17, 4  ;;  %s1613_s19 = int_to_ptr.vmem [resolvable:$true] %s912_s19 }
  0x11   : > { %s1292_s29 = scalar_lea.vmem (!%p216_p9), %s1613_s19, 16 }
  0x12   : > { %p1293_p11 = scmp.ne.s32.totalorder (!%p216_p9), %s1613_s19, %s1292_s29 }
  0x13   : > { %v1246_v0 = vld [vmem:[%s1653_s1 + $0x78] sm:$0xff]   ;;  %v1248_v2 = vld [vmem:[%s1653_s1 + $0x70] sm:$0xff]   ;;  %v1250_v4 = vld [vmem:[%s1653_s1 + $0x68] sm:$0xff]   ;;  %s245_s26 = scalar_select %p244_p10, %s1413_s25, 1  ;;  %v1354_v31 = vmov 0.0   ;;  %vm1355_vm0 = vmmov 0  }
  0x14   : > { %v1247_v1 = vld [vmem:[%s1653_s1 + $0x38] sm:$0xff]   ;;  %1104 = vmatprep.subr.bf16.mxu0 %v1246_v0  ;;  %v1249_v3 = vld [vmem:[%s1653_s1 + $0x30] sm:$0xff]   ;;  %v1251_v5 = vld [vmem:[%s1653_s1 + $0x28] sm:$0xff]   ;;  %p1294_p12 = pnand %p1293_p11, %p1430_p5  ;;  %s1356_s25 = smov [#allocation3]  }
  0x15   : > { %1124 = vmatprep.subr.bf16.mxu1 %v1247_v1  ;;  %1105 = vmatpush3.bf16.msra.mxu0 %v1246_v0  ;;  %v1252_v6 = vld [vmem:[%s1653_s1 + $0x60] sm:$0xff]   ;;  %s1204_s11 = smul.u32 48, %s245_s26  ;;  %v1254_v8 = vld [vmem:[%s1653_s1 + $0x58] sm:$0xff]   ;;  %v1256_v10 = vld [vmem:[%s1653_s1 + $0x50] sm:$0xff]   ;;  %s1296_s9 = sshll.u32 %s1356_s25, 4  ;;  %s1297_s9 = int_to_ptr.vmem [resolvable:$false] %s1296_s9 }
  0x16   : > { %1125 = vmatpush3.bf16.msra.mxu1 %v1247_v1  ;;  %1106 = vmatprep.subr.bf16.mxu0 %v1248_v2  ;;  %v1253_v7 = vld [vmem:[%s1653_s1 + $0x20] sm:$0xff]   ;;  %v1255_v9 = vld [vmem:[%s1653_s1 + $0x18] sm:$0xff]   ;;  %v1257_v11 = vld [vmem:[%s1653_s1 + $0x10] sm:$0xff]   ;;  %p1295_p13 = pneg %p1294_p12  ;;  %s1298_s10 = scalar_lea.vmem %s1297_s9, 32 }
  0x17   : > { %1126 = vmatprep.subr.bf16.mxu1 %v1249_v3  ;;  %s1475_s18 = scalar_lea.vmem %s1652_s0, %s1204_s11  ;;  %v1258_v14 = vld [vmem:[%s1653_s1 + $0x48] sm:$0xff]   ;;  %v1260_v16 = vld [vmem:[%s1653_s1 + $0x40] sm:$0xff]   ;;  %v1266_v19 = vld [vmem:[%s1653_s1 + $0xb8] sm:$0xff]   ;;  %p1299_p0 = scmp.lt.s32.totalorder %s1613_s19, %s1297_s9 }
  0x18   : > { %v1262_v12 = vld [vmem:[%s1475_s18 + $0x18] sm:$0xff]   ;;  %v1263_v13 = vld [vmem:[%s1475_s18] sm:$0xff]   ;;  %v1259_v15 = vld [vmem:[%s1653_s1 + $0x8] sm:$0xff]   ;;  %p1300_p1 = scmp.lt.s32.totalorder %s1298_s10, %s1292_s29 }
  0x19   : > { %1107 = vmatpush3.bf16.msra.mxu0 %v1248_v2  ;;  %1120 = vmatprep.mubr.bf16.mxu0 %v1262_v12  ;;  %v1261_v17 = vld [vmem:[%s1653_s1] sm:$0xff]   ;;  %v1265_v20 = vld [vmem:[%s1475_s18 + $0x8] sm:$0xff]   ;;  %v1267_v21 = vld [vmem:[%s1653_s1 + $0xb0] sm:$0xff]  }
  0x1a   : > { %1127 = vmatpush3.bf16.msra.mxu1 %v1249_v3  ;;  %1108 = vmatprep.subr.bf16.mxu0 %v1250_v4  ;;  %v1264_v18 = vld [vmem:[%s1475_s18 + $0x20] sm:$0xff]   ;;  %v1274_v22 = vld [vmem:[%s1475_s18 + $0x8] sm:$0xff]   ;;  %v1270_v25 = vld [vmem:[%s1653_s1 + $0x98] sm:$0xff]   ;;  %p1301_p2 = por %p1300_p1, %p1299_p0 }
  0x1b   : > { %1128 = vmatprep.subr.bf16.mxu1 %v1251_v5  ;;  %1140 = vmatprep.mubr.bf16.mxu1 %v1263_v13  ;;  %v1268_v23 = vld [vmem:[%s1653_s1 + $0xa8] sm:$0xff]   ;;  %v1269_v24 = vld [vmem:[%s1653_s1 + $0xa0] sm:$0xff]   ;;  %v1271_v26 = vld [vmem:[%s1653_s1 + $0x90] sm:$0xff]  }
  0x1c   : > { %v1272_v27 = vld [vmem:[%s1653_s1 + $0x88] sm:$0xff]   ;;  %v1273_v28 = vld [vmem:[%s1653_s1 + $0x80] sm:$0xff]   ;;  %v1275_v29 = vld [vmem:[%s1475_s18 + $0x10] sm:$0xff]   ;;  %s900_s18 = scalar_lea.sflag [#allocation4], %s242_s13  ;;  %p1302_p3 = pnand %p1301_p2, %p1295_p13 }
  0x1d   : > { %1109 = vmatpush3.bf16.msra.mxu0 %v1250_v4  ;;  %v1276_v30 = vld [vmem:[%s1655_s3 + $0x38] sm:$0xff]   ;;  %v1277_v32 = vld [vmem:[%s1655_s3 + $0x30] sm:$0xff]   ;;  %v1278_v33 = vld [vmem:[%s1655_s3 + $0x28] sm:$0xff]  }
  0x1e   : > { %1129 = vmatpush3.bf16.msra.mxu1 %v1251_v5  ;;  %1110 = vmatprep.subr.bf16.mxu0 %v1252_v6  ;;  %v1279_v34 = vld [vmem:[%s1655_s3 + $0x20] sm:$0xff]   ;;  %v1280_v35 = vld [vmem:[%s1655_s3 + $0x18] sm:$0xff]   ;;  %v1281_v36 = vld [vmem:[%s1655_s3 + $0x10] sm:$0xff]  }
  0x1f   : > { %1130 = vmatprep.subr.bf16.mxu1 %v1253_v7  ;;  %v1282_v37 = vld [vmem:[%s1655_s3 + $0x8] sm:$0xff]   ;;  %v1283_v38 = vld [vmem:[%s1655_s3] sm:$0xff]   ;;  %v1284_v39 = vld [vmem:[%s1656_s4 + $0x38] sm:$0xff]  }
  0x20   : > { %v1285_v40 = vld [vmem:[%s1656_s4 + $0x30] sm:$0xff]   ;;  %v1286_v41 = vld [vmem:[%s1656_s4 + $0x28] sm:$0xff]   ;;  %v1287_v42 = vld [vmem:[%s1656_s4 + $0x20] sm:$0xff]  }
  0x21   : > { %1111 = vmatpush3.bf16.msra.mxu0 %v1252_v6  ;;  %v1288_v43 = vld [vmem:[%s1656_s4 + $0x18] sm:$0xff]   ;;  %v1289_v44 = vld [vmem:[%s1656_s4 + $0x10] sm:$0xff]   ;;  %v1034_v54 = vld [vmem:[%s1654_s2] ss:$0 sm:$0xff] }
  0x22   : > { %1131 = vmatpush3.bf16.msra.mxu1 %v1253_v7  ;;  %1112 = vmatprep.subr.bf16.mxu0 %v1254_v8  ;;  %v1035_v7 = vld [vmem:[%s1654_s2 + $0x1] ss:$0 sm:$0xff] }
  0x23   : > { %1132 = vmatprep.subr.bf16.mxu1 %v1255_v9 }
  0x25   : > { %1113 = vmatpush3.bf16.msra.mxu0 %v1254_v8 }
  0x26   : > { %1133 = vmatpush3.bf16.msra.mxu1 %v1255_v9  ;;  %1114 = vmatprep.subr.bf16.mxu0 %v1256_v10 }
  0x27   : > { %1134 = vmatprep.subr.bf16.mxu1 %v1257_v11 }
  0x29   : > { %1115 = vmatpush3.bf16.msra.mxu0 %v1256_v10 }
  0x2a   : > { %1135 = vmatpush3.bf16.msra.mxu1 %v1257_v11  ;;  %1116 = vmatprep.subr.bf16.mxu0 %v1258_v14 }
  0x2b   : > { %1136 = vmatprep.subr.bf16.mxu1 %v1259_v15 }
  0x2d   : > { %1117 = vmatpush3.bf16.msra.mxu0 %v1258_v14  ;;  %v1036_v14 = vld [vmem:[%s1654_s2 + $0x2] ss:$0 sm:$0xff] }
  0x2e   : > { %1137 = vmatpush3.bf16.msra.mxu1 %v1259_v15  ;;  %1118 = vmatprep.subr.bf16.mxu0 %v1260_v16 }
  0x2f   : > { %1138 = vmatprep.subr.bf16.mxu1 %v1261_v17 }
  0x31   : > { %1119 = vmatpush3.bf16.msra.mxu0 %v1260_v16 }
  0x32   : > { %1139 = vmatpush3.bf16.msra.mxu1 %v1261_v17  ;;  %1144 = vmatprep.subr.bf16.mxu0 %v1266_v19 }
  0x33   : > { %1164 = vmatprep.subr.bf16.mxu1 %v1354_v31 }
  0x34   : > { %1121 = vmatmul.mubr.bf16.vlgmr.msra.gmra.mxu0 %v1264_v18 }
  0x35   : > { %1141 = vmatmul.mubr.bf16.vlgmr.msra.gmra.mxu1 %v1265_v20  ;;  %1145 = vmatpush3.bf16.msra.mxu0 %v1266_v19 }
  0x36   : > { %1146 = vmatprep.subr.bf16.mxu0 %v1267_v21  ;;  %1160 = vmatprep.mubr.bf16.mxu0 %v1274_v22 }
  0x37   : > { %1165 = vmatpush3.bf16.msra.mxu1 %v1276_v30  ;;  %1180 = vmatprep.mubr.msk.bf16.mxu1 %vm1355_vm0, %v1354_v31 }
  0x38   : > { %1166 = vmatprep.subr.bf16.mxu1 %v1354_v31 }
  0x39   : > { %1147 = vmatpush3.bf16.msra.mxu0 %v1267_v21 }
  0x3a   : > { %1148 = vmatprep.subr.bf16.mxu0 %v1268_v23 }
  0x3b   : > { %1167 = vmatpush3.bf16.msra.mxu1 %v1277_v32 }
  0x3c   : > { %1168 = vmatprep.subr.bf16.mxu1 %v1354_v31 }
  0x3d   : > { %1149 = vmatpush3.bf16.msra.mxu0 %v1268_v23 }
  0x3e   : > { %1150 = vmatprep.subr.bf16.mxu0 %v1269_v24 }
  0x3f   : > { %1169 = vmatpush3.bf16.msra.mxu1 %v1278_v33 }
  0x40   : > { %1170 = vmatprep.subr.bf16.mxu1 %v1354_v31 }
  0x41   : > { %1151 = vmatpush3.bf16.msra.mxu0 %v1269_v24  ;;  %v1290_v24 = vld [vmem:[%s1656_s4 + $0x8] sm:$0xff]  }
  0x42   : > { %1152 = vmatprep.subr.bf16.mxu0 %v1270_v25 }
  0x43   : > { %1171 = vmatpush3.bf16.msra.mxu1 %v1279_v34 }
  0x44   : > { %1172 = vmatprep.subr.bf16.mxu1 %v1354_v31 }
  0x45   : > { %1153 = vmatpush3.bf16.msra.mxu0 %v1270_v25  ;;  %v1291_v25 = vld [vmem:[%s1656_s4] sm:$0xff]  }
  0x46   : > { %1154 = vmatprep.subr.bf16.mxu0 %v1271_v26 }
  0x47   : > { %1173 = vmatpush3.bf16.msra.mxu1 %v1280_v35 }
  0x48   : > { %1174 = vmatprep.subr.bf16.mxu1 %v1354_v31 }
  0x49   : > { %1155 = vmatpush3.bf16.msra.mxu0 %v1271_v26  ;;  %v702_v26 = vld [vmem:[%s1657_s5] sm:$0x1] }
  0x4a   : > { %1156 = vmatprep.subr.bf16.mxu0 %v1272_v27 }
  0x4b   : > { %1175 = vmatpush3.bf16.msra.mxu1 %v1281_v36 }
  0x4c   : > { %1176 = vmatprep.subr.bf16.mxu1 %v1354_v31 }
  0x4d   : > { %1157 = vmatpush3.bf16.msra.mxu0 %v1272_v27 }
  0x4e   : > { %1158 = vmatprep.subr.bf16.mxu0 %v1273_v28 }
  0x4f   : > { %1177 = vmatpush3.bf16.msra.mxu1 %v1282_v37 }
  0x50   : > { %1178 = vmatprep.subr.bf16.mxu1 %v1354_v31 }
  0x51   : > { %1159 = vmatpush3.bf16.msra.mxu0 %v1273_v28 }
  0x52   : > { %1184 = vmatprep.subr.bf16.mxu0 %v1354_v31 }
  0x53   : > { %1179 = vmatpush3.bf16.msra.mxu1 %v1283_v38 }
  0x54   : > { %1161 = vmatmul.mubr.bf16.vlgmr.msra.gmra.mxu0 %v1275_v29 }
  0x55   : > { %1200 = vmatprep.mubr.msk.bf16.mxu0 %vm1355_vm0, %v1354_v31  ;;  %1185 = vmatpush3.bf16.msra.mxu0 %v1284_v39 }
  0x56   : > { %1186 = vmatprep.subr.bf16.mxu0 %v1354_v31 }
  0x59   : > { %1187 = vmatpush3.bf16.msra.mxu0 %v1285_v40 }
  0x5a   : > { %1188 = vmatprep.subr.bf16.mxu0 %v1354_v31 }
  0x5d   : > { %1189 = vmatpush3.bf16.msra.mxu0 %v1286_v41 }
  0x5e   : > { %1190 = vmatprep.subr.bf16.mxu0 %v1354_v31 }
  0x61   : > { %1191 = vmatpush3.bf16.msra.mxu0 %v1287_v42 }
  0x62   : > { %1192 = vmatprep.subr.bf16.mxu0 %v1354_v31 }
  0x65   : > { %1193 = vmatpush3.bf16.msra.mxu0 %v1288_v43 }
  0x66   : > { %1194 = vmatprep.subr.bf16.mxu0 %v1354_v31 }
  0x69   : > { %1195 = vmatpush3.bf16.msra.mxu0 %v1289_v44 }
  0x6a   : > { %1196 = vmatprep.subr.bf16.mxu0 %v1354_v31 }
  0x6d   : > { %1197 = vmatpush3.bf16.msra.mxu0 %v1290_v24 }
  0x6e   : > { %1198 = vmatprep.subr.bf16.mxu0 %v1354_v31  ;;  %v809_v31 = vld [vmem:[%s1657_s5 + $0x1] sm:$0x1] }
  0x71   : > { %1199 = vmatpush3.bf16.msra.mxu0 %v1291_v25 }
  0xf4   : > { %v1122_v45 = vpop.f32.mrf.mxu0 }
  0xf5   : > { %v1142_v46 = vpop.f32.mrf.mxu1 }
  0xf6   : > { %v385_v47 = vpop.f32.mrf.mxu0  ;;  %v503_v52 = vadd.f32 %v1142_v46, %v1122_v45 }
  0xf7   : > { %v494_v48 = vpop.f32.mrf.mxu1 }
  0xf8   : > { %v1123_v49 = vpop.f32.mrf.mxu0  ;;  %v495_v55 = vadd.f32 %v494_v48, %v385_v47 }
  0xf9   : > { %v1143_v50 = vpop.f32.mrf.mxu1 }
  0xfa   : > { %v388_v51 = vpop.f32.mrf.mxu0  ;;  %v506_v59 = vadd.f32 %v1143_v50, %v1123_v49 }
  0xfb   : > { %v497_v57 = vpop.f32.mrf.mxu1 }
  0xfc   : > { %v498_v63 = vadd.f32 %v497_v57, %v388_v51 }
 0x114   : > { %v1162_v53 = vpop.f32.mrf.mxu0 }
 0x115   : > { %v641_v56 = vadd.f32 %v1162_v53, %v503_v52 }
 0x116   : > { %v624_v58 = vpop.f32.mrf.mxu0 }
 0x117   : > { %v674_v60 = vadd.f32 %v1034_v54, %v641_v56  ;;  %v639_v61 = vadd.f32 %v624_v58, %v495_v55 }
 0x118   : > { %v1163_v62 = vpop.f32.mrf.mxu0 }
 0x119   : > { %v655_v0 = vadd.f32 %v1034_v54, %v639_v61  ;;  %v642_v1 = vadd.f32 %v1163_v62, %v506_v59  ;;  %v675_v3 = vmax.f32 %v674_v60, 0.0 }
 0x11a   : > { %v627_v2 = vpop.f32.mrf.mxu0 }
 0x11b   : > { %v656_v4 = vmax.f32 %v655_v0, 0.0  ;;  %v679_v5 = vadd.f32 %v1034_v54, %v642_v1  ;;  %v640_v6 = vadd.f32 %v627_v2, %v498_v63  ;;  %v676_v10 = vmul.f32 %v1035_v7, %v675_v3 }
 0x11d   : > { %v680_v8 = vmax.f32 %v679_v5, 0.0  ;;  %v668_v9 = vadd.f32 %v1034_v54, %v640_v6  ;;  %v661_v11 = vmul.f32 %v1035_v7, %v656_v4  ;;  %v677_v17 = vadd.f32 %v1036_v14, %v676_v10 }
 0x11f   : > { %v681_v12 = vmul.f32 %v1035_v7, %v680_v8  ;;  %v669_v13 = vmax.f32 %v668_v9, 0.0  ;;  %v666_v18 = vadd.f32 %v1036_v14, %v661_v11 }
 0x121   : > { %v682_v15 = vadd.f32 %v1036_v14, %v681_v12  ;;  %v670_v16 = vmul.f32 %v1035_v7, %v669_v13 }
 0x123   : > { %v671_v19 = vadd.f32 %v1036_v14, %v670_v16  ;;  %v683_v20 = vmax.f32 %v677_v17, %v682_v15 }
 0x125   : > { %v672_v21 = vmax.f32 %v666_v18, %v671_v19 }
 0x127   : > { %v684_v22 = vmax.f32 %v672_v21, %v683_v20 }
 0x129   : > { %v685_v23 = vpack.c.bf16 %v684_v22, %v684_v22 }
 0x12b   : > { %1181 = vmatmul.mubr.bf16.vlgmr.msra.gmra.mxu1 %v685_v23 }
 0x1eb   : > { %v785_v27 = vpop.f32.mrf.mxu1 }
 0x1ec   : > { %v786_v28 = vadd.f32 %v785_v27, %v702_v26 }
 0x1ed   : > { %v1182_v29 = vpop.f32.mrf.mxu1 }
 0x1ee   : > { %v791_v30 = vmax.f32 %v786_v28, 0.0 }
 0x1ef   : > { %v788_v32 = vpop.f32.mrf.mxu1 }
 0x1f0   : > { %v792_v33 = vpack.c.bf16 %v791_v30, %v791_v30 }
 0x1f1   : > { %v1183_v34 = vpop.f32.mrf.mxu1 }
 0x1f2   : > { %1201 = vmatmul.mubr.bf16.vlgmr.msra.gmra.mxu0 %v792_v33 }
 0x2b2   : > { %v892_v35 = vpop.f32.mrf.mxu0 }
 0x2b3   : > { %v893_v36 = vadd.f32 %v892_v35, %v809_v31 }
 0x2b4   : > { %v1202_v37 = vpop.f32.mrf.mxu0 }
 0x2b5   : > { %898 = vst [vmem:[%s243_s17] sm:$0x1] %v893_v36 }
 0x2b6   : > { %v895_v38 = vpop.f32.mrf.mxu0 }
 0x2b7   : > { %1305 = shalt.err (!%p1302_p3)
}
 0x2b8   : > { %s1306_s11 = scalar_lea.hbm %s1611_s28, 16  ;;  %s1310_s14 = scalar_lea.hbm %s1658_s6, 32 }
 0x2b9   : > { %p1307_p4 = scmp.ne.s32.totalorder %s1611_s28, %s1306_s11  ;;  %p1311_p9 = scmp.lt.s32.totalorder %s1611_s28, %s1658_s6 }
 0x2ba   : > { %p1312_p10 = scmp.lt.s32.totalorder %s1310_s14, %s1306_s11 }
 0x2bb   : > { %p1308_p7 = pnand %p1307_p4, %p1430_p5 }
 0x2bc   : > { %p1313_p11 = por %p1312_p10, %p1311_p9 }
 0x2bd   : > { %p1309_p8 = pneg %p1308_p7 }
 0x2bf   : > { %p1314_p12 = pnand %p1313_p11, %p1309_p8 }
 0x2c1   : > { %1317 = shalt.err (!%p1314_p12)
}
 0x2c2   : > { %1205 = dma.vmem_to_hbm [thread:$0]  (%p1430_p5), %s1613_s19, 16, %s1611_s28, %s900_s18   ;;  %v1203_v39 = vpop.f32.mrf.mxu0 }
 0x2c3 PF: > { %p1211_p13 = scmp.ge.s32.totalorder %s1352_s24, 2  ;;  %s924_s17 = sand.u32 1, %s1340_s21  }
 0x2c4   : > { %s925_s20 = scalar_lea.sflag [#allocation4], %s924_s17 }
 0x2c5   : > { %p1208_p0 = pnand %p1211_p13, %p1434_p6 }
 0x2c7   : > { %p1209_p1 = pneg %p1208_p0 }
 0x2c9   : > { %1335 = dma.done.wait (%p1209_p1), %s925_s20, 16  }
 0x2ca   : > { %1337 = vsyncadd (%p1209_p1), %s925_s20, 4294967280  ;;  %p16_p2 = scmp.ge.s32.totalorder %s1417_s27, 4   ;;  %s1661_s21 = smov %s1344_s22 }
 0x2cb   : > { %s1662_s22 = smov %s1348_s23  ;;  %s1663_s23 = smov %s1428_s30 }
 0x2cc   : > { %s1664_s24 = smov %s1417_s27  ;;  %18 = sbr.rel (!%p16_p2) target bundleno = 3 (0x3), region = 81 }
 0x2d1   :  { %929 = vsyncpa [#allocation4], 1 }
 0x2d2   :  { %931 = vsyncpa [#allocation4 + $0x1], 1 }

// kernel: cnn_forward.3
= control target key start
LH: loop header
LB: loop body
LE: loop exit
PB: predicated region body
PF: predicated region fallthrough
CT: control target
= control target key end

     0   :  { %s14806_s12 = smov 0   ;;  %s17916_s0 = inlined_call_operand.vmem [shape: bf16[2,2112,128], index: 0, kind: input, shape index: {}]   ;;  %s17917_s1 = inlined_call_operand.vmem [shape: bf16[7,128,128], index: 1, kind: input, shape index: {}]   ;;  %s17918_s2 = inlined_call_operand.vmem [shape: f32[3,128], index: 2, kind: input, shape index: {}]   ;;  %s17919_s3 = inlined_call_operand.vmem [shape: f32[2,240,128], index: 3, kind: output, shape index: {}]  }
   0x1 LB: > { %s11124_s13 = sadd.s32 4294967295, %s14784_s12   ;;  %p11128_p0 = scmp.ge.s32.totalorder %s14784_s12, 1  ;;  %s14784_s12 = sphi %s14806_s12, %s13_s12  }
   0x2   : > { %p137_p1 = scmp.lt.s32.totalorder %s14784_s12, 3 }
   0x4   : > { %p138_p2 = pnand %p11128_p0, %p137_p1 }
   0x6   : > { %141 = sbr.rel (%p138_p2) target bundleno = 1095 (0x447), region = 32 }
   0xb   : > { %v14122_v0 = vld [vmem:[%s17917_s1 + $0x78] sm:$0xff]   ;;  %p161_p3 = scmp.lt.s32.totalorder %s11124_s13, 1  ;;  %v14124_v2 = vld [vmem:[%s17917_s1 + $0x70] sm:$0xff]   ;;  %v14126_v4 = vld [vmem:[%s17917_s1 + $0x68] sm:$0xff]  }
   0xc   : > { %v14123_v1 = vld [vmem:[%s17917_s1 + $0x38] sm:$0xff]   ;;  %12808 = vmatprep.subr.bf16.mxu0 %v14122_v0  ;;  %v14125_v3 = vld [vmem:[%s17917_s1 + $0x30] sm:$0xff]   ;;  %v14127_v5 = vld [vmem:[%s17917_s1 + $0x28] sm:$0xff]  }
   0xd   : > { %12856 = vmatprep.subr.bf16.mxu1 %v14123_v1  ;;  %12809 = vmatpush3.bf16.msra.mxu0 %v14122_v0  ;;  %s18034_s13 = smov (!%p161_p3, %s11124_s13), 1  ;;  %v14128_v6 = vld [vmem:[%s17917_s1 + $0x60] sm:$0xff]   ;;  %v14130_v8 = vld [vmem:[%s17917_s1 + $0x58] sm:$0xff]   ;;  %v14132_v10 = vld [vmem:[%s17917_s1 + $0x50] sm:$0xff]  }
   0xe   : > { %12857 = vmatpush3.bf16.msra.mxu1 %v14123_v1  ;;  %12810 = vmatprep.subr.bf16.mxu0 %v14124_v2  ;;  %v14129_v7 = vld [vmem:[%s17917_s1 + $0x20] sm:$0xff]   ;;  %s14112_s30 = smul.u32 1056, %s18034_s13  ;;  %v14131_v9 = vld [vmem:[%s17917_s1 + $0x18] sm:$0xff]   ;;  %v14133_v11 = vld [vmem:[%s17917_s1 + $0x10] sm:$0xff]  }
   0xf   : > { %12858 = vmatprep.subr.bf16.mxu1 %v14125_v3  ;;  %v14134_v14 = vld [vmem:[%s17917_s1 + $0x48] sm:$0xff]   ;;  %v14136_v16 = vld [vmem:[%s17917_s1 + $0x40] sm:$0xff]   ;;  %v14142_v19 = vld [vmem:[%s17917_s1 + $0xb8] sm:$0xff]   ;;  %s14113_s27 = smul.u32 240, %s18034_s13 }
  0x10   : > { %s14850_s10 = scalar_lea.vmem %s17916_s0, %s14112_s30  ;;  %v14135_v15 = vld [vmem:[%s17917_s1 + $0x8] sm:$0xff]   ;;  %v14137_v17 = vld [vmem:[%s17917_s1] sm:$0xff]   ;;  %v14143_v20 = vld [vmem:[%s17917_s1 + $0xf8] sm:$0xff]  }
  0x11   : > { %12811 = vmatpush3.bf16.msra.mxu0 %v14124_v2  ;;  %v14138_v12 = vld [vmem:[%s14850_s10 + $0x210] sm:$0xff]   ;;  %v14139_v13 = vld [vmem:[%s14850_s10] sm:$0xff]   ;;  %v14140_v18 = vld [vmem:[%s14850_s10 + $0x218] sm:$0xff]   ;;  %s15804_s9 = scalar_lea.vmem %s17919_s3, %s14113_s27 }
  0x12   : > { %12859 = vmatpush3.bf16.msra.mxu1 %v14125_v3  ;;  %12812 = vmatprep.subr.bf16.mxu0 %v14126_v4  ;;  %v14141_v21 = vld [vmem:[%s14850_s10 + $0x8] sm:$0xff]   ;;  %v14144_v22 = vld [vmem:[%s14850_s10 + $0x220] sm:$0xff]   ;;  %v14145_v23 = vld [vmem:[%s14850_s10 + $0x10] sm:$0xff]  }
  0x13   : > { %12860 = vmatprep.subr.bf16.mxu1 %v14127_v5  ;;  %12824 = vmatprep.mubr.bf16.mxu0 %v14138_v12  ;;  %v14148_v24 = vld [vmem:[%s17917_s1 + $0xb0] sm:$0xff]   ;;  %v14146_v26 = vld [vmem:[%s14850_s10 + $0x228] sm:$0xff]   ;;  %v14147_v29 = vld [vmem:[%s14850_s10 + $0x18] sm:$0xff]  }
  0x14   : > { %12872 = vmatprep.mubr.bf16.mxu1 %v14139_v13  ;;  %v14149_v25 = vld [vmem:[%s17917_s1 + $0xf0] sm:$0xff]   ;;  %v14154_v27 = vld [vmem:[%s17917_s1 + $0xa8] sm:$0xff]   ;;  %v14151_v31 = vld [vmem:[%s14850_s10 + $0x20] sm:$0xff]  }
  0x15   : > { %12813 = vmatpush3.bf16.msra.mxu0 %v14126_v4  ;;  %v14155_v28 = vld [vmem:[%s17917_s1 + $0xe8] sm:$0xff]   ;;  %v14150_v30 = vld [vmem:[%s14850_s10 + $0x230] sm:$0xff]   ;;  %v14160_v32 = vld [vmem:[%s17917_s1 + $0xa0] sm:$0xff]  }
  0x16   : > { %12861 = vmatpush3.bf16.msra.mxu1 %v14127_v5  ;;  %12814 = vmatprep.subr.bf16.mxu0 %v14128_v6  ;;  %v14161_v33 = vld [vmem:[%s17917_s1 + $0xe0] sm:$0xff]   ;;  %v14152_v34 = vld [vmem:[%s14850_s10 + $0x238] sm:$0xff]   ;;  %v14153_v35 = vld [vmem:[%s14850_s10 + $0x28] sm:$0xff]  }
  0x17   : > { %12862 = vmatprep.subr.bf16.mxu1 %v14129_v7  ;;  %v14166_v36 = vld [vmem:[%s17917_s1 + $0x98] sm:$0xff]   ;;  %v14156_v38 = vld [vmem:[%s14850_s10 + $0x240] sm:$0xff]   ;;  %v14157_v39 = vld [vmem:[%s14850_s10 + $0x30] sm:$0xff]  }
  0x18   : > { %v14167_v37 = vld [vmem:[%s17917_s1 + $0xd8] sm:$0xff]   ;;  %v14172_v40 = vld [vmem:[%s17917_s1 + $0x90] sm:$0xff]   ;;  %v14158_v42 = vld [vmem:[%s14850_s10 + $0x248] sm:$0xff]  }
  0x19   : > { %12815 = vmatpush3.bf16.msra.mxu0 %v14128_v6  ;;  %v14173_v41 = vld [vmem:[%s17917_s1 + $0xd0] sm:$0xff]   ;;  %v14159_v43 = vld [vmem:[%s14850_s10 + $0x38] sm:$0xff]   ;;  %v14163_v45 = vld [vmem:[%s14850_s10 + $0x40] sm:$0xff]  }
  0x1a   : > { %12863 = vmatpush3.bf16.msra.mxu1 %v14129_v7  ;;  %12816 = vmatprep.subr.bf16.mxu0 %v14130_v8  ;;  %v14162_v44 = vld [vmem:[%s14850_s10 + $0x250] sm:$0xff]   ;;  %v14178_v46 = vld [vmem:[%s17917_s1 + $0x88] sm:$0xff]   ;;  %v14164_v48 = vld [vmem:[%s14850_s10 + $0x258] sm:$0xff]  }
  0x1b   : > { %12864 = vmatprep.subr.bf16.mxu1 %v14131_v9  ;;  %v14179_v47 = vld [vmem:[%s17917_s1 + $0xc8] sm:$0xff]   ;;  %v14168_v50 = vld [vmem:[%s14850_s10 + $0x260] sm:$0xff]   ;;  %v14169_v53 = vld [vmem:[%s14850_s10 + $0x50] sm:$0xff]  }
  0x1c   : > { %v14165_v49 = vld [vmem:[%s14850_s10 + $0x48] sm:$0xff]   ;;  %v14184_v51 = vld [vmem:[%s17917_s1 + $0x80] sm:$0xff]   ;;  %v14190_v55 = vld [vmem:[%s17917_s1 + $0x138] sm:$0xff]  }
  0x1d   : > { %12817 = vmatpush3.bf16.msra.mxu0 %v14130_v8  ;;  %v14185_v52 = vld [vmem:[%s17917_s1 + $0xc0] sm:$0xff]   ;;  %v14170_v54 = vld [vmem:[%s14850_s10 + $0x268] sm:$0xff]   ;;  %v14191_v56 = vld [vmem:[%s17917_s1 + $0x178] sm:$0xff]  }
  0x1e   : > { %12865 = vmatpush3.bf16.msra.mxu1 %v14131_v9  ;;  %12818 = vmatprep.subr.bf16.mxu0 %v14132_v10  ;;  %v14171_v57 = vld [vmem:[%s14850_s10 + $0x58] sm:$0xff]   ;;  %v14174_v58 = vld [vmem:[%s14850_s10 + $0x270] sm:$0xff]   ;;  %v14175_v59 = vld [vmem:[%s14850_s10 + $0x60] sm:$0xff]  }
  0x1f   : > { %12866 = vmatprep.subr.bf16.mxu1 %v14133_v11  ;;  %v14176_v60 = vld [vmem:[%s14850_s10 + $0x278] sm:$0xff]   ;;  %v14177_v61 = vld [vmem:[%s14850_s10 + $0x68] sm:$0xff]   ;;  %v14180_v62 = vld [vmem:[%s14850_s10 + $0x280] sm:$0xff]  }
  0x20   : > { %v14181_v63 = vld [vmem:[%s14850_s10 + $0x70] sm:$0xff]   ;;  %v14182_v0 = vld [vmem:[%s14850_s10 + $0x288] sm:$0xff]   ;;  %v14183_v1 = vld [vmem:[%s14850_s10 + $0x78] sm:$0xff]  }
  0x21   : > { %12819 = vmatpush3.bf16.msra.mxu0 %v14132_v10  ;;  %v14186_v2 = vld [vmem:[%s14850_s10 + $0x10] sm:$0xff]   ;;  %v14187_v3 = vld [vmem:[%s14850_s10 + $0x220] sm:$0xff]   ;;  %v14188_v4 = vld [vmem:[%s14850_s10 + $0x18] sm:$0xff]  }
  0x22   : > { %12867 = vmatpush3.bf16.msra.mxu1 %v14133_v11  ;;  %12820 = vmatprep.subr.bf16.mxu0 %v14134_v14  ;;  %v14189_v5 = vld [vmem:[%s14850_s10 + $0x228] sm:$0xff]   ;;  %v14192_v6 = vld [vmem:[%s14850_s10 + $0x20] sm:$0xff]   ;;  %v14193_v7 = vld [vmem:[%s14850_s10 + $0x230] sm:$0xff]  }
  0x23   : > { %12868 = vmatprep.subr.bf16.mxu1 %v14135_v15  ;;  %v14196_v8 = vld [vmem:[%s17917_s1 + $0x130] sm:$0xff]   ;;  %v14194_v10 = vld [vmem:[%s14850_s10 + $0x28] sm:$0xff]   ;;  %v14195_v13 = vld [vmem:[%s14850_s10 + $0x238] sm:$0xff]  }
  0x24   : > { %v14197_v9 = vld [vmem:[%s17917_s1 + $0x170] sm:$0xff]   ;;  %v14202_v11 = vld [vmem:[%s17917_s1 + $0x128] sm:$0xff]  }
  0x25   : > { %12821 = vmatpush3.bf16.msra.mxu0 %v14134_v14  ;;  %v14203_v12 = vld [vmem:[%s17917_s1 + $0x168] sm:$0xff]   ;;  %v14198_v14 = vld [vmem:[%s14850_s10 + $0x30] sm:$0xff]  }
  0x26   : > { %12869 = vmatpush3.bf16.msra.mxu1 %v14135_v15  ;;  %12822 = vmatprep.subr.bf16.mxu0 %v14136_v16  ;;  %v14199_v15 = vld [vmem:[%s14850_s10 + $0x240] sm:$0xff]  }
  0x27   : > { %12870 = vmatprep.subr.bf16.mxu1 %v14137_v17 }
  0x29   : > { %12823 = vmatpush3.bf16.msra.mxu0 %v14136_v16  ;;  %v14208_v16 = vld [vmem:[%s17917_s1 + $0x120] sm:$0xff]  }
  0x2a   : > { %12871 = vmatpush3.bf16.msra.mxu1 %v14137_v17  ;;  %12904 = vmatprep.subr.bf16.mxu0 %v14142_v19  ;;  %v14209_v17 = vld [vmem:[%s17917_s1 + $0x160] sm:$0xff]  }
  0x2b   : > { %12952 = vmatprep.subr.bf16.mxu1 %v14143_v20 }
  0x2c   : > { %12825 = vmatmul.mubr.bf16.vlgmr.msra.gmra.mxu0 %v14140_v18  ;;  %v14200_v18 = vld [vmem:[%s14850_s10 + $0x38] sm:$0xff]  }
  0x2d   : > { %12873 = vmatmul.mubr.bf16.vlgmr.msra.gmra.mxu1 %v14141_v21  ;;  %12905 = vmatpush3.bf16.msra.mxu0 %v14142_v19  ;;  %v14201_v19 = vld [vmem:[%s14850_s10 + $0x248] sm:$0xff]   ;;  %v14215_v21 = vld [vmem:[%s17917_s1 + $0x158] sm:$0xff]  }
  0x2e   : > { %12953 = vmatpush3.bf16.msra.mxu1 %v14143_v20  ;;  %12828 = vmatprep.mubr.bf16.mxu0 %v14144_v22  ;;  %v14214_v20 = vld [vmem:[%s17917_s1 + $0x118] sm:$0xff]   ;;  %v14204_v22 = vld [vmem:[%s14850_s10 + $0x40] sm:$0xff]  }
  0x2f   : > { %12876 = vmatprep.mubr.bf16.mxu1 %v14145_v23  ;;  %12906 = vmatprep.subr.bf16.mxu0 %v14148_v24  ;;  %v14205_v23 = vld [vmem:[%s14850_s10 + $0x250] sm:$0xff]  }
  0x30   : > { %12954 = vmatprep.subr.bf16.mxu1 %v14149_v25 }
  0x31   : > { %12907 = vmatpush3.bf16.msra.mxu0 %v14148_v24  ;;  %v14220_v24 = vld [vmem:[%s17917_s1 + $0x110] sm:$0xff]  }
  0x32   : > { %12955 = vmatpush3.bf16.msra.mxu1 %v14149_v25  ;;  %12908 = vmatprep.subr.bf16.mxu0 %v14154_v27  ;;  %v14221_v25 = vld [vmem:[%s17917_s1 + $0x150] sm:$0xff]  }
  0x33   : > { %12956 = vmatprep.subr.bf16.mxu1 %v14155_v28 }
  0x34   : > { %12829 = vmatmul.mubr.bf16.gmra.mxu0 %v14146_v26  ;;  %v14206_v26 = vld [vmem:[%s14850_s10 + $0x48] sm:$0xff]  }
  0x35   : > { %12877 = vmatmul.mubr.bf16.gmra.mxu1 %v14147_v29  ;;  %12832 = vmatprep.mubr.bf16.mxu0 %v14150_v30  ;;  %v14227_v29 = vld [vmem:[%s17917_s1 + $0x148] sm:$0xff]   ;;  %v14210_v30 = vld [vmem:[%s14850_s10 + $0x50] sm:$0xff]  }
  0x36   : > { %12880 = vmatprep.mubr.bf16.mxu1 %v14151_v31  ;;  %12909 = vmatpush3.bf16.msra.mxu0 %v14154_v27  ;;  %v14207_v27 = vld [vmem:[%s14850_s10 + $0x258] sm:$0xff]   ;;  %v14211_v31 = vld [vmem:[%s14850_s10 + $0x260] sm:$0xff]  }
  0x37   : > { %12957 = vmatpush3.bf16.msra.mxu1 %v14155_v28  ;;  %12910 = vmatprep.subr.bf16.mxu0 %v14160_v32  ;;  %v14226_v28 = vld [vmem:[%s17917_s1 + $0x108] sm:$0xff]  }
  0x38   : > { %12958 = vmatprep.subr.bf16.mxu1 %v14161_v33 }
  0x3a   : > { %12911 = vmatpush3.bf16.msra.mxu0 %v14160_v32  ;;  %v14232_v32 = vld [vmem:[%s17917_s1 + $0x100] sm:$0xff]  }
  0x3b   : > { %12959 = vmatpush3.bf16.msra.mxu1 %v14161_v33  ;;  %12912 = vmatprep.subr.bf16.mxu0 %v14166_v36  ;;  %v14233_v33 = vld [vmem:[%s17917_s1 + $0x140] sm:$0xff]  }
  0x3c   : > { %12833 = vmatmul.mubr.bf16.gmra.mxu0 %v14152_v34  ;;  %12960 = vmatprep.subr.bf16.mxu1 %v14167_v37  ;;  %v14212_v34 = vld [vmem:[%s14850_s10 + $0x58] sm:$0xff]  }
  0x3d   : > { %12881 = vmatmul.mubr.bf16.gmra.mxu1 %v14153_v35  ;;  %12836 = vmatprep.mubr.bf16.mxu0 %v14156_v38  ;;  %v14213_v35 = vld [vmem:[%s14850_s10 + $0x268] sm:$0xff]   ;;  %v14216_v38 = vld [vmem:[%s14850_s10 + $0x60] sm:$0xff]  }
  0x3e   : > { %12884 = vmatprep.mubr.bf16.mxu1 %v14157_v39  ;;  %12913 = vmatpush3.bf16.msra.mxu0 %v14166_v36  ;;  %v14238_v36 = vld [vmem:[%s17917_s1 + $0x1b8] sm:$0xff]   ;;  %v14217_v39 = vld [vmem:[%s14850_s10 + $0x270] sm:$0xff]  }
  0x3f   : > { %12961 = vmatpush3.bf16.msra.mxu1 %v14167_v37  ;;  %12914 = vmatprep.subr.bf16.mxu0 %v14172_v40  ;;  %v14239_v37 = vld [vmem:[%s17917_s1 + $0x78] sm:$0xff]  }
  0x40   : > { %12962 = vmatprep.subr.bf16.mxu1 %v14173_v41 }
  0x42   : > { %12915 = vmatpush3.bf16.msra.mxu0 %v14172_v40  ;;  %v14218_v40 = vld [vmem:[%s14850_s10 + $0x68] sm:$0xff]  }
  0x43   : > { %12963 = vmatpush3.bf16.msra.mxu1 %v14173_v41  ;;  %12916 = vmatprep.subr.bf16.mxu0 %v14178_v46  ;;  %v14219_v41 = vld [vmem:[%s14850_s10 + $0x278] sm:$0xff]  }
  0x44   : > { %12837 = vmatmul.mubr.bf16.gmra.mxu0 %v14158_v42  ;;  %12964 = vmatprep.subr.bf16.mxu1 %v14179_v47  ;;  %v14222_v42 = vld [vmem:[%s14850_s10 + $0x70] sm:$0xff]  }
  0x45   : > { %12885 = vmatmul.mubr.bf16.gmra.mxu1 %v14159_v43  ;;  %12840 = vmatprep.mubr.bf16.mxu0 %v14162_v44  ;;  %v14223_v43 = vld [vmem:[%s14850_s10 + $0x280] sm:$0xff]   ;;  %v14224_v44 = vld [vmem:[%s14850_s10 + $0x78] sm:$0xff]  }
  0x46   : > { %12888 = vmatprep.mubr.bf16.mxu1 %v14163_v45  ;;  %12917 = vmatpush3.bf16.msra.mxu0 %v14178_v46  ;;  %v14225_v45 = vld [vmem:[%s14850_s10 + $0x288] sm:$0xff]   ;;  %v14228_v46 = vld [vmem:[%s14850_s10 + $0x80] sm:$0xff]  }
  0x47   : > { %12965 = vmatpush3.bf16.msra.mxu1 %v14179_v47  ;;  %12918 = vmatprep.subr.bf16.mxu0 %v14184_v51  ;;  %v14229_v47 = vld [vmem:[%s14850_s10 + $0x290] sm:$0xff]  }
  0x48   : > { %12966 = vmatprep.subr.bf16.mxu1 %v14185_v52 }
  0x4a   : > { %12919 = vmatpush3.bf16.msra.mxu0 %v14184_v51  ;;  %v14235_v51 = vld [vmem:[%s14850_s10 + $0x230] sm:$0xff]  }
  0x4b   : > { %12967 = vmatpush3.bf16.msra.mxu1 %v14185_v52  ;;  %13000 = vmatprep.subr.bf16.mxu0 %v14190_v55  ;;  %v14236_v52 = vld [vmem:[%s14850_s10 + $0x28] sm:$0xff]  }
  0x4c   : > { %12841 = vmatmul.mubr.bf16.gmra.mxu0 %v14164_v48  ;;  %13048 = vmatprep.subr.bf16.mxu1 %v14191_v56  ;;  %v14230_v48 = vld [vmem:[%s14850_s10 + $0x88] sm:$0xff]  }
  0x4d   : > { %12889 = vmatmul.mubr.bf16.gmra.mxu1 %v14165_v49  ;;  %12844 = vmatprep.mubr.bf16.mxu0 %v14168_v50  ;;  %v14231_v49 = vld [vmem:[%s14850_s10 + $0x298] sm:$0xff]   ;;  %v14234_v50 = vld [vmem:[%s14850_s10 + $0x20] sm:$0xff]  }
  0x4e   : > { %12892 = vmatprep.mubr.bf16.mxu1 %v14169_v53  ;;  %v14237_v53 = vld [vmem:[%s14850_s10 + $0x238] sm:$0xff]  }
  0x54   : > { %12845 = vmatmul.mubr.bf16.gmra.mxu0 %v14170_v54  ;;  %v14240_v54 = vld [vmem:[%s14850_s10 + $0x30] sm:$0xff]  }
  0x55   : > { %12893 = vmatmul.mubr.bf16.gmra.mxu1 %v14171_v57  ;;  %12848 = vmatprep.mubr.bf16.mxu0 %v14174_v58  ;;  %v14245_v57 = vld [vmem:[%s17917_s1 + $0x70] sm:$0xff]   ;;  %v14242_v58 = vld [vmem:[%s14850_s10 + $0x38] sm:$0xff]  }
  0x56   : > { %12896 = vmatprep.mubr.bf16.mxu1 %v14175_v59  ;;  %v14250_v59 = vld [vmem:[%s17917_s1 + $0x1a8] sm:$0xff]  }
  0x5c   : > { %12849 = vmatmul.mubr.bf16.gmra.mxu0 %v14176_v60  ;;  %v14251_v60 = vld [vmem:[%s17917_s1 + $0x68] sm:$0xff]  }
  0x5d   : > { %12897 = vmatmul.mubr.bf16.gmra.mxu1 %v14177_v61  ;;  %12852 = vmatprep.mubr.bf16.mxu0 %v14180_v62  ;;  %v14243_v61 = vld [vmem:[%s14850_s10 + $0x248] sm:$0xff]   ;;  %v14246_v62 = vld [vmem:[%s14850_s10 + $0x40] sm:$0xff]  }
  0x5e   : > { %12900 = vmatprep.mubr.bf16.mxu1 %v14181_v63  ;;  %v14247_v63 = vld [vmem:[%s14850_s10 + $0x250] sm:$0xff]  }
  0x64   : > { %12853 = vmatmul.mubr.bf16.gmra.mxu0 %v14182_v0  ;;  %v14256_v0 = vld [vmem:[%s17917_s1 + $0x1a0] sm:$0xff]  }
  0x65   : > { %12901 = vmatmul.mubr.bf16.gmra.mxu1 %v14183_v1  ;;  %12920 = vmatprep.mubr.bf16.mxu0 %v14186_v2  ;;  %v14257_v1 = vld [vmem:[%s17917_s1 + $0x60] sm:$0xff]   ;;  %v14248_v2 = vld [vmem:[%s14850_s10 + $0x48] sm:$0xff]  }
  0x66   : > { %12968 = vmatprep.mubr.bf16.mxu1 %v14187_v3  ;;  %v14249_v3 = vld [vmem:[%s14850_s10 + $0x258] sm:$0xff]  }
  0x6c   : > { %12921 = vmatmul.mubr.bf16.vlgmr.msra.gmra.mxu0 %v14188_v4  ;;  %v14262_v4 = vld [vmem:[%s17917_s1 + $0x198] sm:$0xff]  }
  0x6d   : > { %12969 = vmatmul.mubr.bf16.vlgmr.msra.gmra.mxu1 %v14189_v5  ;;  %13001 = vmatpush3.bf16.msra.mxu0 %v14190_v55  ;;  %v14241_v55 = vld [vmem:[%s14850_s10 + $0x240] sm:$0xff]   ;;  %v14263_v5 = vld [vmem:[%s17917_s1 + $0x58] sm:$0xff]  }
  0x6e   : > { %13049 = vmatpush3.bf16.msra.mxu1 %v14191_v56  ;;  %12924 = vmatprep.mubr.bf16.mxu0 %v14192_v6  ;;  %v14244_v56 = vld [vmem:[%s17917_s1 + $0x1b0] sm:$0xff]  }
  0x6f   : > { %12972 = vmatprep.mubr.bf16.mxu1 %v14193_v7  ;;  %13002 = vmatprep.subr.bf16.mxu0 %v14196_v8  ;;  %v14252_v6 = vld [vmem:[%s14850_s10 + $0x50] sm:$0xff]   ;;  %v14253_v7 = vld [vmem:[%s14850_s10 + $0x260] sm:$0xff]  }
  0x70   : > { %13050 = vmatprep.subr.bf16.mxu1 %v14197_v9 }
  0x71   : > { %13003 = vmatpush3.bf16.msra.mxu0 %v14196_v8  ;;  %v14268_v8 = vld [vmem:[%s17917_s1 + $0x190] sm:$0xff]  }
  0x72   : > { %13051 = vmatpush3.bf16.msra.mxu1 %v14197_v9  ;;  %13004 = vmatprep.subr.bf16.mxu0 %v14202_v11  ;;  %v14269_v9 = vld [vmem:[%s17917_s1 + $0x50] sm:$0xff]  }
  0x73   : > { %13052 = vmatprep.subr.bf16.mxu1 %v14203_v12 }
  0x74   : > { %12925 = vmatmul.mubr.bf16.gmra.mxu0 %v14194_v10  ;;  %v14254_v10 = vld [vmem:[%s14850_s10 + $0x58] sm:$0xff]  }
  0x75   : > { %12973 = vmatmul.mubr.bf16.gmra.mxu1 %v14195_v13  ;;  %12928 = vmatprep.mubr.bf16.mxu0 %v14198_v14  ;;  %v14275_v13 = vld [vmem:[%s17917_s1 + $0x48] sm:$0xff]   ;;  %v14258_v14 = vld [vmem:[%s14850_s10 + $0x60] sm:$0xff]  }
  0x76   : > { %12976 = vmatprep.mubr.bf16.mxu1 %v14199_v15  ;;  %13005 = vmatpush3.bf16.msra.mxu0 %v14202_v11  ;;  %v14255_v11 = vld [vmem:[%s14850_s10 + $0x268] sm:$0xff]   ;;  %v14259_v15 = vld [vmem:[%s14850_s10 + $0x270] sm:$0xff]  }
  0x77   : > { %13053 = vmatpush3.bf16.msra.mxu1 %v14203_v12  ;;  %13006 = vmatprep.subr.bf16.mxu0 %v14208_v16  ;;  %v14274_v12 = vld [vmem:[%s17917_s1 + $0x188] sm:$0xff]  }
  0x78   : > { %13054 = vmatprep.subr.bf16.mxu1 %v14209_v17 }
  0x7a   : > { %13007 = vmatpush3.bf16.msra.mxu0 %v14208_v16  ;;  %v14280_v16 = vld [vmem:[%s17917_s1 + $0x180] sm:$0xff]  }
  0x7b   : > { %13055 = vmatpush3.bf16.msra.mxu1 %v14209_v17  ;;  %13008 = vmatprep.subr.bf16.mxu0 %v14214_v20  ;;  %v14281_v17 = vld [vmem:[%s17917_s1 + $0x40] sm:$0xff]  }
  0x7c   : > { %12929 = vmatmul.mubr.bf16.gmra.mxu0 %v14200_v18  ;;  %13056 = vmatprep.subr.bf16.mxu1 %v14215_v21  ;;  %v14260_v18 = vld [vmem:[%s14850_s10 + $0x68] sm:$0xff]  }
  0x7d   : > { %12977 = vmatmul.mubr.bf16.gmra.mxu1 %v14201_v19  ;;  %12932 = vmatprep.mubr.bf16.mxu0 %v14204_v22  ;;  %v14261_v19 = vld [vmem:[%s14850_s10 + $0x278] sm:$0xff]   ;;  %v14264_v22 = vld [vmem:[%s14850_s10 + $0x70] sm:$0xff]  }
  0x7e   : > { %12980 = vmatprep.mubr.bf16.mxu1 %v14205_v23  ;;  %13009 = vmatpush3.bf16.msra.mxu0 %v14214_v20  ;;  %v14286_v20 = vld [vmem:[%s17917_s1 + $0x38] sm:$0xff]   ;;  %v14265_v23 = vld [vmem:[%s14850_s10 + $0x280] sm:$0xff]  }
  0x7f   : > { %13057 = vmatpush3.bf16.msra.mxu1 %v14215_v21  ;;  %13010 = vmatprep.subr.bf16.mxu0 %v14220_v24  ;;  %v14287_v21 = vld [vmem:[%s17917_s1 + $0xb8] sm:$0xff]  }
  0x80   : > { %13058 = vmatprep.subr.bf16.mxu1 %v14221_v25 }
  0x82   : > { %13011 = vmatpush3.bf16.msra.mxu0 %v14220_v24  ;;  %v14266_v24 = vld [vmem:[%s14850_s10 + $0x78] sm:$0xff]  }
  0x83   : > { %13059 = vmatpush3.bf16.msra.mxu1 %v14221_v25  ;;  %13012 = vmatprep.subr.bf16.mxu0 %v14226_v28  ;;  %v14267_v25 = vld [vmem:[%s14850_s10 + $0x288] sm:$0xff]  }
  0x84   : > { %12933 = vmatmul.mubr.bf16.gmra.mxu0 %v14206_v26  ;;  %13060 = vmatprep.subr.bf16.mxu1 %v14227_v29  ;;  %v14270_v26 = vld [vmem:[%s14850_s10 + $0x80] sm:$0xff]  }
  0x85   : > { %12981 = vmatmul.mubr.bf16.gmra.mxu1 %v14207_v27  ;;  %12936 = vmatprep.mubr.bf16.mxu0 %v14210_v30  ;;  %v14271_v27 = vld [vmem:[%s14850_s10 + $0x290] sm:$0xff]  }
  0x86   : > { %12984 = vmatprep.mubr.bf16.mxu1 %v14211_v31  ;;  %13013 = vmatpush3.bf16.msra.mxu0 %v14226_v28  ;;  %v14272_v28 = vld [vmem:[%s14850_s10 + $0x88] sm:$0xff]   ;;  %v14276_v30 = vld [vmem:[%s14850_s10 + $0x90] sm:$0xff]   ;;  %v14277_v31 = vld [vmem:[%s14850_s10 + $0x2a0] sm:$0xff]  }
  0x87   : > { %13061 = vmatpush3.bf16.msra.mxu1 %v14227_v29  ;;  %13014 = vmatprep.subr.bf16.mxu0 %v14232_v32  ;;  %v14273_v29 = vld [vmem:[%s14850_s10 + $0x298] sm:$0xff]  }
  0x88   : > { %13062 = vmatprep.subr.bf16.mxu1 %v14233_v33 }
  0x8a   : > { %13015 = vmatpush3.bf16.msra.mxu0 %v14232_v32  ;;  %v14278_v32 = vld [vmem:[%s14850_s10 + $0x98] sm:$0xff]  }
  0x8b   : > { %13063 = vmatpush3.bf16.msra.mxu1 %v14233_v33  ;;  %13096 = vmatprep.subr.bf16.mxu0 %v14238_v36  ;;  %v14279_v33 = vld [vmem:[%s14850_s10 + $0x2a8] sm:$0xff]  }
  0x8c   : > { %12937 = vmatmul.mubr.bf16.gmra.mxu0 %v14212_v34  ;;  %13144 = vmatprep.subr.bf16.mxu1 %v14239_v37  ;;  %v14282_v34 = vld [vmem:[%s14850_s10 + $0x30] sm:$0xff]  }
  0x8d   : > { %12985 = vmatmul.mubr.bf16.gmra.mxu1 %v14213_v35  ;;  %12940 = vmatprep.mubr.bf16.mxu0 %v14216_v38  ;;  %v14283_v35 = vld [vmem:[%s14850_s10 + $0x290] sm:$0xff]   ;;  %v14288_v38 = vld [vmem:[%s14850_s10 + $0x40] sm:$0xff]  }
  0x8e   : > { %12988 = vmatprep.mubr.bf16.mxu1 %v14217_v39  ;;  %v14289_v39 = vld [vmem:[%s14850_s10 + $0x2a0] sm:$0xff]  }
  0x94   : > { %12941 = vmatmul.mubr.bf16.gmra.mxu0 %v14218_v40  ;;  %v14292_v40 = vld [vmem:[%s17917_s1 + $0x30] sm:$0xff]  }
  0x95   : > { %12989 = vmatmul.mubr.bf16.gmra.mxu1 %v14219_v41  ;;  %12944 = vmatprep.mubr.bf16.mxu0 %v14222_v42  ;;  %v14293_v42 = vld [vmem:[%s17917_s1 + $0xb0] sm:$0xff]  }
  0x96   : > { %12992 = vmatprep.mubr.bf16.mxu1 %v14223_v43 }
  0x9c   : > { %12945 = vmatmul.mubr.bf16.gmra.mxu0 %v14224_v44 }
  0x9d   : > { %12993 = vmatmul.mubr.bf16.gmra.mxu1 %v14225_v45  ;;  %12948 = vmatprep.mubr.bf16.mxu0 %v14228_v46  ;;  %v14290_v46 = vld [vmem:[%s14850_s10 + $0x48] sm:$0xff]  }
  0x9e   : > { %12996 = vmatprep.mubr.bf16.mxu1 %v14229_v47  ;;  %v14298_v47 = vld [vmem:[%s17917_s1 + $0x28] sm:$0xff]  }
  0xa4   : > { %12949 = vmatmul.mubr.bf16.gmra.mxu0 %v14230_v48 }
  0xa5   : > { %12997 = vmatmul.mubr.bf16.gmra.mxu1 %v14231_v49  ;;  %13016 = vmatprep.mubr.bf16.mxu0 %v14234_v50  ;;  %v14299_v49 = vld [vmem:[%s17917_s1 + $0xa8] sm:$0xff]  }
  0xa6   : > { %13064 = vmatprep.mubr.bf16.mxu1 %v14235_v51 }
  0xac   : > { %13017 = vmatmul.mubr.bf16.vlgmr.msra.gmra.mxu0 %v14236_v52  ;;  %v14291_v52 = vld [vmem:[%s14850_s10 + $0x2a8] sm:$0xff]  }
  0xad   : > { %13065 = vmatmul.mubr.bf16.vlgmr.msra.gmra.mxu1 %v14237_v53  ;;  %13097 = vmatpush3.bf16.msra.mxu0 %v14238_v36  ;;  %v14284_v36 = vld [vmem:[%s14850_s10 + $0x38] sm:$0xff]  }
  0xae   : > { %13145 = vmatpush3.bf16.msra.mxu1 %v14239_v37  ;;  %13020 = vmatprep.mubr.bf16.mxu0 %v14240_v54  ;;  %v14285_v37 = vld [vmem:[%s14850_s10 + $0x298] sm:$0xff]   ;;  %v14294_v54 = vld [vmem:[%s14850_s10 + $0x50] sm:$0xff]  }
  0xaf   : > { %13068 = vmatprep.mubr.bf16.mxu1 %v14241_v55  ;;  %13098 = vmatprep.subr.bf16.mxu0 %v14244_v56 }
  0xb0   : > { %13146 = vmatprep.subr.bf16.mxu1 %v14245_v57 }
  0xb1   : > { %13099 = vmatpush3.bf16.msra.mxu0 %v14244_v56 }
  0xb2   : > { %13147 = vmatpush3.bf16.msra.mxu1 %v14245_v57  ;;  %13100 = vmatprep.subr.bf16.mxu0 %v14250_v59  ;;  %v14295_v57 = vld [vmem:[%s14850_s10 + $0x2b0] sm:$0xff]  }
  0xb3   : > { %13148 = vmatprep.subr.bf16.mxu1 %v14251_v60 }
  0xb4   : > { %13021 = vmatmul.mubr.bf16.gmra.mxu0 %v14242_v58 }
  0xb5   : > { %13069 = vmatmul.mubr.bf16.gmra.mxu1 %v14243_v61  ;;  %13024 = vmatprep.mubr.bf16.mxu0 %v14246_v62  ;;  %v14305_v62 = vld [vmem:[%s17917_s1 + $0xa0] sm:$0xff]  }
  0xb6   : > { %13072 = vmatprep.mubr.bf16.mxu1 %v14247_v63  ;;  %13101 = vmatpush3.bf16.msra.mxu0 %v14250_v59  ;;  %v14304_v59 = vld [vmem:[%s17917_s1 + $0x20] sm:$0xff]  }
  0xb7   : > { %13149 = vmatpush3.bf16.msra.mxu1 %v14251_v60  ;;  %13102 = vmatprep.subr.bf16.mxu0 %v14256_v0 }
  0xb8   : > { %13150 = vmatprep.subr.bf16.mxu1 %v14257_v1 }
  0xba   : > { %13103 = vmatpush3.bf16.msra.mxu0 %v14256_v0 }
  0xbb   : > { %13151 = vmatpush3.bf16.msra.mxu1 %v14257_v1  ;;  %13104 = vmatprep.subr.bf16.mxu0 %v14262_v4 }
  0xbc   : > { %13025 = vmatmul.mubr.bf16.gmra.mxu0 %v14248_v2  ;;  %13152 = vmatprep.subr.bf16.mxu1 %v14263_v5  ;;  %v14296_v2 = vld [vmem:[%s14850_s10 + $0x58] sm:$0xff]  }
  0xbd   : > { %13073 = vmatmul.mubr.bf16.gmra.mxu1 %v14249_v3  ;;  %13028 = vmatprep.mubr.bf16.mxu0 %v14252_v6 }
  0xbe   : > { %13076 = vmatprep.mubr.bf16.mxu1 %v14253_v7  ;;  %13105 = vmatpush3.bf16.msra.mxu0 %v14262_v4  ;;  %v14297_v4 = vld [vmem:[%s14850_s10 + $0x2b8] sm:$0xff]  }
  0xbf   : > { %13153 = vmatpush3.bf16.msra.mxu1 %v14263_v5  ;;  %13106 = vmatprep.subr.bf16.mxu0 %v14268_v8  ;;  %v14310_v5 = vld [vmem:[%s17917_s1 + $0x18] sm:$0xff]  }
  0xc0   : > { %13154 = vmatprep.subr.bf16.mxu1 %v14269_v9 }
  0xc2   : > { %13107 = vmatpush3.bf16.msra.mxu0 %v14268_v8  ;;  %v14311_v8 = vld [vmem:[%s17917_s1 + $0x98] sm:$0xff]  }
  0xc3   : > { %13155 = vmatpush3.bf16.msra.mxu1 %v14269_v9  ;;  %13108 = vmatprep.subr.bf16.mxu0 %v14274_v12 }
  0xc4   : > { %13029 = vmatmul.mubr.bf16.gmra.mxu0 %v14254_v10  ;;  %13156 = vmatprep.subr.bf16.mxu1 %v14275_v13  ;;  %v14300_v10 = vld [vmem:[%s14850_s10 + $0x60] sm:$0xff]  }
  0xc5   : > { %13077 = vmatmul.mubr.bf16.gmra.mxu1 %v14255_v11  ;;  %13032 = vmatprep.mubr.bf16.mxu0 %v14258_v14 }
  0xc6   : > { %13080 = vmatprep.mubr.bf16.mxu1 %v14259_v15  ;;  %13109 = vmatpush3.bf16.msra.mxu0 %v14274_v12  ;;  %v14316_v15 = vld [vmem:[%s17917_s1 + $0x10] sm:$0xff]  }
  0xc7   : > { %13157 = vmatpush3.bf16.msra.mxu1 %v14275_v13  ;;  %13110 = vmatprep.subr.bf16.mxu0 %v14280_v16  ;;  %v14301_v13 = vld [vmem:[%s14850_s10 + $0x2c0] sm:$0xff]  }
  0xc8   : > { %13158 = vmatprep.subr.bf16.mxu1 %v14281_v17 }
  0xca   : > { %13111 = vmatpush3.bf16.msra.mxu0 %v14280_v16 }
  0xcb   : > { %13159 = vmatpush3.bf16.msra.mxu1 %v14281_v17  ;;  %13192 = vmatprep.subr.bf16.mxu0 %v14286_v20 }
  0xcc   : > { %13033 = vmatmul.mubr.bf16.gmra.mxu0 %v14260_v18  ;;  %13240 = vmatprep.subr.bf16.mxu1 %v14287_v21  ;;  %v14317_v18 = vld [vmem:[%s17917_s1 + $0x90] sm:$0xff]  }
  0xcd   : > { %13081 = vmatmul.mubr.bf16.gmra.mxu1 %v14261_v19  ;;  %13036 = vmatprep.mubr.bf16.mxu0 %v14264_v22  ;;  %v14302_v22 = vld [vmem:[%s14850_s10 + $0x68] sm:$0xff]  }
  0xce   : > { %13084 = vmatprep.mubr.bf16.mxu1 %v14265_v23 }
  0xd4   : > { %13037 = vmatmul.mubr.bf16.gmra.mxu0 %v14266_v24  ;;  %v14303_v24 = vld [vmem:[%s14850_s10 + $0x2c8] sm:$0xff]  }
  0xd5   : > { %13085 = vmatmul.mubr.bf16.gmra.mxu1 %v14267_v25  ;;  %13040 = vmatprep.mubr.bf16.mxu0 %v14270_v26  ;;  %v14322_v25 = vld [vmem:[%s17917_s1 + $0x8] sm:$0xff]  }
  0xd6   : > { %13088 = vmatprep.mubr.bf16.mxu1 %v14271_v27 }
  0xdc   : > { %13041 = vmatmul.mubr.bf16.gmra.mxu0 %v14272_v28  ;;  %v14323_v28 = vld [vmem:[%s17917_s1 + $0x88] sm:$0xff]  }
  0xdd   : > { %13089 = vmatmul.mubr.bf16.gmra.mxu1 %v14273_v29  ;;  %13044 = vmatprep.mubr.bf16.mxu0 %v14276_v30  ;;  %v14306_v30 = vld [vmem:[%s14850_s10 + $0x70] sm:$0xff]  }
  0xde   : > { %13092 = vmatprep.mubr.bf16.mxu1 %v14277_v31 }
  0xe4   : > { %13045 = vmatmul.mubr.bf16.gmra.mxu0 %v14278_v32 }
  0xe5   : > { %13093 = vmatmul.mubr.bf16.gmra.mxu1 %v14279_v33  ;;  %13112 = vmatprep.mubr.bf16.mxu0 %v14282_v34  ;;  %v14307_v33 = vld [vmem:[%s14850_s10 + $0x2d0] sm:$0xff]  }
  0xe6   : > { %13160 = vmatprep.mubr.bf16.mxu1 %v14283_v35  ;;  %v14328_v35 = vld [vmem:[%s17917_s1] sm:$0xff]  }
  0xec   : > { %v12826_v41 = vpop.f32.mrf.mxu0  ;;  %13113 = vmatmul.mubr.bf16.vlgmr.msra.gmra.mxu0 %v14284_v36 }
  0xed   : > { %v12874_v43 = vpop.f32.mrf.mxu1  ;;  %13161 = vmatmul.mubr.bf16.vlgmr.msra.gmra.mxu1 %v14285_v37  ;;  %13193 = vmatpush3.bf16.msra.mxu0 %v14286_v20 }
  0xee   : > { %v15128_v44 = vadd.f32 %v12874_v43, %v12826_v41  ;;  %13241 = vmatpush3.bf16.msra.mxu1 %v14287_v21  ;;  %v447_v45 = vpop.f32.mrf.mxu0  ;;  %13116 = vmatprep.mubr.bf16.mxu0 %v14288_v38  ;;  %v14329_v38 = vld [vmem:[%s17917_s1 + $0x80] sm:$0xff]  }
  0xef   : > { %v752_v48 = vpop.f32.mrf.mxu1  ;;  %13164 = vmatprep.mubr.bf16.mxu1 %v14289_v39  ;;  %13194 = vmatprep.subr.bf16.mxu0 %v14292_v40 }
  0xf0   : > { %v15137_v50 = vadd.f32 %v752_v48, %v447_v45  ;;  %v12827_v51 = vpop.f32.mrf.mxu0  ;;  %13242 = vmatprep.subr.bf16.mxu1 %v14293_v42  ;;  %v14309_v45 = vld [vmem:[%s14850_s10 + $0x2d8] sm:$0xff]  }
  0xf1   : > { %v12875_v53 = vpop.f32.mrf.mxu1  ;;  %13195 = vmatpush3.bf16.msra.mxu0 %v14292_v40 }
  0xf2   : > { %v15141_v55 = vadd.f32 %v12875_v53, %v12827_v51  ;;  %v450_v56 = vpop.f32.mrf.mxu0  ;;  %13243 = vmatpush3.bf16.msra.mxu1 %v14293_v42  ;;  %13196 = vmatprep.subr.bf16.mxu0 %v14298_v47  ;;  %v14308_v42 = vld [vmem:[%s14850_s10 + $0x78] sm:$0xff]  }
  0xf3   : > { %v755_v58 = vpop.f32.mrf.mxu1  ;;  %13244 = vmatprep.subr.bf16.mxu1 %v14299_v49 }
  0xf4   : > { %v15147_v60 = vadd.f32 %v755_v58, %v450_v56  ;;  %v12830_v61 = vpop.f32.mrf.mxu0  ;;  %13117 = vmatmul.mubr.bf16.gmra.mxu0 %v14290_v46  ;;  %v15207_v46 = vld [vmem:[%s17917_s1 + $0xf8] sm:$0xff]   ;;  %v14313_v56 = vld [vmem:[%s14850_s10 + $0x2e0] sm:$0xff]  }
  0xf5   : > { %v12878_v63 = vpop.f32.mrf.mxu1  ;;  %13165 = vmatmul.mubr.bf16.gmra.mxu1 %v14291_v52  ;;  %13120 = vmatprep.mubr.bf16.mxu0 %v14294_v54  ;;  %v14312_v52 = vld [vmem:[%s14850_s10 + $0x80] sm:$0xff]  }
  0xf6   : > { %v15152_v0 = vadd.f32 %v12878_v63, %v12830_v61  ;;  %v463_v1 = vpop.f32.mrf.mxu0  ;;  %13168 = vmatprep.mubr.bf16.mxu1 %v14295_v57  ;;  %13197 = vmatpush3.bf16.msra.mxu0 %v14298_v47 }
  0xf7   : > { %v768_v3 = vpop.f32.mrf.mxu1  ;;  %13245 = vmatpush3.bf16.msra.mxu1 %v14299_v49  ;;  %13198 = vmatprep.subr.bf16.mxu0 %v14304_v59  ;;  %v15214_v49 = vld [vmem:[%s17917_s1 + $0x138] sm:$0xff]  }
  0xf8   : > { %v15159_v6 = vadd.f32 %v768_v3, %v463_v1  ;;  %v12831_v7 = vpop.f32.mrf.mxu0  ;;  %13246 = vmatprep.subr.bf16.mxu1 %v14305_v62 }
  0xf9   : > { %v12879_v9 = vpop.f32.mrf.mxu1 }
  0xfa   : > { %v15165_v11 = vadd.f32 %v12879_v9, %v12831_v7  ;;  %v466_v12 = vpop.f32.mrf.mxu0  ;;  %13199 = vmatpush3.bf16.msra.mxu0 %v14304_v59 }
  0xfb   : > { %v771_v14 = vpop.f32.mrf.mxu1  ;;  %13247 = vmatpush3.bf16.msra.mxu1 %v14305_v62  ;;  %13200 = vmatprep.subr.bf16.mxu0 %v14310_v5 }
  0xfc   : > { %v15171_v16 = vadd.f32 %v771_v14, %v466_v12  ;;  %v12834_v17 = vpop.f32.mrf.mxu0  ;;  %13121 = vmatmul.mubr.bf16.gmra.mxu0 %v14296_v2  ;;  %13248 = vmatprep.subr.bf16.mxu1 %v14311_v8  ;;  %v14314_v2 = vld [vmem:[%s14850_s10 + $0x88] sm:$0xff]   ;;  %v14319_v12 = vld [vmem:[%s14850_s10 + $0x2f0] sm:$0xff]  }
  0xfd   : > { %v12882_v19 = vpop.f32.mrf.mxu1  ;;  %13169 = vmatmul.mubr.bf16.gmra.mxu1 %v14297_v4  ;;  %13124 = vmatprep.mubr.bf16.mxu0 %v14300_v10 }
  0xfe   : > { %v15176_v20 = vadd.f32 %v12882_v19, %v12834_v17  ;;  %v479_v21 = vpop.f32.mrf.mxu0  ;;  %13172 = vmatprep.mubr.bf16.mxu1 %v14301_v13  ;;  %13201 = vmatpush3.bf16.msra.mxu0 %v14310_v5  ;;  %v14315_v5 = vld [vmem:[%s14850_s10 + $0x2e8] sm:$0xff]  }
  0xff   : > { %v784_v23 = vpop.f32.mrf.mxu1  ;;  %13249 = vmatpush3.bf16.msra.mxu1 %v14311_v8  ;;  %13202 = vmatprep.subr.bf16.mxu0 %v14316_v15  ;;  %v14318_v8 = vld [vmem:[%s14850_s10 + $0x90] sm:$0xff]  }
 0x100   : > { %v15183_v26 = vadd.f32 %v784_v23, %v479_v21  ;;  %v12835_v27 = vpop.f32.mrf.mxu0  ;;  %13250 = vmatprep.subr.bf16.mxu1 %v14317_v18 }
 0x101   : > { %v12883_v29 = vpop.f32.mrf.mxu1 }
 0x102   : > { %v15189_v31 = vadd.f32 %v12883_v29, %v12835_v27  ;;  %v482_v32 = vpop.f32.mrf.mxu0  ;;  %13203 = vmatpush3.bf16.msra.mxu0 %v14316_v15 }
 0x103   : > { %v787_v34 = vpop.f32.mrf.mxu1  ;;  %13251 = vmatpush3.bf16.msra.mxu1 %v14317_v18  ;;  %13204 = vmatprep.subr.bf16.mxu0 %v14322_v25 }
 0x104   : > { %v15195_v36 = vadd.f32 %v787_v34, %v482_v32  ;;  %v12838_v37 = vpop.f32.mrf.mxu0  ;;  %13125 = vmatmul.mubr.bf16.gmra.mxu0 %v14302_v22  ;;  %13252 = vmatprep.subr.bf16.mxu1 %v14323_v28  ;;  %v14320_v22 = vld [vmem:[%s14850_s10 + $0x98] sm:$0xff]   ;;  %v14325_v32 = vld [vmem:[%s14850_s10 + $0x300] sm:$0xff]  }
 0x105   : > { %v12886_v39 = vpop.f32.mrf.mxu1  ;;  %13173 = vmatmul.mubr.bf16.gmra.mxu1 %v14303_v24  ;;  %13128 = vmatprep.mubr.bf16.mxu0 %v14306_v30 }
 0x106   : > { %v15200_v40 = vadd.f32 %v12886_v39, %v12838_v37  ;;  %v495_v41 = vpop.f32.mrf.mxu0  ;;  %13176 = vmatprep.mubr.bf16.mxu1 %v14307_v33  ;;  %13205 = vmatpush3.bf16.msra.mxu0 %v14322_v25  ;;  %v14321_v25 = vld [vmem:[%s14850_s10 + $0x2f8] sm:$0xff]  }
 0x107   : > { %v800_v43 = vpop.f32.mrf.mxu1  ;;  %13253 = vmatpush3.bf16.msra.mxu1 %v14323_v28  ;;  %13206 = vmatprep.subr.bf16.mxu0 %v14328_v35  ;;  %v14324_v28 = vld [vmem:[%s14850_s10 + $0xa0] sm:$0xff]  }
 0x108   : > { %v15209_v47 = vadd.f32 %v800_v43, %v495_v41  ;;  %v12839_v48 = vpop.f32.mrf.mxu0  ;;  %13254 = vmatprep.subr.bf16.mxu1 %v14329_v38 }
 0x109   : > { %v12887_v51 = vpop.f32.mrf.mxu1 }
 0x10a   : > { %v15217_v53 = vadd.f32 %v12887_v51, %v12839_v48  ;;  %v498_v54 = vpop.f32.mrf.mxu0  ;;  %13207 = vmatpush3.bf16.msra.mxu0 %v14328_v35  ;;  %v14327_v48 = vld [vmem:[%s14850_s10 + $0x308] sm:$0xff]  }
 0x10b   : > { %v803_v57 = vpop.f32.mrf.mxu1  ;;  %13255 = vmatpush3.bf16.msra.mxu1 %v14329_v38  ;;  %13288 = vmatprep.subr.bf16.mxu0 %v15207_v46 }
 0x10c   : > { %v15221_v58 = vadd.f32 %v803_v57, %v498_v54  ;;  %v12842_v59 = vpop.f32.mrf.mxu0  ;;  %13129 = vmatmul.mubr.bf16.gmra.mxu0 %v14308_v42  ;;  %13336 = vmatprep.subr.bf16.mxu1 %v15214_v49  ;;  %v14326_v42 = vld [vmem:[%s14850_s10 + $0xa8] sm:$0xff]   ;;  %v14331_v57 = vld [vmem:[%s14850_s10 + $0x90] sm:$0xff]  }
 0x10d   : > { %v12890_v61 = vpop.f32.mrf.mxu1  ;;  %13177 = vmatmul.mubr.bf16.gmra.mxu1 %v14309_v45  ;;  %13132 = vmatprep.mubr.bf16.mxu0 %v14312_v52  ;;  %v14330_v52 = vld [vmem:[%s14850_s10 + $0x80] sm:$0xff]  }
 0x10e   : > { %v15224_v62 = vadd.f32 %v12890_v61, %v12842_v59  ;;  %v511_v63 = vpop.f32.mrf.mxu0  ;;  %13180 = vmatprep.mubr.bf16.mxu1 %v14313_v56 }
 0x10f   : > { %v816_v1 = vpop.f32.mrf.mxu1 }
 0x110   : > { %v15227_v3 = vadd.f32 %v816_v1, %v511_v63  ;;  %v12843_v4 = vpop.f32.mrf.mxu0 }
 0x111   : > { %v12891_v7 = vpop.f32.mrf.mxu1 }
 0x112   : > { %v15231_v9 = vadd.f32 %v12891_v7, %v12843_v4  ;;  %v514_v10 = vpop.f32.mrf.mxu0  ;;  %v14332_v7 = vld [vmem:[%s14850_s10 + $0x88] sm:$0xff]  }
 0x113   : > { %v819_v13 = vpop.f32.mrf.mxu1 }
 0x114   : > { %v15234_v14 = vadd.f32 %v819_v13, %v514_v10  ;;  %v12846_v15 = vpop.f32.mrf.mxu0  ;;  %13133 = vmatmul.mubr.bf16.gmra.mxu0 %v14314_v2 }
 0x115   : > { %v12894_v17 = vpop.f32.mrf.mxu1  ;;  %13181 = vmatmul.mubr.bf16.gmra.mxu1 %v14315_v5  ;;  %13136 = vmatprep.mubr.bf16.mxu0 %v14318_v8 }
 0x116   : > { %v15236_v18 = vadd.f32 %v12894_v17, %v12846_v15  ;;  %v527_v19 = vpop.f32.mrf.mxu0  ;;  %13184 = vmatprep.mubr.bf16.mxu1 %v14319_v12  ;;  %v14333_v12 = vld [vmem:[%s14850_s10 + $0x98] sm:$0xff]   ;;  %v14336_v15 = vld [vmem:[%s14850_s10 + $0x90] sm:$0xff]  }
 0x117   : > { %v832_v21 = vpop.f32.mrf.mxu1 }
 0x118   : > { %v15239_v23 = vadd.f32 %v832_v21, %v527_v19  ;;  %v12847_v24 = vpop.f32.mrf.mxu0  ;;  %v14337_v21 = vld [vmem:[%s14850_s10 + $0xa0] sm:$0xff]  }
 0x119   : > { %v12895_v27 = vpop.f32.mrf.mxu1 }
 0x11a   : > { %v15243_v29 = vadd.f32 %v12895_v27, %v12847_v24  ;;  %v530_v30 = vpop.f32.mrf.mxu0  ;;  %v14340_v24 = vld [vmem:[%s17917_s1 + $0xf0] sm:$0xff]  }
 0x11b   : > { %v835_v33 = vpop.f32.mrf.mxu1 }
 0x11c   : > { %v15246_v34 = vadd.f32 %v835_v33, %v530_v30  ;;  %v12850_v35 = vpop.f32.mrf.mxu0  ;;  %13137 = vmatmul.mubr.bf16.gmra.mxu0 %v14320_v22 }
 0x11d   : > { %v12898_v37 = vpop.f32.mrf.mxu1  ;;  %13185 = vmatmul.mubr.bf16.gmra.mxu1 %v14321_v25  ;;  %13140 = vmatprep.mubr.bf16.mxu0 %v14324_v28  ;;  %v14341_v28 = vld [vmem:[%s17917_s1 + $0x130] sm:$0xff]  }
 0x11e   : > { %v15248_v38 = vadd.f32 %v12898_v37, %v12850_v35  ;;  %v543_v39 = vpop.f32.mrf.mxu0  ;;  %13188 = vmatprep.mubr.bf16.mxu1 %v14325_v32  ;;  %v14338_v35 = vld [vmem:[%s14850_s10 + $0x98] sm:$0xff]   ;;  %v14346_v37 = vld [vmem:[%s17917_s1 + $0xe8] sm:$0xff]  }
 0x11f   : > { %v848_v41 = vpop.f32.mrf.mxu1 }
 0x120   : > { %v15251_v43 = vadd.f32 %v848_v41, %v543_v39  ;;  %v12851_v45 = vpop.f32.mrf.mxu0 }
 0x121   : > { %v12899_v51 = vpop.f32.mrf.mxu1 }
 0x122   : > { %v15255_v54 = vadd.f32 %v12899_v51, %v12851_v45  ;;  %v546_v56 = vpop.f32.mrf.mxu0 }
 0x123   : > { %v851_v59 = vpop.f32.mrf.mxu1 }
 0x124   : > { %v15258_v61 = vadd.f32 %v851_v59, %v546_v56  ;;  %v12854_v63 = vpop.f32.mrf.mxu0  ;;  %13141 = vmatmul.mubr.bf16.gmra.mxu0 %v14326_v42  ;;  %v14339_v42 = vld [vmem:[%s14850_s10 + $0xa8] sm:$0xff]  }
 0x125   : > { %v12902_v1 = vpop.f32.mrf.mxu1  ;;  %13189 = vmatmul.mubr.bf16.gmra.mxu1 %v14327_v48  ;;  %13208 = vmatprep.mubr.bf16.mxu0 %v14330_v52  ;;  %v14342_v52 = vld [vmem:[%s14850_s10 + $0xa0] sm:$0xff]  }
 0x126   : > { %v15260_v2 = vadd.f32 %v12902_v1, %v12854_v63  ;;  %v559_v4 = vpop.f32.mrf.mxu0  ;;  %13256 = vmatprep.mubr.bf16.mxu1 %v14331_v57  ;;  %v14352_v1 = vld [vmem:[%s17917_s1 + $0xe0] sm:$0xff]  }
 0x127   : > { %v864_v5 = vpop.f32.mrf.mxu1 }
 0x128   : > { %v15263_v8 = vadd.f32 %v864_v5, %v559_v4  ;;  %v12855_v10 = vpop.f32.mrf.mxu0  ;;  %v14353_v4 = vld [vmem:[%s17917_s1 + $0x120] sm:$0xff]  }
 0x129   : > { %v12903_v13 = vpop.f32.mrf.mxu1 }
 0x12a   : > { %v15267_v17 = vadd.f32 %v12903_v13, %v12855_v10  ;;  %v562_v19 = vpop.f32.mrf.mxu0 }
 0x12b   : > { %v867_v22 = vpop.f32.mrf.mxu1 }
 0x12c   : > { %v15273_v25 = vadd.f32 %v867_v22, %v562_v19  ;;  %v12922_v27 = vpop.f32.mrf.mxu0  ;;  %13209 = vmatmul.mubr.bf16.vlgmr.msra.gmra.mxu0 %v14332_v7 }
 0x12d   : > { %v1235_v30 = vadd.f32 %v12922_v27, %v15128_v44  ;;  %v12970_v32 = vpop.f32.mrf.mxu1  ;;  %13257 = vmatmul.mubr.bf16.vlgmr.msra.gmra.mxu1 %v14333_v12  ;;  %13289 = vmatpush3.bf16.msra.mxu0 %v15207_v46  ;;  %v14347_v46 = vld [vmem:[%s17917_s1 + $0x128] sm:$0xff]  }
 0x12e   : > { %13337 = vmatpush3.bf16.msra.mxu1 %v15214_v49  ;;  %v1106_v33 = vpop.f32.mrf.mxu0  ;;  %13212 = vmatprep.mubr.bf16.mxu0 %v14336_v15  ;;  %v14344_v12 = vld [vmem:[%s14850_s10 + $0xa8] sm:$0xff]  }
 0x12f   : > { %v15285_v39 = vadd.f32 %v12970_v32, %v1235_v30  ;;  %v1233_v44 = vadd.f32 %v1106_v33, %v15137_v50  ;;  %v1492_v41 = vpop.f32.mrf.mxu1  ;;  %13260 = vmatprep.mubr.bf16.mxu1 %v14337_v21  ;;  %13290 = vmatprep.subr.bf16.mxu0 %v14340_v24  ;;  %v14343_v50 = vld [vmem:[%s14850_s10 + $0xb0] sm:$0xff]   ;;  %v14345_v21 = vld [vmem:[%s14850_s10 + $0xb8] sm:$0xff]   ;;  %v14349_v33 = vld [vmem:[%s14850_s10 + $0xc0] sm:$0xff]  }
 0x130   : > { %v12923_v49 = vpop.f32.mrf.mxu0  ;;  %13338 = vmatprep.subr.bf16.mxu1 %v14341_v28 }
 0x131   : > { %v15292_v45 = vadd.f32 %v1492_v41, %v1233_v44  ;;  %v1236_v48 = vadd.f32 %v12923_v49, %v15141_v55  ;;  %v12971_v51 = vpop.f32.mrf.mxu1  ;;  %13291 = vmatpush3.bf16.msra.mxu0 %v14340_v24  ;;  %v14359_v24 = vld [vmem:[%s17917_s1 + $0x118] sm:$0xff]   ;;  %v14364_v41 = vld [vmem:[%s17917_s1 + $0xd0] sm:$0xff]  }
 0x132   : > { %v1109_v56 = vpop.f32.mrf.mxu0  ;;  %13339 = vmatpush3.bf16.msra.mxu1 %v14341_v28  ;;  %13292 = vmatprep.subr.bf16.mxu0 %v14346_v37 }
 0x133   : > { %v15297_v57 = vadd.f32 %v12971_v51, %v1236_v48  ;;  %v1234_v59 = vadd.f32 %v1109_v56, %v15147_v60  ;;  %v1495_v63 = vpop.f32.mrf.mxu1  ;;  %13340 = vmatprep.subr.bf16.mxu1 %v14347_v46  ;;  %v14350_v51 = vld [vmem:[%s14850_s10 + $0xb8] sm:$0xff]  }
 0x134   : > { %v12926_v55 = vpop.f32.mrf.mxu0  ;;  %13213 = vmatmul.mubr.bf16.gmra.mxu0 %v14338_v35 }
 0x135   : > { %v15306_v5 = vadd.f32 %v1495_v63, %v1234_v59  ;;  %v1239_v7 = vadd.f32 %v12926_v55, %v15152_v0  ;;  %v12974_v10 = vpop.f32.mrf.mxu1  ;;  %13261 = vmatmul.mubr.bf16.gmra.mxu1 %v14339_v42  ;;  %13216 = vmatprep.mubr.bf16.mxu0 %v14342_v52  ;;  %v14358_v0 = vld [vmem:[%s17917_s1 + $0xd8] sm:$0xff]   ;;  %v14351_v59 = vld [vmem:[%s14850_s10 + $0xc8] sm:$0xff]  }
 0x136   : > { %v1122_v60 = vpop.f32.mrf.mxu0  ;;  %13264 = vmatprep.mubr.bf16.mxu1 %v14343_v50  ;;  %13293 = vmatpush3.bf16.msra.mxu0 %v14346_v37 }
 0x137   : > { %v15310_v13 = vadd.f32 %v12974_v10, %v1239_v7  ;;  %v1237_v15 = vadd.f32 %v1122_v60, %v15159_v6  ;;  %v1508_v19 = vpop.f32.mrf.mxu1  ;;  %13341 = vmatpush3.bf16.msra.mxu1 %v14347_v46  ;;  %13294 = vmatprep.subr.bf16.mxu0 %v14352_v1  ;;  %v14348_v6 = vld [vmem:[%s14850_s10 + $0xb0] sm:$0xff]  }
 0x138   : > { %v12927_v22 = vpop.f32.mrf.mxu0  ;;  %13342 = vmatprep.subr.bf16.mxu1 %v14353_v4  ;;  %v14355_v60 = vld [vmem:[%s14850_s10 + $0xd0] sm:$0xff]  }
 0x139   : > { %v15320_v27 = vadd.f32 %v1508_v19, %v1237_v15  ;;  %v1240_v28 = vadd.f32 %v12927_v22, %v15165_v11  ;;  %v12975_v30 = vpop.f32.mrf.mxu1  ;;  %v14365_v11 = vld [vmem:[%s17917_s1 + $0x110] sm:$0xff]  }
 0x13a   : > { %v1125_v32 = vpop.f32.mrf.mxu0  ;;  %13295 = vmatpush3.bf16.msra.mxu0 %v14352_v1  ;;  %v14371_v1 = vld [vmem:[%s17917_s1 + $0x108] sm:$0xff]  }
 0x13b   : > { %v15325_v35 = vadd.f32 %v12975_v30, %v1240_v28  ;;  %v1238_v37 = vadd.f32 %v1125_v32, %v15171_v16  ;;  %v1511_v44 = vpop.f32.mrf.mxu1  ;;  %13343 = vmatpush3.bf16.msra.mxu1 %v14353_v4  ;;  %13296 = vmatprep.subr.bf16.mxu0 %v14358_v0  ;;  %v14356_v30 = vld [vmem:[%s14850_s10 + $0xc8] sm:$0xff]  }
 0x13c   : > { %v12930_v46 = vpop.f32.mrf.mxu0  ;;  %13217 = vmatmul.mubr.bf16.gmra.mxu0 %v14344_v12  ;;  %13344 = vmatprep.subr.bf16.mxu1 %v14359_v24 }
 0x13d   : > { %v15334_v49 = vadd.f32 %v1511_v44, %v1238_v37  ;;  %v1243_v16 = vadd.f32 %v12930_v46, %v15176_v20  ;;  %v12978_v42 = vpop.f32.mrf.mxu1  ;;  %13265 = vmatmul.mubr.bf16.gmra.mxu1 %v14345_v21  ;;  %13220 = vmatprep.mubr.bf16.mxu0 %v14348_v6  ;;  %v14370_v20 = vld [vmem:[%s17917_s1 + $0xc8] sm:$0xff]   ;;  %v14376_v21 = vld [vmem:[%s17917_s1 + $0xc0] sm:$0xff]   ;;  %v14357_v37 = vld [vmem:[%s14850_s10 + $0xd8] sm:$0xff]  }
 0x13e   : > { %v1138_v48 = vpop.f32.mrf.mxu0  ;;  %13268 = vmatprep.mubr.bf16.mxu1 %v14349_v33  ;;  %13297 = vmatpush3.bf16.msra.mxu0 %v14358_v0 }
 0x13f   : > { %v15338_v52 = vadd.f32 %v12978_v42, %v1243_v16  ;;  %v1241_v56 = vadd.f32 %v1138_v48, %v15183_v26  ;;  %v1524_v50 = vpop.f32.mrf.mxu1  ;;  %13345 = vmatpush3.bf16.msra.mxu1 %v14359_v24  ;;  %13298 = vmatprep.subr.bf16.mxu0 %v14364_v41  ;;  %v14354_v26 = vld [vmem:[%s14850_s10 + $0xc0] sm:$0xff]   ;;  %v14360_v16 = vld [vmem:[%s14850_s10 + $0xd0] sm:$0xff]  }
 0x140   : > { %v12931_v63 = vpop.f32.mrf.mxu0  ;;  %13346 = vmatprep.subr.bf16.mxu1 %v14365_v11  ;;  %v14361_v48 = vld [vmem:[%s14850_s10 + $0xe0] sm:$0xff]  }
 0x141   : > { %v15348_v55 = vadd.f32 %v1524_v50, %v1241_v56  ;;  %v1244_v4 = vadd.f32 %v12931_v63, %v15189_v31  ;;  %v12979_v7 = vpop.f32.mrf.mxu1  ;;  %v14377_v31 = vld [vmem:[%s17917_s1 + $0x100] sm:$0xff]  }
 0x142   : > { %v1141_v10 = vpop.f32.mrf.mxu0  ;;  %13299 = vmatpush3.bf16.msra.mxu0 %v14364_v41  ;;  %v15378_v41 = vld [vmem:[%s17917_s1 + $0x1b8] sm:$0xff]  }
 0x143   : > { %v15353_v12 = vadd.f32 %v12979_v7, %v1244_v4  ;;  %v1242_v15 = vadd.f32 %v1141_v10, %v15195_v36  ;;  %v1527_v19 = vpop.f32.mrf.mxu1  ;;  %13347 = vmatpush3.bf16.msra.mxu1 %v14365_v11  ;;  %13300 = vmatprep.subr.bf16.mxu0 %v14370_v20 }
 0x144   : > { %v12934_v0 = vpop.f32.mrf.mxu0  ;;  %13221 = vmatmul.mubr.bf16.gmra.mxu0 %v14350_v51  ;;  %13348 = vmatprep.subr.bf16.mxu1 %v14371_v1 }
 0x145   : > { %v15362_v22 = vadd.f32 %v1527_v19, %v1242_v15  ;;  %v1247_v36 = vadd.f32 %v12934_v0, %v15200_v40  ;;  %v12982_v24 = vpop.f32.mrf.mxu1  ;;  %13269 = vmatmul.mubr.bf16.gmra.mxu1 %v14351_v59  ;;  %13224 = vmatprep.mubr.bf16.mxu0 %v14354_v26  ;;  %v15373_v40 = vld [vmem:[%s17917_s1 + $0x178] sm:$0xff]  }
 0x146   : > { %v1154_v28 = vpop.f32.mrf.mxu0  ;;  %13272 = vmatprep.mubr.bf16.mxu1 %v14355_v60  ;;  %13301 = vmatpush3.bf16.msra.mxu0 %v14370_v20  ;;  %v14362_v26 = vld [vmem:[%s14850_s10 + $0xd8] sm:$0xff]   ;;  %v14363_v60 = vld [vmem:[%s14850_s10 + $0xe8] sm:$0xff]  }
 0x147   : > { %v15366_v6 = vadd.f32 %v12982_v24, %v1247_v36  ;;  %v1245_v32 = vadd.f32 %v1154_v28, %v15209_v47  ;;  %v1540_v33 = vpop.f32.mrf.mxu1  ;;  %13349 = vmatpush3.bf16.msra.mxu1 %v14371_v1  ;;  %13302 = vmatprep.subr.bf16.mxu0 %v14376_v21 }
 0x148   : > { %v12935_v44 = vpop.f32.mrf.mxu0  ;;  %13350 = vmatprep.subr.bf16.mxu1 %v14377_v31 }
 0x149   : > { %v15380_v46 = vadd.f32 %v1540_v33, %v1245_v32  ;;  %v1248_v47 = vadd.f32 %v12935_v44, %v15217_v53  ;;  %v12983_v11 = vpop.f32.mrf.mxu1 }
 0x14a   : > { %v1157_v42 = vpop.f32.mrf.mxu0  ;;  %13303 = vmatpush3.bf16.msra.mxu0 %v14376_v21 }
 0x14b   : > { %v15385_v51 = vadd.f32 %v12983_v11, %v1248_v47  ;;  %v1246_v56 = vadd.f32 %v1157_v42, %v15221_v58  ;;  %v1543_v50 = vpop.f32.mrf.mxu1  ;;  %13351 = vmatpush3.bf16.msra.mxu1 %v14377_v31  ;;  %13384 = vmatprep.subr.bf16.mxu0 %v15373_v40  ;;  %v14367_v31 = vld [vmem:[%s14850_s10 + $0xf0] sm:$0xff]  }
 0x14c   : > { %v12938_v59 = vpop.f32.mrf.mxu0  ;;  %13225 = vmatmul.mubr.bf16.gmra.mxu0 %v14356_v30  ;;  %13432 = vmatprep.subr.bf16.mxu1 %v15378_v41 }
 0x14d   : > { %v15390_v53 = vadd.f32 %v1543_v50, %v1246_v56  ;;  %v1251_v20 = vadd.f32 %v12938_v59, %v15224_v62  ;;  %v12986_v63 = vpop.f32.mrf.mxu1  ;;  %13273 = vmatmul.mubr.bf16.gmra.mxu1 %v14357_v37  ;;  %13228 = vmatprep.mubr.bf16.mxu0 %v14360_v16  ;;  %v14366_v62 = vld [vmem:[%s14850_s10 + $0xe0] sm:$0xff]   ;;  %v14368_v37 = vld [vmem:[%s14850_s10 + $0xe8] sm:$0xff]   ;;  %v14369_v56 = vld [vmem:[%s14850_s10 + $0xf8] sm:$0xff]  }
 0x14e   : > { %v1170_v58 = vpop.f32.mrf.mxu0  ;;  %13276 = vmatprep.mubr.bf16.mxu1 %v14361_v48  ;;  %v14373_v59 = vld [vmem:[%s14850_s10 + $0x100] sm:$0xff]  }
 0x14f   : > { %v15393_v1 = vadd.f32 %v12986_v63, %v1251_v20  ;;  %v1249_v4 = vadd.f32 %v1170_v58, %v15227_v3  ;;  %v1556_v7 = vpop.f32.mrf.mxu1 }
 0x150   : > { %v12939_v10 = vpop.f32.mrf.mxu0 }
 0x151   : > { %v15398_v15 = vadd.f32 %v1556_v7, %v1249_v4  ;;  %v1252_v19 = vadd.f32 %v12939_v10, %v15231_v9  ;;  %v12987_v21 = vpop.f32.mrf.mxu1 }
 0x152   : > { %v1173_v0 = vpop.f32.mrf.mxu0 }
 0x153   : > { %v15403_v36 = vadd.f32 %v12987_v21, %v1252_v19  ;;  %v1250_v24 = vadd.f32 %v1173_v0, %v15234_v14  ;;  %v1559_v28 = vpop.f32.mrf.mxu1  ;;  %v14374_v19 = vld [vmem:[%s14850_s10 + $0xf8] sm:$0xff]  }
 0x154   : > { %v12942_v30 = vpop.f32.mrf.mxu0  ;;  %13229 = vmatmul.mubr.bf16.gmra.mxu0 %v14362_v26 }
 0x155   : > { %v15406_v3 = vadd.f32 %v1559_v28, %v1250_v24  ;;  %v1255_v32 = vadd.f32 %v12942_v30, %v15236_v18  ;;  %v12990_v33 = vpop.f32.mrf.mxu1  ;;  %13277 = vmatmul.mubr.bf16.gmra.mxu1 %v14363_v60  ;;  %13232 = vmatprep.mubr.bf16.mxu0 %v14366_v62  ;;  %v14372_v18 = vld [vmem:[%s14850_s10 + $0xf0] sm:$0xff]   ;;  %v14375_v62 = vld [vmem:[%s14850_s10 + $0x108] sm:$0xff]   ;;  %v14379_v30 = vld [vmem:[%s14850_s10 + $0xa0] sm:$0xff]  }
 0x156   : > { %v1186_v9 = vpop.f32.mrf.mxu0  ;;  %13280 = vmatprep.mubr.bf16.mxu1 %v14367_v31 }
 0x157   : > { %v15410_v44 = vadd.f32 %v12990_v33, %v1255_v32  ;;  %v1253_v14 = vadd.f32 %v1186_v9, %v15239_v23  ;;  %v1572_v47 = vpop.f32.mrf.mxu1 }
 0x158   : > { %v12943_v11 = vpop.f32.mrf.mxu0 }
 0x159   : > { %v15413_v16 = vadd.f32 %v1572_v47, %v1253_v14  ;;  %v1256_v42 = vadd.f32 %v12943_v11, %v15243_v29  ;;  %v12991_v48 = vpop.f32.mrf.mxu1 }
 0x15a   : > { %v1189_v50 = vpop.f32.mrf.mxu0 }
 0x15b   : > { %v15419_v20 = vadd.f32 %v12991_v48, %v1256_v42  ;;  %v1254_v63 = vadd.f32 %v1189_v50, %v15246_v34  ;;  %v1575_v58 = vpop.f32.mrf.mxu1  ;;  %v14380_v48 = vld [vmem:[%s14850_s10 + $0x2a8] sm:$0xff]  }
 0x15c   : > { %v12946_v4 = vpop.f32.mrf.mxu0  ;;  %13233 = vmatmul.mubr.bf16.gmra.mxu0 %v14368_v37 }
 0x15d   : > { %v15422_v23 = vadd.f32 %v1575_v58, %v1254_v63  ;;  %v1259_v7 = vadd.f32 %v12946_v4, %v15248_v38  ;;  %v12994_v29 = vpop.f32.mrf.mxu1  ;;  %13281 = vmatmul.mubr.bf16.gmra.mxu1 %v14369_v56  ;;  %13236 = vmatprep.mubr.bf16.mxu0 %v14372_v18  ;;  %v14378_v38 = vld [vmem:[%s14850_s10 + $0x2a0] sm:$0xff]   ;;  %v14381_v18 = vld [vmem:[%s14850_s10 + $0xa8] sm:$0xff]   ;;  %v14385_v4 = vld [vmem:[%s14850_s10 + $0xb0] sm:$0xff]  }
 0x15e   : > { %v1202_v26 = vpop.f32.mrf.mxu0  ;;  %13284 = vmatprep.mubr.bf16.mxu1 %v14373_v59 }
 0x15f   : > { %v15425_v10 = vadd.f32 %v12994_v29, %v1259_v7  ;;  %v1257_v60 = vadd.f32 %v1202_v26, %v15251_v43  ;;  %v1588_v34 = vpop.f32.mrf.mxu1 }
 0x160   : > { %v12947_v21 = vpop.f32.mrf.mxu0 }
 0x161   : > { %v15430_v0 = vadd.f32 %v1588_v34, %v1257_v60  ;;  %v1260_v31 = vadd.f32 %v12947_v21, %v15255_v54  ;;  %v12995_v24 = vpop.f32.mrf.mxu1 }
 0x162   : > { %v1205_v28 = vpop.f32.mrf.mxu0 }
 0x163   : > { %v15435_v32 = vadd.f32 %v12995_v24, %v1260_v31  ;;  %v1258_v33 = vadd.f32 %v1205_v28, %v15258_v61  ;;  %v1591_v9 = vpop.f32.mrf.mxu1  ;;  %v14386_v31 = vld [vmem:[%s14850_s10 + $0x2b8] sm:$0xff]   ;;  %v14395_v24 = vld [vmem:[%s17917_s1 + $0x1a8] sm:$0xff]  }
 0x164   : > { %v12950_v43 = vpop.f32.mrf.mxu0  ;;  %13237 = vmatmul.mubr.bf16.gmra.mxu0 %v14374_v19 }
 0x165   : > { %v15438_v37 = vadd.f32 %v1591_v9, %v1258_v33  ;;  %v1263_v14 = vadd.f32 %v12950_v43, %v15260_v2  ;;  %v12998_v47 = vpop.f32.mrf.mxu1  ;;  %13285 = vmatmul.mubr.bf16.gmra.mxu1 %v14375_v62  ;;  %13304 = vmatprep.mubr.bf16.mxu0 %v14378_v38  ;;  %v14384_v2 = vld [vmem:[%s14850_s10 + $0x2b0] sm:$0xff]  }
 0x166   : > { %v1218_v54 = vpop.f32.mrf.mxu0  ;;  %13352 = vmatprep.mubr.bf16.mxu1 %v14379_v30  ;;  %v14390_v30 = vld [vmem:[%s14850_s10 + $0x2c0] sm:$0xff]  }
 0x167   : > { %v15441_v11 = vadd.f32 %v12998_v47, %v1263_v14  ;;  %v1261_v42 = vadd.f32 %v1218_v54, %v15263_v8  ;;  %v1604_v61 = vpop.f32.mrf.mxu1  ;;  %v14388_v8 = vld [vmem:[%s17917_s1 + $0x170] sm:$0xff]   ;;  %v14391_v47 = vld [vmem:[%s14850_s10 + $0xc0] sm:$0xff]  }
 0x168   : > { %v12951_v56 = vpop.f32.mrf.mxu0 }
 0x169   : > { %v15446_v50 = vadd.f32 %v1604_v61, %v1261_v42  ;;  %v1264_v59 = vadd.f32 %v12951_v56, %v15267_v17  ;;  %v12999_v63 = vpop.f32.mrf.mxu1  ;;  %v14389_v17 = vld [vmem:[%s17917_s1 + $0x1b0] sm:$0xff]   ;;  %v14400_v61 = vld [vmem:[%s17917_s1 + $0x160] sm:$0xff]  }
 0x16a   : > { %v1221_v58 = vpop.f32.mrf.mxu0 }
 0x16b   : > { %17922 = vst [vmem:[#allocation3_spill] sm:$0xff] %v15446_v50  ;;  %v15451_v7 = vadd.f32 %v12999_v63, %v1264_v59  ;;  %v1262_v29 = vadd.f32 %v1221_v58, %v15273_v25  ;;  %v1607_v26 = vpop.f32.mrf.mxu1  ;;  %v14394_v25 = vld [vmem:[%s17917_s1 + $0x168] sm:$0xff]  }
 0x16c   : > { %v13018_v60 = vpop.f32.mrf.mxu0  ;;  %13305 = vmatmul.mubr.bf16.vlgmr.msra.gmra.mxu0 %v14380_v48  ;;  %v14392_v63 = vld [vmem:[%s14850_s10 + $0x2c8] sm:$0xff]  }
 0x16d   : > { %17923 = vst [vmem:[#allocation4_spill] sm:$0xff] %v15451_v7  ;;  %v15460_v34 = vadd.f32 %v1607_v26, %v1262_v29  ;;  %v2007_v19 = vadd.f32 %v13018_v60, %v15285_v39  ;;  %v13066_v21 = vpop.f32.mrf.mxu1  ;;  %13353 = vmatmul.mubr.bf16.vlgmr.msra.gmra.mxu1 %v14381_v18  ;;  %13385 = vmatpush3.bf16.msra.mxu0 %v15373_v40  ;;  %v14387_v40 = vld [vmem:[%s14850_s10 + $0xb8] sm:$0xff]   ;;  %v14393_v26 = vld [vmem:[%s14850_s10 + $0xc8] sm:$0xff]  }
 0x16e   : > { %13433 = vmatpush3.bf16.msra.mxu1 %v15378_v41  ;;  %v1878_v62 = vpop.f32.mrf.mxu0  ;;  %13308 = vmatprep.mubr.bf16.mxu0 %v14384_v2  ;;  %v14407_v2 = vld [vmem:[%s17917_s1 + $0x198] sm:$0xff]  }
 0x16f   : > { %17924 = vst [vmem:[#allocation5_spill] sm:$0xff] %v15460_v34  ;;  %v15472_v39 = vadd.f32 %v13066_v21, %v2007_v19  ;;  %v2005_v38 = vadd.f32 %v1878_v62, %v15292_v45  ;;  %v2264_v28 = vpop.f32.mrf.mxu1  ;;  %13356 = vmatprep.mubr.bf16.mxu1 %v14385_v4  ;;  %13386 = vmatprep.subr.bf16.mxu0 %v14388_v8  ;;  %v14412_v21 = vld [vmem:[%s17917_s1 + $0x150] sm:$0xff]  }
 0x170   : > { %v13019_v33 = vpop.f32.mrf.mxu0  ;;  %13434 = vmatprep.subr.bf16.mxu1 %v14389_v17 }
 0x171   : > { %v15477_v41 = vadd.f32 %v2264_v28, %v2005_v38  ;;  %v2008_v9 = vadd.f32 %v13019_v33, %v15297_v57  ;;  %v13067_v43 = vpop.f32.mrf.mxu1  ;;  %13387 = vmatpush3.bf16.msra.mxu0 %v14388_v8  ;;  %v14401_v57 = vld [vmem:[%s17917_s1 + $0x1a0] sm:$0xff]   ;;  %v14396_v8 = vld [vmem:[%s14850_s10 + $0x2d0] sm:$0xff]   ;;  %v14398_v28 = vld [vmem:[%s14850_s10 + $0x2d8] sm:$0xff]  }
 0x172   : > { %v1881_v14 = vpop.f32.mrf.mxu0  ;;  %13435 = vmatpush3.bf16.msra.mxu1 %v14389_v17  ;;  %13388 = vmatprep.subr.bf16.mxu0 %v14394_v25  ;;  %v14397_v17 = vld [vmem:[%s14850_s10 + $0xd0] sm:$0xff]  }
 0x173   : > { %v15481_v54 = vadd.f32 %v13067_v43, %v2008_v9  ;;  %v2006_v45 = vadd.f32 %v1881_v14, %v15306_v5  ;;  %v2267_v42 = vpop.f32.mrf.mxu1  ;;  %13436 = vmatprep.subr.bf16.mxu1 %v14395_v24  ;;  %v14406_v5 = vld [vmem:[%s17917_s1 + $0x158] sm:$0xff]   ;;  %v14402_v43 = vld [vmem:[%s14850_s10 + $0x2e0] sm:$0xff]   ;;  %v14419_v14 = vld [vmem:[%s17917_s1 + $0x188] sm:$0xff]  }
 0x174   : > { %v15487_v48 = vpop.f32.mrf.mxu0  ;;  %13309 = vmatmul.mubr.bf16.gmra.mxu0 %v14386_v31  ;;  %v14399_v9 = vld [vmem:[%s14850_s10 + $0xd8] sm:$0xff]  }
 0x175   : > { %v15492_v56 = vadd.f32 %v2267_v42, %v2006_v45  ;;  %v15494_v18 = vpop.f32.mrf.mxu1  ;;  %13357 = vmatmul.mubr.bf16.gmra.mxu1 %v14387_v40  ;;  %13312 = vmatprep.mubr.bf16.mxu0 %v14390_v30 }
 0x176   : > { %v15499_v59 = vpop.f32.mrf.mxu0  ;;  %13360 = vmatprep.mubr.bf16.mxu1 %v14391_v47  ;;  %13389 = vmatpush3.bf16.msra.mxu0 %v14394_v25  ;;  %v14413_v25 = vld [vmem:[%s17917_s1 + $0x190] sm:$0xff]  }
 0x177   : > { %v15505_v58 = vpop.f32.mrf.mxu1  ;;  %13437 = vmatpush3.bf16.msra.mxu1 %v14395_v24  ;;  %13390 = vmatprep.subr.bf16.mxu0 %v14400_v61 }
 0x178   : > { %v15507_v4 = vpop.f32.mrf.mxu0  ;;  %13438 = vmatprep.subr.bf16.mxu1 %v14401_v57 }
 0x179   : > { %v15509_v29 = vpop.f32.mrf.mxu1 }
 0x17a   : > { %v15513_v60 = vpop.f32.mrf.mxu0  ;;  %13391 = vmatpush3.bf16.msra.mxu0 %v14400_v61 }
 0x17b   : > { %v15516_v19 = vpop.f32.mrf.mxu1  ;;  %13439 = vmatpush3.bf16.msra.mxu1 %v14401_v57  ;;  %13392 = vmatprep.subr.bf16.mxu0 %v14406_v5  ;;  %v14403_v57 = vld [vmem:[%s14850_s10 + $0xe0] sm:$0xff]  }
 0x17c   : > { %v13026_v62 = vpop.f32.mrf.mxu0  ;;  %13313 = vmatmul.mubr.bf16.gmra.mxu0 %v14392_v63  ;;  %13440 = vmatprep.subr.bf16.mxu1 %v14407_v2 }
 0x17d   : > { %v2015_v31 = vadd.f32 %v13026_v62, %v15338_v52  ;;  %v13074_v24 = vpop.f32.mrf.mxu1  ;;  %13361 = vmatmul.mubr.bf16.gmra.mxu1 %v14393_v26  ;;  %13316 = vmatprep.mubr.bf16.mxu0 %v14396_v8  ;;  %v14418_v52 = vld [vmem:[%s17917_s1 + $0x148] sm:$0xff]   ;;  %v14424_v26 = vld [vmem:[%s17917_s1 + $0x140] sm:$0xff]  }
 0x17e   : > { %v1910_v38 = vpop.f32.mrf.mxu0  ;;  %13364 = vmatprep.mubr.bf16.mxu1 %v14397_v17  ;;  %13393 = vmatpush3.bf16.msra.mxu0 %v14406_v5 }
 0x17f   : > { %v15526_v40 = vadd.f32 %v13074_v24, %v2015_v31  ;;  %v2013_v30 = vadd.f32 %v1910_v38, %v15348_v55  ;;  %v2296_v33 = vpop.f32.mrf.mxu1  ;;  %13441 = vmatpush3.bf16.msra.mxu1 %v14407_v2  ;;  %13394 = vmatprep.subr.bf16.mxu0 %v14412_v21  ;;  %v14405_v31 = vld [vmem:[%s14850_s10 + $0xe8] sm:$0xff]   ;;  %v14408_v24 = vld [vmem:[%s14850_s10 + $0x2f0] sm:$0xff]   ;;  %v15566_v38 = vld [vmem:[%s17917_s1 + $0x78] sm:$0xff]  }
 0x180   : > { %v13027_v47 = vpop.f32.mrf.mxu0  ;;  %13442 = vmatprep.subr.bf16.mxu1 %v14413_v25 }
 0x181   : > { %v15537_v45 = vadd.f32 %v2296_v33, %v2013_v30  ;;  %v2016_v42 = vadd.f32 %v13027_v47, %v15353_v12  ;;  %v13075_v55 = vpop.f32.mrf.mxu1  ;;  %v14425_v12 = vld [vmem:[%s17917_s1 + $0x180] sm:$0xff]  }
 0x182   : > { %v1913_v61 = vpop.f32.mrf.mxu0  ;;  %13395 = vmatpush3.bf16.msra.mxu0 %v14412_v21 }
 0x183   : > { %v15541_v5 = vadd.f32 %v13075_v55, %v2016_v42  ;;  %v2014_v63 = vadd.f32 %v1913_v61, %v15362_v22  ;;  %v2299_v2 = vpop.f32.mrf.mxu1  ;;  %13443 = vmatpush3.bf16.msra.mxu1 %v14413_v25  ;;  %13396 = vmatprep.subr.bf16.mxu0 %v14418_v52  ;;  %v14404_v25 = vld [vmem:[%s14850_s10 + $0x2e8] sm:$0xff]   ;;  %v14410_v61 = vld [vmem:[%s14850_s10 + $0x2f8] sm:$0xff]  }
 0x184   : > { %v15550_v8 = vpop.f32.mrf.mxu0  ;;  %13317 = vmatmul.mubr.bf16.gmra.mxu0 %v14398_v28  ;;  %13444 = vmatprep.subr.bf16.mxu1 %v14419_v14  ;;  %v15571_v28 = vld [vmem:[%s17917_s1 + $0x38] sm:$0xff]  }
 0x185   : > { %v15552_v17 = vadd.f32 %v2299_v2, %v2014_v63  ;;  %v15554_v22 = vpop.f32.mrf.mxu1  ;;  %13365 = vmatmul.mubr.bf16.gmra.mxu1 %v14399_v9  ;;  %13320 = vmatprep.mubr.bf16.mxu0 %v14402_v43  ;;  %v14409_v43 = vld [vmem:[%s14850_s10 + $0xf0] sm:$0xff]  }
 0x186   : > { %v15556_v21 = vpop.f32.mrf.mxu0  ;;  %13368 = vmatprep.mubr.bf16.mxu1 %v14403_v57  ;;  %13397 = vmatpush3.bf16.msra.mxu0 %v14418_v52 }
 0x187   : > { %v15559_v62 = vpop.f32.mrf.mxu1  ;;  %13445 = vmatpush3.bf16.msra.mxu1 %v14419_v14  ;;  %13398 = vmatprep.subr.bf16.mxu0 %v14424_v26 }
 0x188   : > { %v15573_v30 = vpop.f32.mrf.mxu0  ;;  %13446 = vmatprep.subr.bf16.mxu1 %v14425_v12 }
 0x189   : > { %v15575_v33 = vpop.f32.mrf.mxu1 }
 0x18a   : > { %v15577_v9 = vpop.f32.mrf.mxu0  ;;  %13399 = vmatpush3.bf16.msra.mxu0 %v14424_v26  ;;  %v14411_v26 = vld [vmem:[%s14850_s10 + $0xf8] sm:$0xff]  }
 0x18b   : > { %v15580_v52 = vpop.f32.mrf.mxu1  ;;  %13447 = vmatpush3.bf16.msra.mxu1 %v14425_v12  ;;  %13480 = vmatprep.subr.bf16.mxu0 %v15566_v38  ;;  %v14414_v12 = vld [vmem:[%s14850_s10 + $0x300] sm:$0xff]  }
 0x18c   : > { %v13034_v14 = vpop.f32.mrf.mxu0  ;;  %13321 = vmatmul.mubr.bf16.gmra.mxu0 %v14404_v25  ;;  %13528 = vmatprep.subr.bf16.mxu1 %v15571_v28 }
 0x18d   : > { %v2023_v47 = vadd.f32 %v13034_v14, %v15393_v1  ;;  %v13082_v42 = vpop.f32.mrf.mxu1  ;;  %13369 = vmatmul.mubr.bf16.gmra.mxu1 %v14405_v31  ;;  %13324 = vmatprep.mubr.bf16.mxu0 %v14408_v24  ;;  %v14415_v31 = vld [vmem:[%s14850_s10 + $0x100] sm:$0xff]  }
 0x18e   : > { %v1942_v55 = vpop.f32.mrf.mxu0  ;;  %13372 = vmatprep.mubr.bf16.mxu1 %v14409_v43 }
 0x18f   : > { %v15586_v57 = vadd.f32 %v13082_v42, %v2023_v47  ;;  %v2021_v63 = vadd.f32 %v1942_v55, %v15398_v15  ;;  %v2328_v2 = vpop.f32.mrf.mxu1 }
 0x190   : > { %v13035_v34 = vpop.f32.mrf.mxu0 }
 0x191   : > { %v15591_v25 = vadd.f32 %v2328_v2, %v2021_v63  ;;  %v2024_v7 = vadd.f32 %v13035_v34, %v15403_v36  ;;  %v13083_v1 = vpop.f32.mrf.mxu1  ;;  %v14416_v34 = vld [vmem:[%s14850_s10 + $0x308] sm:$0xff]  }
 0x192   : > { %v1945_v14 = vpop.f32.mrf.mxu0 }
 0x193   : > { %v15595_v24 = vadd.f32 %v13083_v1, %v2024_v7  ;;  %v2022_v43 = vadd.f32 %v1945_v14, %v15406_v3  ;;  %v2331_v47 = vpop.f32.mrf.mxu1  ;;  %v14417_v3 = vld [vmem:[%s14850_s10 + $0x108] sm:$0xff]   ;;  %v14420_v1 = vld [vmem:[%s14850_s10 + $0x310] sm:$0xff]  }
 0x194   : > { %v13038_v15 = vpop.f32.mrf.mxu0  ;;  %13325 = vmatmul.mubr.bf16.gmra.mxu0 %v14410_v61 }
 0x195   : > { %v15598_v42 = vadd.f32 %v2331_v47, %v2022_v43  ;;  %v2027_v55 = vadd.f32 %v13038_v15, %v15410_v44  ;;  %v13086_v63 = vpop.f32.mrf.mxu1  ;;  %13373 = vmatmul.mubr.bf16.gmra.mxu1 %v14411_v26  ;;  %13328 = vmatprep.mubr.bf16.mxu0 %v14414_v12  ;;  %v14421_v26 = vld [vmem:[%s14850_s10 + $0x110] sm:$0xff]  }
 0x196   : > { %v15601_v36 = vpop.f32.mrf.mxu0  ;;  %13376 = vmatprep.mubr.bf16.mxu1 %v14415_v31 }
 0x197   : > { %v15604_v7 = vadd.f32 %v13086_v63, %v2027_v55  ;;  %v15606_v2 = vpop.f32.mrf.mxu1  ;;  %v14422_v55 = vld [vmem:[%s14850_s10 + $0x318] sm:$0xff]  }
 0x198   : > { %17926 = vst [vmem:[#allocation7_spill] sm:$0xff] %v15606_v2  ;;  %v15610_v61 = vpop.f32.mrf.mxu0  ;;  %v14423_v2 = vld [vmem:[%s14850_s10 + $0x118] sm:$0xff]  }
 0x199   : > { %17925 = vst [vmem:[#allocation6_spill] sm:$0xff] %v15604_v7  ;;  %v15612_v14 = vpop.f32.mrf.mxu1  ;;  %v14426_v7 = vld [vmem:[%s14850_s10 + $0x2b0] sm:$0xff]  }
 0x19a   : > { %17927 = vst [vmem:[#allocation8_spill] sm:$0xff] %v15612_v14  ;;  %v15614_v44 = vpop.f32.mrf.mxu0 }
 0x19b   : > { %17928 = vst [vmem:[#allocation9_spill] sm:$0xff] %v15614_v44  ;;  %v15617_v12 = vpop.f32.mrf.mxu1 }
 0x19c   : > { %17929 = vst [vmem:[#allocation10_spill] sm:$0xff] %v15617_v12  ;;  %v13042_v31 = vpop.f32.mrf.mxu0  ;;  %13329 = vmatmul.mubr.bf16.gmra.mxu0 %v14416_v34 }
 0x19d   : > { %v2031_v43 = vadd.f32 %v13042_v31, %v15425_v10  ;;  %v13090_v47 = vpop.f32.mrf.mxu1  ;;  %13377 = vmatmul.mubr.bf16.gmra.mxu1 %v14417_v3  ;;  %13332 = vmatprep.mubr.bf16.mxu0 %v14420_v1  ;;  %v14427_v3 = vld [vmem:[%s14850_s10 + $0xb0] sm:$0xff]  }
 0x19e   : > { %v1974_v15 = vpop.f32.mrf.mxu0  ;;  %13380 = vmatprep.mubr.bf16.mxu1 %v14421_v26 }
 0x19f   : > { %v15621_v63 = vadd.f32 %v13090_v47, %v2031_v43  ;;  %v2029_v50 = vadd.f32 %v1974_v15, %v15430_v0  ;;  %v2360_v14 = vpop.f32.mrf.mxu1 }
 0x1a0   : > { %v13043_v44 = vpop.f32.mrf.mxu0 }
 0x1a1   : > { %v15626_v12 = vadd.f32 %v2360_v14, %v2029_v50  ;;  %v2032_v34 = vadd.f32 %v13043_v44, %v15435_v32  ;;  %v13091_v10 = vpop.f32.mrf.mxu1 }
 0x1a2   : > { %v1977_v31 = vpop.f32.mrf.mxu0 }
 0x1a3   : > { %v15630_v1 = vadd.f32 %v13091_v10, %v2032_v34  ;;  %v2030_v26 = vadd.f32 %v1977_v31, %v15438_v37  ;;  %v2363_v43 = vpop.f32.mrf.mxu1  ;;  %v14428_v37 = vld [vmem:[%s14850_s10 + $0x2b8] sm:$0xff]  }
 0x1a4   : > { %v13046_v47 = vpop.f32.mrf.mxu0  ;;  %13333 = vmatmul.mubr.bf16.gmra.mxu0 %v14422_v55  ;;  %v14429_v34 = vld [vmem:[%s14850_s10 + $0xb8] sm:$0xff]  }
 0x1a5   : > { %v15633_v0 = vadd.f32 %v2363_v43, %v2030_v26  ;;  %v2035_v50 = vadd.f32 %v13046_v47, %v15441_v11  ;;  %v13094_v14 = vpop.f32.mrf.mxu1  ;;  %13381 = vmatmul.mubr.bf16.gmra.mxu1 %v14423_v2  ;;  %13400 = vmatprep.mubr.bf16.mxu0 %v14426_v7  ;;  %v15653_v11 = vld [vmem:[%s17918_s2] ss:$0 sm:$0xff]  ;;  %v14436_v26 = vld [vmem:[%s17917_s1 + $0x70] sm:$0xff]  }
 0x1a6   : > { %v15636_v32 = vpop.f32.mrf.mxu0  ;;  %13448 = vmatprep.mubr.bf16.mxu1 %v14427_v3  ;;  %v14432_v7 = vld [vmem:[%s14850_s10 + $0x2c0] sm:$0xff]   ;;  %v14437_v43 = vld [vmem:[%s17917_s1 + $0x30] sm:$0xff]  }
 0x1a7   : > { %17930 = vst [vmem:[#allocation11_spill] sm:$0xff] %v15633_v0  ;;  %v15638_v44 = vadd.f32 %v13094_v14, %v2035_v50  ;;  %v15640_v15 = vpop.f32.mrf.mxu1  ;;  %v14433_v2 = vld [vmem:[%s14850_s10 + $0xc0] sm:$0xff]   ;;  %v14442_v50 = vld [vmem:[%s17917_s1 + $0x68] sm:$0xff]  }
 0x1a8   : > { %17932 = vst [vmem:[#allocation13_spill] sm:$0xff] %v15640_v15  ;;  %v15644_v10 = vpop.f32.mrf.mxu0 }
 0x1a9   : > { %17931 = vst [vmem:[#allocation12_spill] sm:$0xff] %v15638_v44  ;;  %v15646_v55 = vpop.f32.mrf.mxu1 }
 0x1aa   : > { %17933 = vst [vmem:[#allocation14_spill] sm:$0xff] %v15646_v55  ;;  %v15648_v31 = vpop.f32.mrf.mxu0 }
 0x1ab   : > { %17934 = vst [vmem:[#allocation15_spill] sm:$0xff] %v15648_v31  ;;  %v15657_v3 = vpop.f32.mrf.mxu1  ;;  %v15699_v31 = vld [vmem:[%s17918_s2 + $0x2] ss:$0 sm:$0xff] }
 0x1ac   : > { %17935 = vst [vmem:[#allocation16_spill] sm:$0xff] %v15657_v3  ;;  %v13114_v47 = vpop.f32.mrf.mxu0  ;;  %13401 = vmatmul.mubr.bf16.vlgmr.msra.gmra.mxu0 %v14428_v37  ;;  %v15675_v3 = vld [vmem:[%s17918_s2 + $0x1] ss:$0 sm:$0xff]  ;;  %v14434_v37 = vld [vmem:[%s14850_s10 + $0x2c8] sm:$0xff]  }
 0x1ad   : > { %v2779_v14 = vadd.f32 %v13114_v47, %v15472_v39  ;;  %v15669_v44 = vpop.f32.mrf.mxu1  ;;  %13449 = vmatmul.mubr.bf16.vlgmr.msra.gmra.mxu1 %v14429_v34  ;;  %13481 = vmatpush3.bf16.msra.mxu0 %v15566_v38  ;;  %v14435_v34 = vld [vmem:[%s14850_s10 + $0xc8] sm:$0xff]  }
 0x1ae   : > { %17936 = vst [vmem:[#allocation17_spill] sm:$0xff] %v15669_v44  ;;  %13529 = vmatpush3.bf16.msra.mxu1 %v15571_v28  ;;  %v2650_v55 = vpop.f32.mrf.mxu0  ;;  %13404 = vmatprep.mubr.bf16.mxu0 %v14432_v7  ;;  %v14443_v38 = vld [vmem:[%s17917_s1 + $0x28] sm:$0xff]   ;;  %v2011_v28 = vadd.f32 %v15487_v48, %v15310_v13  ;;  %v2009_v7 = vadd.f32 %v15499_v59, %v15320_v27  ;;  %v14439_v48 = vld [vmem:[%s14850_s10 + $0xd0] sm:$0xff]  }
 0x1af   : > { %v10361_v15 = vadd.f32 %v15653_v11, %v2779_v14  ;;  %v2777_v39 = vadd.f32 %v2650_v55, %v15477_v41  ;;  %v15681_v47 = vpop.f32.mrf.mxu1  ;;  %13452 = vmatprep.mubr.bf16.mxu1 %v14433_v2  ;;  %13482 = vmatprep.subr.bf16.mxu0 %v14436_v26 }
 0x1b0   : > { %17937 = vst [vmem:[#allocation18_spill] sm:$0xff] %v15681_v47  ;;  %v13115_v14 = vpop.f32.mrf.mxu0  ;;  %13530 = vmatprep.subr.bf16.mxu1 %v14437_v43  ;;  %v14438_v47 = vld [vmem:[%s14850_s10 + $0x2d0] sm:$0xff]  }
 0x1b1   : > { %v10363_v44 = vmax.f32 %v10361_v15, 0.0  ;;  %v10343_v41 = vadd.f32 %v15653_v11, %v2777_v39  ;;  %v2780_v55 = vadd.f32 %v13115_v14, %v15481_v54  ;;  %v15693_v2 = vpop.f32.mrf.mxu1  ;;  %13483 = vmatpush3.bf16.msra.mxu0 %v14436_v26  ;;  %v14448_v26 = vld [vmem:[%s17917_s1 + $0x60] sm:$0xff]   ;;  %v2397_v14 = vadd.f32 %v15494_v18, %v2011_v28 }
 0x1b2   : > { %17938 = vst [vmem:[#allocation19_spill] sm:$0xff] %v15693_v2  ;;  %v2653_v13 = vpop.f32.mrf.mxu0  ;;  %13531 = vmatpush3.bf16.msra.mxu1 %v14437_v43  ;;  %13484 = vmatprep.subr.bf16.mxu0 %v14442_v50  ;;  %v14449_v43 = vld [vmem:[%s17917_s1 + $0x20] sm:$0xff]  }
 0x1b3   : > { %v10365_v27 = vmul.f32 %v15675_v3, %v10363_v44  ;;  %v10345_v59 = vmax.f32 %v10343_v41, 0.0  ;;  %v10362_v15 = vadd.f32 %v15653_v11, %v2780_v55  ;;  %v2778_v54 = vadd.f32 %v2653_v13, %v15492_v56  ;;  %v15705_v39 = vpop.f32.mrf.mxu1  ;;  %13532 = vmatprep.subr.bf16.mxu1 %v14443_v38 }
 0x1b4   : > { %17939 = vst [vmem:[#allocation20_spill] sm:$0xff] %v15705_v39  ;;  %v2395_v44 = vadd.f32 %v15505_v58, %v2009_v7  ;;  %v2012_v41 = vadd.f32 %v15507_v4, %v15325_v35  ;;  %v13118_v56 = vpop.f32.mrf.mxu0  ;;  %13405 = vmatmul.mubr.bf16.gmra.mxu0 %v14434_v37  ;;  %v2010_v55 = vadd.f32 %v15513_v60, %v15334_v49  ;;  %v14440_v4 = vld [vmem:[%s14850_s10 + $0x2d8] sm:$0xff]  }
 0x1b5   : > { %v10351_v13 = vmul.f32 %v15675_v3, %v10345_v59  ;;  %v10364_v39 = vmax.f32 %v10362_v15, 0.0  ;;  %v10344_v2 = vadd.f32 %v15653_v11, %v2778_v54  ;;  %v15721_v0 = vpop.f32.mrf.mxu1  ;;  %13453 = vmatmul.mubr.bf16.gmra.mxu1 %v14435_v34  ;;  %13408 = vmatprep.mubr.bf16.mxu0 %v14438_v47  ;;  %v15724_v18 = vadd.f32 %v15699_v31, %v10365_v27  ;;  %v14441_v59 = vld [vmem:[%s14850_s10 + $0xd8] sm:$0xff]  }
 0x1b6   : > { %v2783_v58 = vadd.f32 %v13118_v56, %v2397_v14  ;;  %v2666_v35 = vpop.f32.mrf.mxu0  ;;  %13456 = vmatprep.mubr.bf16.mxu1 %v14439_v48  ;;  %13485 = vmatpush3.bf16.msra.mxu0 %v14442_v50  ;;  %v14454_v47 = vld [vmem:[%s17917_s1 + $0x58] sm:$0xff]   ;;  %v2398_v34 = vadd.f32 %v15509_v29, %v2012_v41  ;;  %v14444_v29 = vld [vmem:[%s14850_s10 + $0x2e0] sm:$0xff]  }
 0x1b7   : > { %v15728_v49 = vadd.f32 %v15699_v31, %v10351_v13  ;;  %v10366_v60 = vmul.f32 %v15675_v3, %v10364_v39  ;;  %v10346_v37 = vmax.f32 %v10344_v2, 0.0  ;;  %v2781_v28 = vadd.f32 %v2666_v35, %v2395_v44  ;;  %v15731_v7 = vpop.f32.mrf.mxu1  ;;  %13533 = vmatpush3.bf16.msra.mxu1 %v14443_v38  ;;  %13486 = vmatprep.subr.bf16.mxu0 %v14448_v26  ;;  %v14455_v50 = vld [vmem:[%s17917_s1 + $0x18] sm:$0xff]   ;;  %v14445_v41 = vld [vmem:[%s14850_s10 + $0xe0] sm:$0xff]  }
 0x1b8   : > { %v10383_v2 = vadd.f32 %v15653_v11, %v2783_v58  ;;  %v13119_v48 = vpop.f32.mrf.mxu0  ;;  %13534 = vmatprep.subr.bf16.mxu1 %v14449_v43  ;;  %v2396_v38 = vadd.f32 %v15516_v19, %v2010_v55 }
 0x1b9   : > { %v10369_v27 = vmax.f32 %v15728_v49, %v15724_v18  ;;  %v10352_v15 = vmul.f32 %v15675_v3, %v10346_v37  ;;  %v10373_v54 = vadd.f32 %v15653_v11, %v2781_v28  ;;  %v15747_v39 = vpop.f32.mrf.mxu1  ;;  %v2784_v44 = vadd.f32 %v13119_v48, %v2398_v34  ;;  %v14460_v37 = vld [vmem:[%s17917_s1 + $0x50] sm:$0xff]   ;;  %v14473_v18 = vld [vmem:[%s17917_s1] sm:$0xff]  }
 0x1ba   : > { %v10385_v14 = vmax.f32 %v10383_v2, 0.0  ;;  %v2669_v56 = vpop.f32.mrf.mxu0  ;;  %13487 = vmatpush3.bf16.msra.mxu0 %v14448_v26  ;;  %v15752_v13 = vadd.f32 %v15699_v31, %v10366_v60  ;;  %v14461_v26 = vld [vmem:[%s17917_s1 + $0x10] sm:$0xff]   ;;  %v2018_v49 = vadd.f32 %v15577_v9, %v15390_v53 }
 0x1bb   : > { %v15755_v19 = vadd.f32 %v15699_v31, %v10352_v15  ;;  %v10375_v55 = vmax.f32 %v10373_v54, 0.0  ;;  %v2782_v58 = vadd.f32 %v2669_v56, %v2396_v38  ;;  %v15758_v35 = vpop.f32.mrf.mxu1  ;;  %13535 = vmatpush3.bf16.msra.mxu1 %v14449_v43  ;;  %13488 = vmatprep.subr.bf16.mxu0 %v14454_v47  ;;  %v10384_v28 = vadd.f32 %v15653_v11, %v2784_v44  ;;  %v14446_v56 = vld [vmem:[%s14850_s10 + $0x2e8] sm:$0xff]  }
 0x1bc   : > { %v10387_v60 = vmul.f32 %v15675_v3, %v10385_v14  ;;  %v13122_v34 = vpop.f32.mrf.mxu0  ;;  %13409 = vmatmul.mubr.bf16.gmra.mxu0 %v14440_v4  ;;  %13536 = vmatprep.subr.bf16.mxu1 %v14455_v50  ;;  %v2019_v54 = vadd.f32 %v15550_v8, %v15366_v6  ;;  %v14466_v6 = vld [vmem:[%s17917_s1 + $0x48] sm:$0xff]   ;;  %v2017_v8 = vadd.f32 %v15556_v21, %v15380_v46 }
 0x1bd   : > { %v10377_v2 = vmul.f32 %v15675_v3, %v10375_v55  ;;  %v10374_v48 = vadd.f32 %v15653_v11, %v2782_v58  ;;  %v2787_v38 = vadd.f32 %v13122_v34, %v15526_v40  ;;  %v15773_v15 = vpop.f32.mrf.mxu1  ;;  %13457 = vmatmul.mubr.bf16.gmra.mxu1 %v14441_v59  ;;  %v10386_v4 = vmax.f32 %v10384_v28, 0.0  ;;  %13412 = vmatprep.mubr.bf16.mxu0 %v14444_v29  ;;  %v14447_v59 = vld [vmem:[%s14850_s10 + $0xe8] sm:$0xff]  }
 0x1be   : > { %v10389_v14 = vadd.f32 %v15699_v31, %v10387_v60  ;;  %v2682_v44 = vpop.f32.mrf.mxu0  ;;  %13460 = vmatprep.mubr.bf16.mxu1 %v14445_v41  ;;  %13489 = vmatpush3.bf16.msra.mxu0 %v14454_v47  ;;  %v2020_v46 = vadd.f32 %v15573_v30, %v15385_v51 }
 0x1bf   : > { %v10379_v55 = vadd.f32 %v15699_v31, %v10377_v2  ;;  %v10376_v43 = vmax.f32 %v10374_v48, 0.0  ;;  %v10409_v58 = vadd.f32 %v15653_v11, %v2787_v38  ;;  %v2785_v40 = vadd.f32 %v2682_v44, %v15537_v45  ;;  %v15782_v34 = vpop.f32.mrf.mxu1  ;;  %13537 = vmatpush3.bf16.msra.mxu1 %v14455_v50  ;;  %13490 = vmatprep.subr.bf16.mxu0 %v14460_v37  ;;  %v14450_v2 = vld [vmem:[%s14850_s10 + $0x2f0] sm:$0xff]  }
 0x1c0   : > { %v10388_v29 = vmul.f32 %v15675_v3, %v10386_v4  ;;  %v13123_v41 = vpop.f32.mrf.mxu0  ;;  %13538 = vmatprep.subr.bf16.mxu1 %v14461_v26  ;;  %v2405_v48 = vadd.f32 %v15554_v22, %v2019_v54  ;;  %v14467_v4 = vld [vmem:[%s17917_s1 + $0x8] sm:$0xff]   ;;  %v2406_v53 = vadd.f32 %v15575_v33, %v2020_v46 }
 0x1c1   : > { %v10391_v45 = vmax.f32 %v10379_v55, %v10389_v14  ;;  %v10378_v60 = vmul.f32 %v15675_v3, %v10376_v43  ;;  %v10411_v28 = vmax.f32 %v10409_v58, 0.0  ;;  %v10399_v47 = vadd.f32 %v15653_v11, %v2785_v40  ;;  %v15793_v50 = vpop.f32.mrf.mxu1  ;;  %v14451_v14 = vld [vmem:[%s14850_s10 + $0xf0] sm:$0xff]  }
 0x1c2   : > { %v10390_v21 = vadd.f32 %v15699_v31, %v10388_v29  ;;  %v2788_v43 = vadd.f32 %v13123_v41, %v15541_v5  ;;  %v2685_v38 = vpop.f32.mrf.mxu0  ;;  %13491 = vmatpush3.bf16.msra.mxu0 %v14460_v37  ;;  %v15822_v5 = vld [vmem:[%s17917_s1 + $0x40] sm:$0xff]   ;;  %v2403_v37 = vadd.f32 %v15559_v62, %v2017_v8  ;;  %v17940_v62 = vmax.f32 %v15755_v19, %v15752_v13  ;;  %v14453_v13 = vld [vmem:[%s14850_s10 + $0xf8] sm:$0xff]  }
 0x1c3   : > { %v10393_v51 = vmax.f32 %v10369_v27, %v10391_v45  ;;  %v10380_v22 = vadd.f32 %v15699_v31, %v10378_v60  ;;  %v10413_v30 = vmul.f32 %v15675_v3, %v10411_v28  ;;  %v10401_v54 = vmax.f32 %v10399_v47, 0.0  ;;  %v15817_v44 = vpop.f32.mrf.mxu1  ;;  %13539 = vmatpush3.bf16.msra.mxu1 %v14461_v26  ;;  %13492 = vmatprep.subr.bf16.mxu0 %v14466_v6  ;;  %v14452_v47 = vld [vmem:[%s14850_s10 + $0x2f8] sm:$0xff]  }
 0x1c4   : > { %v10410_v27 = vadd.f32 %v15653_v11, %v2788_v43  ;;  %v2786_v55 = vadd.f32 %v2685_v38, %v15552_v17  ;;  %v13126_v58 = vpop.f32.mrf.mxu0  ;;  %13413 = vmatmul.mubr.bf16.gmra.mxu0 %v14446_v56  ;;  %13540 = vmatprep.subr.bf16.mxu1 %v14467_v4 }
 0x1c5   : > { %10395 = vst [vmem:[%s15804_s9] sm:$0xff] %v10393_v51  ;;  %v10392_v26 = vmax.f32 %v10380_v22, %v10390_v21  ;;  %v10403_v40 = vmul.f32 %v15675_v3, %v10401_v54  ;;  %v2791_v29 = vadd.f32 %v13126_v58, %v2405_v48  ;;  %v15834_v41 = vpop.f32.mrf.mxu1  ;;  %13461 = vmatmul.mubr.bf16.gmra.mxu1 %v14447_v59  ;;  %v14456_v22 = vld [vmem:[%s14850_s10 + $0x300] sm:$0xff]   ;;  %v15871_v58 = vld [vmem:[%s17917_s1 + $0xb8] sm:$0xff]  }
 0x1c6   : > { %v15838_v9 = vadd.f32 %v15699_v31, %v10413_v30  ;;  %v10412_v17 = vmax.f32 %v10410_v27, 0.0  ;;  %v10400_v56 = vadd.f32 %v15653_v11, %v2786_v55  ;;  %v2698_v45 = vpop.f32.mrf.mxu0  ;;  %13416 = vmatprep.mubr.bf16.mxu0 %v14450_v2  ;;  %13464 = vmatprep.mubr.bf16.mxu1 %v14451_v14  ;;  %v2404_v48 = vadd.f32 %v15580_v52, %v2018_v49  ;;  %v14457_v54 = vld [vmem:[%s14850_s10 + $0x100] sm:$0xff]  }
 0x1c7   : > { %v10394_v8 = vmax.f32 %v17940_v62, %v10392_v26  ;;  %v15845_v60 = vadd.f32 %v15699_v31, %v10403_v40  ;;  %v10431_v33 = vadd.f32 %v15653_v11, %v2791_v29  ;;  %v2789_v59 = vadd.f32 %v2698_v45, %v2403_v37  ;;  %v15848_v28 = vpop.f32.mrf.mxu1  ;;  %13493 = vmatpush3.bf16.msra.mxu0 %v14466_v6  ;;  %v15876_v37 = vld [vmem:[%s17917_s1 + $0xf8] sm:$0xff]  }
 0x1c8   : > { %v10414_v2 = vmul.f32 %v15675_v3, %v10412_v17  ;;  %v10402_v46 = vmax.f32 %v10400_v56, 0.0  ;;  %v13127_v21 = vpop.f32.mrf.mxu0  ;;  %13541 = vmatpush3.bf16.msra.mxu1 %v14467_v4  ;;  %13494 = vmatprep.subr.bf16.mxu0 %v15822_v5 }
 0x1c9   : > { %10396 = vst [vmem:[%s15804_s9 + $0x8] sm:$0xff] %v10394_v8  ;;  %v10417_v19 = vmax.f32 %v15845_v60, %v15838_v9  ;;  %v10433_v43 = vmax.f32 %v10431_v33, 0.0  ;;  %v10421_v38 = vadd.f32 %v15653_v11, %v2789_v59  ;;  %v2792_v14 = vadd.f32 %v13127_v21, %v2406_v53  ;;  %v15858_v51 = vpop.f32.mrf.mxu1  ;;  %13542 = vmatprep.subr.bf16.mxu1 %v14473_v18 }
 0x1ca   : > { %v10404_v52 = vmul.f32 %v15675_v3, %v10402_v46  ;;  %v2701_v30 = vpop.f32.mrf.mxu0  ;;  %v15879_v26 = vadd.f32 %v15699_v31, %v10414_v2  ;;  %v14458_v2 = vld [vmem:[%s14850_s10 + $0x308] sm:$0xff]   ;;  %v2025_v21 = vadd.f32 %v15601_v36, %v15413_v16 }
 0x1cb   : > { %v10435_v6 = vmul.f32 %v15675_v3, %v10433_v43  ;;  %v10423_v4 = vmax.f32 %v10421_v38, 0.0  ;;  %v10432_v49 = vadd.f32 %v15653_v11, %v2792_v14  ;;  %v2790_v27 = vadd.f32 %v2701_v30, %v2404_v48  ;;  %v15866_v55 = vpop.f32.mrf.mxu1  ;;  %13495 = vmatpush3.bf16.msra.mxu0 %v15822_v5  ;;  %v14459_v46 = vld [vmem:[%s14850_s10 + $0x108] sm:$0xff]  }
 0x1cc   : > { %v15882_v40 = vadd.f32 %v15699_v31, %v10404_v52  ;;  %v13130_v29 = vpop.f32.mrf.mxu0  ;;  %13417 = vmatmul.mubr.bf16.gmra.mxu0 %v14452_v47  ;;  %13543 = vmatpush3.bf16.msra.mxu1 %v14473_v18  ;;  %v2028_v14 = vadd.f32 %v15610_v61, %v15419_v20 }
 0x1cd   : > { %v10425_v53 = vmul.f32 %v15675_v3, %v10423_v4  ;;  %v10434_v9 = vmax.f32 %v10432_v49, 0.0  ;;  %v10422_v17 = vadd.f32 %v15653_v11, %v2790_v27  ;;  %v15886_v56 = vpop.f32.mrf.mxu1  ;;  %13465 = vmatmul.mubr.bf16.gmra.mxu1 %v14453_v13  ;;  %13420 = vmatprep.mubr.bf16.mxu0 %v14456_v22  ;;  %v10437_v62 = vadd.f32 %v15699_v31, %v10435_v6  ;;  %v14462_v6 = vld [vmem:[%s14850_s10 + $0x310] sm:$0xff]  }
 0x1ce   : > { %v10418_v45 = vmax.f32 %v15882_v40, %v15879_v26  ;;  %v2795_v8 = vadd.f32 %v13130_v29, %v15586_v57  ;;  %v2714_v60 = vpop.f32.mrf.mxu0  ;;  %13468 = vmatprep.mubr.bf16.mxu1 %v14457_v54  ;;  %13576 = vmatprep.subr.bf16.mxu0 %v15871_v58  ;;  %v14463_v4 = vld [vmem:[%s14850_s10 + $0x110] sm:$0xff]  }
 0x1cf   : > { %v10427_v18 = vadd.f32 %v15699_v31, %v10425_v53  ;;  %v10436_v33 = vmul.f32 %v15675_v3, %v10434_v9  ;;  %v10424_v59 = vmax.f32 %v10422_v17, 0.0  ;;  %v2793_v47 = vadd.f32 %v2714_v60, %v15591_v25  ;;  %v15896_v48 = vpop.f32.mrf.mxu1  ;;  %13624 = vmatprep.subr.bf16.mxu1 %v15876_v37  ;;  %v17941_v40 = vld [vmem:[#allocation9_spill] sm:$0xff]  ;;  %v17942_v17 = vld [vmem:[#allocation6_spill] sm:$0xff]  ;;  %v17944_v60 = vld [vmem:[#allocation8_spill] sm:$0xff] }
 0x1d0   : > { %v10457_v57 = vadd.f32 %v15653_v11, %v2795_v8  ;;  %v13131_v5 = vpop.f32.mrf.mxu0  ;;  %v2026_v20 = vadd.f32 %v17941_v40, %v15422_v23  ;;  %v17943_v23 = vld [vmem:[#allocation7_spill] sm:$0xff] }
 0x1d1   : > { %v10439_v13 = vmax.f32 %v10427_v18, %v10437_v62  ;;  %v10426_v43 = vmul.f32 %v15675_v3, %v10424_v59  ;;  %v10447_v25 = vadd.f32 %v15653_v11, %v2793_v47  ;;  %v15907_v38 = vpop.f32.mrf.mxu1  ;;  %v10438_v22 = vadd.f32 %v15699_v31, %v10436_v33  ;;  %v14469_v40 = vld [vmem:[%s14850_s10 + $0x120] sm:$0xff]  }
 0x1d2   : > { %v10459_v52 = vmax.f32 %v10457_v57, 0.0  ;;  %v2796_v30 = vadd.f32 %v13131_v5, %v15595_v24  ;;  %v2717_v54 = vpop.f32.mrf.mxu0  ;;  %v2411_v8 = vadd.f32 %v17943_v23, %v2025_v21  ;;  %v2414_v18 = vadd.f32 %v17944_v60, %v2028_v14  ;;  %v14464_v21 = vld [vmem:[%s14850_s10 + $0x318] sm:$0xff]  }
 0x1d3   : > { %v10441_v16 = vmax.f32 %v10417_v19, %v10439_v13  ;;  %v10428_v36 = vadd.f32 %v15699_v31, %v10426_v43  ;;  %v10449_v49 = vmax.f32 %v10447_v25, 0.0  ;;  %v2794_v27 = vadd.f32 %v2717_v54, %v15598_v42  ;;  %v15917_v26 = vpop.f32.mrf.mxu1  ;;  %v14465_v43 = vld [vmem:[%s14850_s10 + $0x118] sm:$0xff]  }
 0x1d4   : > { %v10461_v61 = vmul.f32 %v15675_v3, %v10459_v52  ;;  %v10458_v29 = vadd.f32 %v15653_v11, %v2796_v30  ;;  %v13134_v53 = vpop.f32.mrf.mxu0  ;;  %13421 = vmatmul.mubr.bf16.gmra.mxu0 %v14458_v2  ;;  %v17945_v25 = vld [vmem:[#allocation10_spill] sm:$0xff] }
 0x1d5   : > { %10443 = vst [vmem:[%s15804_s9 + $0x10] sm:$0xff] %v10441_v16  ;;  %v10440_v24 = vmax.f32 %v10428_v36, %v10438_v22  ;;  %v10451_v19 = vmul.f32 %v15675_v3, %v10449_v49  ;;  %v10448_v9 = vadd.f32 %v15653_v11, %v2794_v27  ;;  %v2799_v42 = vadd.f32 %v13134_v53, %v17942_v17  ;;  %v15927_v62 = vpop.f32.mrf.mxu1  ;;  %v14468_v36 = vld [vmem:[%s14850_s10 + $0x320] sm:$0xff]  }
 0x1d6   : > { %13469 = vmatmul.mubr.bf16.gmra.mxu1 %v14459_v46  ;;  %v15932_v33 = vadd.f32 %v15699_v31, %v10461_v61  ;;  %v10460_v59 = vmax.f32 %v10458_v29, 0.0  ;;  %v2730_v47 = vpop.f32.mrf.mxu0  ;;  %13424 = vmatprep.mubr.bf16.mxu0 %v14462_v6  ;;  %v2412_v14 = vadd.f32 %v17945_v25, %v2026_v20  ;;  %v14474_v25 = vld [vmem:[%s14850_s10 + $0x310] sm:$0xff]  }
 0x1d7   : > { %13472 = vmatprep.mubr.bf16.mxu1 %v14463_v4  ;;  %v10442_v2 = vmax.f32 %v10418_v45, %v10440_v24  ;;  %v15935_v57 = vadd.f32 %v15699_v31, %v10451_v19  ;;  %v10450_v5 = vmax.f32 %v10448_v9, 0.0  ;;  %v10479_v46 = vadd.f32 %v15653_v11, %v2799_v42  ;;  %v15938_v13 = vpop.f32.mrf.mxu1 }
 0x1d8   : > { %v10462_v22 = vmul.f32 %v15675_v3, %v10460_v59  ;;  %v2797_v52 = vadd.f32 %v2730_v47, %v2411_v8  ;;  %v13135_v30 = vpop.f32.mrf.mxu0  ;;  %v14470_v47 = vld [vmem:[%s14850_s10 + $0x328] sm:$0xff]  }
 0x1d9   : > { %10444 = vst [vmem:[%s15804_s9 + $0x18] sm:$0xff] %v10442_v2  ;;  %v10465_v45 = vmax.f32 %v15935_v57, %v15932_v33  ;;  %v10452_v54 = vmul.f32 %v15675_v3, %v10450_v5  ;;  %v10481_v6 = vmax.f32 %v10479_v46, 0.0  ;;  %v2800_v4 = vadd.f32 %v13135_v30, %v2414_v18  ;;  %v15948_v16 = vpop.f32.mrf.mxu1 }
 0x1da   : > { %v10469_v49 = vadd.f32 %v15653_v11, %v2797_v52  ;;  %v2733_v27 = vpop.f32.mrf.mxu0  ;;  %v15954_v20 = vadd.f32 %v15699_v31, %v10462_v22  ;;  %v17946_v52 = vld [vmem:[#allocation3_spill] sm:$0xff] }
 0x1db   : > { %v15957_v61 = vadd.f32 %v15699_v31, %v10452_v54  ;;  %v10480_v29 = vadd.f32 %v15653_v11, %v2800_v4  ;;  %v2798_v53 = vadd.f32 %v2733_v27, %v2412_v14  ;;  %v15960_v24 = vpop.f32.mrf.mxu1  ;;  %v10483_v19 = vmul.f32 %v15675_v3, %v10481_v6 }
 0x1dc   : > { %v10471_v9 = vmax.f32 %v10469_v49, 0.0  ;;  %v13138_v17 = vpop.f32.mrf.mxu0  ;;  %13425 = vmatmul.mubr.bf16.gmra.mxu0 %v14464_v21  ;;  %v14471_v21 = vld [vmem:[%s14850_s10 + $0x128] sm:$0xff]   ;;  %v2033_v30 = vadd.f32 %v15636_v32, %v17946_v52  ;;  %v17952_v52 = vld [vmem:[#allocation14_spill] sm:$0xff] }
 0x1dd   : > { %v10466_v42 = vmax.f32 %v15957_v61, %v15954_v20  ;;  %v10482_v23 = vmax.f32 %v10480_v29, 0.0  ;;  %v10470_v8 = vadd.f32 %v15653_v11, %v2798_v53  ;;  %v15966_v60 = vpop.f32.mrf.mxu1  ;;  %13428 = vmatprep.mubr.bf16.mxu0 %v14468_v36  ;;  %v2803_v33 = vadd.f32 %v13138_v17, %v15621_v63  ;;  %v17947_v36 = vld [vmem:[#allocation4_spill] sm:$0xff]  ;;  %v14475_v29 = vld [vmem:[%s14850_s10 + $0x100] sm:$0xff]  }
 0x1de   : > { %13473 = vmatmul.mubr.bf16.gmra.mxu1 %v14465_v43  ;;  %v10473_v18 = vmul.f32 %v15675_v3, %v10471_v9  ;;  %v2746_v59 = vpop.f32.mrf.mxu0  ;;  %v10485_v43 = vadd.f32 %v15699_v31, %v10483_v19  ;;  %v2036_v49 = vadd.f32 %v15644_v10, %v17947_v36  ;;  %v17948_v9 = vld [vmem:[#allocation11_spill] sm:$0xff] }
 0x1df   : > { %13476 = vmatprep.mubr.bf16.mxu1 %v14469_v40  ;;  %v10484_v2 = vmul.f32 %v15675_v3, %v10482_v23  ;;  %v10472_v57 = vmax.f32 %v10470_v8, 0.0  ;;  %v2801_v5 = vadd.f32 %v2746_v59, %v15626_v12  ;;  %v15973_v46 = vpop.f32.mrf.mxu1  ;;  %v10505_v22 = vadd.f32 %v15653_v11, %v2803_v33  ;;  %v17949_v23 = vld [vmem:[#allocation5_spill] sm:$0xff]  ;;  %v17950_v8 = vld [vmem:[#allocation15_spill] sm:$0xff] }
 0x1e0   : > { %v10475_v14 = vadd.f32 %v15699_v31, %v10473_v18  ;;  %v13139_v63 = vpop.f32.mrf.mxu0  ;;  %v2034_v18 = vadd.f32 %v17950_v8, %v17949_v23 }
 0x1e1   : > { %v10474_v54 = vmul.f32 %v15675_v3, %v10472_v57  ;;  %v10495_v6 = vadd.f32 %v15653_v11, %v2801_v5  ;;  %v2804_v12 = vadd.f32 %v13139_v63, %v15630_v1  ;;  %v15985_v4 = vpop.f32.mrf.mxu1  ;;  %v10486_v40 = vadd.f32 %v15699_v31, %v10484_v2 }
 0x1e2   : > { %v10487_v27 = vmax.f32 %v10475_v14, %v10485_v43  ;;  %v10507_v20 = vmax.f32 %v10505_v22, 0.0  ;;  %v2749_v61 = vpop.f32.mrf.mxu0  ;;  %v17951_v22 = vld [vmem:[#allocation13_spill] sm:$0xff] }
 0x1e3   : > { %v10476_v53 = vadd.f32 %v15699_v31, %v10474_v54  ;;  %v10497_v32 = vmax.f32 %v10495_v6, 0.0  ;;  %v10506_v19 = vadd.f32 %v15653_v11, %v2804_v12  ;;  %v2802_v17 = vadd.f32 %v2749_v61, %v17948_v9  ;;  %v15994_v1 = vpop.f32.mrf.mxu1  ;;  %v17953_v54 = vld [vmem:[#allocation12_spill] sm:$0xff] }
 0x1e4   : > { %v10489_v10 = vmax.f32 %v10465_v45, %v10487_v27  ;;  %v10509_v33 = vmul.f32 %v15675_v3, %v10507_v20  ;;  %v13142_v59 = vpop.f32.mrf.mxu0  ;;  %13429 = vmatmul.mubr.bf16.gmra.mxu0 %v14470_v47  ;;  %v2419_v63 = vadd.f32 %v17951_v22, %v2033_v30  ;;  %v2422_v45 = vadd.f32 %v17952_v52, %v2036_v49  ;;  %v14476_v49 = vld [vmem:[%s14850_s10 + $0x318] sm:$0xff]   ;;  %v14481_v22 = vld [vmem:[%s14850_s10 + $0x110] sm:$0xff]  }
 0x1e5   : > { %v10488_v2 = vmax.f32 %v10476_v53, %v10486_v40  ;;  %v10499_v57 = vmul.f32 %v15675_v3, %v10497_v32  ;;  %v10508_v5 = vmax.f32 %v10506_v19, 0.0  ;;  %v10496_v43 = vadd.f32 %v15653_v11, %v2802_v17  ;;  %v16001_v14 = vpop.f32.mrf.mxu1  ;;  %13496 = vmatprep.mubr.bf16.mxu0 %v14474_v25  ;;  %v14477_v40 = vld [vmem:[%s14850_s10 + $0x108] sm:$0xff]  }
 0x1e6   : > { %13477 = vmatmul.mubr.bf16.gmra.mxu1 %v14471_v21  ;;  %10491 = vst [vmem:[%s15804_s9 + $0x20] sm:$0xff] %v10489_v10  ;;  %v16007_v47 = vadd.f32 %v15699_v31, %v10509_v33  ;;  %v2807_v6 = vadd.f32 %v13142_v59, %v17953_v54  ;;  %v2762_v12 = vpop.f32.mrf.mxu0  ;;  %v17954_v32 = vld [vmem:[#allocation16_spill] sm:$0xff]  ;;  %v14480_v33 = vld [vmem:[%s14850_s10 + $0x320] sm:$0xff]   ;;  %v14485_v54 = vld [vmem:[%s17917_s1 + $0xf0] sm:$0xff]  }
 0x1e7   : > { %13544 = vmatprep.mubr.bf16.mxu1 %v14475_v29  ;;  %v10490_v36 = vmax.f32 %v10466_v42, %v10488_v2  ;;  %v16011_v27 = vadd.f32 %v15699_v31, %v10499_v57  ;;  %v10510_v21 = vmul.f32 %v15675_v3, %v10508_v5  ;;  %v10498_v25 = vmax.f32 %v10496_v43, 0.0  ;;  %v16014_v30 = vpop.f32.mrf.mxu1  ;;  %v14766_v2 = vld [vmem:[%s17918_s2] ss:$0 sm:$0xff] }
 0x1e8   : > { %v10527_v20 = vadd.f32 %v15653_v11, %v2807_v6  ;;  %v2805_v61 = vadd.f32 %v2762_v12, %v2419_v63  ;;  %v13143_v53 = vpop.f32.mrf.mxu0  ;;  %v2420_v19 = vadd.f32 %v17954_v32, %v2034_v18  ;;  %v14482_v32 = vld [vmem:[%s14850_s10 + $0x328] sm:$0xff]  }
 0x1e9   : > { %10492 = vst [vmem:[%s15804_s9 + $0x28] sm:$0xff] %v10490_v36  ;;  %v10513_v42 = vmax.f32 %v16011_v27, %v16007_v47  ;;  %v10500_v29 = vmul.f32 %v15675_v3, %v10498_v25  ;;  %v2808_v9 = vadd.f32 %v13143_v53, %v2422_v45  ;;  %v16024_v17 = vpop.f32.mrf.mxu1  ;;  %v16029_v59 = vadd.f32 %v15699_v31, %v10510_v21  ;;  %v17955_v21 = vld [vmem:[#allocation17_spill] sm:$0xff] }
 0x1ea   : > { %v10529_v23 = vmax.f32 %v10527_v20, 0.0  ;;  %v10517_v8 = vadd.f32 %v15653_v11, %v2805_v61  ;;  %v2765_v10 = vpop.f32.mrf.mxu0  ;;  %v14484_v11 = vld [vmem:[%s17917_s1 + $0xb0] sm:$0xff]  }
 0x1eb   : > { %v16032_v18 = vadd.f32 %v15699_v31, %v10500_v29  ;;  %v10528_v57 = vadd.f32 %v14766_v2, %v2808_v9  ;;  %v2806_v5 = vadd.f32 %v2765_v10, %v2420_v19  ;;  %v16037_v43 = vpop.f32.mrf.mxu1  ;;  %v14486_v10 = vld [vmem:[%s14850_s10 + $0x330] sm:$0xff]  }
 0x1ec   : > { %v10531_v63 = vmul.f32 %v15675_v3, %v10529_v23  ;;  %v10519_v52 = vmax.f32 %v10517_v8, 0.0  ;;  %v13210_v45 = vpop.f32.mrf.mxu0  ;;  %13497 = vmatmul.mubr.bf16.vlgmr.msra.gmra.mxu0 %v14476_v49  ;;  %v14490_v3 = vld [vmem:[%s17917_s1 + $0xa8] sm:$0xff]   ;;  %v14767_v49 = vld [vmem:[%s17918_s2 + $0x1] ss:$0 sm:$0xff]  ;;  %v14483_v8 = vld [vmem:[%s14850_s10 + $0x118] sm:$0xff]  }
 0x1ed   : > { %v10514_v6 = vmax.f32 %v16032_v18, %v16029_v59  ;;  %v10530_v12 = vmax.f32 %v10528_v57, 0.0  ;;  %v10518_v36 = vadd.f32 %v14766_v2, %v2806_v5  ;;  %v3429_v25 = vadd.f32 %v13210_v45, %v17955_v21  ;;  %v13258_v20 = vpop.f32.mrf.mxu1  ;;  %13577 = vmatpush3.bf16.msra.mxu0 %v15871_v58  ;;  %13500 = vmatprep.mubr.bf16.mxu0 %v14480_v33  ;;  %v17956_v58 = vld [vmem:[#allocation18_spill] sm:$0xff]  ;;  %v14491_v59 = vld [vmem:[%s17917_s1 + $0xe8] sm:$0xff]   ;;  %v17957_v5 = vld [vmem:[#allocation19_spill] sm:$0xff] }
 0x1ee   : > { %13545 = vmatmul.mubr.bf16.vlgmr.msra.gmra.mxu1 %v14477_v40  ;;  %v10521_v61 = vmul.f32 %v14767_v49, %v10519_v52  ;;  %v3420_v53 = vpop.f32.mrf.mxu0  ;;  %13578 = vmatprep.subr.bf16.mxu0 %v14484_v11 }
 0x1ef   : > { %13625 = vmatpush3.bf16.msra.mxu1 %v15876_v37  ;;  %v10532_v19 = vmul.f32 %v14767_v49, %v10530_v12  ;;  %v10520_v29 = vmax.f32 %v10518_v36, 0.0  ;;  %v16059_v40 = vadd.f32 %v13258_v20, %v3429_v25  ;;  %v3421_v9 = vadd.f32 %v3420_v53, %v17956_v58  ;;  %v3773_v23 = vpop.f32.mrf.mxu1  ;;  %13548 = vmatprep.mubr.bf16.mxu1 %v14481_v22  ;;  %v14487_v36 = vld [vmem:[%s14850_s10 + $0x120] sm:$0xff]   ;;  %v17958_v20 = vld [vmem:[#allocation20_spill] sm:$0xff] }
 0x1f0   : > { %v10533_v37 = vadd.f32 %v15699_v31, %v10531_v63  ;;  %v10523_v33 = vadd.f32 %v15699_v31, %v10521_v61  ;;  %v13211_v18 = vpop.f32.mrf.mxu0  ;;  %13626 = vmatprep.subr.bf16.mxu1 %v14485_v54  ;;  %v14768_v63 = vld [vmem:[%s17918_s2 + $0x2] ss:$0 sm:$0xff] }
 0x1f1   : > { %v10522_v2 = vmul.f32 %v14767_v49, %v10520_v29  ;;  %v16069_v57 = vadd.f32 %v3773_v23, %v3421_v9  ;;  %v3432_v52 = vadd.f32 %v13211_v18, %v17957_v5  ;;  %v13259_v22 = vpop.f32.mrf.mxu1  ;;  %13579 = vmatpush3.bf16.msra.mxu0 %v14484_v11  ;;  %v10534_v21 = vadd.f32 %v14768_v63, %v10532_v19  ;;  %v14496_v11 = vld [vmem:[%s17917_s1 + $0xa0] sm:$0xff]   ;;  %v14489_v18 = vld [vmem:[%s14850_s10 + $0x128] sm:$0xff]  }
 0x1f2   : > { %v10535_v45 = vmax.f32 %v10523_v33, %v10533_v37  ;;  %v3423_v12 = vpop.f32.mrf.mxu0  ;;  %13580 = vmatprep.subr.bf16.mxu0 %v14490_v3  ;;  %v14488_v33 = vld [vmem:[%s14850_s10 + $0x338] sm:$0xff]  }
 0x1f3   : > { %13627 = vmatpush3.bf16.msra.mxu1 %v14485_v54  ;;  %v10524_v31 = vadd.f32 %v14768_v63, %v10522_v2  ;;  %v16076_v25 = vadd.f32 %v13259_v22, %v3432_v52  ;;  %v3424_v49 = vadd.f32 %v3423_v12, %v17958_v20  ;;  %v3776_v61 = vpop.f32.mrf.mxu1  ;;  %v14497_v54 = vld [vmem:[%s17917_s1 + $0xe0] sm:$0xff]   ;;  %v14508_v12 = vld [vmem:[%s17917_s1 + $0x90] sm:$0xff]  }
 0x1f4   : > { %13628 = vmatprep.subr.bf16.mxu1 %v14491_v59  ;;  %v10537_v53 = vmax.f32 %v10513_v42, %v10535_v45  ;;  %v13214_v19 = vpop.f32.mrf.mxu0  ;;  %13501 = vmatmul.mubr.bf16.gmra.mxu0 %v14482_v32  ;;  %v14492_v2 = vld [vmem:[%s14850_s10 + $0x340] sm:$0xff]  }
 0x1f5   : > { %v10536_v29 = vmax.f32 %v10524_v31, %v10534_v21  ;;  %v16088_v58 = vadd.f32 %v3776_v61, %v3424_v49  ;;  %v3445_v9 = vadd.f32 %v13214_v19, %v15721_v0  ;;  %v13262_v23 = vpop.f32.mrf.mxu1  ;;  %13504 = vmatprep.mubr.bf16.mxu0 %v14486_v10  ;;  %13581 = vmatpush3.bf16.msra.mxu0 %v14490_v3  ;;  %v14502_v0 = vld [vmem:[%s17917_s1 + $0x98] sm:$0xff]   ;;  %v14514_v31 = vld [vmem:[%s17917_s1 + $0x88] sm:$0xff]   ;;  %v14498_v19 = vld [vmem:[%s14850_s10 + $0x350] sm:$0xff]  }
 0x1f6   : > { %13549 = vmatmul.mubr.bf16.gmra.mxu1 %v14483_v8  ;;  %10539 = vst [vmem:[%s15804_s9 + $0x30] sm:$0xff] %v10537_v53  ;;  %v3436_v37 = vpop.f32.mrf.mxu0  ;;  %13582 = vmatprep.subr.bf16.mxu0 %v14496_v11  ;;  %v14503_v8 = vld [vmem:[%s17917_s1 + $0xd8] sm:$0xff]   ;;  %v14494_v49 = vld [vmem:[%s14850_s10 + $0x348] sm:$0xff]  }
 0x1f7   : > { %13552 = vmatprep.mubr.bf16.mxu1 %v14487_v36  ;;  %v10538_v47 = vmax.f32 %v10514_v6, %v10536_v29  ;;  %v16093_v27 = vadd.f32 %v13262_v23, %v3445_v9  ;;  %v3437_v42 = vadd.f32 %v3436_v37, %v15731_v7  ;;  %v3789_v32 = vpop.f32.mrf.mxu1  ;;  %13629 = vmatpush3.bf16.msra.mxu1 %v14491_v59  ;;  %v14493_v59 = vld [vmem:[%s14850_s10 + $0x130] sm:$0xff]   ;;  %v14495_v53 = vld [vmem:[%s14850_s10 + $0x138] sm:$0xff]   ;;  %v14515_v29 = vld [vmem:[%s17917_s1 + $0xc8] sm:$0xff]  }
 0x1f8   : > { %v13215_v3 = vpop.f32.mrf.mxu0  ;;  %13630 = vmatprep.subr.bf16.mxu1 %v14497_v54 }
 0x1f9   : > { %10540 = vst [vmem:[%s15804_s9 + $0x38] sm:$0xff] %v10538_v47  ;;  %v16105_v6 = vadd.f32 %v3789_v32, %v3437_v42  ;;  %v3448_v7 = vadd.f32 %v13215_v3, %v15747_v39  ;;  %v13263_v10 = vpop.f32.mrf.mxu1  ;;  %13583 = vmatpush3.bf16.msra.mxu0 %v14496_v11  ;;  %v14509_v39 = vld [vmem:[%s17917_s1 + $0xd0] sm:$0xff]   ;;  %v14499_v47 = vld [vmem:[%s14850_s10 + $0x140] sm:$0xff]   ;;  %v16152_v3 = vld [vmem:[%s17917_s1 + $0x138] sm:$0xff]  }
 0x1fa   : > { %v3439_v5 = vpop.f32.mrf.mxu0  ;;  %13584 = vmatprep.subr.bf16.mxu0 %v14502_v0 }
 0x1fb   : > { %v16109_v52 = vadd.f32 %v13263_v10, %v3448_v7  ;;  %v3440_v22 = vadd.f32 %v3439_v5, %v15758_v35  ;;  %v3792_v45 = vpop.f32.mrf.mxu1  ;;  %13631 = vmatpush3.bf16.msra.mxu1 %v14497_v54  ;;  %v14500_v10 = vld [vmem:[%s14850_s10 + $0x358] sm:$0xff]  }
 0x1fc   : > { %v13218_v36 = vpop.f32.mrf.mxu0  ;;  %13505 = vmatmul.mubr.bf16.gmra.mxu0 %v14488_v33  ;;  %13632 = vmatprep.subr.bf16.mxu1 %v14503_v8  ;;  %v16158_v5 = vld [vmem:[%s17917_s1 + $0x178] sm:$0xff]  }
 0x1fd   : > { %v16118_v63 = vadd.f32 %v3792_v45, %v3440_v22  ;;  %v3461_v35 = vadd.f32 %v13218_v36, %v15773_v15  ;;  %v13266_v21 = vpop.f32.mrf.mxu1  ;;  %13508 = vmatprep.mubr.bf16.mxu0 %v14492_v2  ;;  %13585 = vmatpush3.bf16.msra.mxu0 %v14502_v0  ;;  %v14501_v45 = vld [vmem:[%s14850_s10 + $0x148] sm:$0xff]  }
 0x1fe   : > { %13553 = vmatmul.mubr.bf16.gmra.mxu1 %v14489_v18  ;;  %v3452_v20 = vpop.f32.mrf.mxu0  ;;  %13586 = vmatprep.subr.bf16.mxu0 %v14508_v12  ;;  %v14520_v18 = vld [vmem:[%s17917_s1 + $0x80] sm:$0xff]  }
 0x1ff   : > { %13556 = vmatprep.mubr.bf16.mxu1 %v14493_v59  ;;  %v16125_v61 = vadd.f32 %v13266_v21, %v3461_v35  ;;  %v3453_v11 = vadd.f32 %v3452_v20, %v15782_v34  ;;  %v3805_v54 = vpop.f32.mrf.mxu1  ;;  %13633 = vmatpush3.bf16.msra.mxu1 %v14503_v8  ;;  %v14505_v20 = vld [vmem:[%s14850_s10 + $0x150] sm:$0xff]  }
 0x200   : > { %v13219_v15 = vpop.f32.mrf.mxu0  ;;  %13634 = vmatprep.subr.bf16.mxu1 %v14509_v39 }
 0x201   : > { %v16133_v9 = vadd.f32 %v3805_v54, %v3453_v11  ;;  %v3464_v23 = vadd.f32 %v13219_v15, %v15793_v50  ;;  %v13267_v37 = vpop.f32.mrf.mxu1  ;;  %13587 = vmatpush3.bf16.msra.mxu0 %v14508_v12  ;;  %v14521_v50 = vld [vmem:[%s17917_s1 + $0xc0] sm:$0xff]  }
 0x202   : > { %v3455_v33 = vpop.f32.mrf.mxu0  ;;  %13588 = vmatprep.subr.bf16.mxu0 %v14514_v31  ;;  %v14504_v12 = vld [vmem:[%s14850_s10 + $0x360] sm:$0xff]  }
 0x203   : > { %v16137_v34 = vadd.f32 %v13267_v37, %v3464_v23  ;;  %v3456_v42 = vadd.f32 %v3455_v33, %v15817_v44  ;;  %v3808_v32 = vpop.f32.mrf.mxu1  ;;  %13635 = vmatpush3.bf16.msra.mxu1 %v14509_v39 }
 0x204   : > { %v13222_v2 = vpop.f32.mrf.mxu0  ;;  %13509 = vmatmul.mubr.bf16.gmra.mxu0 %v14494_v49  ;;  %13636 = vmatprep.subr.bf16.mxu1 %v14515_v29 }
 0x205   : > { %v16146_v0 = vadd.f32 %v3808_v32, %v3456_v42  ;;  %v3477_v44 = vadd.f32 %v13222_v2, %v15834_v41  ;;  %v13270_v8 = vpop.f32.mrf.mxu1  ;;  %13512 = vmatprep.mubr.bf16.mxu0 %v14498_v19  ;;  %13589 = vmatpush3.bf16.msra.mxu0 %v14514_v31  ;;  %v14510_v42 = vld [vmem:[%s14850_s10 + $0x370] sm:$0xff]   ;;  %v14511_v2 = vld [vmem:[%s14850_s10 + $0x160] sm:$0xff]  }
 0x206   : > { %13557 = vmatmul.mubr.bf16.gmra.mxu1 %v14495_v53  ;;  %v3468_v7 = vpop.f32.mrf.mxu0  ;;  %13590 = vmatprep.subr.bf16.mxu0 %v14520_v18 }
 0x207   : > { %13560 = vmatprep.mubr.bf16.mxu1 %v14499_v47  ;;  %v16160_v59 = vadd.f32 %v13270_v8, %v3477_v44  ;;  %v3469_v41 = vadd.f32 %v3468_v7, %v15848_v28  ;;  %v3821_v22 = vpop.f32.mrf.mxu1  ;;  %13637 = vmatpush3.bf16.msra.mxu1 %v14515_v29  ;;  %v14507_v47 = vld [vmem:[%s14850_s10 + $0x158] sm:$0xff]  }
 0x208   : > { %v13223_v39 = vpop.f32.mrf.mxu0  ;;  %13638 = vmatprep.subr.bf16.mxu1 %v14521_v50 }
 0x209   : > { %v16165_v36 = vadd.f32 %v3821_v22, %v3469_v41  ;;  %v3480_v35 = vadd.f32 %v13223_v39, %v15858_v51  ;;  %v13271_v21 = vpop.f32.mrf.mxu1  ;;  %13591 = vmatpush3.bf16.msra.mxu0 %v14520_v18 }
 0x20a   : > { %v3471_v31 = vpop.f32.mrf.mxu0  ;;  %13672 = vmatprep.subr.bf16.mxu0 %v16152_v3 }
 0x20b   : > { %v16169_v49 = vadd.f32 %v13271_v21, %v3480_v35  ;;  %v3472_v28 = vadd.f32 %v3471_v31, %v15866_v55  ;;  %v3824_v11 = vpop.f32.mrf.mxu1  ;;  %13639 = vmatpush3.bf16.msra.mxu1 %v14521_v50  ;;  %v14506_v55 = vld [vmem:[%s14850_s10 + $0x368] sm:$0xff]   ;;  %v14516_v21 = vld [vmem:[%s14850_s10 + $0x380] sm:$0xff]  }
 0x20c   : > { %v13226_v54 = vpop.f32.mrf.mxu0  ;;  %13513 = vmatmul.mubr.bf16.gmra.mxu0 %v14500_v10  ;;  %13720 = vmatprep.subr.bf16.mxu1 %v16158_v5  ;;  %v14513_v35 = vld [vmem:[%s14850_s10 + $0x168] sm:$0xff]  }
 0x20d   : > { %v16174_v51 = vadd.f32 %v3824_v11, %v3472_v28  ;;  %v3493_v53 = vadd.f32 %v13226_v54, %v15886_v56  ;;  %v13274_v15 = vpop.f32.mrf.mxu1  ;;  %13516 = vmatprep.mubr.bf16.mxu0 %v14504_v12  ;;  %v14517_v54 = vld [vmem:[%s14850_s10 + $0x170] sm:$0xff]  }
 0x20e   : > { %13561 = vmatmul.mubr.bf16.gmra.mxu1 %v14501_v45  ;;  %v3484_v19 = vpop.f32.mrf.mxu0  ;;  %v14512_v45 = vld [vmem:[%s14850_s10 + $0x378] sm:$0xff]  }
 0x20f   : > { %13564 = vmatprep.mubr.bf16.mxu1 %v14505_v20  ;;  %v16178_v29 = vadd.f32 %v13274_v15, %v3493_v53  ;;  %v3485_v23 = vadd.f32 %v3484_v19, %v15896_v48  ;;  %v3837_v37 = vpop.f32.mrf.mxu1 }
 0x210   : > { %v13227_v33 = vpop.f32.mrf.mxu0 }
 0x211   : > { %v16183_v32 = vadd.f32 %v3837_v37, %v3485_v23  ;;  %v3496_v18 = vadd.f32 %v13227_v33, %v15907_v38  ;;  %v13275_v56 = vpop.f32.mrf.mxu1  ;;  %v14518_v33 = vld [vmem:[%s14850_s10 + $0x388] sm:$0xff]  }
 0x212   : > { %v3487_v50 = vpop.f32.mrf.mxu0 }
 0x213   : > { %v16187_v44 = vadd.f32 %v13275_v56, %v3496_v18  ;;  %v3488_v8 = vadd.f32 %v3487_v50, %v15917_v26  ;;  %v3840_v7 = vpop.f32.mrf.mxu1  ;;  %v14519_v18 = vld [vmem:[%s14850_s10 + $0x178] sm:$0xff]   ;;  %v14522_v56 = vld [vmem:[%s14850_s10 + $0x110] sm:$0xff]  }
 0x214   : > { %v13230_v48 = vpop.f32.mrf.mxu0  ;;  %13517 = vmatmul.mubr.bf16.gmra.mxu0 %v14506_v55 }
 0x215   : > { %v16190_v10 = vadd.f32 %v3840_v7, %v3488_v8  ;;  %v3509_v41 = vadd.f32 %v13230_v48, %v15927_v62  ;;  %v13278_v22 = vpop.f32.mrf.mxu1  ;;  %13520 = vmatprep.mubr.bf16.mxu0 %v14510_v42  ;;  %v14523_v48 = vld [vmem:[%s14850_s10 + $0x320] sm:$0xff]  }
 0x216   : > { %13565 = vmatmul.mubr.bf16.gmra.mxu1 %v14507_v47  ;;  %v3500_v38 = vpop.f32.mrf.mxu0 }
 0x217   : > { %13568 = vmatprep.mubr.bf16.mxu1 %v14511_v2  ;;  %v16194_v12 = vadd.f32 %v13278_v22, %v3509_v41  ;;  %v3501_v39 = vadd.f32 %v3500_v38, %v15938_v13  ;;  %v3853_v26 = vpop.f32.mrf.mxu1 }
 0x218   : > { %v13231_v31 = vpop.f32.mrf.mxu0 }
 0x219   : > { %v16199_v20 = vadd.f32 %v3853_v26, %v3501_v39  ;;  %v3512_v28 = vadd.f32 %v13231_v31, %v15948_v16  ;;  %v13279_v62 = vpop.f32.mrf.mxu1 }
 0x21a   : > { %v3503_v11 = vpop.f32.mrf.mxu0 }
 0x21b   : > { %v16203_v53 = vadd.f32 %v13279_v62, %v3512_v28  ;;  %v3504_v15 = vadd.f32 %v3503_v11, %v15960_v24  ;;  %v3856_v19 = vpop.f32.mrf.mxu1  ;;  %v14525_v28 = vld [vmem:[%s14850_s10 + $0x328] sm:$0xff]  }
 0x21c   : > { %v13234_v13 = vpop.f32.mrf.mxu0  ;;  %13521 = vmatmul.mubr.bf16.gmra.mxu0 %v14512_v45 }
 0x21d   : > { %v16206_v55 = vadd.f32 %v3856_v19, %v3504_v15  ;;  %v3525_v23 = vadd.f32 %v13234_v13, %v15966_v60  ;;  %v13282_v37 = vpop.f32.mrf.mxu1  ;;  %13524 = vmatprep.mubr.bf16.mxu0 %v14516_v21  ;;  %v14528_v19 = vld [vmem:[%s14850_s10 + $0x120] sm:$0xff]   ;;  %v14529_v13 = vld [vmem:[%s14850_s10 + $0x330] sm:$0xff]  }
 0x21e   : > { %13569 = vmatmul.mubr.bf16.gmra.mxu1 %v14513_v35  ;;  %v3516_v16 = vpop.f32.mrf.mxu0 }
 0x21f   : > { %13572 = vmatprep.mubr.bf16.mxu1 %v14517_v54  ;;  %v16210_v47 = vadd.f32 %v13282_v37, %v3525_v23  ;;  %v3517_v42 = vadd.f32 %v3516_v16, %v15973_v46  ;;  %v3869_v24 = vpop.f32.mrf.mxu1 }
 0x220   : > { %v13235_v50 = vpop.f32.mrf.mxu0 }
 0x221   : > { %v16215_v2 = vadd.f32 %v3869_v24, %v3517_v42  ;;  %v3528_v8 = vadd.f32 %v13235_v50, %v15985_v4  ;;  %v13283_v60 = vpop.f32.mrf.mxu1 }
 0x222   : > { %v3519_v7 = vpop.f32.mrf.mxu0 }
 0x223   : > { %v16219_v41 = vadd.f32 %v13283_v60, %v3528_v8  ;;  %v3520_v22 = vadd.f32 %v3519_v7, %v15994_v1  ;;  %v3872_v38 = vpop.f32.mrf.mxu1  ;;  %v14524_v1 = vld [vmem:[%s14850_s10 + $0x118] sm:$0xff]   ;;  %v14530_v8 = vld [vmem:[%s14850_s10 + $0x128] sm:$0xff]  }
 0x224   : > { %v13238_v45 = vpop.f32.mrf.mxu0  ;;  %13525 = vmatmul.mubr.bf16.gmra.mxu0 %v14518_v33  ;;  %v14533_v33 = vld [vmem:[%s17917_s1 + $0x170] sm:$0xff]  }
 0x225   : > { %v16222_v46 = vadd.f32 %v3872_v38, %v3520_v22  ;;  %v3541_v39 = vadd.f32 %v13238_v45, %v16001_v14  ;;  %v13286_v26 = vpop.f32.mrf.mxu1  ;;  %13592 = vmatprep.mubr.bf16.mxu0 %v14522_v56  ;;  %v14539_v56 = vld [vmem:[%s17917_s1 + $0x168] sm:$0xff]   ;;  %v14534_v22 = vld [vmem:[%s14850_s10 + $0x130] sm:$0xff]  }
 0x226   : > { %13573 = vmatmul.mubr.bf16.gmra.mxu1 %v14519_v18  ;;  %v3532_v4 = vpop.f32.mrf.mxu0 }
 0x227   : > { %13640 = vmatprep.mubr.bf16.mxu1 %v14523_v48  ;;  %v16225_v35 = vadd.f32 %v13286_v26, %v3541_v39  ;;  %v3533_v21 = vadd.f32 %v3532_v4, %v16014_v30  ;;  %v3885_v31 = vpop.f32.mrf.mxu1  ;;  %v14532_v30 = vld [vmem:[%s17917_s1 + $0x130] sm:$0xff]   ;;  %v14535_v26 = vld [vmem:[%s14850_s10 + $0x340] sm:$0xff]  }
 0x228   : > { %v13239_v62 = vpop.f32.mrf.mxu0 }
 0x229   : > { %v16230_v11 = vadd.f32 %v3885_v31, %v3533_v21  ;;  %v3544_v54 = vadd.f32 %v13239_v62, %v16024_v17  ;;  %v13287_v14 = vpop.f32.mrf.mxu1  ;;  %v14538_v17 = vld [vmem:[%s17917_s1 + $0x128] sm:$0xff]   ;;  %v14544_v31 = vld [vmem:[%s17917_s1 + $0x120] sm:$0xff]  }
 0x22a   : > { %v3535_v15 = vpop.f32.mrf.mxu0 }
 0x22b   : > { %v16235_v23 = vadd.f32 %v13287_v14, %v3544_v54  ;;  %v3536_v37 = vadd.f32 %v3535_v15, %v16037_v43  ;;  %v3888_v16 = vpop.f32.mrf.mxu1  ;;  %v14536_v15 = vld [vmem:[%s14850_s10 + $0x138] sm:$0xff]  }
 0x22c   : > { %v13306_v42 = vpop.f32.mrf.mxu0  ;;  %13593 = vmatmul.mubr.bf16.vlgmr.msra.gmra.mxu0 %v14524_v1 }
 0x22d   : > { %v16247_v24 = vadd.f32 %v3888_v16, %v3536_v37  ;;  %v4287_v43 = vadd.f32 %v13306_v42, %v16059_v40  ;;  %v13354_v18 = vpop.f32.mrf.mxu1  ;;  %13673 = vmatpush3.bf16.msra.mxu0 %v16152_v3  ;;  %13596 = vmatprep.mubr.bf16.mxu0 %v14528_v19  ;;  %v14531_v40 = vld [vmem:[%s14850_s10 + $0x338] sm:$0xff]   ;;  %v14537_v37 = vld [vmem:[%s14850_s10 + $0x348] sm:$0xff]   ;;  %v14540_v16 = vld [vmem:[%s14850_s10 + $0x140] sm:$0xff]  }
 0x22e   : > { %13641 = vmatmul.mubr.bf16.vlgmr.msra.gmra.mxu1 %v14525_v28  ;;  %v4158_v50 = vpop.f32.mrf.mxu0  ;;  %13674 = vmatprep.subr.bf16.mxu0 %v14532_v30  ;;  %v14551_v19 = vld [vmem:[%s17917_s1 + $0x158] sm:$0xff]  }
 0x22f   : > { %13721 = vmatpush3.bf16.msra.mxu1 %v16158_v5  ;;  %v16256_v60 = vadd.f32 %v13354_v18, %v4287_v43  ;;  %v4285_v7 = vadd.f32 %v4158_v50, %v16069_v57  ;;  %v4543_v48 = vpop.f32.mrf.mxu1  ;;  %13644 = vmatprep.mubr.bf16.mxu1 %v14529_v13 }
 0x230   : > { %v13307_v3 = vpop.f32.mrf.mxu0  ;;  %13722 = vmatprep.subr.bf16.mxu1 %v14533_v33 }
 0x231   : > { %v16261_v38 = vadd.f32 %v4543_v48, %v4285_v7  ;;  %v4288_v45 = vadd.f32 %v13307_v3, %v16076_v25  ;;  %v13355_v5 = vpop.f32.mrf.mxu1  ;;  %13675 = vmatpush3.bf16.msra.mxu0 %v14532_v30  ;;  %v14545_v25 = vld [vmem:[%s17917_s1 + $0x160] sm:$0xff]   ;;  %v14562_v3 = vld [vmem:[%s17917_s1 + $0x108] sm:$0xff]  }
 0x232   : > { %v4161_v39 = vpop.f32.mrf.mxu0  ;;  %13676 = vmatprep.subr.bf16.mxu0 %v14538_v17 }
 0x233   : > { %13723 = vmatpush3.bf16.msra.mxu1 %v14533_v33  ;;  %v16265_v4 = vadd.f32 %v13355_v5, %v4288_v45  ;;  %v4286_v57 = vadd.f32 %v4161_v39, %v16088_v58  ;;  %v4546_v21 = vpop.f32.mrf.mxu1  ;;  %v14550_v58 = vld [vmem:[%s17917_s1 + $0x118] sm:$0xff]  }
 0x234   : > { %13724 = vmatprep.subr.bf16.mxu1 %v14539_v56  ;;  %v13310_v1 = vpop.f32.mrf.mxu0  ;;  %13597 = vmatmul.mubr.bf16.gmra.mxu0 %v14530_v8 }
 0x235   : > { %v16274_v28 = vadd.f32 %v4546_v21, %v4286_v57  ;;  %v4291_v62 = vadd.f32 %v13310_v1, %v16093_v27  ;;  %v13358_v54 = vpop.f32.mrf.mxu1  ;;  %13600 = vmatprep.mubr.bf16.mxu0 %v14534_v22  ;;  %13677 = vmatpush3.bf16.msra.mxu0 %v14538_v17  ;;  %v14541_v17 = vld [vmem:[%s14850_s10 + $0x350] sm:$0xff]   ;;  %v14542_v22 = vld [vmem:[%s14850_s10 + $0x148] sm:$0xff]  }
 0x236   : > { %13645 = vmatmul.mubr.bf16.gmra.mxu1 %v14531_v40  ;;  %v16280_v14 = vpop.f32.mrf.mxu0  ;;  %13678 = vmatprep.subr.bf16.mxu0 %v14544_v31  ;;  %v14546_v57 = vld [vmem:[%s14850_s10 + $0x150] sm:$0xff]   ;;  %v14563_v21 = vld [vmem:[%s17917_s1 + $0x148] sm:$0xff]  }
 0x237   : > { %13648 = vmatprep.mubr.bf16.mxu1 %v14535_v26  ;;  %v16286_v13 = vadd.f32 %v13358_v54, %v4291_v62  ;;  %v16288_v27 = vpop.f32.mrf.mxu1  ;;  %13725 = vmatpush3.bf16.msra.mxu1 %v14539_v56  ;;  %v14556_v56 = vld [vmem:[%s17917_s1 + $0x110] sm:$0xff]   ;;  %v14543_v26 = vld [vmem:[%s14850_s10 + $0x358] sm:$0xff]   ;;  %v14547_v54 = vld [vmem:[%s14850_s10 + $0x360] sm:$0xff]  }
 0x238   : > { %v13311_v30 = vpop.f32.mrf.mxu0  ;;  %13726 = vmatprep.subr.bf16.mxu1 %v14545_v25 }
 0x239   : > { %v4292_v33 = vadd.f32 %v13311_v30, %v16109_v52  ;;  %v13359_v42 = vpop.f32.mrf.mxu1  ;;  %13679 = vmatpush3.bf16.msra.mxu0 %v14544_v31  ;;  %v14557_v52 = vld [vmem:[%s17917_s1 + $0x150] sm:$0xff]  }
 0x23a   : > { %v16293_v43 = vpop.f32.mrf.mxu0  ;;  %13680 = vmatprep.subr.bf16.mxu0 %v14550_v58 }
 0x23b   : > { %v16296_v18 = vadd.f32 %v13359_v42, %v4292_v33  ;;  %v16298_v50 = vpop.f32.mrf.mxu1  ;;  %13727 = vmatpush3.bf16.msra.mxu1 %v14545_v25  ;;  %v14548_v42 = vld [vmem:[%s14850_s10 + $0x158] sm:$0xff]  }
 0x23c   : > { %v13314_v8 = vpop.f32.mrf.mxu0  ;;  %13601 = vmatmul.mubr.bf16.gmra.mxu0 %v14536_v15  ;;  %13728 = vmatprep.subr.bf16.mxu1 %v14551_v19 }
 0x23d   : > { %v4295_v7 = vadd.f32 %v13314_v8, %v16125_v61  ;;  %v13362_v48 = vpop.f32.mrf.mxu1  ;;  %13604 = vmatprep.mubr.bf16.mxu0 %v14540_v16  ;;  %13681 = vmatpush3.bf16.msra.mxu0 %v14550_v58 }
 0x23e   : > { %13649 = vmatmul.mubr.bf16.gmra.mxu1 %v14537_v37  ;;  %v4190_v40 = vpop.f32.mrf.mxu0  ;;  %13682 = vmatprep.subr.bf16.mxu0 %v14556_v56 }
 0x23f   : > { %13652 = vmatprep.mubr.bf16.mxu1 %v14541_v17  ;;  %v16311_v45 = vadd.f32 %v13362_v48, %v4295_v7  ;;  %v4293_v5 = vadd.f32 %v4190_v40, %v16133_v9  ;;  %v4575_v39 = vpop.f32.mrf.mxu1  ;;  %13729 = vmatpush3.bf16.msra.mxu1 %v14551_v19  ;;  %v14568_v19 = vld [vmem:[%s17917_s1 + $0x100] sm:$0xff]   ;;  %v16341_v17 = vld [vmem:[%s17917_s1 + $0x1b8] sm:$0xff]  }
 0x240   : > { %v13315_v61 = vpop.f32.mrf.mxu0  ;;  %13730 = vmatprep.subr.bf16.mxu1 %v14557_v52  ;;  %v14552_v7 = vld [vmem:[%s14850_s10 + $0x160] sm:$0xff]  }
 0x241   : > { %v16319_v31 = vadd.f32 %v4575_v39, %v4293_v5  ;;  %v4296_v25 = vadd.f32 %v13315_v61, %v16137_v34  ;;  %v13363_v1 = vpop.f32.mrf.mxu1  ;;  %13683 = vmatpush3.bf16.msra.mxu0 %v14556_v56  ;;  %v14569_v34 = vld [vmem:[%s17917_s1 + $0x140] sm:$0xff]   ;;  %v16346_v56 = vld [vmem:[%s17917_s1 + $0x78] sm:$0xff]   ;;  %v14553_v5 = vld [vmem:[%s14850_s10 + $0x370] sm:$0xff]  }
 0x242   : > { %v4193_v62 = vpop.f32.mrf.mxu0  ;;  %13684 = vmatprep.subr.bf16.mxu0 %v14562_v3 }
 0x243   : > { %v16323_v9 = vadd.f32 %v13363_v1, %v4296_v25  ;;  %v4294_v58 = vadd.f32 %v4193_v62, %v16146_v0  ;;  %v4578_v15 = vpop.f32.mrf.mxu1  ;;  %13731 = vmatpush3.bf16.msra.mxu1 %v14557_v52  ;;  %v14549_v52 = vld [vmem:[%s14850_s10 + $0x368] sm:$0xff]  }
 0x244   : > { %v13318_v37 = vpop.f32.mrf.mxu0  ;;  %13605 = vmatmul.mubr.bf16.gmra.mxu0 %v14542_v22  ;;  %13732 = vmatprep.subr.bf16.mxu1 %v14563_v21  ;;  %v14554_v25 = vld [vmem:[%s14850_s10 + $0x168] sm:$0xff]  }
 0x245   : > { %v16332_v16 = vadd.f32 %v4578_v15, %v4294_v58  ;;  %v4299_v0 = vadd.f32 %v13318_v37, %v16160_v59  ;;  %v13366_v30 = vpop.f32.mrf.mxu1  ;;  %13608 = vmatprep.mubr.bf16.mxu0 %v14546_v57  ;;  %13685 = vmatpush3.bf16.msra.mxu0 %v14562_v3  ;;  %v14555_v58 = vld [vmem:[%s14850_s10 + $0x378] sm:$0xff]   ;;  %v14558_v15 = vld [vmem:[%s14850_s10 + $0x170] sm:$0xff]  }
 0x246   : > { %13653 = vmatmul.mubr.bf16.gmra.mxu1 %v14543_v26  ;;  %v16335_v33 = vpop.f32.mrf.mxu0  ;;  %13686 = vmatprep.subr.bf16.mxu0 %v14568_v19 }
 0x247   : > { %13656 = vmatprep.mubr.bf16.mxu1 %v14547_v54  ;;  %v16348_v59 = vadd.f32 %v13366_v30, %v4299_v0  ;;  %v16350_v8 = vpop.f32.mrf.mxu1  ;;  %13733 = vmatpush3.bf16.msra.mxu1 %v14563_v21  ;;  %v14559_v30 = vld [vmem:[%s14850_s10 + $0x380] sm:$0xff]  }
 0x248   : > { %v13319_v48 = vpop.f32.mrf.mxu0  ;;  %13734 = vmatprep.subr.bf16.mxu1 %v14569_v34 }
 0x249   : > { %v4300_v40 = vadd.f32 %v13319_v48, %v16169_v49  ;;  %v13367_v22 = vpop.f32.mrf.mxu1  ;;  %13687 = vmatpush3.bf16.msra.mxu0 %v14568_v19 }
 0x24a   : > { %v16355_v3 = vpop.f32.mrf.mxu0  ;;  %13768 = vmatprep.subr.bf16.mxu0 %v16341_v17 }
 0x24b   : > { %v16358_v39 = vadd.f32 %v13367_v22, %v4300_v40  ;;  %v16360_v26 = vpop.f32.mrf.mxu1  ;;  %13735 = vmatpush3.bf16.msra.mxu1 %v14569_v34 }
 0x24c   : > { %v13322_v57 = vpop.f32.mrf.mxu0  ;;  %13609 = vmatmul.mubr.bf16.gmra.mxu0 %v14548_v42  ;;  %13816 = vmatprep.subr.bf16.mxu1 %v16346_v56 }
 0x24d   : > { %v4303_v49 = vadd.f32 %v13322_v57, %v16178_v29  ;;  %v13370_v61 = vpop.f32.mrf.mxu1  ;;  %13612 = vmatprep.mubr.bf16.mxu0 %v14552_v7 }
 0x24e   : > { %13657 = vmatmul.mubr.bf16.gmra.mxu1 %v14549_v52  ;;  %v4222_v21 = vpop.f32.mrf.mxu0 }
 0x24f   : > { %13660 = vmatprep.mubr.bf16.mxu1 %v14553_v5  ;;  %v16366_v1 = vadd.f32 %v13370_v61, %v4303_v49  ;;  %v4301_v62 = vadd.f32 %v4222_v21, %v16183_v32  ;;  %v4607_v54 = vpop.f32.mrf.mxu1  ;;  %v14560_v5 = vld [vmem:[%s14850_s10 + $0x178] sm:$0xff]   ;;  %v14564_v61 = vld [vmem:[%s14850_s10 + $0x180] sm:$0xff]  }
 0x250   : > { %v13323_v19 = vpop.f32.mrf.mxu0 }
 0x251   : > { %v16371_v34 = vadd.f32 %v4607_v54, %v4301_v62  ;;  %v4304_v37 = vadd.f32 %v13323_v19, %v16187_v44  ;;  %v13371_v29 = vpop.f32.mrf.mxu1 }
 0x252   : > { %v4225_v0 = vpop.f32.mrf.mxu0 }
 0x253   : > { %v16375_v42 = vadd.f32 %v13371_v29, %v4304_v37  ;;  %v4302_v52 = vadd.f32 %v4225_v0, %v16190_v10  ;;  %v4610_v7 = vpop.f32.mrf.mxu1  ;;  %v14561_v10 = vld [vmem:[%s14850_s10 + $0x388] sm:$0xff]  }
 0x254   : > { %v13326_v32 = vpop.f32.mrf.mxu0  ;;  %13613 = vmatmul.mubr.bf16.gmra.mxu0 %v14554_v25 }
 0x255   : > { %v16378_v48 = vadd.f32 %v4610_v7, %v4302_v52  ;;  %v4307_v40 = vadd.f32 %v13326_v32, %v16194_v12  ;;  %v13374_v22 = vpop.f32.mrf.mxu1  ;;  %13616 = vmatprep.mubr.bf16.mxu0 %v14558_v15  ;;  %v14565_v12 = vld [vmem:[%s14850_s10 + $0x390] sm:$0xff]   ;;  %v14567_v32 = vld [vmem:[%s14850_s10 + $0x398] sm:$0xff]  }
 0x256   : > { %13661 = vmatmul.mubr.bf16.gmra.mxu1 %v14555_v58  ;;  %v16381_v44 = vpop.f32.mrf.mxu0 }
 0x257   : > { %13664 = vmatprep.mubr.bf16.mxu1 %v14559_v30  ;;  %v16384_v57 = vadd.f32 %v13374_v22, %v4307_v40  ;;  %v16386_v49 = vpop.f32.mrf.mxu1  ;;  %v14570_v40 = vld [vmem:[%s14850_s10 + $0x120] sm:$0xff]  }
 0x258   : > { %v13327_v21 = vpop.f32.mrf.mxu0 }
 0x259   : > { %v4308_v25 = vadd.f32 %v13327_v21, %v16203_v53  ;;  %v13375_v62 = vpop.f32.mrf.mxu1  ;;  %v14566_v53 = vld [vmem:[%s14850_s10 + $0x188] sm:$0xff]  }
 0x25a   : > { %v16391_v54 = vpop.f32.mrf.mxu0 }
 0x25b   : > { %v16394_v58 = vadd.f32 %v13375_v62, %v4308_v25  ;;  %v16396_v15 = vpop.f32.mrf.mxu1 }
 0x25c   : > { %v13330_v19 = vpop.f32.mrf.mxu0  ;;  %13617 = vmatmul.mubr.bf16.gmra.mxu0 %v14560_v5 }
 0x25d   : > { %v4311_v37 = vadd.f32 %v13330_v19, %v16210_v47  ;;  %v13378_v29 = vpop.f32.mrf.mxu1  ;;  %13620 = vmatprep.mubr.bf16.mxu0 %v14564_v61 }
 0x25e   : > { %13665 = vmatmul.mubr.bf16.gmra.mxu1 %v14561_v10  ;;  %v4254_v0 = vpop.f32.mrf.mxu0  ;;  %v14571_v10 = vld [vmem:[%s14850_s10 + $0x330] sm:$0xff]  }
 0x25f   : > { %13668 = vmatprep.mubr.bf16.mxu1 %v14565_v12  ;;  %v16400_v30 = vadd.f32 %v13378_v29, %v4311_v37  ;;  %v4309_v52 = vadd.f32 %v4254_v0, %v16215_v2  ;;  %v4639_v7 = vpop.f32.mrf.mxu1  ;;  %v14572_v0 = vld [vmem:[%s14850_s10 + $0x128] sm:$0xff]  }
 0x260   : > { %v13331_v22 = vpop.f32.mrf.mxu0 }
 0x261   : > { %v16405_v21 = vadd.f32 %v4639_v7, %v4309_v52  ;;  %v4312_v5 = vadd.f32 %v13331_v22, %v16219_v41  ;;  %v13379_v47 = vpop.f32.mrf.mxu1 }
 0x262   : > { %v4257_v25 = vpop.f32.mrf.mxu0 }
 0x263   : > { %v16409_v61 = vadd.f32 %v13379_v47, %v4312_v5  ;;  %v4310_v62 = vadd.f32 %v4257_v25, %v16222_v46  ;;  %v4642_v12 = vpop.f32.mrf.mxu1  ;;  %v14573_v46 = vld [vmem:[%s14850_s10 + $0x338] sm:$0xff]   ;;  %v14576_v25 = vld [vmem:[%s14850_s10 + $0x130] sm:$0xff]  }
 0x264   : > { %v13334_v19 = vpop.f32.mrf.mxu0  ;;  %13621 = vmatmul.mubr.bf16.gmra.mxu0 %v14566_v53 }
 0x265   : > { %v16412_v2 = vadd.f32 %v4642_v12, %v4310_v62  ;;  %v4315_v37 = vadd.f32 %v13334_v19, %v16225_v35  ;;  %v13382_v29 = vpop.f32.mrf.mxu1  ;;  %13688 = vmatprep.mubr.bf16.mxu0 %v14570_v40  ;;  %v14577_v35 = vld [vmem:[%s14850_s10 + $0x340] sm:$0xff]   ;;  %v14581_v62 = vld [vmem:[%s17917_s1 + $0x70] sm:$0xff]   ;;  %v14586_v12 = vld [vmem:[%s17917_s1 + $0x1a8] sm:$0xff]  }
 0x266   : > { %13669 = vmatmul.mubr.bf16.gmra.mxu1 %v14567_v32  ;;  %v16415_v41 = vpop.f32.mrf.mxu0 }
 0x267   : > { %17959 = vst [vmem:[#allocation9_spill] sm:$0xff] %v16412_v2  ;;  %13736 = vmatprep.mubr.bf16.mxu1 %v14571_v10  ;;  %v16418_v52 = vadd.f32 %v13382_v29, %v4315_v37  ;;  %v16420_v7 = vpop.f32.mrf.mxu1  ;;  %v14580_v10 = vld [vmem:[%s17917_s1 + $0x1b0] sm:$0xff]  }
 0x268   : > { %v13335_v22 = vpop.f32.mrf.mxu0 }
 0x269   : > { %17960 = vst [vmem:[#allocation6_spill] sm:$0xff] %v16418_v52  ;;  %v4316_v53 = vadd.f32 %v13335_v22, %v16235_v23  ;;  %v13383_v5 = vpop.f32.mrf.mxu1  ;;  %v14578_v22 = vld [vmem:[%s14850_s10 + $0x138] sm:$0xff]  }
 0x26a   : > { %v16424_v47 = vpop.f32.mrf.mxu0 }
 0x26b   : > { %17961 = vst [vmem:[#allocation7_spill] sm:$0xff] %v16424_v47  ;;  %v16428_v32 = vadd.f32 %v13383_v5, %v4316_v53  ;;  %v16430_v40 = vpop.f32.mrf.mxu1 }
 0x26c   : > { %17963 = vst [vmem:[#allocation10_spill] sm:$0xff] %v16430_v40  ;;  %v13402_v23 = vpop.f32.mrf.mxu0  ;;  %13689 = vmatmul.mubr.bf16.vlgmr.msra.gmra.mxu0 %v14572_v0  ;;  %v14579_v40 = vld [vmem:[%s14850_s10 + $0x348] sm:$0xff]  }
 0x26d   : > { %17962 = vst [vmem:[#allocation8_spill] sm:$0xff] %v16428_v32  ;;  %v5057_v19 = vadd.f32 %v13402_v23, %v16256_v60  ;;  %v13450_v37 = vpop.f32.mrf.mxu1  ;;  %13769 = vmatpush3.bf16.msra.mxu0 %v16341_v17  ;;  %13692 = vmatprep.mubr.bf16.mxu0 %v14576_v25  ;;  %v14587_v60 = vld [vmem:[%s17917_s1 + $0x68] sm:$0xff]   ;;  %v16453_v17 = vld [vmem:[%s17918_s2] ss:$0 sm:$0xff] }
 0x26e   : > { %13737 = vmatmul.mubr.bf16.vlgmr.msra.gmra.mxu1 %v14573_v46  ;;  %v4928_v29 = vpop.f32.mrf.mxu0  ;;  %13770 = vmatprep.subr.bf16.mxu0 %v14580_v10  ;;  %v14582_v23 = vld [vmem:[%s14850_s10 + $0x140] sm:$0xff]  }
 0x26f   : > { %13817 = vmatpush3.bf16.msra.mxu1 %v16346_v56  ;;  %v5442_v53 = vadd.f32 %v13450_v37, %v5057_v19  ;;  %v5055_v5 = vadd.f32 %v4928_v29, %v16261_v38  ;;  %v5313_v0 = vpop.f32.mrf.mxu1  ;;  %13740 = vmatprep.mubr.bf16.mxu1 %v14577_v35  ;;  %v4289_v19 = vadd.f32 %v16280_v14, %v16105_v6  ;;  %v14583_v29 = vld [vmem:[%s14850_s10 + $0x350] sm:$0xff]   ;;  %v14593_v6 = vld [vmem:[%s17917_s1 + $0x60] sm:$0xff]  }
 0x270   : > { %v13403_v46 = vpop.f32.mrf.mxu0  ;;  %13818 = vmatprep.subr.bf16.mxu1 %v14581_v62 }
 0x271   : > { %v10553_v56 = vadd.f32 %v16453_v17, %v5442_v53  ;;  %v5440_v25 = vadd.f32 %v5313_v0, %v5055_v5  ;;  %v5058_v38 = vadd.f32 %v13403_v46, %v16265_v4  ;;  %v13451_v35 = vpop.f32.mrf.mxu1  ;;  %13771 = vmatpush3.bf16.msra.mxu0 %v14580_v10  ;;  %v14592_v4 = vld [vmem:[%s17917_s1 + $0x1a0] sm:$0xff]  }
 0x272   : > { %v4931_v37 = vpop.f32.mrf.mxu0  ;;  %13772 = vmatprep.subr.bf16.mxu0 %v14586_v12  ;;  %v16472_v10 = vld [vmem:[%s17918_s2 + $0x1] ss:$0 sm:$0xff] }
 0x273   : > { %13819 = vmatpush3.bf16.msra.mxu1 %v14581_v62  ;;  %v10555_v32 = vmax.f32 %v10553_v56, 0.0  ;;  %v10543_v52 = vadd.f32 %v16453_v17, %v5440_v25  ;;  %v5443_v2 = vadd.f32 %v13451_v35, %v5058_v38  ;;  %v5056_v47 = vadd.f32 %v4931_v37, %v16274_v28  ;;  %v5316_v53 = vpop.f32.mrf.mxu1 }
 0x274   : > { %13820 = vmatprep.subr.bf16.mxu1 %v14587_v60  ;;  %v13406_v14 = vpop.f32.mrf.mxu0  ;;  %13693 = vmatmul.mubr.bf16.gmra.mxu0 %v14578_v22  ;;  %v4674_v56 = vadd.f32 %v16288_v27, %v4289_v19  ;;  %v4290_v25 = vadd.f32 %v16293_v43, %v16118_v63  ;;  %v16485_v63 = vld [vmem:[%s17918_s2 + $0x2] ss:$0 sm:$0xff] }
 0x275   : > { %v10557_v62 = vmul.f32 %v16472_v10, %v10555_v32  ;;  %v10545_v28 = vmax.f32 %v10543_v52, 0.0  ;;  %v10554_v5 = vadd.f32 %v16453_v17, %v5443_v2  ;;  %v5441_v0 = vadd.f32 %v5316_v53, %v5056_v47  ;;  %v13454_v46 = vpop.f32.mrf.mxu1  ;;  %13696 = vmatprep.mubr.bf16.mxu0 %v14582_v23  ;;  %13773 = vmatpush3.bf16.msra.mxu0 %v14586_v12  ;;  %v14584_v12 = vld [vmem:[%s14850_s10 + $0x148] sm:$0xff]   ;;  %v14585_v53 = vld [vmem:[%s14850_s10 + $0x358] sm:$0xff]  }
 0x276   : > { %13741 = vmatmul.mubr.bf16.gmra.mxu1 %v14579_v40  ;;  %v5061_v22 = vadd.f32 %v13406_v14, %v16286_v13  ;;  %v4944_v38 = vpop.f32.mrf.mxu0  ;;  %13774 = vmatprep.subr.bf16.mxu0 %v14592_v4  ;;  %v14588_v14 = vld [vmem:[%s14850_s10 + $0x150] sm:$0xff]  }
 0x277   : > { %13744 = vmatprep.mubr.bf16.mxu1 %v14583_v29  ;;  %v10547_v32 = vmul.f32 %v16472_v10, %v10545_v28  ;;  %v10556_v52 = vmax.f32 %v10554_v5, 0.0  ;;  %v10544_v2 = vadd.f32 %v16453_v17, %v5441_v0  ;;  %v5329_v47 = vpop.f32.mrf.mxu1  ;;  %13821 = vmatpush3.bf16.msra.mxu1 %v14587_v60  ;;  %v16488_v13 = vadd.f32 %v16485_v63, %v10557_v62  ;;  %v14598_v60 = vld [vmem:[%s17917_s1 + $0x198] sm:$0xff]  }
 0x278   : > { %v5446_v27 = vadd.f32 %v13454_v46, %v5061_v22  ;;  %v5059_v43 = vadd.f32 %v4944_v38, %v4674_v56  ;;  %v13407_v40 = vpop.f32.mrf.mxu0  ;;  %13822 = vmatprep.subr.bf16.mxu1 %v14593_v6  ;;  %v4675_v62 = vadd.f32 %v16298_v50, %v4290_v25  ;;  %v14589_v46 = vld [vmem:[%s14850_s10 + $0x360] sm:$0xff]   ;;  %v14599_v56 = vld [vmem:[%s17917_s1 + $0x58] sm:$0xff]   ;;  %v4297_v22 = vadd.f32 %v16335_v33, %v16165_v36  ;;  %v14604_v36 = vld [vmem:[%s17917_s1 + $0x190] sm:$0xff]  }
 0x279   : > { %v16495_v35 = vadd.f32 %v16485_v63, %v10547_v32  ;;  %v10558_v23 = vmul.f32 %v16472_v10, %v10556_v52  ;;  %v10546_v19 = vmax.f32 %v10544_v2, 0.0  ;;  %v5062_v37 = vadd.f32 %v13407_v40, %v16296_v18  ;;  %v13455_v29 = vpop.f32.mrf.mxu1  ;;  %13775 = vmatpush3.bf16.msra.mxu0 %v14592_v4  ;;  %v14605_v33 = vld [vmem:[%s17917_s1 + $0x50] sm:$0xff]  }
 0x27a   : > { %v10575_v28 = vadd.f32 %v16453_v17, %v5446_v27  ;;  %v5444_v5 = vadd.f32 %v5329_v47, %v5059_v43  ;;  %v4947_v0 = vpop.f32.mrf.mxu0  ;;  %13776 = vmatprep.subr.bf16.mxu0 %v14598_v60 }
 0x27b   : > { %v10561_v18 = vmax.f32 %v16495_v35, %v16488_v13  ;;  %v10548_v38 = vmul.f32 %v16472_v10, %v10546_v19  ;;  %v5447_v32 = vadd.f32 %v13455_v29, %v5062_v37  ;;  %v5332_v50 = vpop.f32.mrf.mxu1  ;;  %13823 = vmatpush3.bf16.msra.mxu1 %v14593_v6  ;;  %v16513_v25 = vadd.f32 %v16485_v63, %v10558_v23 }
 0x27c   : > { %v10577_v52 = vmax.f32 %v10575_v28, 0.0  ;;  %v10565_v4 = vadd.f32 %v16453_v17, %v5444_v5  ;;  %v5060_v2 = vadd.f32 %v4947_v0, %v4675_v62  ;;  %v13410_v47 = vpop.f32.mrf.mxu0  ;;  %13697 = vmatmul.mubr.bf16.gmra.mxu0 %v14584_v12  ;;  %13824 = vmatprep.subr.bf16.mxu1 %v14599_v56 }
 0x27d   : > { %v16523_v6 = vadd.f32 %v16485_v63, %v10548_v38  ;;  %v10576_v27 = vadd.f32 %v16453_v17, %v5447_v32  ;;  %v5065_v43 = vadd.f32 %v13410_v47, %v16311_v45  ;;  %v13458_v40 = vpop.f32.mrf.mxu1  ;;  %13700 = vmatprep.mubr.bf16.mxu0 %v14588_v14  ;;  %13777 = vmatpush3.bf16.msra.mxu0 %v14598_v60  ;;  %v14590_v38 = vld [vmem:[%s14850_s10 + $0x158] sm:$0xff]  }
 0x27e   : > { %13745 = vmatmul.mubr.bf16.gmra.mxu1 %v14585_v53  ;;  %v10579_v12 = vmul.f32 %v16472_v10, %v10577_v52  ;;  %v10567_v23 = vmax.f32 %v10565_v4, 0.0  ;;  %v5445_v19 = vadd.f32 %v5332_v50, %v5060_v2  ;;  %v4960_v37 = vpop.f32.mrf.mxu0  ;;  %v4682_v45 = vadd.f32 %v16350_v8, %v4297_v22  ;;  %13778 = vmatprep.subr.bf16.mxu0 %v14604_v36  ;;  %v14591_v50 = vld [vmem:[%s14850_s10 + $0x368] sm:$0xff]   ;;  %v14594_v52 = vld [vmem:[%s14850_s10 + $0x160] sm:$0xff]  }
 0x27f   : > { %13748 = vmatprep.mubr.bf16.mxu1 %v14589_v46  ;;  %v10562_v29 = vmax.f32 %v16523_v6, %v16513_v25  ;;  %v10578_v62 = vmax.f32 %v10576_v27, 0.0  ;;  %v5450_v28 = vadd.f32 %v13458_v40, %v5065_v43  ;;  %v5063_v5 = vadd.f32 %v4960_v37, %v16319_v31  ;;  %v5345_v0 = vpop.f32.mrf.mxu1  ;;  %13825 = vmatpush3.bf16.msra.mxu1 %v14599_v56  ;;  %v14610_v31 = vld [vmem:[%s17917_s1 + $0x188] sm:$0xff]   ;;  %v14595_v40 = vld [vmem:[%s14850_s10 + $0x370] sm:$0xff]  }
 0x280   : > { %v10569_v53 = vmul.f32 %v16472_v10, %v10567_v23  ;;  %v10566_v14 = vadd.f32 %v16453_v17, %v5445_v19  ;;  %v13411_v46 = vpop.f32.mrf.mxu0  ;;  %13826 = vmatprep.subr.bf16.mxu1 %v14605_v33  ;;  %v4298_v4 = vadd.f32 %v16355_v3, %v16174_v51  ;;  %v10581_v2 = vadd.f32 %v16485_v63, %v10579_v12  ;;  %v14611_v23 = vld [vmem:[%s17917_s1 + $0x48] sm:$0xff]  }
 0x281   : > { %v10580_v32 = vmul.f32 %v16472_v10, %v10578_v62  ;;  %v10601_v60 = vadd.f32 %v16453_v17, %v5450_v28  ;;  %v5448_v56 = vadd.f32 %v5345_v0, %v5063_v5  ;;  %v5066_v8 = vadd.f32 %v13411_v46, %v16323_v9  ;;  %v13459_v22 = vpop.f32.mrf.mxu1  ;;  %13779 = vmatpush3.bf16.msra.mxu0 %v14604_v36  ;;  %v14616_v0 = vld [vmem:[%s17917_s1 + $0x180] sm:$0xff]  }
 0x282   : > { %v10571_v47 = vadd.f32 %v16485_v63, %v10569_v53  ;;  %v10568_v27 = vmax.f32 %v10566_v14, 0.0  ;;  %v4963_v43 = vpop.f32.mrf.mxu0  ;;  %13780 = vmatprep.subr.bf16.mxu0 %v14610_v31  ;;  %v14617_v53 = vld [vmem:[%s17917_s1 + $0x40] sm:$0xff]  }
 0x283   : > { %v10582_v19 = vadd.f32 %v16485_v63, %v10580_v32  ;;  %v10603_v9 = vmax.f32 %v10601_v60, 0.0  ;;  %v10591_v37 = vadd.f32 %v16453_v17, %v5448_v56  ;;  %v5451_v62 = vadd.f32 %v13459_v22, %v5066_v8  ;;  %v5348_v28 = vpop.f32.mrf.mxu1  ;;  %13827 = vmatpush3.bf16.msra.mxu1 %v14605_v33 }
 0x284   : > { %v10583_v51 = vmax.f32 %v10571_v47, %v10581_v2  ;;  %v10570_v3 = vmul.f32 %v16472_v10, %v10568_v27  ;;  %v5064_v12 = vadd.f32 %v4963_v43, %v16332_v16  ;;  %v13414_v5 = vpop.f32.mrf.mxu0  ;;  %13701 = vmatmul.mubr.bf16.gmra.mxu0 %v14590_v38  ;;  %13828 = vmatprep.subr.bf16.mxu1 %v14611_v23  ;;  %v14596_v47 = vld [vmem:[%s14850_s10 + $0x168] sm:$0xff]   ;;  %v16578_v27 = vld [vmem:[%s17917_s1 + $0x38] sm:$0xff]  }
 0x285   : > { %v10605_v14 = vmul.f32 %v16472_v10, %v10603_v9  ;;  %v10593_v36 = vmax.f32 %v10591_v37, 0.0  ;;  %v10602_v33 = vadd.f32 %v16453_v17, %v5451_v62  ;;  %v5069_v46 = vadd.f32 %v13414_v5, %v16348_v59  ;;  %v13462_v32 = vpop.f32.mrf.mxu1  ;;  %13704 = vmatprep.mubr.bf16.mxu0 %v14594_v52  ;;  %13781 = vmatpush3.bf16.msra.mxu0 %v14610_v31  ;;  %v14600_v9 = vld [vmem:[%s14850_s10 + $0x170] sm:$0xff]   ;;  %v16596_v5 = vld [vmem:[%s17917_s1 + $0xb8] sm:$0xff]  }
 0x286   : > { %13749 = vmatmul.mubr.bf16.gmra.mxu1 %v14591_v50  ;;  %v10585_v16 = vmax.f32 %v10561_v18, %v10583_v51  ;;  %v10572_v38 = vadd.f32 %v16485_v63, %v10570_v3  ;;  %v5449_v60 = vadd.f32 %v5348_v28, %v5064_v12  ;;  %v4976_v56 = vpop.f32.mrf.mxu0  ;;  %13782 = vmatprep.subr.bf16.mxu0 %v14616_v0  ;;  %v14601_v12 = vld [vmem:[%s14850_s10 + $0x380] sm:$0xff]  }
 0x287   : > { %13752 = vmatprep.mubr.bf16.mxu1 %v14595_v40  ;;  %v16569_v8 = vadd.f32 %v16485_v63, %v10605_v14  ;;  %v10595_v59 = vmul.f32 %v16472_v10, %v10593_v36  ;;  %v10604_v22 = vmax.f32 %v10602_v33, 0.0  ;;  %v5454_v2 = vadd.f32 %v13462_v32, %v5069_v46  ;;  %v5361_v50 = vpop.f32.mrf.mxu1  ;;  %13829 = vmatpush3.bf16.msra.mxu1 %v14611_v23 }
 0x288   : > { %10587 = vst [vmem:[%s15804_s9 + $0x40] sm:$0xff] %v10585_v16  ;;  %v10584_v13 = vmax.f32 %v10572_v38, %v10582_v19  ;;  %v10592_v35 = vadd.f32 %v16453_v17, %v5449_v60  ;;  %v5067_v18 = vadd.f32 %v4976_v56, %v4682_v45  ;;  %v13415_v52 = vpop.f32.mrf.mxu0  ;;  %13830 = vmatprep.subr.bf16.mxu1 %v14617_v53  ;;  %v14597_v19 = vld [vmem:[%s14850_s10 + $0x378] sm:$0xff]  }
 0x289   : > { %v16581_v31 = vadd.f32 %v16485_v63, %v10595_v59  ;;  %v10606_v43 = vmul.f32 %v16472_v10, %v10604_v22  ;;  %v10623_v40 = vadd.f32 %v16453_v17, %v5454_v2  ;;  %v5070_v23 = vadd.f32 %v13415_v52, %v16358_v39  ;;  %v13463_v45 = vpop.f32.mrf.mxu1  ;;  %13783 = vmatpush3.bf16.msra.mxu0 %v14616_v0 }
 0x28a   : > { %v4683_v37 = vadd.f32 %v16360_v26, %v4298_v4  ;;  %v10586_v62 = vmax.f32 %v10562_v29, %v10584_v13  ;;  %v10594_v28 = vmax.f32 %v10592_v35, 0.0  ;;  %v5452_v51 = vadd.f32 %v5361_v50, %v5067_v18  ;;  %v4979_v3 = vpop.f32.mrf.mxu0  ;;  %13896 = vmatprep.subr.bf16.mxu0 %v16596_v5 }
 0x28b   : > { %v10609_v39 = vmax.f32 %v16581_v31, %v16569_v8  ;;  %v10625_v14 = vmax.f32 %v10623_v40, 0.0  ;;  %v5455_v36 = vadd.f32 %v13463_v45, %v5070_v23  ;;  %v5364_v33 = vpop.f32.mrf.mxu1  ;;  %13831 = vmatpush3.bf16.msra.mxu1 %v14617_v53  ;;  %v16605_v4 = vadd.f32 %v16485_v63, %v10606_v43  ;;  %v14603_v23 = vld [vmem:[%s14850_s10 + $0x388] sm:$0xff]   ;;  %v14606_v45 = vld [vmem:[%s14850_s10 + $0x180] sm:$0xff]  }
 0x28c   : > { %10588 = vst [vmem:[%s15804_s9 + $0x48] sm:$0xff] %v10586_v62  ;;  %v10596_v26 = vmul.f32 %v16472_v10, %v10594_v28  ;;  %v10613_v25 = vadd.f32 %v16453_v17, %v5452_v51  ;;  %v5068_v6 = vadd.f32 %v4979_v3, %v4683_v37  ;;  %v13418_v29 = vpop.f32.mrf.mxu0  ;;  %13705 = vmatmul.mubr.bf16.gmra.mxu0 %v14596_v47  ;;  %v14602_v47 = vld [vmem:[%s14850_s10 + $0x178] sm:$0xff]   ;;  %v14607_v28 = vld [vmem:[%s14850_s10 + $0x390] sm:$0xff]  }
 0x28d   : > { %13856 = vmatprep.subr.bf16.mxu1 %v16578_v27  ;;  %v10624_v46 = vadd.f32 %v16453_v17, %v5455_v36  ;;  %v5073_v32 = vadd.f32 %v13418_v29, %v16366_v1  ;;  %v13466_v16 = vpop.f32.mrf.mxu1  ;;  %13708 = vmatprep.mubr.bf16.mxu0 %v14600_v9  ;;  %v10627_v53 = vmul.f32 %v16472_v10, %v10625_v14 }
 0x28e   : > { %13753 = vmatmul.mubr.bf16.gmra.mxu1 %v14597_v19  ;;  %v16610_v0 = vadd.f32 %v16485_v63, %v10596_v26  ;;  %v10615_v38 = vmax.f32 %v10613_v25, 0.0  ;;  %v5453_v60 = vadd.f32 %v5364_v33, %v5068_v6  ;;  %v4992_v56 = vpop.f32.mrf.mxu0  ;;  %v4305_v1 = vadd.f32 %v16381_v44, %v16199_v20 }
 0x28f   : > { %13756 = vmatprep.mubr.bf16.mxu1 %v14601_v12  ;;  %v10626_v59 = vmax.f32 %v10624_v46, 0.0  ;;  %v5458_v22 = vadd.f32 %v13466_v16, %v5073_v32  ;;  %v5071_v2 = vadd.f32 %v4992_v56, %v16371_v34  ;;  %v5377_v50 = vpop.f32.mrf.mxu1  ;;  %v10629_v34 = vadd.f32 %v16485_v63, %v10627_v53 }
 0x290   : > { %v10610_v13 = vmax.f32 %v16610_v0, %v16605_v4  ;;  %v10617_v35 = vmul.f32 %v16472_v10, %v10615_v38  ;;  %v10614_v18 = vadd.f32 %v16453_v17, %v5453_v60  ;;  %v13419_v52 = vpop.f32.mrf.mxu0  ;;  %v4690_v51 = vadd.f32 %v16386_v49, %v4305_v1 }
 0x291   : > { %v10649_v43 = vadd.f32 %v16453_v17, %v5458_v22  ;;  %v5456_v40 = vadd.f32 %v5377_v50, %v5071_v2  ;;  %v5074_v20 = vadd.f32 %v13419_v52, %v16375_v42  ;;  %v13467_v44 = vpop.f32.mrf.mxu1  ;;  %v10628_v9 = vmul.f32 %v16472_v10, %v10626_v59  ;;  %v14608_v59 = vld [vmem:[%s14850_s10 + $0x188] sm:$0xff]   ;;  %v14609_v52 = vld [vmem:[%s14850_s10 + $0x398] sm:$0xff]  }
 0x292   : > { %v10619_v19 = vadd.f32 %v16485_v63, %v10617_v35  ;;  %v10616_v37 = vmax.f32 %v10614_v18, 0.0  ;;  %v4995_v62 = vpop.f32.mrf.mxu0  ;;  %v4306_v42 = vadd.f32 %v16391_v54, %v16206_v55 }
 0x293   : > { %v10651_v3 = vmax.f32 %v10649_v43, 0.0  ;;  %v10639_v12 = vadd.f32 %v16453_v17, %v5456_v40  ;;  %v5459_v14 = vadd.f32 %v13467_v44, %v5074_v20  ;;  %v5380_v36 = vpop.f32.mrf.mxu1  ;;  %v5072_v25 = vadd.f32 %v4995_v62, %v16378_v48 }
 0x294   : > { %v10631_v33 = vmax.f32 %v10619_v19, %v10629_v34  ;;  %v10618_v26 = vmul.f32 %v16472_v10, %v10616_v37  ;;  %v13422_v6 = vpop.f32.mrf.mxu0  ;;  %13709 = vmatmul.mubr.bf16.gmra.mxu0 %v14602_v47  ;;  %v10630_v48 = vadd.f32 %v16485_v63, %v10628_v9  ;;  %v14612_v47 = vld [vmem:[%s14850_s10 + $0x190] sm:$0xff]   ;;  %v4691_v43 = vadd.f32 %v16396_v15, %v4306_v42 }
 0x295   : > { %v10653_v29 = vmul.f32 %v16472_v10, %v10651_v3  ;;  %v10641_v4 = vmax.f32 %v10639_v12, 0.0  ;;  %v10650_v49 = vadd.f32 %v16453_v17, %v5459_v14  ;;  %v5077_v46 = vadd.f32 %v13422_v6, %v16384_v57  ;;  %13712 = vmatprep.mubr.bf16.mxu0 %v14606_v45  ;;  %v14613_v45 = vld [vmem:[%s14850_s10 + $0x3a0] sm:$0xff]  }
 0x296   : > { %v13470_v32 = vpop.f32.mrf.mxu1  ;;  %13757 = vmatmul.mubr.bf16.gmra.mxu1 %v14603_v23  ;;  %v10633_v55 = vmax.f32 %v10609_v39, %v10631_v33  ;;  %v10620_v54 = vadd.f32 %v16485_v63, %v10618_v26  ;;  %v5457_v16 = vadd.f32 %v5380_v36, %v5072_v25  ;;  %v5008_v0 = vpop.f32.mrf.mxu0  ;;  %v4313_v25 = vadd.f32 %v16415_v41, %v16230_v11 }
 0x297   : > { %13760 = vmatprep.mubr.bf16.mxu1 %v14607_v28  ;;  %v10643_v53 = vmul.f32 %v16472_v10, %v10641_v4  ;;  %v10652_v38 = vmax.f32 %v10650_v49, 0.0  ;;  %v5462_v57 = vadd.f32 %v13470_v32, %v5077_v46  ;;  %v16647_v8 = vadd.f32 %v16485_v63, %v10653_v29 }
 0x298   : > { %v5393_v60 = vpop.f32.mrf.mxu1  ;;  %10635 = vst [vmem:[%s15804_s9 + $0x50] sm:$0xff] %v10633_v55  ;;  %v10632_v56 = vmax.f32 %v10620_v54, %v10630_v48  ;;  %v10640_v31 = vadd.f32 %v16453_v17, %v5457_v16  ;;  %v5075_v39 = vadd.f32 %v5008_v0, %v4690_v51  ;;  %v13423_v1 = vpop.f32.mrf.mxu0  ;;  %v14614_v48 = vld [vmem:[%s14850_s10 + $0x198] sm:$0xff]   ;;  %v14615_v0 = vld [vmem:[%s14850_s10 + $0x3a8] sm:$0xff]  }
 0x299   : > { %v16652_v22 = vadd.f32 %v16485_v63, %v10643_v53  ;;  %v10654_v2 = vmul.f32 %v16472_v10, %v10652_v38  ;;  %v10671_v50 = vadd.f32 %v16453_v17, %v5462_v57  ;;  %v5078_v35 = vadd.f32 %v13423_v1, %v16394_v58  ;;  %v14618_v53 = vld [vmem:[%s14850_s10 + $0x130] sm:$0xff]  }
 0x29a   : > { %v13471_v18 = vpop.f32.mrf.mxu1  ;;  %v10634_v40 = vmax.f32 %v10610_v13, %v10632_v56  ;;  %v10642_v20 = vmax.f32 %v10640_v31, 0.0  ;;  %v5460_v44 = vadd.f32 %v5393_v60, %v5075_v39  ;;  %v5011_v23 = vpop.f32.mrf.mxu0  ;;  %v4698_v31 = vadd.f32 %v16420_v7, %v4313_v25 }
 0x29b   : > { %v10657_v34 = vmax.f32 %v16652_v22, %v16647_v8  ;;  %v10673_v19 = vmax.f32 %v10671_v50, 0.0  ;;  %v5463_v9 = vadd.f32 %v13471_v18, %v5078_v35  ;;  %v5076_v28 = vadd.f32 %v5011_v23, %v4691_v43  ;;  %v14619_v8 = vld [vmem:[%s14850_s10 + $0x390] sm:$0xff]  }
 0x29c   : > { %v5396_v37 = vpop.f32.mrf.mxu1  ;;  %10636 = vst [vmem:[%s15804_s9 + $0x58] sm:$0xff] %v10634_v40  ;;  %v10644_v62 = vmul.f32 %v16472_v10, %v10642_v20  ;;  %v10661_v58 = vadd.f32 %v16453_v17, %v5460_v44  ;;  %v13426_v51 = vpop.f32.mrf.mxu0  ;;  %13713 = vmatmul.mubr.bf16.gmra.mxu0 %v14608_v59  ;;  %v16667_v15 = vadd.f32 %v16485_v63, %v10654_v2  ;;  %v17965_v18 = vld [vmem:[#allocation9_spill] sm:$0xff]  ;;  %v17966_v20 = vld [vmem:[#allocation6_spill] sm:$0xff] }
 0x29d   : > { %v10672_v13 = vadd.f32 %v16453_v17, %v5463_v9  ;;  %v5081_v3 = vadd.f32 %v13426_v51, %v16400_v30  ;;  %13716 = vmatprep.mubr.bf16.mxu0 %v14612_v47  ;;  %v10675_v36 = vmul.f32 %v16472_v10, %v10673_v19  ;;  %v5461_v33 = vadd.f32 %v5396_v37, %v5076_v28 }
 0x29e   : > { %v13474_v12 = vpop.f32.mrf.mxu1  ;;  %13761 = vmatmul.mubr.bf16.gmra.mxu1 %v14609_v52  ;;  %v16672_v14 = vadd.f32 %v16485_v63, %v10644_v62  ;;  %v10663_v42 = vmax.f32 %v10661_v58, 0.0  ;;  %v5024_v26 = vpop.f32.mrf.mxu0 }
 0x29f   : > { %13764 = vmatprep.mubr.bf16.mxu1 %v14613_v45  ;;  %v10674_v6 = vmax.f32 %v10672_v13, 0.0  ;;  %v5466_v30 = vadd.f32 %v13474_v12, %v5081_v3  ;;  %v5079_v29 = vadd.f32 %v5024_v26, %v16405_v21  ;;  %v10662_v32 = vadd.f32 %v16453_v17, %v5461_v33  ;;  %v17967_v26 = vld [vmem:[#allocation8_spill] sm:$0xff] }
 0x2a0   : > { %v5409_v4 = vpop.f32.mrf.mxu1  ;;  %v10658_v49 = vmax.f32 %v16672_v14, %v16667_v15  ;;  %v10665_v46 = vmul.f32 %v16472_v10, %v10663_v42  ;;  %v13427_v55 = vpop.f32.mrf.mxu0  ;;  %v10677_v21 = vadd.f32 %v16485_v63, %v10675_v36  ;;  %v14620_v14 = vld [vmem:[%s14850_s10 + $0x138] sm:$0xff]  }
 0x2a1   : > { %v10697_v54 = vadd.f32 %v16453_v17, %v5466_v30  ;;  %v5464_v16 = vadd.f32 %v5409_v4, %v5079_v29  ;;  %v5082_v11 = vadd.f32 %v13427_v55, %v16409_v61  ;;  %v10676_v57 = vmul.f32 %v16472_v10, %v10674_v6  ;;  %v17964_v61 = vld [vmem:[#allocation7_spill] sm:$0xff]  ;;  %v14621_v30 = vld [vmem:[%s14850_s10 + $0x398] sm:$0xff]  }
 0x2a2   : > { %v13475_v41 = vpop.f32.mrf.mxu1  ;;  %v10667_v38 = vadd.f32 %v16485_v63, %v10665_v46  ;;  %v10664_v60 = vmax.f32 %v10662_v32, 0.0  ;;  %v5027_v56 = vpop.f32.mrf.mxu0  ;;  %v4314_v2 = vadd.f32 %v17964_v61, %v16247_v24  ;;  %v17968_v29 = vld [vmem:[#allocation10_spill] sm:$0xff] }
 0x2a3   : > { %v10699_v39 = vmax.f32 %v10697_v54, 0.0  ;;  %v10687_v1 = vadd.f32 %v16453_v17, %v5464_v16  ;;  %v5467_v59 = vadd.f32 %v13475_v41, %v5082_v11  ;;  %v5080_v52 = vadd.f32 %v5027_v56, %v17965_v18  ;;  %v14625_v54 = vld [vmem:[%s14850_s10 + $0x140] sm:$0xff]   ;;  %v14629_v56 = vld [vmem:[%s17917_s1 + $0xb0] sm:$0xff]  }
 0x2a4   : > { %v5412_v22 = vpop.f32.mrf.mxu1  ;;  %v10679_v50 = vmax.f32 %v10667_v38, %v10677_v21  ;;  %v10666_v35 = vmul.f32 %v16472_v10, %v10664_v60  ;;  %v13430_v47 = vpop.f32.mrf.mxu0  ;;  %13717 = vmatmul.mubr.bf16.gmra.mxu0 %v14614_v48  ;;  %v10678_v24 = vadd.f32 %v16485_v63, %v10676_v57  ;;  %v4699_v4 = vadd.f32 %v17968_v29, %v4314_v2  ;;  %v14626_v21 = vld [vmem:[%s14850_s10 + $0x3a0] sm:$0xff]   ;;  %v14641_v29 = vld [vmem:[%s17917_s1 + $0x18] sm:$0xff]  }
 0x2a5   : > { %v10701_v43 = vmul.f32 %v16472_v10, %v10699_v39  ;;  %v10689_v40 = vmax.f32 %v10687_v1, 0.0  ;;  %v10698_v7 = vadd.f32 %v16453_v17, %v5467_v59  ;;  %v5085_v44 = vadd.f32 %v13430_v47, %v17966_v20  ;;  %13784 = vmatprep.mubr.bf16.mxu0 %v14618_v53  ;;  %v14624_v53 = vld [vmem:[%s17917_s1 + $0x30] sm:$0xff]   ;;  %v14627_v20 = vld [vmem:[%s14850_s10 + $0x148] sm:$0xff]  }
 0x2a6   : > { %v13478_v23 = vpop.f32.mrf.mxu1  ;;  %13765 = vmatmul.mubr.bf16.gmra.mxu1 %v14615_v0  ;;  %v10681_v45 = vmax.f32 %v10657_v34, %v10679_v50  ;;  %v10668_v19 = vadd.f32 %v16485_v63, %v10666_v35  ;;  %v5465_v9 = vadd.f32 %v5412_v22, %v5080_v52  ;;  %v5040_v37 = vpop.f32.mrf.mxu0  ;;  %v14635_v35 = vld [vmem:[%s17917_s1 + $0xa8] sm:$0xff]  }
 0x2a7   : > { %13832 = vmatprep.mubr.bf16.mxu1 %v14619_v8  ;;  %v10691_v62 = vmul.f32 %v16472_v10, %v10689_v40  ;;  %v10700_v58 = vmax.f32 %v10698_v7, 0.0  ;;  %v5470_v28 = vadd.f32 %v13478_v23, %v5085_v44  ;;  %v16705_v13 = vadd.f32 %v16485_v63, %v10701_v43  ;;  %v14630_v52 = vld [vmem:[%s17917_s1 + $0x28] sm:$0xff]  }
 0x2a8   : > { %v5425_v51 = vpop.f32.mrf.mxu1  ;;  %10683 = vst [vmem:[%s15804_s9 + $0x60] sm:$0xff] %v10681_v45  ;;  %v10680_v15 = vmax.f32 %v10668_v19, %v10678_v24  ;;  %v10688_v34 = vadd.f32 %v16453_v17, %v5465_v9  ;;  %v5083_v3 = vadd.f32 %v5040_v37, %v4698_v31  ;;  %v13431_v12 = vpop.f32.mrf.mxu0  ;;  %v14628_v45 = vld [vmem:[%s14850_s10 + $0x3a8] sm:$0xff]   ;;  %v14631_v24 = vld [vmem:[%s14850_s10 + $0x150] sm:$0xff]  }
 0x2a9   : > { %v16710_v36 = vadd.f32 %v16485_v63, %v10691_v62  ;;  %v10702_v42 = vmul.f32 %v16472_v10, %v10700_v58  ;;  %v10719_v33 = vadd.f32 %v16453_v17, %v5470_v28  ;;  %v5086_v25 = vadd.f32 %v13431_v12, %v17967_v26  ;;  %v14632_v58 = vld [vmem:[%s14850_s10 + $0x3b0] sm:$0xff]  }
 0x2aa   : > { %v13479_v6 = vpop.f32.mrf.mxu1  ;;  %v10682_v46 = vmax.f32 %v10658_v49, %v10680_v15  ;;  %v10690_v32 = vmax.f32 %v10688_v34, 0.0  ;;  %v5468_v55 = vadd.f32 %v5425_v51, %v5083_v3  ;;  %v5043_v48 = vpop.f32.mrf.mxu0  ;;  %v14636_v51 = vld [vmem:[%s17917_s1 + $0x20] sm:$0xff]  }
 0x2ab   : > { %v10705_v16 = vmax.f32 %v16710_v36, %v16705_v13  ;;  %v10721_v11 = vmax.f32 %v10719_v33, 0.0  ;;  %v5471_v41 = vadd.f32 %v13479_v6, %v5086_v25  ;;  %v5084_v57 = vadd.f32 %v5043_v48, %v4699_v4  ;;  %v14633_v4 = vld [vmem:[%s14850_s10 + $0x158] sm:$0xff]   ;;  %v14637_v48 = vld [vmem:[%s14850_s10 + $0x160] sm:$0xff]  }
 0x2ac   : > { %v5428_v0 = vpop.f32.mrf.mxu1  ;;  %10684 = vst [vmem:[%s15804_s9 + $0x68] sm:$0xff] %v10682_v46  ;;  %v10692_v38 = vmul.f32 %v16472_v10, %v10690_v32  ;;  %v10709_v49 = vadd.f32 %v16453_v17, %v5468_v55  ;;  %v13498_v60 = vpop.f32.mrf.mxu0  ;;  %13785 = vmatmul.mubr.bf16.vlgmr.msra.gmra.mxu0 %v14620_v14  ;;  %v16731_v8 = vadd.f32 %v16485_v63, %v10702_v42  ;;  %v14642_v14 = vld [vmem:[%s17917_s1 + $0xa0] sm:$0xff]   ;;  %v14648_v46 = vld [vmem:[%s17917_s1 + $0x98] sm:$0xff]  }
 0x2ad   : > { %v10723_v31 = vmul.f32 %v16472_v10, %v10721_v11  ;;  %v10720_v39 = vadd.f32 %v16453_v17, %v5471_v41  ;;  %13897 = vmatpush3.bf16.msra.mxu0 %v16596_v5  ;;  %v5469_v61 = vadd.f32 %v5428_v0, %v5084_v57  ;;  %13788 = vmatprep.mubr.bf16.mxu0 %v14625_v54  ;;  %v14634_v55 = vld [vmem:[%s14850_s10 + $0x3b8] sm:$0xff]   ;;  %v14638_v41 = vld [vmem:[%s14850_s10 + $0x3c0] sm:$0xff]  }
 0x2ae   : > { %v13546_v1 = vpop.f32.mrf.mxu1  ;;  %13833 = vmatmul.mubr.bf16.vlgmr.msra.gmra.mxu1 %v14621_v30  ;;  %v16737_v59 = vadd.f32 %v16485_v63, %v10692_v38  ;;  %v10711_v22 = vmax.f32 %v10709_v49, 0.0  ;;  %v5778_v50 = vpop.f32.mrf.mxu0  ;;  %13898 = vmatprep.subr.bf16.mxu0 %v14629_v56  ;;  %v14654_v49 = vld [vmem:[%s17917_s1 + $0x90] sm:$0xff]  }
 0x2af   : > { %v16739_v2 = vadd.f32 %v13546_v1, %v13498_v60  ;;  %13857 = vmatpush3.bf16.msra.mxu1 %v16578_v27  ;;  %v10722_v18 = vmax.f32 %v10720_v39, 0.0  ;;  %13836 = vmatprep.mubr.bf16.mxu1 %v14626_v21  ;;  %v10710_v43 = vadd.f32 %v16453_v17, %v5469_v61  ;;  %v10725_v19 = vadd.f32 %v16485_v63, %v10723_v31  ;;  %v14649_v31 = vld [vmem:[%s17917_s1 + $0x8] sm:$0xff]  }
 0x2b0   : > { %v6083_v5 = vpop.f32.mrf.mxu1  ;;  %13858 = vmatprep.subr.bf16.mxu1 %v14624_v53  ;;  %v10706_v47 = vmax.f32 %v16737_v59, %v16731_v8  ;;  %v10713_v27 = vmul.f32 %v16472_v10, %v10711_v22  ;;  %v13499_v7 = vpop.f32.mrf.mxu0  ;;  %v14639_v59 = vld [vmem:[%s14850_s10 + $0x168] sm:$0xff]  }
 0x2b1   : > { %v16752_v40 = vadd.f32 %v6083_v5, %v5778_v50  ;;  %v10724_v44 = vmul.f32 %v16472_v10, %v10722_v18  ;;  %13899 = vmatpush3.bf16.msra.mxu0 %v14629_v56  ;;  %v10712_v37 = vmax.f32 %v10710_v43, 0.0  ;;  %v14660_v22 = vld [vmem:[%s17917_s1 + $0x88] sm:$0xff]  }
 0x2b2   : > { %v13547_v23 = vpop.f32.mrf.mxu1  ;;  %v10715_v9 = vadd.f32 %v16485_v63, %v10713_v27  ;;  %v5781_v17 = vpop.f32.mrf.mxu0  ;;  %13900 = vmatprep.subr.bf16.mxu0 %v14635_v35  ;;  %v14640_v50 = vld [vmem:[%s14850_s10 + $0x3c8] sm:$0xff]   ;;  %v14655_v27 = vld [vmem:[%s17917_s1] sm:$0xff]  }
 0x2b3   : > { %v16760_v62 = vadd.f32 %v13547_v23, %v13499_v7  ;;  %13859 = vmatpush3.bf16.msra.mxu1 %v14624_v53  ;;  %v10714_v34 = vmul.f32 %v16472_v10, %v10712_v37  ;;  %v10726_v42 = vadd.f32 %v16485_v63, %v10724_v44  ;;  %v14643_v53 = vld [vmem:[%s17917_s1 + $0x10] sm:$0xff]  }
 0x2b4   : > { %v6086_v28 = vpop.f32.mrf.mxu1  ;;  %13860 = vmatprep.subr.bf16.mxu1 %v14630_v52  ;;  %v10727_v15 = vmax.f32 %v10715_v9, %v10725_v19  ;;  %v13502_v12 = vpop.f32.mrf.mxu0  ;;  %13789 = vmatmul.mubr.bf16.gmra.mxu0 %v14627_v20  ;;  %v14667_v20 = vld [vmem:[%s17917_s1 + $0x80] sm:$0xff]   ;;  %v16832_v19 = vld [vmem:[%s17917_s1 + $0xf8] sm:$0xff]  }
 0x2b5   : > { %v16767_v3 = vadd.f32 %v6086_v28, %v5781_v17  ;;  %13792 = vmatprep.mubr.bf16.mxu0 %v14631_v24  ;;  %v10716_v10 = vadd.f32 %v16485_v63, %v10714_v34  ;;  %13901 = vmatpush3.bf16.msra.mxu0 %v14635_v35  ;;  %v14644_v35 = vld [vmem:[%s14850_s10 + $0x170] sm:$0xff]   ;;  %v14646_v17 = vld [vmem:[%s14850_s10 + $0x178] sm:$0xff]  }
 0x2b6   : > { %v13550_v33 = vpop.f32.mrf.mxu1  ;;  %13837 = vmatmul.mubr.bf16.gmra.mxu1 %v14628_v45  ;;  %v10729_v26 = vmax.f32 %v10705_v16, %v10727_v15  ;;  %v5794_v6 = vpop.f32.mrf.mxu0  ;;  %13902 = vmatprep.subr.bf16.mxu0 %v14642_v14  ;;  %v14650_v15 = vld [vmem:[%s14850_s10 + $0x180] sm:$0xff]  }
 0x2b7   : > { %v16777_v25 = vadd.f32 %v13550_v33, %v13502_v12  ;;  %13861 = vmatpush3.bf16.msra.mxu1 %v14630_v52  ;;  %13840 = vmatprep.mubr.bf16.mxu1 %v14632_v58  ;;  %v10728_v13 = vmax.f32 %v10716_v10, %v10726_v42  ;;  %v14645_v52 = vld [vmem:[%s14850_s10 + $0x3d0] sm:$0xff]   ;;  %v16840_v58 = vld [vmem:[%s17917_s1 + $0x138] sm:$0xff]  }
 0x2b8   : > { %v6099_v30 = vpop.f32.mrf.mxu1  ;;  %13862 = vmatprep.subr.bf16.mxu1 %v14636_v51  ;;  %10731 = vst [vmem:[%s15804_s9 + $0x70] sm:$0xff] %v10729_v26  ;;  %v13503_v63 = vpop.f32.mrf.mxu0 }
 0x2b9   : > { %v16783_v36 = vadd.f32 %v6099_v30, %v5794_v6  ;;  %v10730_v54 = vmax.f32 %v10706_v47, %v10728_v13  ;;  %13903 = vmatpush3.bf16.msra.mxu0 %v14642_v14  ;;  %v14651_v14 = vld [vmem:[%s14850_s10 + $0x3e0] sm:$0xff]  }
 0x2ba   : > { %v13551_v32 = vpop.f32.mrf.mxu1  ;;  %v5797_v11 = vpop.f32.mrf.mxu0  ;;  %13904 = vmatprep.subr.bf16.mxu0 %v14648_v46 }
 0x2bb   : > { %v16791_v16 = vadd.f32 %v13551_v32, %v13503_v63  ;;  %13863 = vmatpush3.bf16.msra.mxu1 %v14636_v51  ;;  %10732 = vst [vmem:[%s15804_s9 + $0x78] sm:$0xff] %v10730_v54  ;;  %v14647_v51 = vld [vmem:[%s14850_s10 + $0x3d8] sm:$0xff]   ;;  %v14653_v32 = vld [vmem:[%s14850_s10 + $0x3e8] sm:$0xff]  }
 0x2bc   : > { %v6102_v0 = vpop.f32.mrf.mxu1  ;;  %13864 = vmatprep.subr.bf16.mxu1 %v14641_v29  ;;  %v13506_v38 = vpop.f32.mrf.mxu0  ;;  %13793 = vmatmul.mubr.bf16.gmra.mxu0 %v14633_v4  ;;  %v14652_v4 = vld [vmem:[%s14850_s10 + $0x188] sm:$0xff]  }
 0x2bd   : > { %v16798_v21 = vadd.f32 %v6102_v0, %v5797_v11  ;;  %13796 = vmatprep.mubr.bf16.mxu0 %v14637_v48  ;;  %13905 = vmatpush3.bf16.msra.mxu0 %v14648_v46  ;;  %v14657_v11 = vld [vmem:[%s14850_s10 + $0x180] sm:$0xff]  }
 0x2be   : > { %v13554_v57 = vpop.f32.mrf.mxu1  ;;  %13841 = vmatmul.mubr.bf16.gmra.mxu1 %v14634_v55  ;;  %v5810_v56 = vpop.f32.mrf.mxu0  ;;  %13906 = vmatprep.subr.bf16.mxu0 %v14654_v49  ;;  %v14656_v55 = vld [vmem:[%s14850_s10 + $0x190] sm:$0xff]  }
 0x2bf   : > { %v16803_v60 = vadd.f32 %v13554_v57, %v13506_v38  ;;  %13844 = vmatprep.mubr.bf16.mxu1 %v14638_v41  ;;  %13865 = vmatpush3.bf16.msra.mxu1 %v14641_v29 }
 0x2c0   : > { %v6115_v8 = vpop.f32.mrf.mxu1  ;;  %13866 = vmatprep.subr.bf16.mxu1 %v14643_v53  ;;  %v13507_v1 = vpop.f32.mrf.mxu0 }
 0x2c1   : > { %v16808_v39 = vadd.f32 %v6115_v8, %v5810_v56  ;;  %13907 = vmatpush3.bf16.msra.mxu0 %v14654_v49 }
 0x2c2   : > { %v13555_v61 = vpop.f32.mrf.mxu1  ;;  %v5813_v5 = vpop.f32.mrf.mxu0  ;;  %13908 = vmatprep.subr.bf16.mxu0 %v14660_v22 }
 0x2c3   : > { %v16816_v18 = vadd.f32 %v13555_v61, %v13507_v1  ;;  %13867 = vmatpush3.bf16.msra.mxu1 %v14643_v53  ;;  %v14658_v1 = vld [vmem:[%s14850_s10 + $0x198] sm:$0xff]   ;;  %v14663_v61 = vld [vmem:[%s14850_s10 + $0x1a0] sm:$0xff]  }
 0x2c4   : > { %v6118_v47 = vpop.f32.mrf.mxu1  ;;  %13868 = vmatprep.subr.bf16.mxu1 %v14649_v31  ;;  %v13510_v7 = vpop.f32.mrf.mxu0  ;;  %13797 = vmatmul.mubr.bf16.gmra.mxu0 %v14639_v59 }
 0x2c5   : > { %v16822_v43 = vadd.f32 %v6118_v47, %v5813_v5  ;;  %13800 = vmatprep.mubr.bf16.mxu0 %v14644_v35  ;;  %13909 = vmatpush3.bf16.msra.mxu0 %v14660_v22  ;;  %v14659_v22 = vld [vmem:[%s14850_s10 + $0x188] sm:$0xff]   ;;  %v14664_v5 = vld [vmem:[%s14850_s10 + $0x190] sm:$0xff]  }
 0x2c6   : > { %v13558_v44 = vpop.f32.mrf.mxu1  ;;  %13845 = vmatmul.mubr.bf16.gmra.mxu1 %v14640_v50  ;;  %v5826_v45 = vpop.f32.mrf.mxu0  ;;  %13910 = vmatprep.subr.bf16.mxu0 %v14667_v20  ;;  %v14662_v47 = vld [vmem:[%s17917_s1 + $0xf0] sm:$0xff]  }
 0x2c7   : > { %v16827_v23 = vadd.f32 %v13558_v44, %v13510_v7  ;;  %13848 = vmatprep.mubr.bf16.mxu1 %v14645_v52  ;;  %13869 = vmatpush3.bf16.msra.mxu1 %v14649_v31 }
 0x2c8   : > { %v6131_v24 = vpop.f32.mrf.mxu1  ;;  %13870 = vmatprep.subr.bf16.mxu1 %v14655_v27  ;;  %v13511_v37 = vpop.f32.mrf.mxu0 }
 0x2c9   : > { %v16834_v9 = vadd.f32 %v6131_v24, %v5826_v45  ;;  %13911 = vmatpush3.bf16.msra.mxu0 %v14667_v20 }
 0x2ca   : > { %v13559_v28 = vpop.f32.mrf.mxu1  ;;  %v5829_v12 = vpop.f32.mrf.mxu0  ;;  %13976 = vmatprep.subr.bf16.mxu0 %v16840_v58 }
 0x2cb   : > { %v16844_v34 = vadd.f32 %v13559_v28, %v13511_v37  ;;  %13871 = vmatpush3.bf16.msra.mxu1 %v14655_v27  ;;  %v14668_v37 = vld [vmem:[%s17917_s1 + $0xe8] sm:$0xff]  }
 0x2cc   : > { %v6134_v42 = vpop.f32.mrf.mxu1  ;;  %13936 = vmatprep.subr.bf16.mxu1 %v16832_v19  ;;  %v13514_v26 = vpop.f32.mrf.mxu0  ;;  %13801 = vmatmul.mubr.bf16.gmra.mxu0 %v14646_v17 }
 0x2cd   : > { %v16848_v33 = vadd.f32 %v6134_v42, %v5829_v12  ;;  %13804 = vmatprep.mubr.bf16.mxu0 %v14650_v15  ;;  %v14666_v12 = vld [vmem:[%s14850_s10 + $0x198] sm:$0xff]  }
 0x2ce   : > { %v13562_v10 = vpop.f32.mrf.mxu1  ;;  %13849 = vmatmul.mubr.bf16.gmra.mxu1 %v14647_v51  ;;  %v5842_v30 = vpop.f32.mrf.mxu0  ;;  %v14665_v51 = vld [vmem:[%s14850_s10 + $0x1a8] sm:$0xff]  }
 0x2cf   : > { %v16851_v6 = vadd.f32 %v13562_v10, %v13514_v26  ;;  %13852 = vmatprep.mubr.bf16.mxu1 %v14651_v14  ;;  %v14670_v14 = vld [vmem:[%s14850_s10 + $0x190] sm:$0xff]  }
 0x2d0   : > { %v6147_v29 = vpop.f32.mrf.mxu1  ;;  %v13515_v63 = vpop.f32.mrf.mxu0 }
 0x2d1   : > { %v16853_v13 = vadd.f32 %v6147_v29, %v5842_v30  ;;  %v14674_v30 = vld [vmem:[%s17917_s1 + $0xe0] sm:$0xff]  }
 0x2d2   : > { %v13563_v46 = vpop.f32.mrf.mxu1  ;;  %v5845_v54 = vpop.f32.mrf.mxu0 }
 0x2d3   : > { %v16858_v48 = vadd.f32 %v13563_v46, %v13515_v63 }
 0x2d4   : > { %v6150_v41 = vpop.f32.mrf.mxu1  ;;  %v13518_v53 = vpop.f32.mrf.mxu0  ;;  %13805 = vmatmul.mubr.bf16.gmra.mxu0 %v14652_v4 }
 0x2d5   : > { %v16861_v0 = vadd.f32 %v6150_v41, %v5845_v54  ;;  %13808 = vmatprep.mubr.bf16.mxu0 %v14656_v55  ;;  %v14680_v54 = vld [vmem:[%s17917_s1 + $0xd8] sm:$0xff]  }
 0x2d6   : > { %v13566_v38 = vpop.f32.mrf.mxu1  ;;  %13853 = vmatmul.mubr.bf16.gmra.mxu1 %v14653_v32  ;;  %v5858_v57 = vpop.f32.mrf.mxu0 }
 0x2d7   : > { %v16863_v49 = vadd.f32 %v13566_v38, %v13518_v53  ;;  %13872 = vmatprep.mubr.bf16.mxu1 %v14657_v11  ;;  %v14672_v53 = vld [vmem:[%s14850_s10 + $0x198] sm:$0xff]  }
 0x2d8   : > { %v6163_v56 = vpop.f32.mrf.mxu1  ;;  %v13519_v31 = vpop.f32.mrf.mxu0 }
 0x2d9   : > { %v16865_v8 = vadd.f32 %v6163_v56, %v5858_v57  ;;  %v14671_v57 = vld [vmem:[%s14850_s10 + $0x1a8] sm:$0xff]  }
 0x2da   : > { %v13567_v59 = vpop.f32.mrf.mxu1  ;;  %v5861_v35 = vpop.f32.mrf.mxu0 }
 0x2db   : > { %v16870_v50 = vadd.f32 %v13567_v59, %v13519_v31  ;;  %v14676_v59 = vld [vmem:[%s14850_s10 + $0x1b0] sm:$0xff]  }
 0x2dc   : > { %v6166_v52 = vpop.f32.mrf.mxu1  ;;  %v13522_v7 = vpop.f32.mrf.mxu0  ;;  %13809 = vmatmul.mubr.bf16.gmra.mxu0 %v14658_v1  ;;  %v14675_v1 = vld [vmem:[%s17917_s1 + $0x130] sm:$0xff]  }
 0x2dd   : > { %v16876_v27 = vadd.f32 %v6166_v52, %v5861_v35  ;;  %13812 = vmatprep.mubr.bf16.mxu0 %v14663_v61  ;;  %v14677_v61 = vld [vmem:[%s14850_s10 + $0x1a0] sm:$0xff]   ;;  %v14682_v52 = vld [vmem:[%s17917_s1 + $0xd0] sm:$0xff]  }
 0x2de   : > { %v13570_v20 = vpop.f32.mrf.mxu1  ;;  %13873 = vmatmul.mubr.bf16.vlgmr.msra.gmra.mxu1 %v14659_v22  ;;  %v5874_v45 = vpop.f32.mrf.mxu0 }
 0x2df   : > { %v16878_v44 = vadd.f32 %v13570_v20, %v13522_v7  ;;  %13937 = vmatpush3.bf16.msra.mxu1 %v16832_v19  ;;  %13876 = vmatprep.mubr.bf16.mxu1 %v14664_v5  ;;  %v14669_v19 = vld [vmem:[%s14850_s10 + $0x1a0] sm:$0xff]  }
 0x2e0   : > { %v6179_v24 = vpop.f32.mrf.mxu1  ;;  %13938 = vmatprep.subr.bf16.mxu1 %v14662_v47  ;;  %v13523_v28 = vpop.f32.mrf.mxu0 }
 0x2e1   : > { %v16884_v17 = vadd.f32 %v6179_v24, %v5874_v45  ;;  %v14681_v45 = vld [vmem:[%s17917_s1 + $0x128] sm:$0xff]  }
 0x2e2   : > { %v13571_v15 = vpop.f32.mrf.mxu1  ;;  %v5877_v26 = vpop.f32.mrf.mxu0 }
 0x2e3   : > { %v16889_v42 = vadd.f32 %v13571_v15, %v13523_v28  ;;  %13939 = vmatpush3.bf16.msra.mxu1 %v14662_v47 }
 0x2e4   : > { %v6182_v10 = vpop.f32.mrf.mxu1  ;;  %13940 = vmatprep.subr.bf16.mxu1 %v14668_v37  ;;  %v13526_v63 = vpop.f32.mrf.mxu0  ;;  %13813 = vmatmul.mubr.bf16.gmra.mxu0 %v14665_v51  ;;  %v14679_v51 = vld [vmem:[%s14850_s10 + $0x1a8] sm:$0xff]  }
 0x2e5   : > { %v16895_v29 = vadd.f32 %v6182_v10, %v5877_v26  ;;  %13912 = vmatprep.mubr.bf16.mxu0 %v14670_v14  ;;  %v14678_v26 = vld [vmem:[%s14850_s10 + $0x1b8] sm:$0xff]   ;;  %v14684_v10 = vld [vmem:[%s14850_s10 + $0x1b0] sm:$0xff]  }
 0x2e6   : > { %v13574_v4 = vpop.f32.mrf.mxu1  ;;  %13877 = vmatmul.mubr.bf16.gmra.mxu1 %v14666_v12  ;;  %v5890_v32 = vpop.f32.mrf.mxu0 }
 0x2e7   : > { %v16897_v46 = vadd.f32 %v13574_v4, %v13526_v63  ;;  %13941 = vmatpush3.bf16.msra.mxu1 %v14668_v37  ;;  %13880 = vmatprep.mubr.bf16.mxu1 %v14669_v19 }
 0x2e8   : > { %v6195_v55 = vpop.f32.mrf.mxu1  ;;  %13942 = vmatprep.subr.bf16.mxu1 %v14674_v30  ;;  %v13527_v41 = vpop.f32.mrf.mxu0 }
 0x2e9   : > { %v16902_v11 = vadd.f32 %v6195_v55, %v5890_v32  ;;  %v14687_v32 = vld [vmem:[%s17917_s1 + $0x120] sm:$0xff]  }
 0x2ea   : > { %v13575_v38 = vpop.f32.mrf.mxu1  ;;  %v5893_v31 = vpop.f32.mrf.mxu0 }
 0x2eb   : > { %v16906_v56 = vadd.f32 %v13575_v38, %v13527_v41  ;;  %13943 = vmatpush3.bf16.msra.mxu1 %v14674_v30  ;;  %v14693_v38 = vld [vmem:[%s17917_s1 + $0x118] sm:$0xff]  }
 0x2ec   : > { %v6198_v22 = vpop.f32.mrf.mxu1  ;;  %13944 = vmatprep.subr.bf16.mxu1 %v14680_v54  ;;  %v13594_v5 = vpop.f32.mrf.mxu0  ;;  %13913 = vmatmul.mubr.bf16.vlgmr.msra.gmra.mxu0 %v14672_v53 }
 0x2ed   : > { %v16913_v35 = vadd.f32 %v6198_v22, %v5893_v31  ;;  %v6565_v47 = vadd.f32 %v13594_v5, %v16739_v2  ;;  %13977 = vmatpush3.bf16.msra.mxu0 %v16840_v58  ;;  %13916 = vmatprep.mubr.bf16.mxu0 %v14677_v61  ;;  %v14688_v58 = vld [vmem:[%s17917_s1 + $0xc8] sm:$0xff]   ;;  %v16958_v22 = vld [vmem:[%s17917_s1 + $0x178] sm:$0xff]  }
 0x2ee   : > { %v13642_v7 = vpop.f32.mrf.mxu1  ;;  %13881 = vmatmul.mubr.bf16.gmra.mxu1 %v14671_v57  ;;  %v6436_v20 = vpop.f32.mrf.mxu0  ;;  %13978 = vmatprep.subr.bf16.mxu0 %v14675_v1 }
 0x2ef   : > { %13884 = vmatprep.mubr.bf16.mxu1 %v14676_v59  ;;  %v16923_v24 = vadd.f32 %v13642_v7, %v6565_v47  ;;  %v6563_v37 = vadd.f32 %v6436_v20, %v16752_v40  ;;  %13945 = vmatpush3.bf16.msra.mxu1 %v14680_v54  ;;  %v14683_v40 = vld [vmem:[%s14850_s10 + $0x1c0] sm:$0xff]   ;;  %v14686_v59 = vld [vmem:[%s14850_s10 + $0x1b8] sm:$0xff]   ;;  %v14685_v47 = vld [vmem:[%s14850_s10 + $0x1c8] sm:$0xff]  }
 0x2f0   : > { %v6821_v28 = vpop.f32.mrf.mxu1  ;;  %v13595_v2 = vpop.f32.mrf.mxu0  ;;  %13946 = vmatprep.subr.bf16.mxu1 %v14682_v52  ;;  %v14690_v7 = vld [vmem:[%s14850_s10 + $0x1c0] sm:$0xff]   ;;  %v14689_v20 = vld [vmem:[%s14850_s10 + $0x1d0] sm:$0xff]  }
 0x2f1   : > { %v16930_v15 = vadd.f32 %v6821_v28, %v6563_v37  ;;  %v6566_v12 = vadd.f32 %v13595_v2, %v16760_v62  ;;  %13979 = vmatpush3.bf16.msra.mxu0 %v14675_v1  ;;  %v14694_v62 = vld [vmem:[%s17917_s1 + $0xc0] sm:$0xff]   ;;  %v14695_v2 = vld [vmem:[%s17917_s1 + $0x110] sm:$0xff]  }
 0x2f2   : > { %v13643_v14 = vpop.f32.mrf.mxu1  ;;  %v6439_v19 = vpop.f32.mrf.mxu0  ;;  %13980 = vmatprep.subr.bf16.mxu0 %v14681_v45 }
 0x2f3   : > { %v16936_v30 = vadd.f32 %v13643_v14, %v6566_v12  ;;  %v6564_v63 = vadd.f32 %v6439_v19, %v16767_v3  ;;  %13947 = vmatpush3.bf16.msra.mxu1 %v14682_v52 }
 0x2f4   : > { %v6824_v4 = vpop.f32.mrf.mxu1  ;;  %v13598_v55 = vpop.f32.mrf.mxu0  ;;  %13917 = vmatmul.mubr.bf16.gmra.mxu0 %v14679_v51  ;;  %13948 = vmatprep.subr.bf16.mxu1 %v14688_v58 }
 0x2f5   : > { %v16945_v54 = vadd.f32 %v6824_v4, %v6564_v63  ;;  %v6569_v41 = vadd.f32 %v13598_v55, %v16777_v25  ;;  %13981 = vmatpush3.bf16.msra.mxu0 %v14681_v45  ;;  %13920 = vmatprep.mubr.bf16.mxu0 %v14684_v10  ;;  %v14692_v10 = vld [vmem:[%s14850_s10 + $0x1c8] sm:$0xff]   ;;  %v14691_v55 = vld [vmem:[%s14850_s10 + $0x1d8] sm:$0xff]  }
 0x2f6   : > { %v13646_v53 = vpop.f32.mrf.mxu1  ;;  %13885 = vmatmul.mubr.bf16.gmra.mxu1 %v14678_v26  ;;  %v6452_v3 = vpop.f32.mrf.mxu0  ;;  %13982 = vmatprep.subr.bf16.mxu0 %v14687_v32 }
 0x2f7   : > { %13888 = vmatprep.mubr.bf16.mxu1 %v14683_v40  ;;  %v16951_v57 = vadd.f32 %v13646_v53, %v6569_v41  ;;  %v6567_v31 = vadd.f32 %v6452_v3, %v16783_v36  ;;  %13949 = vmatpush3.bf16.msra.mxu1 %v14688_v58  ;;  %v14701_v40 = vld [vmem:[%s17917_s1 + $0x108] sm:$0xff]   ;;  %v14697_v53 = vld [vmem:[%s14850_s10 + $0x3a0] sm:$0xff]  }
 0x2f8   : > { %v6837_v1 = vpop.f32.mrf.mxu1  ;;  %v13599_v25 = vpop.f32.mrf.mxu0  ;;  %13950 = vmatprep.subr.bf16.mxu1 %v14694_v62 }
 0x2f9   : > { %v16960_v61 = vadd.f32 %v6837_v1, %v6567_v31  ;;  %v6570_v5 = vadd.f32 %v13599_v25, %v16791_v16  ;;  %13983 = vmatpush3.bf16.msra.mxu0 %v14687_v32  ;;  %v14707_v31 = vld [vmem:[%s17917_s1 + $0x100] sm:$0xff]  }
 0x2fa   : > { %v13647_v52 = vpop.f32.mrf.mxu1  ;;  %v6455_v36 = vpop.f32.mrf.mxu0  ;;  %13984 = vmatprep.subr.bf16.mxu0 %v14693_v38 }
 0x2fb   : > { %v16966_v45 = vadd.f32 %v13647_v52, %v6570_v5  ;;  %v6568_v37 = vadd.f32 %v6455_v36, %v16798_v21  ;;  %13951 = vmatpush3.bf16.msra.mxu1 %v14694_v62  ;;  %v14696_v62 = vld [vmem:[%s14850_s10 + $0x1d0] sm:$0xff]   ;;  %v14698_v36 = vld [vmem:[%s14850_s10 + $0x1d8] sm:$0xff]  }
 0x2fc   : > { %v6840_v28 = vpop.f32.mrf.mxu1  ;;  %v13602_v51 = vpop.f32.mrf.mxu0  ;;  %13921 = vmatmul.mubr.bf16.gmra.mxu0 %v14686_v59  ;;  %14016 = vmatprep.subr.bf16.mxu1 %v16958_v22 }
 0x2fd   : > { %v16973_v16 = vadd.f32 %v6840_v28, %v6568_v37  ;;  %v6573_v58 = vadd.f32 %v13602_v51, %v16803_v60  ;;  %13924 = vmatprep.mubr.bf16.mxu0 %v14690_v7  ;;  %13985 = vmatpush3.bf16.msra.mxu0 %v14693_v38  ;;  %v17004_v7 = vld [vmem:[%s17917_s1 + $0x1b8] sm:$0xff]   ;;  %v14703_v51 = vld [vmem:[%s14850_s10 + $0x1e0] sm:$0xff]  }
 0x2fe   : > { %v13650_v12 = vpop.f32.mrf.mxu1  ;;  %13889 = vmatmul.mubr.bf16.gmra.mxu1 %v14685_v47  ;;  %v6468_v21 = vpop.f32.mrf.mxu0  ;;  %13986 = vmatprep.subr.bf16.mxu0 %v14695_v2 }
 0x2ff   : > { %13892 = vmatprep.mubr.bf16.mxu1 %v14689_v20  ;;  %v16976_v14 = vadd.f32 %v13650_v12, %v6573_v58  ;;  %v6571_v26 = vadd.f32 %v6468_v21, %v16808_v39  ;;  %v14704_v12 = vld [vmem:[%s14850_s10 + $0x3b0] sm:$0xff]  }
 0x300   : > { %v6853_v19 = vpop.f32.mrf.mxu1  ;;  %v13603_v60 = vpop.f32.mrf.mxu0 }
 0x301   : > { %v16983_v63 = vadd.f32 %v6853_v19, %v6571_v26  ;;  %v6574_v4 = vadd.f32 %v13603_v60, %v16816_v18  ;;  %13987 = vmatpush3.bf16.msra.mxu0 %v14695_v2  ;;  %v14699_v2 = vld [vmem:[%s14850_s10 + $0x3a8] sm:$0xff]   ;;  %v14702_v19 = vld [vmem:[%s17917_s1 + $0x170] sm:$0xff]  }
 0x302   : > { %v13651_v32 = vpop.f32.mrf.mxu1  ;;  %v6471_v41 = vpop.f32.mrf.mxu0  ;;  %13988 = vmatprep.subr.bf16.mxu0 %v14701_v40 }
 0x303   : > { %v16989_v3 = vadd.f32 %v13651_v32, %v6574_v4  ;;  %v6572_v39 = vadd.f32 %v6471_v41, %v16822_v43  ;;  %v14705_v41 = vld [vmem:[%s14850_s10 + $0x1e8] sm:$0xff]  }
 0x304   : > { %v6856_v38 = vpop.f32.mrf.mxu1  ;;  %v13606_v1 = vpop.f32.mrf.mxu0  ;;  %13925 = vmatmul.mubr.bf16.gmra.mxu0 %v14692_v10 }
 0x305   : > { %v16995_v18 = vadd.f32 %v6856_v38, %v6572_v39  ;;  %v6577_v25 = vadd.f32 %v13606_v1, %v16827_v23  ;;  %13928 = vmatprep.mubr.bf16.mxu0 %v14696_v62  ;;  %13989 = vmatpush3.bf16.msra.mxu0 %v14701_v40  ;;  %v14706_v38 = vld [vmem:[%s14850_s10 + $0x3b8] sm:$0xff]  }
 0x306   : > { %v13654_v59 = vpop.f32.mrf.mxu1  ;;  %13893 = vmatmul.mubr.bf16.gmra.mxu1 %v14691_v55  ;;  %v6484_v5 = vpop.f32.mrf.mxu0  ;;  %13990 = vmatprep.subr.bf16.mxu0 %v14707_v31 }
 0x307   : > { %13952 = vmatprep.mubr.bf16.mxu1 %v14697_v53  ;;  %v16998_v43 = vadd.f32 %v13654_v59, %v6577_v25  ;;  %v6575_v52 = vadd.f32 %v6484_v5, %v16834_v9  ;;  %v14709_v25 = vld [vmem:[%s14850_s10 + $0x3c0] sm:$0xff]  }
 0x308   : > { %v6869_v47 = vpop.f32.mrf.mxu1  ;;  %v13607_v23 = vpop.f32.mrf.mxu0 }
 0x309   : > { %v17007_v20 = vadd.f32 %v6869_v47, %v6575_v52  ;;  %v6578_v37 = vadd.f32 %v13607_v23, %v16844_v34  ;;  %13991 = vmatpush3.bf16.msra.mxu0 %v14707_v31  ;;  %v14710_v31 = vld [vmem:[%s14850_s10 + $0x1a0] sm:$0xff]  }
 0x30a   : > { %v13655_v28 = vpop.f32.mrf.mxu1  ;;  %v6487_v58 = vpop.f32.mrf.mxu0  ;;  %14056 = vmatprep.subr.bf16.mxu0 %v17004_v7  ;;  %v14714_v52 = vld [vmem:[%s17917_s1 + $0x160] sm:$0xff]  }
 0x30b   : > { %v17013_v9 = vadd.f32 %v13655_v28, %v6578_v37  ;;  %v6576_v21 = vadd.f32 %v6487_v58, %v16848_v33  ;;  %v14712_v58 = vld [vmem:[%s14850_s10 + $0x1a8] sm:$0xff]  }
 0x30c   : > { %v6872_v26 = vpop.f32.mrf.mxu1  ;;  %v13610_v40 = vpop.f32.mrf.mxu0  ;;  %13929 = vmatmul.mubr.bf16.gmra.mxu0 %v14698_v36 }
 0x30d   : > { %v17020_v34 = vadd.f32 %v6872_v26, %v6576_v21  ;;  %v6581_v60 = vadd.f32 %v13610_v40, %v16851_v6  ;;  %13932 = vmatprep.mubr.bf16.mxu0 %v14703_v51  ;;  %v14708_v6 = vld [vmem:[%s17917_s1 + $0x168] sm:$0xff]   ;;  %v14720_v51 = vld [vmem:[%s17917_s1 + $0x158] sm:$0xff]  }
 0x30e   : > { %v13658_v10 = vpop.f32.mrf.mxu1  ;;  %13953 = vmatmul.mubr.bf16.vlgmr.msra.gmra.mxu1 %v14699_v2  ;;  %v6500_v33 = vpop.f32.mrf.mxu0 }
 0x30f   : > { %14017 = vmatpush3.bf16.msra.mxu1 %v16958_v22  ;;  %13956 = vmatprep.mubr.bf16.mxu1 %v14704_v12  ;;  %v17024_v4 = vadd.f32 %v13658_v10, %v6581_v60  ;;  %v6579_v32 = vadd.f32 %v6500_v33, %v16853_v13  ;;  %v14716_v60 = vld [vmem:[%s14850_s10 + $0x3d0] sm:$0xff]  }
 0x310   : > { %v6885_v55 = vpop.f32.mrf.mxu1  ;;  %14018 = vmatprep.subr.bf16.mxu1 %v14702_v19  ;;  %v13611_v62 = vpop.f32.mrf.mxu0 }
 0x311   : > { %v17031_v53 = vadd.f32 %v6885_v55, %v6579_v32  ;;  %v6582_v39 = vadd.f32 %v13611_v62, %v16858_v48  ;;  %v14717_v55 = vld [vmem:[%s14850_s10 + $0x1b0] sm:$0xff]  }
 0x312   : > { %v13659_v22 = vpop.f32.mrf.mxu1  ;;  %v6503_v1 = vpop.f32.mrf.mxu0 }
 0x313   : > { %14019 = vmatpush3.bf16.msra.mxu1 %v14702_v19  ;;  %v17037_v59 = vadd.f32 %v13659_v22, %v6582_v39  ;;  %v6580_v13 = vadd.f32 %v6503_v1, %v16861_v0  ;;  %v14711_v19 = vld [vmem:[%s14850_s10 + $0x3c8] sm:$0xff]  }
 0x314   : > { %v6888_v5 = vpop.f32.mrf.mxu1  ;;  %14020 = vmatprep.subr.bf16.mxu1 %v14708_v6  ;;  %v13614_v47 = vpop.f32.mrf.mxu0  ;;  %13933 = vmatmul.mubr.bf16.gmra.mxu0 %v14705_v41 }
 0x315   : > { %v17043_v48 = vadd.f32 %v6888_v5, %v6580_v13  ;;  %v6585_v23 = vadd.f32 %v13614_v47, %v16863_v49  ;;  %13992 = vmatprep.mubr.bf16.mxu0 %v14710_v31  ;;  %v14728_v13 = vld [vmem:[%s17917_s1 + $0x148] sm:$0xff]  }
 0x316   : > { %v13662_v36 = vpop.f32.mrf.mxu1  ;;  %13957 = vmatmul.mubr.bf16.gmra.mxu1 %v14706_v38  ;;  %v6516_v37 = vpop.f32.mrf.mxu0 }
 0x317   : > { %14021 = vmatpush3.bf16.msra.mxu1 %v14708_v6  ;;  %13960 = vmatprep.mubr.bf16.mxu1 %v14709_v25  ;;  %v17046_v0 = vadd.f32 %v13662_v36, %v6585_v23  ;;  %v6583_v28 = vadd.f32 %v6516_v37, %v16865_v8  ;;  %v17060_v8 = vld [vmem:[%s17917_s1 + $0x1b0] sm:$0xff]   ;;  %v14719_v25 = vld [vmem:[%s14850_s10 + $0x1b8] sm:$0xff]   ;;  %v14723_v36 = vld [vmem:[%s14850_s10 + $0x3e0] sm:$0xff]  }
 0x318   : > { %v6901_v2 = vpop.f32.mrf.mxu1  ;;  %14022 = vmatprep.subr.bf16.mxu1 %v14714_v52  ;;  %v13615_v49 = vpop.f32.mrf.mxu0  ;;  %v14718_v23 = vld [vmem:[%s14850_s10 + $0x3d8] sm:$0xff]   ;;  %v14724_v37 = vld [vmem:[%s14850_s10 + $0x1c0] sm:$0xff]  }
 0x319   : > { %v17053_v12 = vadd.f32 %v6901_v2, %v6583_v28  ;;  %v6586_v21 = vadd.f32 %v13615_v49, %v16870_v50  ;;  %v14722_v50 = vld [vmem:[%s17917_s1 + $0x150] sm:$0xff]   ;;  %v17101_v49 = vld [vmem:[%s17917_s1 + $0x1a0] sm:$0xff]  }
 0x31a   : > { %v13663_v26 = vpop.f32.mrf.mxu1  ;;  %v6519_v40 = vpop.f32.mrf.mxu0 }
 0x31b   : > { %14023 = vmatpush3.bf16.msra.mxu1 %v14714_v52  ;;  %v17063_v10 = vadd.f32 %v13663_v26, %v6586_v21  ;;  %v6584_v33 = vadd.f32 %v6519_v40, %v16876_v27  ;;  %v17078_v27 = vld [vmem:[%s17917_s1 + $0x1a8] sm:$0xff]   ;;  %v17113_v40 = vld [vmem:[%s17917_s1 + $0x198] sm:$0xff]  }
 0x31c   : > { %v6904_v32 = vpop.f32.mrf.mxu1  ;;  %14024 = vmatprep.subr.bf16.mxu1 %v14720_v51  ;;  %v13618_v6 = vpop.f32.mrf.mxu0  ;;  %13993 = vmatmul.mubr.bf16.vlgmr.msra.gmra.mxu0 %v14712_v58  ;;  %v14734_v58 = vld [vmem:[%s17917_s1 + $0x140] sm:$0xff]  }
 0x31d   : > { %v17070_v62 = vadd.f32 %v6904_v32, %v6584_v33  ;;  %v6589_v41 = vadd.f32 %v13618_v6, %v16878_v44  ;;  %14057 = vmatpush3.bf16.msra.mxu0 %v17004_v7  ;;  %13996 = vmatprep.mubr.bf16.mxu0 %v14717_v55  ;;  %v14726_v55 = vld [vmem:[%s14850_s10 + $0x1c8] sm:$0xff]  }
 0x31e   : > { %v13666_v39 = vpop.f32.mrf.mxu1  ;;  %13961 = vmatmul.mubr.bf16.gmra.mxu1 %v14711_v19  ;;  %v6532_v22 = vpop.f32.mrf.mxu0  ;;  %14058 = vmatprep.subr.bf16.mxu0 %v17060_v8 }
 0x31f   : > { %13964 = vmatprep.mubr.bf16.mxu1 %v14716_v60  ;;  %v17080_v38 = vadd.f32 %v13666_v39, %v6589_v41  ;;  %v6587_v31 = vadd.f32 %v6532_v22, %v16884_v17  ;;  %14025 = vmatpush3.bf16.msra.mxu1 %v14720_v51  ;;  %v14725_v39 = vld [vmem:[%s14850_s10 + $0x3e8] sm:$0xff]   ;;  %v14730_v22 = vld [vmem:[%s14850_s10 + $0x1d0] sm:$0xff]  }
 0x320   : > { %v6917_v44 = vpop.f32.mrf.mxu1  ;;  %v13619_v1 = vpop.f32.mrf.mxu0  ;;  %14026 = vmatprep.subr.bf16.mxu1 %v14722_v50 }
 0x321   : > { %v17087_v5 = vadd.f32 %v6917_v44, %v6587_v31  ;;  %v6590_v52 = vadd.f32 %v13619_v1, %v16889_v42  ;;  %14059 = vmatpush3.bf16.msra.mxu0 %v17060_v8  ;;  %v14729_v44 = vld [vmem:[%s14850_s10 + $0x3f0] sm:$0xff]  }
 0x322   : > { %v13667_v47 = vpop.f32.mrf.mxu1  ;;  %v6535_v17 = vpop.f32.mrf.mxu0  ;;  %14060 = vmatprep.subr.bf16.mxu0 %v17078_v27 }
 0x323   : > { %v17095_v28 = vadd.f32 %v13667_v47, %v6590_v52  ;;  %v6588_v2 = vadd.f32 %v6535_v17, %v16895_v29  ;;  %14027 = vmatpush3.bf16.msra.mxu1 %v14722_v50 }
 0x324   : > { %v6920_v51 = vpop.f32.mrf.mxu1  ;;  %v13622_v42 = vpop.f32.mrf.mxu0  ;;  %13997 = vmatmul.mubr.bf16.gmra.mxu0 %v14719_v25  ;;  %14028 = vmatprep.subr.bf16.mxu1 %v14728_v13 }
 0x325   : > { %v17106_v21 = vadd.f32 %v6920_v51, %v6588_v2  ;;  %v6593_v26 = vadd.f32 %v13622_v42, %v16897_v46  ;;  %14061 = vmatpush3.bf16.msra.mxu0 %v17078_v27  ;;  %14000 = vmatprep.mubr.bf16.mxu0 %v14724_v37  ;;  %v14732_v51 = vld [vmem:[%s14850_s10 + $0x1d8] sm:$0xff]  }
 0x326   : > { %v13670_v29 = vpop.f32.mrf.mxu1  ;;  %13965 = vmatmul.mubr.bf16.gmra.mxu1 %v14718_v23  ;;  %v6548_v19 = vpop.f32.mrf.mxu0  ;;  %14062 = vmatprep.subr.bf16.mxu0 %v17101_v49 }
 0x327   : > { %13968 = vmatprep.mubr.bf16.mxu1 %v14723_v36  ;;  %v17115_v60 = vadd.f32 %v13670_v29, %v6593_v26  ;;  %v6591_v33 = vadd.f32 %v6548_v19, %v16902_v11  ;;  %14029 = vmatpush3.bf16.msra.mxu1 %v14728_v13  ;;  %v17134_v13 = vld [vmem:[%s17917_s1 + $0x190] sm:$0xff]   ;;  %v14731_v29 = vld [vmem:[%s14850_s10 + $0x3f8] sm:$0xff]   ;;  %v14736_v19 = vld [vmem:[%s14850_s10 + $0x1e0] sm:$0xff]  }
 0x328   : > { %v6933_v46 = vpop.f32.mrf.mxu1  ;;  %v13623_v32 = vpop.f32.mrf.mxu0  ;;  %14030 = vmatprep.subr.bf16.mxu1 %v14734_v58 }
 0x329   : > { %v17120_v6 = vadd.f32 %v6933_v46, %v6591_v33  ;;  %v6594_v50 = vadd.f32 %v13623_v32, %v16906_v56  ;;  %14063 = vmatpush3.bf16.msra.mxu0 %v17101_v49  ;;  %v14737_v46 = vld [vmem:[%s14850_s10 + $0x3b0] sm:$0xff]  }
 0x32a   : > { %v13671_v41 = vpop.f32.mrf.mxu1  ;;  %v6551_v31 = vpop.f32.mrf.mxu0  ;;  %14064 = vmatprep.subr.bf16.mxu0 %v17113_v40 }
 0x32b   : > { %17969 = vst [vmem:[#allocation3_spill] sm:$0xff] %v17120_v6  ;;  %v17128_v11 = vadd.f32 %v13671_v41, %v6594_v50  ;;  %v6592_v1 = vadd.f32 %v6551_v31, %v16913_v35  ;;  %14031 = vmatpush3.bf16.msra.mxu1 %v14734_v58  ;;  %v14761_v6 = vld [vmem:[%s14850_s10 + $0x1e8] sm:$0xff]  }
 0x32c   : > { %v6936_v25 = vpop.f32.mrf.mxu1  ;;  %v13690_v56 = vpop.f32.mrf.mxu0  ;;  %14001 = vmatmul.mubr.bf16.gmra.mxu0 %v14726_v55  ;;  %14096 = vmatprep.subr.bf16.mxu1 %v17004_v7 }
 0x32d   : > { %17970 = vst [vmem:[#allocation4_spill] sm:$0xff] %v17128_v11  ;;  %v17137_v52 = vadd.f32 %v6936_v25, %v6592_v1  ;;  %v7335_v47 = vadd.f32 %v13690_v56, %v16923_v24  ;;  %14004 = vmatprep.mubr.bf16.mxu0 %v14730_v22  ;;  %14065 = vmatpush3.bf16.msra.mxu0 %v17113_v40  ;;  %v17148_v24 = vld [vmem:[%s17917_s1 + $0x188] sm:$0xff]   ;;  %v14739_v25 = vld [vmem:[%s14850_s10 + $0x3b8] sm:$0xff]   ;;  %v14741_v56 = vld [vmem:[%s14850_s10 + $0x1f0] sm:$0xff]  }
 0x32e   : > { %v13738_v23 = vpop.f32.mrf.mxu1  ;;  %13969 = vmatmul.mubr.bf16.gmra.mxu1 %v14725_v39  ;;  %v7206_v35 = vpop.f32.mrf.mxu0  ;;  %14066 = vmatprep.subr.bf16.mxu0 %v17134_v13 }
 0x32f   : > { %17971 = vst [vmem:[#allocation11_spill] sm:$0xff] %v17137_v52  ;;  %13972 = vmatprep.mubr.bf16.mxu1 %v14729_v44  ;;  %v17141_v17 = vadd.f32 %v13738_v23, %v7335_v47  ;;  %v7333_v36 = vadd.f32 %v7206_v35, %v16930_v15  ;;  %v14738_v44 = vld [vmem:[%s14850_s10 + $0x1e8] sm:$0xff]   ;;  %v14742_v23 = vld [vmem:[%s14850_s10 + $0x3c0] sm:$0xff]   ;;  %v14755_v52 = vld [vmem:[%s14850_s10 + $0x1d0] sm:$0xff]  }
 0x330   : > { %v7591_v37 = vpop.f32.mrf.mxu1  ;;  %v13691_v2 = vpop.f32.mrf.mxu0 }
 0x331   : > { %v17151_v42 = vadd.f32 %v7591_v37, %v7333_v36  ;;  %v7336_v58 = vadd.f32 %v13691_v2, %v16936_v30  ;;  %14067 = vmatpush3.bf16.msra.mxu0 %v17134_v13  ;;  %v17165_v30 = vld [vmem:[%s17917_s1 + $0x180] sm:$0xff]  }
 0x332   : > { %v13739_v26 = vpop.f32.mrf.mxu1  ;;  %v7209_v33 = vpop.f32.mrf.mxu0  ;;  %14068 = vmatprep.subr.bf16.mxu0 %v17148_v24 }
 0x333   : > { %v17158_v15 = vadd.f32 %v13739_v26, %v7336_v58  ;;  %v7334_v32 = vadd.f32 %v7209_v33, %v16945_v54  ;;  %v14743_v33 = vld [vmem:[%s14850_s10 + $0x1f8] sm:$0xff]  }
 0x334   : > { %v7594_v55 = vpop.f32.mrf.mxu1  ;;  %v17167_v50 = vpop.f32.mrf.mxu0  ;;  %14005 = vmatmul.mubr.bf16.gmra.mxu0 %v14732_v51 }
 0x335   : > { %v17169_v41 = vadd.f32 %v7594_v55, %v7334_v32  ;;  %14008 = vmatprep.mubr.bf16.mxu0 %v14736_v19  ;;  %14069 = vmatpush3.bf16.msra.mxu0 %v17148_v24  ;;  %v14744_v55 = vld [vmem:[%s14850_s10 + $0x3c8] sm:$0xff]  }
 0x336   : > { %v17171_v39 = vpop.f32.mrf.mxu1  ;;  %13973 = vmatmul.mubr.bf16.gmra.mxu1 %v14731_v29  ;;  %v17173_v54 = vpop.f32.mrf.mxu0  ;;  %14070 = vmatprep.subr.bf16.mxu0 %v17165_v30 }
 0x337   : > { %14032 = vmatprep.mubr.bf16.mxu1 %v14737_v46 }
 0x338   : > { %v17176_v22 = vpop.f32.mrf.mxu1  ;;  %v17179_v31 = vpop.f32.mrf.mxu0 }
 0x339   : > { %14071 = vmatpush3.bf16.msra.mxu0 %v17165_v30 }
 0x33a   : > { %v17182_v1 = vpop.f32.mrf.mxu1  ;;  %v17186_v47 = vpop.f32.mrf.mxu0 }
 0x33c   : > { %v17190_v35 = vpop.f32.mrf.mxu1  ;;  %v13698_v36 = vpop.f32.mrf.mxu0  ;;  %14009 = vmatmul.mubr.bf16.gmra.mxu0 %v14738_v44  ;;  %v14747_v44 = vld [vmem:[%s14850_s10 + $0x1b0] sm:$0xff]  }
 0x33d   : > { %v7343_v37 = vadd.f32 %v13698_v36, %v16976_v14  ;;  %14012 = vmatprep.mubr.bf16.mxu0 %v14741_v56 }
 0x33e   : > { %v13746_v2 = vpop.f32.mrf.mxu1  ;;  %14033 = vmatmul.mubr.bf16.vlgmr.msra.gmra.mxu1 %v14739_v25  ;;  %v7238_v51 = vpop.f32.mrf.mxu0  ;;  %v14746_v25 = vld [vmem:[%s14850_s10 + $0x3d0] sm:$0xff]  }
 0x33f   : > { %14104 = vmatpush3.bf16.msra.mxu1 %v17004_v7  ;;  %14036 = vmatprep.mubr.bf16.mxu1 %v14742_v23  ;;  %v17194_v58 = vadd.f32 %v13746_v2, %v7343_v37  ;;  %v7341_v26 = vadd.f32 %v7238_v51, %v16983_v63  ;;  %v14749_v51 = vld [vmem:[%s14850_s10 + $0x1b8] sm:$0xff]  }
 0x340   : > { %v7623_v29 = vpop.f32.mrf.mxu1  ;;  %14097 = vmatprep.subr.bf16.mxu1 %v17060_v8  ;;  %v13699_v19 = vpop.f32.mrf.mxu0 }
 0x341   : > { %v17199_v14 = vadd.f32 %v7623_v29, %v7341_v26  ;;  %v7344_v46 = vadd.f32 %v13699_v19, %v16989_v3  ;;  %v14748_v29 = vld [vmem:[%s14850_s10 + $0x3d8] sm:$0xff]   ;;  %v14751_v19 = vld [vmem:[%s14850_s10 + $0x1c0] sm:$0xff]  }
 0x342   : > { %v13747_v32 = vpop.f32.mrf.mxu1  ;;  %v7241_v7 = vpop.f32.mrf.mxu0 }
 0x343   : > { %14105 = vmatpush3.bf16.msra.mxu1 %v17060_v8  ;;  %v17206_v56 = vadd.f32 %v13747_v32, %v7344_v46  ;;  %v7342_v63 = vadd.f32 %v7241_v7, %v16995_v18  ;;  %v14750_v46 = vld [vmem:[%s14850_s10 + $0x3e0] sm:$0xff]  }
 0x344   : > { %v7626_v23 = vpop.f32.mrf.mxu1  ;;  %14098 = vmatprep.subr.bf16.mxu1 %v17078_v27  ;;  %v17210_v36 = vpop.f32.mrf.mxu0  ;;  %14013 = vmatmul.mubr.bf16.gmra.mxu0 %v14743_v33 }
 0x345   : > { %v17212_v3 = vadd.f32 %v7626_v23, %v7342_v63  ;;  %14072 = vmatprep.mubr.bf16.mxu0 %v14747_v44 }
 0x346   : > { %v17214_v37 = vpop.f32.mrf.mxu1  ;;  %14037 = vmatmul.mubr.bf16.gmra.mxu1 %v14744_v55  ;;  %v17216_v8 = vpop.f32.mrf.mxu0 }
 0x347   : > { %14106 = vmatpush3.bf16.msra.mxu1 %v17078_v27  ;;  %14040 = vmatprep.mubr.bf16.mxu1 %v14746_v25 }
 0x348   : > { %v17219_v18 = vpop.f32.mrf.mxu1  ;;  %14099 = vmatprep.subr.bf16.mxu1 %v17101_v49  ;;  %v17222_v2 = vpop.f32.mrf.mxu0 }
 0x34a   : > { %v17225_v26 = vpop.f32.mrf.mxu1  ;;  %v17229_v33 = vpop.f32.mrf.mxu0 }
 0x34b   : > { %14107 = vmatpush3.bf16.msra.mxu1 %v17101_v49 }
 0x34c   : > { %v17233_v32 = vpop.f32.mrf.mxu1  ;;  %14100 = vmatprep.subr.bf16.mxu1 %v17113_v40  ;;  %v13706_v27 = vpop.f32.mrf.mxu0  ;;  %14073 = vmatmul.mubr.bf16.vlgmr.msra.gmra.mxu0 %v14749_v51  ;;  %v14753_v51 = vld [vmem:[%s14850_s10 + $0x1c8] sm:$0xff]  }
 0x34d   : > { %v7351_v55 = vadd.f32 %v13706_v27, %v17024_v4  ;;  %14076 = vmatprep.mubr.bf16.mxu0 %v14751_v19  ;;  %v14752_v19 = vld [vmem:[%s14850_s10 + $0x3e8] sm:$0xff]  }
 0x34e   : > { %v13754_v44 = vpop.f32.mrf.mxu1  ;;  %14041 = vmatmul.mubr.bf16.gmra.mxu1 %v14748_v29  ;;  %v7270_v7 = vpop.f32.mrf.mxu0 }
 0x34f   : > { %14044 = vmatprep.mubr.bf16.mxu1 %v14750_v46  ;;  %14108 = vmatpush3.bf16.msra.mxu1 %v17113_v40  ;;  %v17238_v49 = vadd.f32 %v13754_v44, %v7351_v55  ;;  %v7349_v25 = vadd.f32 %v7270_v7, %v17031_v53  ;;  %v14754_v46 = vld [vmem:[%s14850_s10 + $0x3f0] sm:$0xff]  }
 0x350   : > { %v7655_v63 = vpop.f32.mrf.mxu1  ;;  %14101 = vmatprep.subr.bf16.mxu1 %v17134_v13  ;;  %v13707_v23 = vpop.f32.mrf.mxu0 }
 0x351   : > { %v17243_v4 = vadd.f32 %v7655_v63, %v7349_v25  ;;  %v7352_v27 = vadd.f32 %v13707_v23, %v17037_v59  ;;  %v14757_v23 = vld [vmem:[%s14850_s10 + $0x1d8] sm:$0xff]  }
 0x352   : > { %v13755_v29 = vpop.f32.mrf.mxu1  ;;  %v7273_v11 = vpop.f32.mrf.mxu0 }
 0x353   : > { %14109 = vmatpush3.bf16.msra.mxu1 %v17134_v13  ;;  %v17250_v40 = vadd.f32 %v13755_v29, %v7352_v27  ;;  %v7350_v53 = vadd.f32 %v7273_v11, %v17043_v48  ;;  %v14759_v27 = vld [vmem:[%s14850_s10 + $0x1e0] sm:$0xff]  }
 0x354   : > { %v7658_v55 = vpop.f32.mrf.mxu1  ;;  %14102 = vmatprep.subr.bf16.mxu1 %v17148_v24  ;;  %v13710_v44 = vpop.f32.mrf.mxu0  ;;  %14077 = vmatmul.mubr.bf16.gmra.mxu0 %v14753_v51 }
 0x355   : > { %v17254_v59 = vadd.f32 %v7658_v55, %v7350_v53  ;;  %v7355_v7 = vadd.f32 %v13710_v44, %v17046_v0  ;;  %14080 = vmatprep.mubr.bf16.mxu0 %v14755_v52  ;;  %v14756_v0 = vld [vmem:[%s14850_s10 + $0x3f8] sm:$0xff]   ;;  %v14758_v52 = vld [vmem:[%s14850_s10 + $0x400] sm:$0xff]  }
 0x356   : > { %v13758_v25 = vpop.f32.mrf.mxu1  ;;  %14045 = vmatmul.mubr.bf16.gmra.mxu1 %v14752_v19  ;;  %v17257_v13 = vpop.f32.mrf.mxu0 }
 0x357   : > { %14048 = vmatprep.mubr.bf16.mxu1 %v14754_v46  ;;  %14110 = vmatpush3.bf16.msra.mxu1 %v17148_v24  ;;  %v17260_v48 = vadd.f32 %v13758_v25, %v7355_v7 }
 0x358   : > { %v17262_v11 = vpop.f32.mrf.mxu1  ;;  %14103 = vmatprep.subr.bf16.mxu1 %v17165_v30  ;;  %v17265_v63 = vpop.f32.mrf.mxu0 }
 0x359   : > { %17972 = vst [vmem:[#allocation5_spill] sm:$0xff] %v17260_v48  ;;  %17973 = vst [vmem:[#allocation15_spill] sm:$0xff] %v17262_v11  ;;  %v14760_v11 = vld [vmem:[%s14850_s10 + $0x408] sm:$0xff]   ;;  %v14763_v48 = vld [vmem:[%s14850_s10 + $0x200] sm:$0xff]  }
 0x35a   : > { %v17268_v51 = vpop.f32.mrf.mxu1  ;;  %v17272_v29 = vpop.f32.mrf.mxu0 }
 0x35b   : > { %17974 = vst [vmem:[#allocation13_spill] sm:$0xff] %v17268_v51  ;;  %14111 = vmatpush3.bf16.msra.mxu1 %v17165_v30 }
 0x35c   : > { %v17276_v24 = vpop.f32.mrf.mxu1  ;;  %v13714_v19 = vpop.f32.mrf.mxu0  ;;  %14081 = vmatmul.mubr.bf16.gmra.mxu0 %v14757_v23 }
 0x35d   : > { %17975 = vst [vmem:[#allocation14_spill] sm:$0xff] %v17276_v24  ;;  %v7359_v46 = vadd.f32 %v13714_v19, %v17080_v38  ;;  %14084 = vmatprep.mubr.bf16.mxu0 %v14759_v27  ;;  %v14762_v38 = vld [vmem:[%s14850_s10 + $0x1f0] sm:$0xff]  }
 0x35e   : > { %v13762_v53 = vpop.f32.mrf.mxu1  ;;  %14049 = vmatmul.mubr.bf16.gmra.mxu1 %v14756_v0  ;;  %v7302_v55 = vpop.f32.mrf.mxu0 }
 0x35f   : > { %14052 = vmatprep.mubr.bf16.mxu1 %v14758_v52  ;;  %v17279_v44 = vadd.f32 %v13762_v53, %v7359_v46  ;;  %v7357_v7 = vadd.f32 %v7302_v55, %v17087_v5 }
 0x360   : > { %v7687_v25 = vpop.f32.mrf.mxu1  ;;  %v13715_v30 = vpop.f32.mrf.mxu0 }
 0x361   : > { %v17283_v24 = vadd.f32 %v7687_v25, %v7357_v7  ;;  %v7360_v23 = vadd.f32 %v13715_v30, %v17095_v28 }
 0x362   : > { %v13763_v51 = vpop.f32.mrf.mxu1  ;;  %v7305_v19 = vpop.f32.mrf.mxu0 }
 0x363   : > { %v17289_v0 = vadd.f32 %v13763_v51, %v7360_v23  ;;  %v7358_v27 = vadd.f32 %v7305_v19, %v17106_v21  ;;  %v14764_v21 = vld [vmem:[%s14850_s10 + $0x1f8] sm:$0xff]  }
 0x364   : > { %v7690_v52 = vpop.f32.mrf.mxu1  ;;  %v13718_v5 = vpop.f32.mrf.mxu0  ;;  %14085 = vmatmul.mubr.bf16.gmra.mxu0 %v14761_v6  ;;  %v14765_v6 = vld [vmem:[%s14850_s10 + $0x208] sm:$0xff]  }
 0x365   : > { %v17292_v46 = vadd.f32 %v7690_v52, %v7358_v27  ;;  %v7363_v53 = vadd.f32 %v13718_v5, %v17115_v60  ;;  %14088 = vmatprep.mubr.bf16.mxu0 %v14762_v38  ;;  %v17317_v27 = vld [vmem:[%s17918_s2] ss:$0 sm:$0xff] }
 0x366   : > { %v13766_v55 = vpop.f32.mrf.mxu1  ;;  %14053 = vmatmul.mubr.bf16.gmra.mxu1 %v14760_v11  ;;  %v17295_v28 = vpop.f32.mrf.mxu0 }
 0x367   : > { %14092 = vmatprep.mubr.bf16.mxu1 %v14763_v48  ;;  %v17297_v7 = vadd.f32 %v13766_v55, %v7363_v53  ;;  %v7339_v55 = vadd.f32 %v17167_v50, %v16951_v57 }
 0x368   : > { %v17299_v51 = vpop.f32.mrf.mxu1  ;;  %v17301_v25 = vpop.f32.mrf.mxu0 }
 0x369   : > { %17976 = vst [vmem:[#allocation12_spill] sm:$0xff] %v17297_v7 }
 0x36a   : > { %v17304_v30 = vpop.f32.mrf.mxu1  ;;  %v17307_v23 = vpop.f32.mrf.mxu0 }
 0x36b   : > { %17977 = vst [vmem:[#allocation16_spill] sm:$0xff] %v17304_v30  ;;  %17978 = vst [vmem:[#allocation17_spill] sm:$0xff] %v17307_v23 }
 0x36c   : > { %v17309_v19 = vpop.f32.mrf.mxu1  ;;  %v13786_v60 = vpop.f32.mrf.mxu0  ;;  %14089 = vmatmul.mubr.bf16.gmra.mxu0 %v14764_v21 }
 0x36d   : > { %17979 = vst [vmem:[#allocation18_spill] sm:$0xff] %v17309_v19  ;;  %v8105_v11 = vadd.f32 %v13786_v60, %v17141_v17  ;;  %v7337_v17 = vadd.f32 %v17173_v54, %v16960_v61 }
 0x36e   : > { %v17312_v38 = vpop.f32.mrf.mxu1  ;;  %14093 = vmatmul.mubr.bf16.vlgmr.msra.gmra.mxu1 %v14765_v6  ;;  %v7976_v48 = vpop.f32.mrf.mxu0 }
 0x36f   : > { %v10745_v52 = vadd.f32 %v17317_v27, %v8105_v11  ;;  %v8103_v5 = vadd.f32 %v7976_v48, %v17151_v42  ;;  %v17334_v42 = vld [vmem:[%s17918_s2 + $0x1] ss:$0 sm:$0xff]  ;;  %v7724_v48 = vadd.f32 %v17171_v39, %v7339_v55 }
 0x370   : > { %v17321_v53 = vpop.f32.mrf.mxu1  ;;  %v13787_v21 = vpop.f32.mrf.mxu0 }
 0x371   : > { %v10747_v6 = vmax.f32 %v10745_v52, 0.0  ;;  %v10735_v60 = vadd.f32 %v17317_v27, %v8103_v5  ;;  %v8106_v19 = vadd.f32 %v13787_v21, %v17158_v15  ;;  %v7722_v15 = vadd.f32 %v17176_v22, %v7337_v17 }
 0x372   : > { %v17329_v7 = vpop.f32.mrf.mxu1  ;;  %v7979_v30 = vpop.f32.mrf.mxu0  ;;  %v7340_v52 = vadd.f32 %v17179_v31, %v16966_v45  ;;  %v7338_v21 = vadd.f32 %v17186_v47, %v16973_v16 }
 0x373   : > { %v10749_v11 = vmul.f32 %v17334_v42, %v10747_v6  ;;  %v10737_v57 = vmax.f32 %v10735_v60, 0.0  ;;  %v10746_v50 = vadd.f32 %v17317_v27, %v8106_v19  ;;  %v8104_v61 = vadd.f32 %v7979_v30, %v17169_v41  ;;  %v17354_v41 = vld [vmem:[%s17918_s2 + $0x2] ss:$0 sm:$0xff] }
 0x374   : > { %v17339_v54 = vpop.f32.mrf.mxu1  ;;  %v13790_v5 = vpop.f32.mrf.mxu0  ;;  %17981 = vst [vmem:[#allocation20_spill] sm:$0xff] %v17354_v41  ;;  %v7725_v17 = vadd.f32 %v17182_v1, %v7340_v52 }
 0x375   : > { %v10739_v6 = vmul.f32 %v17334_v42, %v10737_v57  ;;  %v10748_v60 = vmax.f32 %v10746_v50, 0.0  ;;  %v10736_v19 = vadd.f32 %v17317_v27, %v8104_v61  ;;  %v10751_v39 = vadd.f32 %v17354_v41, %v10749_v11 }
 0x376   : > { %v17349_v23 = vpop.f32.mrf.mxu1  ;;  %v8109_v22 = vadd.f32 %v13790_v5, %v7724_v48  ;;  %v7992_v45 = vpop.f32.mrf.mxu0  ;;  %v7723_v61 = vadd.f32 %v17190_v35, %v7338_v21 }
 0x377   : > { %17980 = vst [vmem:[#allocation19_spill] sm:$0xff] %v17349_v23  ;;  %v10741_v31 = vadd.f32 %v17354_v41, %v10739_v6  ;;  %v10750_v16 = vmul.f32 %v17334_v42, %v10748_v60  ;;  %v10738_v47 = vmax.f32 %v10736_v19, 0.0  ;;  %v8107_v30 = vadd.f32 %v7992_v45, %v7722_v15 }
 0x378   : > { %v17359_v55 = vpop.f32.mrf.mxu1  ;;  %v10767_v57 = vadd.f32 %v17317_v27, %v8109_v22  ;;  %v13791_v50 = vpop.f32.mrf.mxu0 }
 0x379   : > { %v10753_v23 = vmax.f32 %v10741_v31, %v10751_v39  ;;  %v10740_v11 = vmul.f32 %v17334_v42, %v10738_v47  ;;  %v10757_v48 = vadd.f32 %v17317_v27, %v8107_v30  ;;  %v8110_v60 = vadd.f32 %v13791_v50, %v7725_v17 }
 0x37a   : > { %v17366_v5 = vpop.f32.mrf.mxu1  ;;  %v10769_v6 = vmax.f32 %v10767_v57, 0.0  ;;  %v7995_v19 = vpop.f32.mrf.mxu0  ;;  %v10752_v15 = vadd.f32 %v17354_v41, %v10750_v16  ;;  %v7347_v16 = vadd.f32 %v17210_v36, %v16998_v43 }
 0x37b   : > { %v10742_v45 = vadd.f32 %v17354_v41, %v10740_v11  ;;  %v10759_v1 = vmax.f32 %v10757_v48, 0.0  ;;  %v8108_v52 = vadd.f32 %v7995_v19, %v7723_v61  ;;  %v10768_v21 = vadd.f32 %v17317_v27, %v8110_v60 }
 0x37c   : > { %v17370_v22 = vpop.f32.mrf.mxu1  ;;  %v10771_v35 = vmul.f32 %v17334_v42, %v10769_v6  ;;  %v13794_v39 = vpop.f32.mrf.mxu0 }
 0x37d   : > { %v10754_v31 = vmax.f32 %v10742_v45, %v10752_v15  ;;  %v10761_v47 = vmul.f32 %v17334_v42, %v10759_v1  ;;  %v10758_v30 = vadd.f32 %v17317_v27, %v8108_v52  ;;  %v8113_v17 = vadd.f32 %v13794_v39, %v17194_v58 }
 0x37e   : > { %v17377_v57 = vpop.f32.mrf.mxu1  ;;  %v10773_v50 = vadd.f32 %v17354_v41, %v10771_v35  ;;  %v10770_v61 = vmax.f32 %v10768_v21, 0.0  ;;  %v8008_v11 = vpop.f32.mrf.mxu0  ;;  %v7345_v58 = vadd.f32 %v17216_v8, %v17007_v20  ;;  %v7732_v39 = vadd.f32 %v17214_v37, %v7347_v16 }
 0x37f   : > { %v10763_v48 = vadd.f32 %v17354_v41, %v10761_v47  ;;  %v10760_v6 = vmax.f32 %v10758_v30, 0.0  ;;  %v10793_v60 = vadd.f32 %v17317_v27, %v8113_v17  ;;  %v8111_v19 = vadd.f32 %v8008_v11, %v17199_v14 }
 0x380   : > { %v17385_v15 = vpop.f32.mrf.mxu1  ;;  %v10772_v45 = vmul.f32 %v17334_v42, %v10770_v61  ;;  %v13795_v1 = vpop.f32.mrf.mxu0  ;;  %v7348_v14 = vadd.f32 %v17222_v2, %v17013_v9  ;;  %v7730_v16 = vadd.f32 %v17219_v18, %v7345_v58 }
 0x381   : > { %v10775_v43 = vmax.f32 %v10763_v48, %v10773_v50  ;;  %v10762_v36 = vmul.f32 %v17334_v42, %v10760_v6  ;;  %v10795_v52 = vmax.f32 %v10793_v60, 0.0  ;;  %v10783_v35 = vadd.f32 %v17317_v27, %v8111_v19 }
 0x382   : > { %v17392_v21 = vpop.f32.mrf.mxu1  ;;  %v10774_v47 = vadd.f32 %v17354_v41, %v10772_v45  ;;  %v8114_v20 = vadd.f32 %v13795_v1, %v17206_v56  ;;  %v8011_v8 = vpop.f32.mrf.mxu0  ;;  %v7346_v48 = vadd.f32 %v17229_v33, %v17020_v34  ;;  %v7733_v19 = vadd.f32 %v17225_v26, %v7348_v14 }
 0x383   : > { %v10777_v30 = vmax.f32 %v10753_v23, %v10775_v43  ;;  %v10764_v17 = vadd.f32 %v17354_v41, %v10762_v36  ;;  %v10797_v50 = vmul.f32 %v17334_v42, %v10795_v52  ;;  %v10785_v61 = vmax.f32 %v10783_v35, 0.0 }
 0x384   : > { %v17401_v11 = vpop.f32.mrf.mxu1  ;;  %v10794_v37 = vadd.f32 %v17317_v27, %v8114_v20  ;;  %v8112_v9 = vadd.f32 %v8011_v8, %v17212_v3  ;;  %v13798_v2 = vpop.f32.mrf.mxu0  ;;  %v7731_v52 = vadd.f32 %v17233_v32, %v7346_v48 }
 0x385   : > { %10779 = vst [vmem:[%s15804_s9 + $0x80] sm:$0xff] %v10777_v30  ;;  %v10776_v56 = vmax.f32 %v10764_v17, %v10774_v47  ;;  %v10787_v23 = vmul.f32 %v17334_v42, %v10785_v61  ;;  %v8117_v6 = vadd.f32 %v13798_v2, %v7732_v39  ;;  %v10799_v45 = vadd.f32 %v17354_v41, %v10797_v50 }
 0x386   : > { %v17410_v60 = vpop.f32.mrf.mxu1  ;;  %v10796_v34 = vmax.f32 %v10794_v37, 0.0  ;;  %v10784_v33 = vadd.f32 %v17317_v27, %v8112_v9  ;;  %v8024_v1 = vpop.f32.mrf.mxu0 }
 0x387   : > { %v10778_v3 = vmax.f32 %v10754_v31, %v10776_v56  ;;  %v10789_v43 = vadd.f32 %v17354_v41, %v10787_v23  ;;  %v10815_v18 = vadd.f32 %v17317_v27, %v8117_v6  ;;  %v8115_v58 = vadd.f32 %v8024_v1, %v7730_v16 }
 0x388   : > { %v17417_v36 = vpop.f32.mrf.mxu1  ;;  %v10798_v35 = vmul.f32 %v17334_v42, %v10796_v34  ;;  %v10786_v39 = vmax.f32 %v10784_v33, 0.0  ;;  %v13799_v26 = vpop.f32.mrf.mxu0 }
 0x389   : > { %10780 = vst [vmem:[%s15804_s9 + $0x88] sm:$0xff] %v10778_v3  ;;  %v10801_v14 = vmax.f32 %v10789_v43, %v10799_v45  ;;  %v10817_v47 = vmax.f32 %v10815_v18, 0.0  ;;  %v10805_v20 = vadd.f32 %v17317_v27, %v8115_v58  ;;  %v8118_v8 = vadd.f32 %v13799_v26, %v7733_v19 }
 0x38a   : > { %v17423_v31 = vpop.f32.mrf.mxu1  ;;  %v10788_v30 = vmul.f32 %v17334_v42, %v10786_v39  ;;  %v8027_v17 = vpop.f32.mrf.mxu0  ;;  %v10800_v9 = vadd.f32 %v17354_v41, %v10798_v35  ;;  %v7353_v26 = vadd.f32 %v17257_v13, %v17053_v12 }
 0x38b   : > { %v10819_v50 = vmul.f32 %v17334_v42, %v10817_v47  ;;  %v10807_v61 = vmax.f32 %v10805_v20, 0.0  ;;  %v10816_v32 = vadd.f32 %v17317_v27, %v8118_v8  ;;  %v8116_v48 = vadd.f32 %v8027_v17, %v7731_v52 }
 0x38c   : > { %v17428_v37 = vpop.f32.mrf.mxu1  ;;  %v10790_v2 = vadd.f32 %v17354_v41, %v10788_v30  ;;  %v13802_v16 = vpop.f32.mrf.mxu0  ;;  %v7356_v30 = vadd.f32 %v17265_v63, %v17063_v10 }
 0x38d   : > { %v10809_v56 = vmul.f32 %v17334_v42, %v10807_v61  ;;  %v10818_v23 = vmax.f32 %v10816_v32, 0.0  ;;  %v10806_v6 = vadd.f32 %v17317_v27, %v8116_v48  ;;  %v10821_v34 = vadd.f32 %v17354_v41, %v10819_v50 }
 0x38e   : > { %v17434_v19 = vpop.f32.mrf.mxu1  ;;  %v10802_v45 = vmax.f32 %v10790_v2, %v10800_v9  ;;  %v8121_v33 = vadd.f32 %v13802_v16, %v17238_v49  ;;  %v8040_v1 = vpop.f32.mrf.mxu0  ;;  %v7354_v2 = vadd.f32 %v17272_v29, %v17070_v62 }
 0x38f   : > { %v10811_v3 = vadd.f32 %v17354_v41, %v10809_v56  ;;  %v10820_v43 = vmul.f32 %v17334_v42, %v10818_v23  ;;  %v10808_v18 = vmax.f32 %v10806_v6, 0.0  ;;  %v8119_v58 = vadd.f32 %v8040_v1, %v17243_v4  ;;  %v17982_v23 = vld [vmem:[#allocation5_spill] sm:$0xff] }
 0x390   : > { %v17441_v52 = vpop.f32.mrf.mxu1  ;;  %v10841_v35 = vadd.f32 %v17317_v27, %v8121_v33  ;;  %v13803_v39 = vpop.f32.mrf.mxu0  ;;  %v17984_v1 = vld [vmem:[#allocation13_spill] sm:$0xff] }
 0x391   : > { %v10823_v47 = vmax.f32 %v10811_v3, %v10821_v34  ;;  %v10810_v20 = vmul.f32 %v17334_v42, %v10808_v18  ;;  %v10831_v49 = vadd.f32 %v17317_v27, %v8119_v58  ;;  %v10822_v4 = vadd.f32 %v17354_v41, %v10820_v43  ;;  %v17983_v34 = vld [vmem:[#allocation15_spill] sm:$0xff] }
 0x392   : > { %v17448_v8 = vpop.f32.mrf.mxu1  ;;  %v10843_v17 = vmax.f32 %v10841_v35, 0.0  ;;  %v8122_v50 = vadd.f32 %v13803_v39, %v17250_v40  ;;  %v8043_v61 = vpop.f32.mrf.mxu0  ;;  %v7738_v33 = vadd.f32 %v17983_v34, %v7353_v26  ;;  %v7741_v62 = vadd.f32 %v17984_v1, %v7356_v30 }
 0x393   : > { %v10825_v32 = vmax.f32 %v10801_v14, %v10823_v47  ;;  %v10812_v12 = vadd.f32 %v17354_v41, %v10810_v20  ;;  %v10833_v13 = vmax.f32 %v10831_v49, 0.0  ;;  %v8120_v48 = vadd.f32 %v8043_v61, %v17254_v59  ;;  %v17985_v20 = vld [vmem:[#allocation14_spill] sm:$0xff] }
 0x394   : > { %v17456_v9 = vpop.f32.mrf.mxu1  ;;  %v10845_v16 = vmul.f32 %v17334_v42, %v10843_v17  ;;  %v10842_v10 = vadd.f32 %v17317_v27, %v8122_v50  ;;  %v13806_v63 = vpop.f32.mrf.mxu0  ;;  %v7739_v49 = vadd.f32 %v17985_v20, %v7354_v2 }
 0x395   : > { %10827 = vst [vmem:[%s15804_s9 + $0x90] sm:$0xff] %v10825_v32  ;;  %v10824_v56 = vmax.f32 %v10812_v12, %v10822_v4  ;;  %v10835_v40 = vmul.f32 %v17334_v42, %v10833_v13  ;;  %v10832_v14 = vadd.f32 %v17317_v27, %v8120_v48  ;;  %v8125_v6 = vadd.f32 %v13806_v63, %v17982_v23  ;;  %v17986_v12 = vld [vmem:[#allocation3_spill] sm:$0xff] }
 0x396   : > { %v17466_v59 = vpop.f32.mrf.mxu1  ;;  %v17471_v29 = vadd.f32 %v17354_v41, %v10845_v16  ;;  %v10844_v3 = vmax.f32 %v10842_v10, 0.0  ;;  %v8056_v43 = vpop.f32.mrf.mxu0  ;;  %v7361_v13 = vadd.f32 %v17295_v28, %v17986_v12 }
 0x397   : > { %v10826_v18 = vmax.f32 %v10802_v45, %v10824_v56  ;;  %v10837_v58 = vadd.f32 %v17354_v41, %v10835_v40  ;;  %v10834_v35 = vmax.f32 %v10832_v14, 0.0  ;;  %v10863_v39 = vadd.f32 %v17317_v27, %v8125_v6 }
 0x398   : > { %v17475_v47 = vpop.f32.mrf.mxu1  ;;  %v10846_v4 = vmul.f32 %v17334_v42, %v10844_v3  ;;  %v8123_v26 = vadd.f32 %v8056_v43, %v7738_v33  ;;  %v13807_v17 = vpop.f32.mrf.mxu0 }
 0x399   : > { %10828 = vst [vmem:[%s15804_s9 + $0x98] sm:$0xff] %v10826_v18  ;;  %v10849_v30 = vmax.f32 %v10837_v58, %v17471_v29  ;;  %v10836_v50 = vmul.f32 %v17334_v42, %v10834_v35  ;;  %v10865_v61 = vmax.f32 %v10863_v39, 0.0  ;;  %v8126_v45 = vadd.f32 %v13807_v17, %v7741_v62  ;;  %v17987_v17 = vld [vmem:[#allocation4_spill] sm:$0xff] }
 0x39a   : > { %v17482_v32 = vpop.f32.mrf.mxu1  ;;  %v10853_v48 = vadd.f32 %v17317_v27, %v8123_v26  ;;  %v8059_v16 = vpop.f32.mrf.mxu0  ;;  %v10848_v2 = vadd.f32 %v17354_v41, %v10846_v4  ;;  %v7746_v18 = vadd.f32 %v17299_v51, %v7361_v13 }
 0x39b   : > { %v10838_v10 = vadd.f32 %v17354_v41, %v10836_v50  ;;  %v10864_v63 = vadd.f32 %v17317_v27, %v8126_v45  ;;  %v8124_v56 = vadd.f32 %v8059_v16, %v7739_v49  ;;  %v10867_v14 = vmul.f32 %v17334_v42, %v10865_v61 }
 0x39c   : > { %v17490_v40 = vpop.f32.mrf.mxu1  ;;  %v10855_v23 = vmax.f32 %v10853_v48, 0.0  ;;  %v13810_v6 = vpop.f32.mrf.mxu0  ;;  %v7364_v50 = vadd.f32 %v17301_v25, %v17987_v17 }
 0x39d   : > { %v10850_v34 = vmax.f32 %v10838_v10, %v10848_v2  ;;  %v10866_v33 = vmax.f32 %v10864_v63, 0.0  ;;  %v10854_v28 = vadd.f32 %v17317_v27, %v8124_v56  ;;  %v8129_v29 = vadd.f32 %v13810_v6, %v17279_v44 }
 0x39e   : > { %v13874_v1 = vpop.f32.mrf.mxu1  ;;  %v10857_v62 = vmul.f32 %v17334_v42, %v10855_v23  ;;  %v8072_v43 = vpop.f32.mrf.mxu0  ;;  %v10869_v49 = vadd.f32 %v17354_v41, %v10867_v14  ;;  %v17988_v14 = vld [vmem:[#allocation11_spill] sm:$0xff] }
 0x39f   : > { %v17497_v3 = vadd.f32 %v13874_v1, %v17312_v38  ;;  %v10868_v58 = vmul.f32 %v17334_v42, %v10866_v33  ;;  %v10856_v35 = vmax.f32 %v10854_v28, 0.0  ;;  %v8127_v39 = vadd.f32 %v8072_v43, %v17283_v24 }
 0x3a0   : > { %v8650_v20 = vpop.f32.mrf.mxu1  ;;  %v10859_v4 = vadd.f32 %v17354_v41, %v10857_v62  ;;  %v10889_v26 = vadd.f32 %v17317_v27, %v8129_v29  ;;  %v13811_v38 = vpop.f32.mrf.mxu0 }
 0x3a1   : > { %v17506_v44 = vadd.f32 %v8650_v20, %v17321_v53  ;;  %v10858_v51 = vmul.f32 %v17334_v42, %v10856_v35  ;;  %v10879_v61 = vadd.f32 %v17317_v27, %v8127_v39  ;;  %v8130_v24 = vadd.f32 %v13811_v38, %v17289_v0  ;;  %v17989_v0 = vld [vmem:[#allocation17_spill] sm:$0xff]  ;;  %v17990_v35 = vld [vmem:[#allocation16_spill] sm:$0xff] }
 0x3a2   : > { %v13875_v45 = vpop.f32.mrf.mxu1  ;;  %v10871_v12 = vmax.f32 %v10859_v4, %v10869_v49  ;;  %v10870_v13 = vadd.f32 %v17354_v41, %v10868_v58  ;;  %v10891_v48 = vmax.f32 %v10889_v26, 0.0  ;;  %v8075_v53 = vpop.f32.mrf.mxu0  ;;  %v7362_v23 = vadd.f32 %v17989_v0, %v17988_v14  ;;  %v17992_v49 = vld [vmem:[#allocation19_spill] sm:$0xff] }
 0x3a3   : > { %v17515_v16 = vadd.f32 %v13875_v45, %v17329_v7  ;;  %v10860_v2 = vadd.f32 %v17354_v41, %v10858_v51  ;;  %v10881_v10 = vmax.f32 %v10879_v61, 0.0  ;;  %v10890_v25 = vadd.f32 %v17317_v27, %v8130_v24 }
 0x3a4   : > { %v8128_v63 = vadd.f32 %v8075_v53, %v17292_v46  ;;  %v8653_v56 = vpop.f32.mrf.mxu1  ;;  %v10873_v6 = vmax.f32 %v10849_v30, %v10871_v12  ;;  %v10893_v33 = vmul.f32 %v17334_v42, %v10891_v48  ;;  %v13814_v7 = vpop.f32.mrf.mxu0  ;;  %v7749_v46 = vadd.f32 %v17990_v35, %v7364_v50  ;;  %v17991_v30 = vld [vmem:[#allocation12_spill] sm:$0xff] }
 0x3a5   : > { %v17524_v28 = vadd.f32 %v8653_v56, %v17339_v54  ;;  %v10872_v1 = vmax.f32 %v10860_v2, %v10870_v13  ;;  %v10883_v62 = vmul.f32 %v17334_v42, %v10881_v10  ;;  %v10892_v29 = vmax.f32 %v10890_v25, 0.0  ;;  %v17993_v13 = vld [vmem:[#allocation18_spill] sm:$0xff] }
 0x3a6   : > { %v10880_v43 = vadd.f32 %v17317_v27, %v8128_v63  ;;  %v13878_v58 = vpop.f32.mrf.mxu1  ;;  %10875 = vst [vmem:[%s15804_s9 + $0xa0] sm:$0xff] %v10873_v6  ;;  %v10895_v39 = vadd.f32 %v17354_v41, %v10893_v33  ;;  %v8133_v20 = vadd.f32 %v13814_v7, %v17991_v30  ;;  %v8088_v54 = vpop.f32.mrf.mxu0  ;;  %v7747_v48 = vadd.f32 %v17993_v13, %v7362_v23 }
 0x3a7   : > { %v8675_v4 = vadd.f32 %v13878_v58, %v17992_v49  ;;  %v10874_v26 = vmax.f32 %v10850_v34, %v10872_v1  ;;  %v10885_v38 = vadd.f32 %v17354_v41, %v10883_v62  ;;  %v10894_v17 = vmul.f32 %v17334_v42, %v10892_v29 }
 0x3a8   : > { %v10882_v51 = vmax.f32 %v10880_v43, 0.0  ;;  %v8666_v61 = vpop.f32.mrf.mxu1  ;;  %v10911_v24 = vadd.f32 %v17317_v27, %v8133_v20  ;;  %v8131_v45 = vadd.f32 %v8088_v54, %v7746_v18  ;;  %v13815_v12 = vpop.f32.mrf.mxu0 }
 0x3a9   : > { %v8667_v50 = vadd.f32 %v8666_v61, %v17359_v55  ;;  %10876 = vst [vmem:[%s15804_s9 + $0xa8] sm:$0xff] %v10874_v26  ;;  %v10897_v53 = vmax.f32 %v10885_v38, %v10895_v39  ;;  %v8134_v10 = vadd.f32 %v13815_v12, %v7749_v46  ;;  %v10896_v0 = vadd.f32 %v17354_v41, %v10894_v17 }
 0x3aa   : > { %v10884_v2 = vmul.f32 %v17334_v42, %v10882_v51  ;;  %v13879_v34 = vpop.f32.mrf.mxu1  ;;  %v10913_v25 = vmax.f32 %v10911_v24, 0.0  ;;  %v10901_v63 = vadd.f32 %v17317_v27, %v8131_v45  ;;  %v8091_v14 = vpop.f32.mrf.mxu0 }
 0x3ab   : > { %v8678_v56 = vadd.f32 %v13879_v34, %v17366_v5  ;;  %v10912_v55 = vadd.f32 %v17317_v27, %v8134_v10  ;;  %v8132_v6 = vadd.f32 %v8091_v14, %v7747_v48 }
 0x3ac   : > { %v10886_v18 = vadd.f32 %v17354_v41, %v10884_v2  ;;  %v8669_v23 = vpop.f32.mrf.mxu1  ;;  %v10915_v33 = vmul.f32 %v17334_v42, %v10913_v25  ;;  %v10903_v7 = vmax.f32 %v10901_v63, 0.0  ;;  %v13914_v62 = vpop.f32.mrf.mxu0 }
 0x3ad   : > { %v8670_v1 = vadd.f32 %v8669_v23, %v17370_v22  ;;  %v10914_v43 = vmax.f32 %v10912_v55, 0.0  ;;  %v10902_v58 = vadd.f32 %v17317_v27, %v8132_v6  ;;  %v17549_v35 = vadd.f32 %v13914_v62, %v17497_v3 }
 0x3ae   : > { %v10898_v29 = vmax.f32 %v10886_v18, %v10896_v0  ;;  %v13882_v5 = vpop.f32.mrf.mxu1  ;;  %v10905_v46 = vmul.f32 %v17334_v42, %v10903_v7  ;;  %v8939_v30 = vpop.f32.mrf.mxu0  ;;  %v10917_v26 = vadd.f32 %v17354_v41, %v10915_v33 }
 0x3af   : > { %v8691_v39 = vadd.f32 %v13882_v5, %v17377_v57  ;;  %v10916_v20 = vmul.f32 %v17334_v42, %v10914_v43  ;;  %v10904_v49 = vmax.f32 %v10902_v58, 0.0  ;;  %v17555_v22 = vadd.f32 %v8939_v30, %v17506_v44 }
 0x3b0   : > { %v8682_v54 = vpop.f32.mrf.mxu1  ;;  %v10907_v38 = vadd.f32 %v17354_v41, %v10905_v46  ;;  %v13915_v3 = vpop.f32.mrf.mxu0 }
 0x3b1   : > { %v8683_v17 = vadd.f32 %v8682_v54, %v17385_v15  ;;  %v10906_v51 = vmul.f32 %v17334_v42, %v10904_v49  ;;  %v17562_v57 = vadd.f32 %v13915_v3, %v17515_v16  ;;  %v10918_v44 = vadd.f32 %v17354_v41, %v10916_v20 }
 0x3b2   : > { %v13883_v61 = vpop.f32.mrf.mxu1  ;;  %v10919_v24 = vmax.f32 %v10907_v38, %v10917_v26  ;;  %v8942_v12 = vpop.f32.mrf.mxu0 }
 0x3b3   : > { %v8694_v45 = vadd.f32 %v13883_v61, %v17392_v21  ;;  %v10908_v13 = vadd.f32 %v17354_v41, %v10906_v51  ;;  %v17568_v15 = vadd.f32 %v8942_v12, %v17524_v28 }
 0x3b4   : > { %v8685_v48 = vpop.f32.mrf.mxu1  ;;  %v10921_v2 = vmax.f32 %v10897_v53, %v10919_v24  ;;  %v13918_v34 = vpop.f32.mrf.mxu0 }
 0x3b5   : > { %v8686_v10 = vadd.f32 %v8685_v48, %v17401_v11  ;;  %v10920_v25 = vmax.f32 %v10908_v13, %v10918_v44  ;;  %v17571_v63 = vadd.f32 %v13918_v34, %v8675_v4 }
 0x3b6   : > { %v13886_v16 = vpop.f32.mrf.mxu1  ;;  %10923 = vst [vmem:[%s15804_s9 + $0xb0] sm:$0xff] %v10921_v2  ;;  %v8955_v14 = vpop.f32.mrf.mxu0 }
 0x3b7   : > { %v8707_v21 = vadd.f32 %v13886_v16, %v17410_v60  ;;  %v10922_v0 = vmax.f32 %v10898_v29, %v10920_v25  ;;  %v17575_v55 = vadd.f32 %v8955_v14, %v8667_v50 }
 0x3b8   : > { %v8698_v18 = vpop.f32.mrf.mxu1  ;;  %v13919_v28 = vpop.f32.mrf.mxu0 }
 0x3b9   : > { %v8699_v6 = vadd.f32 %v8698_v18, %v17417_v36  ;;  %10924 = vst [vmem:[%s15804_s9 + $0xb8] sm:$0xff] %v10922_v0  ;;  %v17579_v23 = vadd.f32 %v13919_v28, %v8678_v56 }
 0x3ba   : > { %v13887_v53 = vpop.f32.mrf.mxu1  ;;  %v8958_v33 = vpop.f32.mrf.mxu0 }
 0x3bb   : > { %v8710_v11 = vadd.f32 %v13887_v53, %v17423_v31  ;;  %v17582_v7 = vadd.f32 %v8958_v33, %v8670_v1 }
 0x3bc   : > { %v8701_v4 = vpop.f32.mrf.mxu1  ;;  %v13922_v62 = vpop.f32.mrf.mxu0 }
 0x3bd   : > { %v8702_v60 = vadd.f32 %v8701_v4, %v17428_v37  ;;  %v9044_v43 = vadd.f32 %v13922_v62, %v8691_v39 }
 0x3be   : > { %v13890_v29 = vpop.f32.mrf.mxu1  ;;  %v8971_v58 = vpop.f32.mrf.mxu0 }
 0x3bf   : > { %v8723_v50 = vadd.f32 %v13890_v29, %v17434_v19  ;;  %v9042_v5 = vadd.f32 %v8971_v58, %v8683_v17 }
 0x3c0   : > { %v8714_v36 = vpop.f32.mrf.mxu1  ;;  %v13923_v56 = vpop.f32.mrf.mxu0 }
 0x3c1   : > { %v8715_v46 = vadd.f32 %v8714_v36, %v17441_v52  ;;  %v9045_v20 = vadd.f32 %v13923_v56, %v8694_v45 }
 0x3c2   : > { %v13891_v30 = vpop.f32.mrf.mxu1  ;;  %v8974_v49 = vpop.f32.mrf.mxu0 }
 0x3c3   : > { %v8726_v31 = vadd.f32 %v13891_v30, %v17448_v8  ;;  %v9043_v54 = vadd.f32 %v8974_v49, %v8686_v10 }
 0x3c4   : > { %v8717_v1 = vpop.f32.mrf.mxu1  ;;  %v13926_v26 = vpop.f32.mrf.mxu0 }
 0x3c5   : > { %v8718_v37 = vadd.f32 %v8717_v1, %v17456_v9  ;;  %v17589_v39 = vadd.f32 %v13926_v26, %v8707_v21 }
 0x3c6   : > { %v13894_v38 = vpop.f32.mrf.mxu1  ;;  %v8987_v3 = vpop.f32.mrf.mxu0 }
 0x3c7   : > { %v8739_v19 = vadd.f32 %v13894_v38, %v17466_v59  ;;  %v17592_v51 = vadd.f32 %v8987_v3, %v8699_v6 }
 0x3c8   : > { %v8730_v17 = vpop.f32.mrf.mxu1  ;;  %v13927_v61 = vpop.f32.mrf.mxu0 }
 0x3c9   : > { %v8731_v52 = vadd.f32 %v8730_v17, %v17475_v47  ;;  %v17595_v8 = vadd.f32 %v13927_v61, %v8710_v11 }
 0x3ca   : > { %v13895_v24 = vpop.f32.mrf.mxu1  ;;  %v8990_v12 = vpop.f32.mrf.mxu0 }
 0x3cb   : > { %v8742_v45 = vadd.f32 %v13895_v24, %v17482_v32  ;;  %v17598_v44 = vadd.f32 %v8990_v12, %v8702_v60 }
 0x3cc   : > { %v8733_v9 = vpop.f32.mrf.mxu1  ;;  %v13930_v48 = vpop.f32.mrf.mxu0 }
 0x3cd   : > { %v8734_v13 = vadd.f32 %v8733_v9, %v17490_v40  ;;  %v17601_v59 = vadd.f32 %v13930_v48, %v8723_v50 }
 0x3ce   : > { %v13954_v2 = vpop.f32.mrf.mxu1  ;;  %v9003_v47 = vpop.f32.mrf.mxu0 }
 0x3cf   : > { %v17604_v10 = vadd.f32 %v13954_v2, %v17549_v35  ;;  %v17606_v34 = vadd.f32 %v9003_v47, %v8715_v46 }
 0x3d0   : > { %v9252_v25 = vpop.f32.mrf.mxu1  ;;  %v13931_v32 = vpop.f32.mrf.mxu0 }
 0x3d1   : > { %v17609_v16 = vadd.f32 %v9252_v25, %v17555_v22  ;;  %v9053_v21 = vadd.f32 %v13931_v32, %v8726_v31 }
 0x3d2   : > { %v13955_v14 = vpop.f32.mrf.mxu1  ;;  %v9006_v40 = vpop.f32.mrf.mxu0 }
 0x3d3   : > { %v17612_v0 = vadd.f32 %v13955_v14, %v17562_v57  ;;  %v17614_v18 = vadd.f32 %v9006_v40, %v8718_v37 }
 0x3d4   : > { %v9255_v6 = vpop.f32.mrf.mxu1  ;;  %v13934_v28 = vpop.f32.mrf.mxu0 }
 0x3d5   : > { %v17617_v35 = vadd.f32 %v9255_v6, %v17568_v15  ;;  %v17619_v53 = vadd.f32 %v13934_v28, %v8739_v19 }
 0x3d6   : > { %v17621_v11 = vpop.f32.mrf.mxu1  ;;  %v9019_v22 = vpop.f32.mrf.mxu0 }
 0x3d7   : > { %v17623_v33 = vadd.f32 %v9019_v22, %v8731_v52 }
 0x3d8   : > { %v9268_v4 = vpop.f32.mrf.mxu1  ;;  %v13935_v60 = vpop.f32.mrf.mxu0 }
 0x3d9   : > { %17994 = vst [vmem:[#allocation7_spill] sm:$0xff] %v17623_v33  ;;  %v17625_v62 = vadd.f32 %v13935_v60, %v8742_v45 }
 0x3da   : > { %v13959_v57 = vpop.f32.mrf.mxu1  ;;  %v9022_v29 = vpop.f32.mrf.mxu0 }
 0x3db   : > { %17995 = vst [vmem:[#allocation9_spill] sm:$0xff] %v17625_v62  ;;  %v17627_v50 = vadd.f32 %v9022_v29, %v8734_v13 }
 0x3dc   : > { %v9271_v58 = vpop.f32.mrf.mxu1  ;;  %v13994_v36 = vpop.f32.mrf.mxu0 }
 0x3dd   : > { %17996 = vst [vmem:[#allocation6_spill] sm:$0xff] %v17627_v50 }
 0x3de   : > { %v13962_v15 = vpop.f32.mrf.mxu1  ;;  %v9565_v56 = vpop.f32.mrf.mxu0 }
 0x3df   : > { %v17629_v46 = vadd.f32 %v13962_v15, %v9044_v43 }
 0x3e0   : > { %v9284_v30 = vpop.f32.mrf.mxu1  ;;  %v13995_v49 = vpop.f32.mrf.mxu0 }
 0x3e1   : > { %v17631_v31 = vadd.f32 %v9284_v30, %v9042_v5 }
 0x3e2   : > { %v13963_v1 = vpop.f32.mrf.mxu1  ;;  %v9568_v26 = vpop.f32.mrf.mxu0 }
 0x3e3   : > { %v17633_v37 = vadd.f32 %v13963_v1, %v9045_v20 }
 0x3e4   : > { %v9287_v38 = vpop.f32.mrf.mxu1  ;;  %v13998_v3 = vpop.f32.mrf.mxu0 }
 0x3e5   : > { %v17635_v19 = vadd.f32 %v9287_v38, %v9043_v54 }
 0x3e6   : > { %v13966_v17 = vpop.f32.mrf.mxu1  ;;  %v9581_v52 = vpop.f32.mrf.mxu0 }
 0x3e8   : > { %v9300_v61 = vpop.f32.mrf.mxu1  ;;  %v13999_v24 = vpop.f32.mrf.mxu0 }
 0x3ea   : > { %v13967_v45 = vpop.f32.mrf.mxu1  ;;  %v9584_v43 = vpop.f32.mrf.mxu0 }
 0x3ec   : > { %v9303_v12 = vpop.f32.mrf.mxu1  ;;  %v14002_v9 = vpop.f32.mrf.mxu0 }
 0x3ee   : > { %v13970_v13 = vpop.f32.mrf.mxu1  ;;  %v9597_v5 = vpop.f32.mrf.mxu0 }
 0x3f0   : > { %v17637_v48 = vpop.f32.mrf.mxu1  ;;  %v17639_v2 = vpop.f32.mrf.mxu0 }
 0x3f2   : > { %v13971_v20 = vpop.f32.mrf.mxu1  ;;  %v17643_v54 = vpop.f32.mrf.mxu0 }
 0x3f3   : > { %v17641_v47 = vadd.f32 %v13971_v20, %v9053_v21 }
 0x3f4   : > { %v9319_v25 = vpop.f32.mrf.mxu1  ;;  %v17645_v32 = vpop.f32.mrf.mxu0 }
 0x3f5   : > { %17997 = vst [vmem:[#allocation8_spill] sm:$0xff] %v17641_v47 }
 0x3f6   : > { %v17647_v14 = vpop.f32.mrf.mxu1  ;;  %v17649_v40 = vpop.f32.mrf.mxu0 }
 0x3f7   : > { %17998 = vst [vmem:[#allocation10_spill] sm:$0xff] %v17649_v40 }
 0x3f8   : > { %v17651_v6 = vpop.f32.mrf.mxu1  ;;  %v17653_v28 = vpop.f32.mrf.mxu0 }
 0x3f9   : > { %17999 = vst [vmem:[#allocation5_spill] sm:$0xff] %v17651_v6  ;;  %18000 = vst [vmem:[#allocation15_spill] sm:$0xff] %v17653_v28  ;;  %v9660_v6 = vadd.f32 %v9565_v56, %v17609_v16  ;;  %v9359_v16 = vadd.f32 %v9300_v61, %v17592_v51  ;;  %v9362_v56 = vadd.f32 %v13967_v45, %v17595_v8 }
 0x3fa   : > { %v17655_v22 = vpop.f32.mrf.mxu1  ;;  %v17657_v60 = vpop.f32.mrf.mxu0  ;;  %v9668_v51 = vadd.f32 %v9597_v5, %v17631_v31  ;;  %v9363_v45 = vadd.f32 %v17637_v48, %v17606_v34 }
 0x3fb   : > { %18001 = vst [vmem:[#allocation13_spill] sm:$0xff] %v17655_v22  ;;  %18002 = vst [vmem:[#allocation14_spill] sm:$0xff] %v17657_v60 }
 0x3fc   : > { %v17659_v29 = vpop.f32.mrf.mxu1  ;;  %v17661_v21 = vpop.f32.mrf.mxu0 }
 0x3fd   : > { %18003 = vst [vmem:[#allocation3_spill] sm:$0xff] %v17659_v29  ;;  %18004 = vst [vmem:[#allocation4_spill] sm:$0xff] %v17661_v21  ;;  %v9662_v21 = vadd.f32 %v13994_v36, %v17604_v10  ;;  %v9663_v10 = vadd.f32 %v13995_v49, %v17612_v0  ;;  %v9661_v36 = vadd.f32 %v9568_v26, %v17617_v35 }
 0x3fe   : > { %v14034_v15 = vpop.f32.mrf.mxu1  ;;  %v17663_v30 = vpop.f32.mrf.mxu0  ;;  %v9365_v26 = vadd.f32 %v13970_v13, %v17601_v59  ;;  %v17712_v59 = vadd.f32 %v9319_v25, %v17614_v18  ;;  %v18013_v13 = vld [vmem:[#allocation10_spill] sm:$0xff] }
 0x3ff   : > { %18005 = vst [vmem:[#allocation11_spill] sm:$0xff] %v17663_v30  ;;  %v17730_v5 = vadd.f32 %v18013_v13, %v9359_v16 }
 0x400   : > { %v9878_v1 = vpop.f32.mrf.mxu1  ;;  %v17665_v38 = vpop.f32.mrf.mxu0 }
 0x401   : > { %18006 = vst [vmem:[#allocation17_spill] sm:$0xff] %v17665_v38  ;;  %v9353_v38 = vadd.f32 %v17621_v11, %v17571_v63  ;;  %v9973_v63 = vadd.f32 %v9878_v1, %v9660_v6 }
 0x402   : > { %v14035_v20 = vpop.f32.mrf.mxu1  ;;  %v17667_v47 = vpop.f32.mrf.mxu0 }
 0x403   : > { %18007 = vst [vmem:[#allocation16_spill] sm:$0xff] %v17667_v47  ;;  %v9351_v47 = vadd.f32 %v9268_v4, %v17575_v55  ;;  %v9666_v40 = vadd.f32 %v13998_v3, %v9353_v38 }
 0x404   : > { %v9881_v50 = vpop.f32.mrf.mxu1  ;;  %v17669_v62 = vpop.f32.mrf.mxu0 }
 0x405   : > { %18008 = vst [vmem:[#allocation12_spill] sm:$0xff] %v17669_v62  ;;  %v9975_v62 = vadd.f32 %v14034_v15, %v9662_v21  ;;  %v9664_v4 = vadd.f32 %v9581_v52, %v9351_v47 }
 0x406   : > { %v14038_v41 = vpop.f32.mrf.mxu1  ;;  %v17671_v22 = vpop.f32.mrf.mxu0 }
 0x407   : > { %18009 = vst [vmem:[#allocation19_spill] sm:$0xff] %v17671_v22  ;;  %v9354_v22 = vadd.f32 %v13959_v57, %v17579_v23 }
 0x408   : > { %v9894_v60 = vpop.f32.mrf.mxu1  ;;  %v17673_v28 = vpop.f32.mrf.mxu0 }
 0x409   : > { %18010 = vst [vmem:[#allocation18_spill] sm:$0xff] %v17673_v28  ;;  %v9352_v28 = vadd.f32 %v9271_v58, %v17582_v7  ;;  %v9667_v23 = vadd.f32 %v13999_v24, %v9354_v22  ;;  %v9976_v58 = vadd.f32 %v14035_v20, %v9663_v10  ;;  %v18015_v22 = vld [vmem:[#allocation5_spill] sm:$0xff] }
 0x40a   : > { %v17676_v29 = vpop.f32.mrf.mxu1  ;;  %v17678_v30 = vpop.f32.mrf.mxu0  ;;  %v18018_v20 = vld [vmem:[#allocation9_spill] sm:$0xff] }
 0x40b   : > { %18011 = vst [vmem:[#allocation21_spill] sm:$0xff] %v17676_v29  ;;  %18012 = vst [vmem:[#allocation22_spill] sm:$0xff] %v17678_v30  ;;  %v9361_v30 = vadd.f32 %v13966_v17, %v17589_v39  ;;  %v9665_v7 = vadd.f32 %v9584_v43, %v9352_v28  ;;  %v9360_v39 = vadd.f32 %v9303_v12, %v17598_v44  ;;  %v18014_v28 = vld [vmem:[#allocation7_spill] sm:$0xff]  ;;  %v18019_v10 = vld [vmem:[#allocation13_spill] sm:$0xff] }
 0x40c   : > { %v17684_v33 = vpop.f32.mrf.mxu1  ;;  %v14074_v29 = vpop.f32.mrf.mxu0  ;;  %v9974_v17 = vadd.f32 %v9881_v50, %v9661_v36  ;;  %v17709_v44 = vadd.f32 %v17639_v2, %v17633_v37  ;;  %v17724_v37 = vadd.f32 %v17647_v14, %v17619_v53  ;;  %v9977_v2 = vadd.f32 %v9894_v60, %v9664_v4  ;;  %v18016_v14 = vld [vmem:[#allocation15_spill] sm:$0xff] }
 0x40d   : > { %v10288_v55 = vadd.f32 %v14074_v29, %v9975_v62  ;;  %v9670_v62 = vadd.f32 %v14002_v9, %v17629_v46  ;;  %v17716_v46 = vadd.f32 %v17643_v54, %v17635_v19  ;;  %v17727_v18 = vadd.f32 %v17645_v32, %v9361_v30  ;;  %v18017_v29 = vld [vmem:[#allocation20_spill] sm:$0xff] }
 0x40e   : > { %v17691_v11 = vpop.f32.mrf.mxu1  ;;  %v10191_v57 = vpop.f32.mrf.mxu0  ;;  %v9979_v19 = vadd.f32 %v14038_v41, %v9666_v40  ;;  %v17738_v53 = vadd.f32 %v18015_v22, %v18014_v28  ;;  %v17741_v32 = vadd.f32 %v18016_v14, %v9362_v56  ;;  %v17754_v36 = vadd.f32 %v18019_v10, %v18018_v20  ;;  %v18026_v22 = vld [vmem:[#allocation8_spill] sm:$0xff]  ;;  %v18027_v14 = vld [vmem:[#allocation17_spill] sm:$0xff] }
 0x40f   : > { %v10937_v0 = vadd.f32 %v17317_v27, %v10288_v55  ;;  %v10286_v49 = vadd.f32 %v10191_v57, %v9973_v63  ;;  %v18020_v63 = vld [vmem:[#allocation14_spill] sm:$0xff] }
 0x410   : > { %v17696_v35 = vpop.f32.mrf.mxu1  ;;  %v14075_v3 = vpop.f32.mrf.mxu0  ;;  %v17757_v55 = vadd.f32 %v18020_v63, %v9360_v39  ;;  %v18028_v63 = vld [vmem:[#allocation16_spill] sm:$0xff] }
 0x411   : > { %v10939_v8 = vmax.f32 %v10937_v0, 0.0  ;;  %v10927_v52 = vadd.f32 %v17317_v27, %v10286_v49  ;;  %v10289_v24 = vadd.f32 %v14075_v3, %v9976_v58  ;;  %v9978_v58 = vadd.f32 %v17684_v33, %v9665_v7 }
 0x412   : > { %v17703_v61 = vpop.f32.mrf.mxu1  ;;  %v10194_v50 = vpop.f32.mrf.mxu0  ;;  %v18021_v16 = vld [vmem:[#allocation21_spill] sm:$0xff] }
 0x413   : > { %v10941_v31 = vmul.f32 %v17334_v42, %v10939_v8  ;;  %v10929_v43 = vmax.f32 %v10927_v52, 0.0  ;;  %v10938_v12 = vadd.f32 %v17317_v27, %v10289_v24  ;;  %v10287_v34 = vadd.f32 %v10194_v50, %v9974_v17  ;;  %v18022_v8 = vld [vmem:[#allocation6_spill] sm:$0xff]  ;;  %v18023_v52 = vld [vmem:[#allocation3_spill] sm:$0xff] }
 0x414   : > { %v17720_v9 = vpop.f32.mrf.mxu1  ;;  %v14078_v48 = vpop.f32.mrf.mxu0  ;;  %v9980_v4 = vadd.f32 %v18021_v16, %v9667_v23  ;;  %v17770_v39 = vadd.f32 %v18023_v52, %v18022_v8  ;;  %v9983_v23 = vadd.f32 %v17691_v11, %v9670_v62  ;;  %v17789_v62 = vld [vmem:[%s17918_s2] ss:$0 sm:$0xff]  ;;  %v17815_v16 = vadd.f32 %v18028_v63, %v17712_v59 }
 0x415   : > { %v10931_v47 = vmul.f32 %v17334_v42, %v10929_v43  ;;  %v10940_v54 = vmax.f32 %v10938_v12, 0.0  ;;  %v10928_v25 = vadd.f32 %v17317_v27, %v10287_v34  ;;  %v17744_v21 = vadd.f32 %v18017_v29, %v10941_v31  ;;  %v18024_v34 = vld [vmem:[#allocation4_spill] sm:$0xff] }
 0x416   : > { %v17734_v6 = vpop.f32.mrf.mxu1  ;;  %v10292_v41 = vadd.f32 %v14078_v48, %v9979_v19  ;;  %v10207_v40 = vpop.f32.mrf.mxu0  ;;  %v17782_v13 = vadd.f32 %v18024_v34, %v9365_v26  ;;  %v9981_v19 = vadd.f32 %v17696_v35, %v9668_v51  ;;  %v17797_v26 = vld [vmem:[%s17918_s2 + $0x1] ss:$0 sm:$0xff]  ;;  %v9982_v59 = vadd.f32 %v17720_v9, %v17716_v46 }
 0x417   : > { %v17747_v60 = vadd.f32 %v18017_v29, %v10931_v47  ;;  %v10942_v15 = vmul.f32 %v17334_v42, %v10940_v54  ;;  %v10930_v30 = vmax.f32 %v10928_v25, 0.0  ;;  %v10290_v38 = vadd.f32 %v10207_v40, %v9977_v2  ;;  %v18025_v25 = vld [vmem:[#allocation11_spill] sm:$0xff] }
 0x418   : > { %v17750_v1 = vpop.f32.mrf.mxu1  ;;  %v10959_v56 = vadd.f32 %v17317_v27, %v10292_v41  ;;  %v14079_v57 = vpop.f32.mrf.mxu0  ;;  %v17804_v28 = vadd.f32 %v18025_v25, %v9363_v45  ;;  %v18029_v45 = vld [vmem:[#allocation12_spill] sm:$0xff]  ;;  %v18030_v9 = vld [vmem:[#allocation19_spill] sm:$0xff] }
 0x419   : > { %v10945_v0 = vmax.f32 %v17747_v60, %v17744_v21  ;;  %v10932_v49 = vmul.f32 %v17334_v42, %v10930_v30  ;;  %v10949_v3 = vadd.f32 %v17317_v27, %v10290_v38  ;;  %v10293_v50 = vadd.f32 %v14079_v57, %v9980_v4 }
 0x41a   : > { %v17766_v17 = vpop.f32.mrf.mxu1  ;;  %v10961_v24 = vmax.f32 %v10959_v56, 0.0  ;;  %v10210_v31 = vpop.f32.mrf.mxu0  ;;  %v17774_v33 = vadd.f32 %v18017_v29, %v10942_v15  ;;  %v17808_v21 = vadd.f32 %v18027_v14, %v18026_v22  ;;  %v17819_v4 = vadd.f32 %v18029_v45, %v17724_v37 }
 0x41b   : > { %v17777_v7 = vadd.f32 %v18017_v29, %v10932_v49  ;;  %v10951_v43 = vmax.f32 %v10949_v3, 0.0  ;;  %v10291_v27 = vadd.f32 %v10210_v31, %v9978_v58  ;;  %v10960_v48 = vadd.f32 %v17789_v62, %v10293_v50 }
 0x41c   : > { %v17779_v12 = vpop.f32.mrf.mxu1  ;;  %v10963_v11 = vmul.f32 %v17334_v42, %v10961_v24  ;;  %v14082_v2 = vpop.f32.mrf.mxu0  ;;  %v9984_v56 = vadd.f32 %v17703_v61, %v17709_v44  ;;  %v9987_v37 = vadd.f32 %v17734_v6, %v17727_v18  ;;  %v17833_v61 = vld [vmem:[%s17918_s2 + $0x2] ss:$0 sm:$0xff]  ;;  %v9680_v18 = vadd.f32 %v18030_v9, %v17738_v53  ;;  %v18031_v6 = vld [vmem:[#allocation18_spill] sm:$0xff] }
 0x41d   : > { %v10946_v47 = vmax.f32 %v17777_v7, %v17774_v33  ;;  %v10953_v35 = vmul.f32 %v17797_v26, %v10951_v43  ;;  %v10950_v42 = vadd.f32 %v17789_v62, %v10291_v27  ;;  %v10296_v54 = vadd.f32 %v14082_v2, %v9983_v23 }
 0x41e   : > { %v17801_v51 = vpop.f32.mrf.mxu1  ;;  %v10965_v41 = vadd.f32 %v18017_v29, %v10963_v11  ;;  %v10962_v40 = vmax.f32 %v10960_v48, 0.0  ;;  %v10223_v60 = vpop.f32.mrf.mxu0  ;;  %v9683_v43 = vadd.f32 %v18031_v6, %v17754_v36  ;;  %v9985_v11 = vadd.f32 %v17750_v1, %v17730_v5 }
 0x41f   : > { %v10955_v15 = vadd.f32 %v18017_v29, %v10953_v35  ;;  %v10952_v30 = vmax.f32 %v10950_v42, 0.0  ;;  %v10985_v38 = vadd.f32 %v17789_v62, %v10296_v54  ;;  %v10294_v10 = vadd.f32 %v10223_v60, %v9981_v19 }
 0x420   : > { %v9942_v20 = vpop.f32.mrf.mxu1  ;;  %v10964_v57 = vmul.f32 %v17797_v26, %v10962_v40  ;;  %v14083_v58 = vpop.f32.mrf.mxu0  ;;  %v9988_v53 = vadd.f32 %v17766_v17, %v17741_v32  ;;  %v18032_v40 = vld [vmem:[#allocation22_spill] sm:$0xff]  ;;  %v9986_v32 = vadd.f32 %v17779_v12, %v17757_v55 }
 0x421   : > { %v10967_v29 = vmax.f32 %v10955_v15, %v10965_v41  ;;  %v10954_v49 = vmul.f32 %v17797_v26, %v10952_v30  ;;  %v10987_v3 = vmax.f32 %v10985_v38, 0.0  ;;  %v10975_v8 = vadd.f32 %v17789_v62, %v10294_v10 }
 0x422   : > { %v14051_v52 = vpop.f32.mrf.mxu1  ;;  %v10966_v44 = vadd.f32 %v17833_v61, %v10964_v57  ;;  %v10297_v23 = vadd.f32 %v14083_v58, %v9984_v56  ;;  %v10226_v24 = vpop.f32.mrf.mxu0  ;;  %v17857_v60 = vadd.f32 %v18032_v40, %v17770_v39  ;;  %v9991_v56 = vadd.f32 %v17801_v51, %v17782_v13 }
 0x423   : > { %v10969_v50 = vmax.f32 %v10945_v0, %v10967_v29  ;;  %v10956_v31 = vadd.f32 %v17833_v61, %v10954_v49  ;;  %v10989_v33 = vmul.f32 %v17797_v26, %v10987_v3  ;;  %v10977_v7 = vmax.f32 %v10975_v8, 0.0 }
 0x424   : > { %v9945_v46 = vpop.f32.mrf.mxu1  ;;  %v10986_v27 = vadd.f32 %v17789_v62, %v10297_v23  ;;  %v10295_v34 = vadd.f32 %v10226_v24, %v9982_v59  ;;  %v14086_v19 = vpop.f32.mrf.mxu0  ;;  %v9989_v39 = vadd.f32 %v9942_v20, %v17804_v28  ;;  %v9992_v57 = vadd.f32 %v14051_v52, %v17808_v21 }
 0x425   : > { %10971 = vst [vmem:[%s15804_s9 + $0xc0] sm:$0xff] %v10969_v50  ;;  %v10968_v0 = vmax.f32 %v10956_v31, %v10966_v44  ;;  %v10979_v48 = vmul.f32 %v17797_v26, %v10977_v7  ;;  %v10300_v35 = vadd.f32 %v14086_v19, %v9987_v37  ;;  %v17850_v42 = vadd.f32 %v17833_v61, %v10989_v33 }
 0x426   : > { %v14054_v2 = vpop.f32.mrf.mxu1  ;;  %v10988_v36 = vmax.f32 %v10986_v27, 0.0  ;;  %v10976_v54 = vadd.f32 %v17789_v62, %v10295_v34  ;;  %v10239_v25 = vpop.f32.mrf.mxu0  ;;  %v9990_v37 = vadd.f32 %v9945_v46, %v17815_v16 }
 0x427   : > { %v10970_v22 = vmax.f32 %v10946_v47, %v10968_v0  ;;  %v10981_v5 = vadd.f32 %v17833_v61, %v10979_v48  ;;  %v11007_v1 = vadd.f32 %v17789_v62, %v10300_v35  ;;  %v10298_v41 = vadd.f32 %v10239_v25, %v9985_v11 }
 0x428   : > { %v9958_v14 = vpop.f32.mrf.mxu1  ;;  %v10990_v17 = vmul.f32 %v17797_v26, %v10988_v36  ;;  %v10978_v15 = vmax.f32 %v10976_v54, 0.0  ;;  %v14087_v30 = vpop.f32.mrf.mxu0  ;;  %v9995_v51 = vadd.f32 %v14054_v2, %v17819_v4 }
 0x429   : > { %10972 = vst [vmem:[%s15804_s9 + $0xc8] sm:$0xff] %v10970_v22  ;;  %v10993_v47 = vmax.f32 %v10981_v5, %v17850_v42  ;;  %v11009_v38 = vmax.f32 %v11007_v1, 0.0  ;;  %v10997_v10 = vadd.f32 %v17789_v62, %v10298_v41  ;;  %v10301_v45 = vadd.f32 %v14087_v30, %v9988_v53 }
 0x42a   : > { %v14055_v63 = vpop.f32.mrf.mxu1  ;;  %v10980_v55 = vmul.f32 %v17797_v26, %v10978_v15  ;;  %v10242_v12 = vpop.f32.mrf.mxu0  ;;  %v10992_v59 = vadd.f32 %v17833_v61, %v10990_v17  ;;  %v9993_v21 = vadd.f32 %v9958_v14, %v9680_v18 }
 0x42b   : > { %v11011_v58 = vmul.f32 %v17797_v26, %v11009_v38  ;;  %v10999_v29 = vmax.f32 %v10997_v10, 0.0  ;;  %v11008_v49 = vadd.f32 %v17789_v62, %v10301_v45  ;;  %v10299_v8 = vadd.f32 %v10242_v12, %v9986_v32 }
 0x42c   : > { %v9961_v3 = vpop.f32.mrf.mxu1  ;;  %v10982_v13 = vadd.f32 %v17833_v61, %v10980_v55  ;;  %v14090_v28 = vpop.f32.mrf.mxu0  ;;  %v9996_v18 = vadd.f32 %v14055_v63, %v9683_v43 }
 0x42d   : > { %v11001_v20 = vmul.f32 %v17797_v26, %v10999_v29  ;;  %v11010_v52 = vmax.f32 %v11008_v49, 0.0  ;;  %v10998_v44 = vadd.f32 %v17789_v62, %v10299_v8  ;;  %v11013_v50 = vadd.f32 %v17833_v61, %v11011_v58 }
 0x42e   : > { %v14094_v23 = vpop.f32.mrf.mxu1  ;;  %v10994_v24 = vmax.f32 %v10982_v13, %v10992_v59  ;;  %v10304_v31 = vadd.f32 %v14090_v28, %v9991_v56  ;;  %v10255_v7 = vpop.f32.mrf.mxu0  ;;  %v9994_v63 = vadd.f32 %v9961_v3, %v17857_v60 }
 0x42f   : > { %v10308_v33 = vadd.f32 %v14094_v23, %v9995_v51  ;;  %v11003_v16 = vadd.f32 %v17833_v61, %v11001_v20  ;;  %v11012_v46 = vmul.f32 %v17797_v26, %v11010_v52  ;;  %v11000_v9 = vmax.f32 %v10998_v44, 0.0 }
 0x430   : > { %v10302_v4 = vadd.f32 %v10255_v7, %v9989_v39  ;;  %v10271_v6 = vpop.f32.mrf.mxu1  ;;  %v11033_v27 = vadd.f32 %v17789_v62, %v10304_v31  ;;  %v14091_v11 = vpop.f32.mrf.mxu0 }
 0x431   : > { %v11055_v34 = vadd.f32 %v17789_v62, %v10308_v33  ;;  %v10306_v19 = vadd.f32 %v10271_v6, %v9993_v21  ;;  %v11015_v0 = vmax.f32 %v11003_v16, %v11013_v50  ;;  %v11014_v48 = vadd.f32 %v17833_v61, %v11012_v46 }
 0x432   : > { %v11002_v2 = vmul.f32 %v17797_v26, %v11000_v9  ;;  %v11023_v35 = vadd.f32 %v17789_v62, %v10302_v4  ;;  %v14095_v53 = vpop.f32.mrf.mxu1  ;;  %v11035_v42 = vmax.f32 %v11033_v27, 0.0  ;;  %v10305_v43 = vadd.f32 %v14091_v11, %v9992_v57  ;;  %v10258_v25 = vpop.f32.mrf.mxu0 }
 0x433   : > { %v11057_v36 = vmax.f32 %v11055_v34, 0.0  ;;  %v11045_v54 = vadd.f32 %v17789_v62, %v10306_v19  ;;  %v11017_v22 = vmax.f32 %v10993_v47, %v11015_v0  ;;  %v10309_v14 = vadd.f32 %v14095_v53, %v9996_v18 }
 0x434   : > { %v11004_v5 = vadd.f32 %v17833_v61, %v11002_v2  ;;  %v11025_v1 = vmax.f32 %v11023_v35, 0.0  ;;  %v11037_v41 = vmul.f32 %v17797_v26, %v11035_v42  ;;  %v11034_v17 = vadd.f32 %v17789_v62, %v10305_v43  ;;  %v10274_v47 = vpop.f32.mrf.mxu1 }
 0x435   : > { %v11059_v40 = vmul.f32 %v17797_v26, %v11057_v36  ;;  %v11047_v32 = vmax.f32 %v11045_v54, 0.0  ;;  %11019 = vst [vmem:[%s15804_s9 + $0xd0] sm:$0xff] %v11017_v22  ;;  %v11056_v38 = vadd.f32 %v17789_v62, %v10309_v14  ;;  %v10303_v10 = vadd.f32 %v10258_v25, %v9990_v37 }
 0x436   : > { %v11016_v15 = vmax.f32 %v11004_v5, %v11014_v48  ;;  %v11027_v30 = vmul.f32 %v17797_v26, %v11025_v1  ;;  %v11036_v56 = vmax.f32 %v11034_v17, 0.0  ;;  %v11039_v57 = vadd.f32 %v17833_v61, %v11037_v41 }
 0x437   : > { %v11049_v45 = vmul.f32 %v17797_v26, %v11047_v32  ;;  %v11024_v12 = vadd.f32 %v17789_v62, %v10303_v10  ;;  %v11061_v58 = vadd.f32 %v17833_v61, %v11059_v40  ;;  %v11058_v49 = vmax.f32 %v11056_v38, 0.0 }
 0x438   : > { %v11018_v39 = vmax.f32 %v10994_v24, %v11016_v15  ;;  %v11029_v55 = vadd.f32 %v17833_v61, %v11027_v30  ;;  %v10307_v8 = vadd.f32 %v10274_v47, %v9994_v63  ;;  %v11038_v60 = vmul.f32 %v17797_v26, %v11036_v56 }
 0x439   : > { %v11051_v29 = vadd.f32 %v17833_v61, %v11049_v45  ;;  %v11026_v3 = vmax.f32 %v11024_v12, 0.0  ;;  %v11060_v21 = vmul.f32 %v17797_v26, %v11058_v49 }
 0x43a   : > { %11020 = vst [vmem:[%s15804_s9 + $0xd8] sm:$0xff] %v11018_v39  ;;  %v11041_v59 = vmax.f32 %v11029_v55, %v11039_v57  ;;  %v11046_v13 = vadd.f32 %v17789_v62, %v10307_v8  ;;  %v11040_v52 = vadd.f32 %v17833_v61, %v11038_v60 }
 0x43b   : > { %v11063_v37 = vmax.f32 %v11051_v29, %v11061_v58  ;;  %v11028_v51 = vmul.f32 %v17797_v26, %v11026_v3  ;;  %v11062_v50 = vadd.f32 %v17833_v61, %v11060_v21 }
 0x43c   : > { %v11048_v20 = vmax.f32 %v11046_v13, 0.0 }
 0x43d   : > { %v11065_v28 = vmax.f32 %v11041_v59, %v11063_v37  ;;  %v11030_v44 = vadd.f32 %v17833_v61, %v11028_v51 }
 0x43e   : > { %v11050_v23 = vmul.f32 %v17797_v26, %v11048_v20 }
 0x43f   : > { %11067 = vst [vmem:[%s15804_s9 + $0xe0] sm:$0xff] %v11065_v28  ;;  %v11042_v24 = vmax.f32 %v11030_v44, %v11040_v52 }
 0x440   : > { %v11052_v31 = vadd.f32 %v17833_v61, %v11050_v23 }
 0x442   : > { %v11064_v33 = vmax.f32 %v11052_v31, %v11062_v50 }
 0x444   : > { %v11066_v62 = vmax.f32 %v11042_v24, %v11064_v33 }
 0x446   : > { %11068 = vst [vmem:[%s15804_s9 + $0xe8] sm:$0xff] %v11066_v62 }
 0x447 PF: > { %s13_s12 = sadd.s32 1, %s14784_s12  }
 0x448   : > { %p10_p4 = scmp.ge.s32.totalorder %s13_s12, 4  }
 0x44a   :  { %12 = sbr.rel (!%p10_p4) target bundleno = 1 (0x1), region = 68 }

</bundles_post_ra>
